<compile_context>
chip_gen: v7x
topology: tpu7x:2x2x1
jax: 0.10.0
libtpu: 0.0.40
codegen_flags: <defaults>
</compile_context>

<pallas_src>
import functools
import math

import jax
import jax.numpy as jnp
from jax.experimental import pallas as pl
from jax.experimental.pallas import tpu as pltpu

MXU_DTYPE = jnp.bfloat16  # matmul operand dtype (weights + cast activations); f32 accumulate


# ---------------------------------------------------------------------------
# In-kernel helpers (traced inside the fused kernel)
# ---------------------------------------------------------------------------
def _linear_f32(x2d, w, b):
    """(M, din) f32 -> (M, dout) f32 : x @ W + b with bf16 MXU inputs, f32 accumulate."""
    return jnp.dot(x2d.astype(w.dtype), w, preferred_element_type=jnp.float32) + b


def _attention(Qp, Qs, Kp, Vp, num_heads):
    """Multi-head attention with residual:  Qp + concat_h( softmax(Qs_h K_h^T) V_h ).
    Residual add + concat hoisted out of the head loop (review).  Works on batched
    (Bt, N, dv) or squeezed (N, dv) activations."""
    dv = Qp.shape[-1]
    ds = dv // num_heads
    batched = Qp.ndim == 3
    eq_s = 'bqd,bkd->bqk' if batched else 'qd,kd->qk'
    eq_av = 'bqk,bkd->bqd' if batched else 'qk,kd->qd'
    outs = []
    for h in range(num_heads):  # static unroll; num_heads is small
        lo = h * ds
        qs = Qs[..., lo:lo + ds].astype(MXU_DTYPE)
        kh = Kp[..., lo:lo + ds].astype(MXU_DTYPE)
        vh = Vp[..., lo:lo + ds].astype(MXU_DTYPE)
        s = jnp.einsum(eq_s, qs, kh, preferred_element_type=jnp.float32)
        s = s - jnp.max(s, axis=-1, keepdims=True)        # shift-invariant (stable softmax)
        e = jnp.exp(s)
        # exact normalization (approx=True available if throughput > parity matters)
        a = e * pl.reciprocal(jnp.sum(e, axis=-1, keepdims=True), approx=False)
        outs.append(jnp.einsum(eq_av, a.astype(MXU_DTYPE), vh,
                               preferred_element_type=jnp.float32))
    # TODO(synk): replace per-head slices with one head-batched einsum (fold H into batch axis).
    return Qp + jnp.concatenate(outs, axis=-1)


def _mab(Qin, Kin, p, num_heads, scale):
    """MAB(Q, K) for one batch block.
    Kin: (Bt, Nk, dk) f32 (batched) or (Nk, dk) f32 (squeezed batch).
    Qin: same rank as Kin, or 2D (Nq, dq) shared across the batch (inducing points / seeds)."""
    wq, bq, wk, bk, wv, bv, wo, bo = p
    dv = wq.shape[-1]
    batched = Kin.ndim == 3

    if batched:
        Bt, Nk, dk = Kin.shape
        Kf = Kin.reshape(Bt * Nk, dk)                      # flatten batch*seq for MXU M dim
    else:
        Nk, dk = Kin.shape
        Kf = Kin
    Kp = _linear_f32(Kf, wk, bk)
    Vp = _linear_f32(Kf, wv, bv)
    if batched:
        Kp = Kp.reshape(Bt, Nk, dv)
        Vp = Vp.reshape(Bt, Nk, dv)

    if Qin.ndim == 2 and batched:                          # shared Q: project once, broadcast
        Nq = Qin.shape[0]
        q2 = _linear_f32(Qin, wq, bq)                      # (Nq, dv)
        Qp = jnp.broadcast_to(q2[None], (Bt, Nq, dv))
        Qs = jnp.broadcast_to((q2 * scale)[None], (Bt, Nq, dv))
    else:
        if batched:
            Bq, Nq, dq = Qin.shape
            Qp = _linear_f32(Qin.reshape(Bq * Nq, dq), wq, bq).reshape(Bq, Nq, dv)
        else:
            Nq = Qin.shape[0]
            Qp = _linear_f32(Qin, wq, bq)
        Qs = Qp * scale                                    # scale once, not per-head on scores

    O = _attention(Qp, Qs, Kp, Vp, num_heads)              # (Bt, Nq, dv) or (Nq, dv)
    Of = O.reshape(Bt * Nq, dv) if batched else O
    Of = Of + jnp.maximum(_linear_f32(Of, wo, bo), 0.0)    # O + relu(fc_o(O))
    return Of.reshape(Bt, Nq, dv) if batched else Of


# ---------------------------------------------------------------------------
# Fused kernel: whole SetTransformer forward for one batch block
# ---------------------------------------------------------------------------
def set_transformer_kernel(x_ref, w_ref, b_ref, is_ref, out_ref, z_scr, h_scr, *,
                           num_heads, scale, w_dims, num_inds, num_outputs, batched):
    dh = w_dims[0][1]

    def weight(idx):
        di, do = w_dims[idx]                               # static (in_dim, out_dim) metadata
        return w_ref[idx, :di, :do], b_ref[idx, :, :do]

    def mab_p(mi):                                         # (wq,bq,wk,bk,wv,bv,wo,bo)
        ps = []
        for j in range(4):
            w, b = weight(4 * mi + j)
            ps += [w, b]
        return tuple(ps)

    X = x_ref[...].astype(jnp.float32)                     # (Bt, N, din)
    if not batched:                                        # Bt == 1: squeeze -> plain 2D matmuls
        X = X.reshape(X.shape[1], X.shape[2])

    I1 = is_ref[0, :num_inds, :]                           # (num_inds, dh)
    I2 = is_ref[1, :num_inds, :]
    S = is_ref[2, :num_outputs, :]                         # (num_outputs, dh)

    # ---- encoder: ISAB -> ISAB ----  (H/Z routed through VMEM scratch to bound live ranges)
    h_scr[...] = _mab(I1, X, mab_p(0), num_heads, scale)                 # MAB(I1, X)
    z_scr[...] = _mab(X, h_scr[...], mab_p(1), num_heads, scale)         # MAB(X, H)
    h_scr[...] = _mab(I2, z_scr[...], mab_p(2), num_heads, scale)        # MAB(I2, Z)
    z_scr[...] = _mab(z_scr[...], h_scr[...], mab_p(3), num_heads, scale)  # MAB(Z, H)

    # ---- decoder: PMA -> SAB -> SAB -> Linear ----
    P = _mab(S, z_scr[...], mab_p(4), num_heads, scale)                  # MAB(S, Z)
    P = _mab(P, P, mab_p(5), num_heads, scale)                           # SAB
    P = _mab(P, P, mab_p(6), num_heads, scale)                           # SAB

    w_fc, b_fc = weight(28)
    rows = P.shape[0] * P.shape[1] if batched else P.shape[0]
    y = _linear_f32(P.reshape(rows, dh), w_fc, b_fc)                     # final Linear
    out_ref[...] = y.reshape(out_ref.shape).astype(out_ref.dtype)


# ---------------------------------------------------------------------------
# Wrapper (parameter packing, VMEM-budgeted tiling, pallas_call glue)
# ---------------------------------------------------------------------------
def _pack_params(params):
    """Pack ~50 tiny tensors into 3 slabs (review: collapse the DMA / BlockSpec count):
       w_slab (29, dImax, dOmax) bf16, b_slab (29, 1, dOmax) f32, is_slab (3, nmax, dh) f32.
       Also returns the static per-weight (in_dim, out_dim) metadata for in-kernel slicing."""
    mabs = [params["enc0"]["mab0"], params["enc0"]["mab1"],
            params["enc1"]["mab0"], params["enc1"]["mab1"],
            params["dec_pma"]["mab"], params["dec_sab0"]["mab"], params["dec_sab1"]["mab"]]
    Ws, Bs = [], []
    for m in mabs:
        for nm in ("q", "k", "v", "o"):
            Ws.append(m["w" + nm])
            Bs.append(m["b" + nm])
    Ws.append(params["dec_fc"]["w"])
    Bs.append(params["dec_fc"]["b"])

    w_dims = tuple((int(w.shape[0]), int(w.shape[1])) for w in Ws)
    dI = max(d[0] for d in w_dims)
    dO = max(d[1] for d in w_dims)
    w_slab = jnp.stack([jnp.pad(w.astype(MXU_DTYPE),
                                ((0, dI - w.shape[0]), (0, dO - w.shape[1]))) for w in Ws])
    b_slab = jnp.stack([jnp.pad(b.astype(jnp.float32).reshape(1, -1),
                                ((0, 0), (0, dO - b.shape[-1]))) for b in Bs])

    I1, I2, S = params["enc0"]["I"], params["enc1"]["I"], params["dec_pma"]["S"]
    nmax = max(I1.shape[0], I2.shape[0], S.shape[0])
    is_slab = jnp.stack([jnp.pad(a.astype(jnp.float32), ((0, nmax - a.shape[0]), (0, 0)))
                         for a in (I1, I2, S)])
    return w_slab, b_slab, is_slab, w_dims


def _const_spec(shape, single_buffer):
    """Constant-index-map spec: block fetched once, VMEM-resident across grid steps.
    single_buffer requests Buffered(1) since the block never rotates (halves weight VMEM)."""
    zeros = (0,) * len(shape)
    index_map = lambda b, _z=zeros: _z
    if single_buffer and hasattr(pl, "Buffered"):
        try:
            return pl.BlockSpec(shape, index_map, pipeline_mode=pl.Buffered(buffer_count=1))
        except TypeError:   # older BlockSpec without pipeline_mode kwarg
            pass
    return pl.BlockSpec(shape, index_map)


def _vmem_capacity_bytes():
    """Generation-aware VMEM capacity (v5e/v6e: 128 MiB, v7x: 64 MiB); conservative fallback."""
    try:
        cap = getattr(pltpu.get_tpu_info(), "vmem_capacity_bytes", None)
        if cap:
            return int(cap)
    except Exception:
        pass
    return 64 << 20


def _act_vmem_bytes(Bt, N, num_inds, num_outputs, dh, din):
    """Rough upper bound on f32 activations live in the fused body for one batch block,
    plus the double-buffered X input block.  Used to budget Bt against VMEM."""
    rows_x = Bt * N
    rows_i = Bt * max(num_inds, num_outputs)
    n_big = max(N, num_inds, num_outputs)
    live = (rows_x * (max(din, dh) + 5 * dh)      # X/Z + Q,K,V,O projections + residuals
            + rows_i * 6 * dh                     # H side of each MAB
            + 2 * Bt * n_big * n_big)             # score / softmax tiles
    return 4 * live + 2 * 4 * Bt * N * din


def _pick_batch_block(B, N, num_inds, num_outputs, dh, din, param_bytes, vmem_cap,
                      target_rows=256):
    """No forced >=2-way split (1-TC chips have a serial grid): prefer the smallest divisor of
    B with Bt*N >= target_rows that fits the VMEM budget (keeps the MXU M dim fed and still
    leaves multiple grid steps for v7x's 2 TCs); otherwise the largest divisor that fits."""
    budget = int(vmem_cap * 0.70) - 2 * param_bytes
    divisors = [d for d in range(1, B + 1) if B % d == 0]
    fits = [d for d in divisors
            if _act_vmem_bytes(d, N, num_inds, num_outputs, dh, din) <= max(budget, 1)]
    if not fits:
        return 1
    for d in fits:
        if d * N >= target_rows:
            return d
    return fits[-1]


def _cost_estimate(B, N, din, dh, num_inds, num_outputs, dout, num_heads, param_bytes):
    def mab_cost(Nq, Nk, dq, dk, dv):
        f = 2 * Nq * dq * dv + 2 * 2 * Nk * dk * dv + 2 * Nq * dv * dv  # projections + fc_o
        f += 2 * 2 * Nq * Nk * dv                                       # scores + AV
        return f, num_heads * Nq * Nk
    flops, trans = 0, 0
    for (Nq, Nk, dq, dk) in [
        (num_inds, N, dh, din), (N, num_inds, din, dh),   # ISAB 1
        (num_inds, N, dh, dh), (N, num_inds, dh, dh),     # ISAB 2
        (num_outputs, N, dh, dh),                          # PMA
        (num_outputs, num_outputs, dh, dh),                # SAB 1
        (num_outputs, num_outputs, dh, dh),                # SAB 2
    ]:
        f, t = mab_cost(Nq, Nk, dq, dk, dh)
        flops += f
        trans += t
    flops += 2 * num_outputs * dh * dout
    flops *= B
    trans *= B
    bytes_accessed = param_bytes + B * N * din * 4 + B * num_outputs * dout * 4
    return pl.CostEstimate(flops=int(flops), transcendentals=int(trans),
                           bytes_accessed=int(bytes_accessed))


def set_transformer_forward(X, params, num_heads, single_buffer_consts=True):
    B, N, din = X.shape
    dh = params["enc0"]["mab0"]["wq"].shape[-1]
    num_inds = params["enc0"]["I"].shape[0]
    num_outputs = params["dec_pma"]["S"].shape[0]
    dout = params["dec_fc"]["w"].shape[-1]
    scale = 1.0 / math.sqrt(dh)   # reference scales by sqrt(dim_V), NOT sqrt(head_dim)

    w_slab, b_slab, is_slab, w_dims = _pack_params(params)
    slabs = (w_slab, b_slab, is_slab)
    param_bytes = sum(math.prod(a.shape) * a.dtype.itemsize for a in slabs)

    vmem_cap = _vmem_capacity_bytes()
    Bt = _pick_batch_block(B, N, num_inds, num_outputs, dh, din, param_bytes, vmem_cap)
    grid = (B // Bt,)
    batched = Bt > 1

    act_bytes = _act_vmem_bytes(Bt, N, num_inds, num_outputs, dh, din)
    vmem_limit = int(min(max(2 * param_bytes + act_bytes + (8 << 20), 32 << 20), vmem_cap))

    z_shape = (Bt, N, dh) if batched else (N, dh)
    h_shape = (Bt, num_inds, dh) if batched else (num_inds, dh)

    kernel = functools.partial(
        set_transformer_kernel, num_heads=num_heads, scale=scale, w_dims=w_dims,
        num_inds=num_inds, num_outputs=num_outputs, batched=batched)

    return pl.pallas_call(
        kernel,
        out_shape=jax.ShapeDtypeStruct((B, num_outputs, dout), jnp.float32),
        grid=grid,
        in_specs=[pl.BlockSpec((Bt, N, din), lambda b: (b, 0, 0))]
                 + [_const_spec(a.shape, single_buffer_consts) for a in slabs],
        out_specs=pl.BlockSpec((Bt, num_outputs, dout), lambda b: (b, 0, 0)),
        scratch_shapes=[pltpu.VMEM(z_shape, jnp.float32),
                        pltpu.VMEM(h_shape, jnp.float32)],
        compiler_params=pltpu.CompilerParams(dimension_semantics=("parallel",),
                                             vmem_limit_bytes=vmem_limit),
        cost_estimate=_cost_estimate(B, N, din, dh, num_inds, num_outputs, dout,
                                     num_heads, param_bytes),
    )(X, w_slab, b_slab, is_slab)


# ---------------------------------------------------------------------------
# Deterministic parameter initialization (synthetic; xavier-uniform style)
# ---------------------------------------------------------------------------
def _xavier(key, shape, fan_in, fan_out):
    limit = math.sqrt(6.0 / (fan_in + fan_out))
    return jax.random.uniform(key, shape, jnp.float32, -limit, limit)


def init_linear(key, din, dout):
    kw, _ = jax.random.split(key)
    return {"w": _xavier(kw, (din, dout), din, dout).astype(MXU_DTYPE),  # bf16 MXU operand
            "b": jnp.zeros((1, dout), jnp.float32)}                      # f32 bias (VPU add)


def init_mab(key, dim_Q, dim_K, dim_V):
    kq, kk, kv, ko = jax.random.split(key, 4)
    q = init_linear(kq, dim_Q, dim_V)
    k = init_linear(kk, dim_K, dim_V)
    v = init_linear(kv, dim_K, dim_V)
    o = init_linear(ko, dim_V, dim_V)
    return {"wq": q["w"], "bq": q["b"], "wk": k["w"], "bk": k["b"],
            "wv": v["w"], "bv": v["b"], "wo": o["w"], "bo": o["b"]}


def init_isab(key, dim_in, dim_out, num_inds):
    ki, k0, k1 = jax.random.split(key, 3)
    return {"I": _xavier(ki, (num_inds, dim_out), num_inds, dim_out),
            "mab0": init_mab(k0, dim_out, dim_in, dim_out),
            "mab1": init_mab(k1, dim_in, dim_out, dim_out)}


def init_pma(key, dim, num_seeds):
    ks, km = jax.random.split(key)
    return {"S": _xavier(ks, (num_seeds, dim), num_seeds, dim),
            "mab": init_mab(km, dim, dim, dim)}


def init_sab(key, dim_in, dim_out):
    return {"mab": init_mab(key, dim_in, dim_in, dim_out)}


def init_set_transformer(key, dim_input, num_outputs, dim_output, num_inds, dim_hidden):
    keys = jax.random.split(key, 6)
    return {
        "enc0": init_isab(keys[0], dim_input, dim_hidden, num_inds),
        "enc1": init_isab(keys[1], dim_hidden, dim_hidden, num_inds),
        "dec_pma": init_pma(keys[2], dim_hidden, num_outputs),
        "dec_sab0": init_sab(keys[3], dim_hidden, dim_hidden),
        "dec_sab1": init_sab(keys[4], dim_hidden, dim_hidden),
        "dec_fc": init_linear(keys[5], dim_hidden, dim_output),
    }


# ---------------------------------------------------------------------------
if __name__ == "__main__":
    # Small config consistent with the module's forward:
    dim_input, num_outputs, dim_output = 4, 4, 4
    num_inds, dim_hidden, num_heads = 8, 32, 2
    batch, set_size = 2, 8

    key = jax.random.PRNGKey(0)
    kx, kp = jax.random.split(key)
    X = jax.random.normal(kx, (batch, set_size, dim_input), jnp.float32)
    params = init_set_transformer(kp, dim_input, num_outputs, dim_output,
                                  num_inds, dim_hidden)

    def run(single_buffer_consts):
        fwd = jax.jit(functools.partial(set_transformer_forward, num_heads=num_heads,
                                        single_buffer_consts=single_buffer_consts))
        return jax.block_until_ready(fwd(X, params))

    try:
        out = run(True)
    except Exception:
        # Fallback: this jax/Mosaic build rejects single-buffered constants -> default buffering.
        out = run(False)

    assert out.shape == (batch, num_outputs, dim_output), out.shape
    assert bool(jnp.all(jnp.isfinite(out)))
    print("KERNEL_OK")
</pallas_src>

<mosaic_0001>
module attributes {stable_mosaic.version = 11 : i64} {
  func.func @set_transformer_kernel(%arg0: i32, %arg1: memref<2x8x4xf32, #tpu.memory_space<vmem>>, %arg2: memref<29x32x32xbf16, #tpu.memory_space<vmem>>, %arg3: memref<29x1x32xf32, #tpu.memory_space<vmem>>, %arg4: memref<3x8x32xf32, #tpu.memory_space<vmem>>, %arg5: memref<2x4x4xf32, #tpu.memory_space<vmem>>, %arg6: memref<2x8x32xf32, #tpu.memory_space<vmem>>, %arg7: memref<2x8x32xf32, #tpu.memory_space<vmem>>) attributes {dimension_semantics = [#tpu.dimension_semantics<parallel>], iteration_bounds = array<i64: 1>, scalar_prefetch = 0 : i64, scratch_operands = 2 : i64, tpu.core_type = #tpu.core_type<tc>, window_params = [{transform_indices = @transform_0, window_bounds = array<i64: 2, 8, 4>}, {pipeline_mode = #tpu.pipeline_mode<synchronous>, transform_indices = @transform_1, window_bounds = array<i64: 29, 32, 32>}, {pipeline_mode = #tpu.pipeline_mode<synchronous>, transform_indices = @transform_2, window_bounds = array<i64: 29, 1, 32>}, {pipeline_mode = #tpu.pipeline_mode<synchronous>, transform_indices = @transform_3, window_bounds = array<i64: 3, 8, 32>}, {transform_indices = @transform_4, window_bounds = array<i64: 2, 4, 4>}]} {
    %c0 = arith.constant 0 : index
    %c0_0 = arith.constant 0 : index
    %c0_1 = arith.constant 0 : index
    %0 = vector.load %arg1[%c0, %c0_0, %c0_1] : memref<2x8x4xf32, #tpu.memory_space<vmem>>, vector<2x8x4xf32>
    %c0_2 = arith.constant 0 : index
    %c0_3 = arith.constant 0 : index
    %c0_4 = arith.constant 0 : index
    %1 = vector.load %arg4[%c0_2, %c0_3, %c0_4] : memref<3x8x32xf32, #tpu.memory_space<vmem>>, vector<1x8x32xf32>
    %2 = vector.shape_cast %1 : vector<1x8x32xf32> to vector<8x32xf32>
    %c1 = arith.constant 1 : index
    %c0_5 = arith.constant 0 : index
    %c0_6 = arith.constant 0 : index
    %3 = vector.load %arg4[%c1, %c0_5, %c0_6] : memref<3x8x32xf32, #tpu.memory_space<vmem>>, vector<1x8x32xf32>
    %4 = vector.shape_cast %3 : vector<1x8x32xf32> to vector<8x32xf32>
    %c2 = arith.constant 2 : index
    %c0_7 = arith.constant 0 : index
    %c0_8 = arith.constant 0 : index
    %5 = vector.load %arg4[%c2, %c0_7, %c0_8] : memref<3x8x32xf32, #tpu.memory_space<vmem>>, vector<1x4x32xf32>
    %6 = vector.shape_cast %5 : vector<1x4x32xf32> to vector<4x32xf32>
    %c0_9 = arith.constant 0 : index
    %c0_10 = arith.constant 0 : index
    %c0_11 = arith.constant 0 : index
    %7 = vector.load %arg2[%c0_9, %c0_10, %c0_11] : memref<29x32x32xbf16, #tpu.memory_space<vmem>>, vector<1x32x32xbf16>
    %8 = vector.shape_cast %7 : vector<1x32x32xbf16> to vector<32x32xbf16>
    %c0_12 = arith.constant 0 : index
    %c0_13 = arith.constant 0 : index
    %c0_14 = arith.constant 0 : index
    %9 = vector.load %arg3[%c0_12, %c0_13, %c0_14] : memref<29x1x32xf32, #tpu.memory_space<vmem>>, vector<1x1x32xf32>
    %10 = vector.shape_cast %9 : vector<1x1x32xf32> to vector<1x32xf32>
    %c1_15 = arith.constant 1 : index
    %c0_16 = arith.constant 0 : index
    %c0_17 = arith.constant 0 : index
    %11 = vector.load %arg2[%c1_15, %c0_16, %c0_17] : memref<29x32x32xbf16, #tpu.memory_space<vmem>>, vector<1x4x32xbf16>
    %12 = vector.shape_cast %11 : vector<1x4x32xbf16> to vector<4x32xbf16>
    %c1_18 = arith.constant 1 : index
    %c0_19 = arith.constant 0 : index
    %c0_20 = arith.constant 0 : index
    %13 = vector.load %arg3[%c1_18, %c0_19, %c0_20] : memref<29x1x32xf32, #tpu.memory_space<vmem>>, vector<1x1x32xf32>
    %14 = vector.shape_cast %13 : vector<1x1x32xf32> to vector<1x32xf32>
    %c2_21 = arith.constant 2 : index
    %c0_22 = arith.constant 0 : index
    %c0_23 = arith.constant 0 : index
    %15 = vector.load %arg2[%c2_21, %c0_22, %c0_23] : memref<29x32x32xbf16, #tpu.memory_space<vmem>>, vector<1x4x32xbf16>
    %16 = vector.shape_cast %15 : vector<1x4x32xbf16> to vector<4x32xbf16>
    %c2_24 = arith.constant 2 : index
    %c0_25 = arith.constant 0 : index
    %c0_26 = arith.constant 0 : index
    %17 = vector.load %arg3[%c2_24, %c0_25, %c0_26] : memref<29x1x32xf32, #tpu.memory_space<vmem>>, vector<1x1x32xf32>
    %18 = vector.shape_cast %17 : vector<1x1x32xf32> to vector<1x32xf32>
    %c3 = arith.constant 3 : index
    %c0_27 = arith.constant 0 : index
    %c0_28 = arith.constant 0 : index
    %19 = vector.load %arg2[%c3, %c0_27, %c0_28] : memref<29x32x32xbf16, #tpu.memory_space<vmem>>, vector<1x32x32xbf16>
    %20 = vector.shape_cast %19 : vector<1x32x32xbf16> to vector<32x32xbf16>
    %c3_29 = arith.constant 3 : index
    %c0_30 = arith.constant 0 : index
    %c0_31 = arith.constant 0 : index
    %21 = vector.load %arg3[%c3_29, %c0_30, %c0_31] : memref<29x1x32xf32, #tpu.memory_space<vmem>>, vector<1x1x32xf32>
    %22 = vector.shape_cast %21 : vector<1x1x32xf32> to vector<1x32xf32>
    %23 = vector.shape_cast %0 : vector<2x8x4xf32> to vector<16x4xf32>
    %24 = arith.truncf %23 : vector<16x4xf32> to vector<16x4xbf16>
    %cst = arith.constant dense<0.000000e+00> : vector<16x32xf32>
    %25 = tpu.matmul %24, %12, %cst {dimension_numbers = #tpu.dot_dimension_numbers<[1], [0], [0], [1], [0, 0, 1, 1], [], []>} : vector<16x4xbf16>, vector<4x32xbf16>, vector<16x32xf32> -> vector<16x32xf32>
    %26 = vector.broadcast %14 : vector<1x32xf32> to vector<16x32xf32>
    %27 = arith.addf %25, %26 : vector<16x32xf32>
    %28 = arith.truncf %23 : vector<16x4xf32> to vector<16x4xbf16>
    %cst_32 = arith.constant dense<0.000000e+00> : vector<16x32xf32>
    %29 = tpu.matmul %28, %16, %cst_32 {dimension_numbers = #tpu.dot_dimension_numbers<[1], [0], [0], [1], [0, 0, 1, 1], [], []>} : vector<16x4xbf16>, vector<4x32xbf16>, vector<16x32xf32> -> vector<16x32xf32>
    %30 = vector.broadcast %18 : vector<1x32xf32> to vector<16x32xf32>
    %31 = arith.addf %29, %30 : vector<16x32xf32>
    %32 = vector.shape_cast %27 : vector<16x32xf32> to vector<2x8x32xf32>
    %33 = vector.shape_cast %31 : vector<16x32xf32> to vector<2x8x32xf32>
    %34 = arith.truncf %2 : vector<8x32xf32> to vector<8x32xbf16>
    %cst_33 = arith.constant dense<0.000000e+00> : vector<8x32xf32>
    %35 = tpu.matmul %34, %8, %cst_33 {dimension_numbers = #tpu.dot_dimension_numbers<[1], [0], [0], [1], [0, 0, 1, 1], [], []>} : vector<8x32xbf16>, vector<32x32xbf16>, vector<8x32xf32> -> vector<8x32xf32>
    %36 = vector.broadcast %10 : vector<1x32xf32> to vector<8x32xf32>
    %37 = arith.addf %35, %36 : vector<8x32xf32>
    %38 = vector.shape_cast %37 : vector<8x32xf32> to vector<1x8x32xf32>
    %39 = vector.shape_cast %38 : vector<1x8x32xf32> to vector<1x8x32xf32>
    %40 = vector.broadcast %39 : vector<1x8x32xf32> to vector<2x8x32xf32>
    %cst_34 = arith.constant 0.176776692 : f32
    %41 = vector.broadcast %cst_34 : f32 to vector<8x32xf32>
    %42 = arith.mulf %37, %41 : vector<8x32xf32>
    %43 = vector.shape_cast %42 : vector<8x32xf32> to vector<1x8x32xf32>
    %44 = vector.shape_cast %43 : vector<1x8x32xf32> to vector<1x8x32xf32>
    %45 = vector.broadcast %44 : vector<1x8x32xf32> to vector<2x8x32xf32>
    %46 = vector.extract_strided_slice %45 {offsets = [0, 0, 0], sizes = [2, 8, 16], strides = [1, 1, 1]} : vector<2x8x32xf32> to vector<2x8x16xf32>
    %47 = arith.truncf %46 : vector<2x8x16xf32> to vector<2x8x16xbf16>
    %48 = vector.extract_strided_slice %32 {offsets = [0, 0, 0], sizes = [2, 8, 16], strides = [1, 1, 1]} : vector<2x8x32xf32> to vector<2x8x16xf32>
    %49 = arith.truncf %48 : vector<2x8x16xf32> to vector<2x8x16xbf16>
    %50 = vector.extract_strided_slice %33 {offsets = [0, 0, 0], sizes = [2, 8, 16], strides = [1, 1, 1]} : vector<2x8x32xf32> to vector<2x8x16xf32>
    %51 = arith.truncf %50 : vector<2x8x16xf32> to vector<2x8x16xbf16>
    "tpu.trace_start"() <{level = 10 : i32, message = "bqd,bkd->bqk"}> : () -> ()
    %cst_35 = arith.constant dense<0.000000e+00> : vector<2x8x8xf32>
    %52 = tpu.matmul %47, %49, %cst_35 {dimension_numbers = #tpu.dot_dimension_numbers<[2], [2], [1], [1], [0, 0, 0, 1, 1, 1], [0], [0]>} : vector<2x8x16xbf16>, vector<2x8x16xbf16>, vector<2x8x8xf32> -> vector<2x8x8xf32>
    "tpu.trace_stop"() : () -> ()
    %cst_36 = arith.constant dense<0xFF800000> : vector<2x8xf32>
    %53 = vector.multi_reduction <maximumf>, %52, %cst_36 [2] : vector<2x8x8xf32> to vector<2x8xf32>
    %54 = vector.shape_cast %53 : vector<2x8xf32> to vector<2x8x1xf32>
    %55 = vector.broadcast %54 : vector<2x8x1xf32> to vector<2x8x8xf32>
    %56 = arith.subf %52, %55 : vector<2x8x8xf32>
    %57 = math.exp %56 : vector<2x8x8xf32>
    %cst_37 = arith.constant dense<0.000000e+00> : vector<2x8xf32>
    %58 = vector.multi_reduction <add>, %57, %cst_37 [2] : vector<2x8x8xf32> to vector<2x8xf32>
    %59 = vector.shape_cast %58 : vector<2x8xf32> to vector<2x8x1xf32>
    %60 = tpu.reciprocal %59 : vector<2x8x1xf32> -> vector<2x8x1xf32>
    %61 = vector.broadcast %60 : vector<2x8x1xf32> to vector<2x8x8xf32>
    %62 = arith.mulf %57, %61 : vector<2x8x8xf32>
    %63 = arith.truncf %62 : vector<2x8x8xf32> to vector<2x8x8xbf16>
    "tpu.trace_start"() <{level = 10 : i32, message = "bqk,bkd->bqd"}> : () -> ()
    %cst_38 = arith.constant dense<0.000000e+00> : vector<2x8x16xf32>
    %64 = tpu.matmul %63, %51, %cst_38 {dimension_numbers = #tpu.dot_dimension_numbers<[2], [1], [1], [2], [0, 0, 0, 1, 1, 2], [0], [0]>} : vector<2x8x8xbf16>, vector<2x8x16xbf16>, vector<2x8x16xf32> -> vector<2x8x16xf32>
    "tpu.trace_stop"() : () -> ()
    %65 = vector.extract_strided_slice %45 {offsets = [0, 0, 16], sizes = [2, 8, 16], strides = [1, 1, 1]} : vector<2x8x32xf32> to vector<2x8x16xf32>
    %66 = arith.truncf %65 : vector<2x8x16xf32> to vector<2x8x16xbf16>
    %67 = vector.extract_strided_slice %32 {offsets = [0, 0, 16], sizes = [2, 8, 16], strides = [1, 1, 1]} : vector<2x8x32xf32> to vector<2x8x16xf32>
    %68 = arith.truncf %67 : vector<2x8x16xf32> to vector<2x8x16xbf16>
    %69 = vector.extract_strided_slice %33 {offsets = [0, 0, 16], sizes = [2, 8, 16], strides = [1, 1, 1]} : vector<2x8x32xf32> to vector<2x8x16xf32>
    %70 = arith.truncf %69 : vector<2x8x16xf32> to vector<2x8x16xbf16>
    "tpu.trace_start"() <{level = 10 : i32, message = "bqd,bkd->bqk"}> : () -> ()
    %cst_39 = arith.constant dense<0.000000e+00> : vector<2x8x8xf32>
    %71 = tpu.matmul %66, %68, %cst_39 {dimension_numbers = #tpu.dot_dimension_numbers<[2], [2], [1], [1], [0, 0, 0, 1, 1, 1], [0], [0]>} : vector<2x8x16xbf16>, vector<2x8x16xbf16>, vector<2x8x8xf32> -> vector<2x8x8xf32>
    "tpu.trace_stop"() : () -> ()
    %cst_40 = arith.constant dense<0xFF800000> : vector<2x8xf32>
    %72 = vector.multi_reduction <maximumf>, %71, %cst_40 [2] : vector<2x8x8xf32> to vector<2x8xf32>
    %73 = vector.shape_cast %72 : vector<2x8xf32> to vector<2x8x1xf32>
    %74 = vector.broadcast %73 : vector<2x8x1xf32> to vector<2x8x8xf32>
    %75 = arith.subf %71, %74 : vector<2x8x8xf32>
    %76 = math.exp %75 : vector<2x8x8xf32>
    %cst_41 = arith.constant dense<0.000000e+00> : vector<2x8xf32>
    %77 = vector.multi_reduction <add>, %76, %cst_41 [2] : vector<2x8x8xf32> to vector<2x8xf32>
    %78 = vector.shape_cast %77 : vector<2x8xf32> to vector<2x8x1xf32>
    %79 = tpu.reciprocal %78 : vector<2x8x1xf32> -> vector<2x8x1xf32>
    %80 = vector.broadcast %79 : vector<2x8x1xf32> to vector<2x8x8xf32>
    %81 = arith.mulf %76, %80 : vector<2x8x8xf32>
    %82 = arith.truncf %81 : vector<2x8x8xf32> to vector<2x8x8xbf16>
    "tpu.trace_start"() <{level = 10 : i32, message = "bqk,bkd->bqd"}> : () -> ()
    %cst_42 = arith.constant dense<0.000000e+00> : vector<2x8x16xf32>
    %83 = tpu.matmul %82, %70, %cst_42 {dimension_numbers = #tpu.dot_dimension_numbers<[2], [1], [1], [2], [0, 0, 0, 1, 1, 2], [0], [0]>} : vector<2x8x8xbf16>, vector<2x8x16xbf16>, vector<2x8x16xf32> -> vector<2x8x16xf32>
    "tpu.trace_stop"() : () -> ()
    %84 = tpu.concatenate %64, %83 in 2 : vector<2x8x16xf32>, vector<2x8x16xf32> -> vector<2x8x32xf32>
    %85 = arith.addf %40, %84 : vector<2x8x32xf32>
    %86 = vector.shape_cast %85 : vector<2x8x32xf32> to vector<16x32xf32>
    %87 = arith.truncf %86 : vector<16x32xf32> to vector<16x32xbf16>
    %cst_43 = arith.constant dense<0.000000e+00> : vector<16x32xf32>
    %88 = tpu.matmul %87, %20, %cst_43 {dimension_numbers = #tpu.dot_dimension_numbers<[1], [0], [0], [1], [0, 0, 1, 1], [], []>} : vector<16x32xbf16>, vector<32x32xbf16>, vector<16x32xf32> -> vector<16x32xf32>
    %89 = vector.broadcast %22 : vector<1x32xf32> to vector<16x32xf32>
    %90 = arith.addf %88, %89 : vector<16x32xf32>
    %cst_44 = arith.constant 0.000000e+00 : f32
    %91 = vector.broadcast %cst_44 : f32 to vector<16x32xf32>
    %92 = arith.maximumf %90, %91 : vector<16x32xf32>
    %93 = arith.addf %86, %92 : vector<16x32xf32>
    %94 = vector.shape_cast %93 : vector<16x32xf32> to vector<2x8x32xf32>
    %c0_45 = arith.constant 0 : index
    %c0_46 = arith.constant 0 : index
    %c0_47 = arith.constant 0 : index
    %95 = vector.load %arg7[%c0_45, %c0_46, %c0_47] : memref<2x8x32xf32, #tpu.memory_space<vmem>>, vector<2x8x32xf32>
    tpu.vector_store %arg7[%c0_45, %c0_46, %c0_47], %94 {strides = array<i32>} : memref<2x8x32xf32, #tpu.memory_space<vmem>>, vector<2x8x32xf32>,
    %c0_48 = arith.constant 0 : index
    %c0_49 = arith.constant 0 : index
    %c0_50 = arith.constant 0 : index
    %96 = vector.load %arg7[%c0_48, %c0_49, %c0_50] : memref<2x8x32xf32, #tpu.memory_space<vmem>>, vector<2x8x32xf32>
    %c4 = arith.constant 4 : index
    %c0_51 = arith.constant 0 : index
    %c0_52 = arith.constant 0 : index
    %97 = vector.load %arg2[%c4, %c0_51, %c0_52] : memref<29x32x32xbf16, #tpu.memory_space<vmem>>, vector<1x4x32xbf16>
    %98 = vector.shape_cast %97 : vector<1x4x32xbf16> to vector<4x32xbf16>
    %c4_53 = arith.constant 4 : index
    %c0_54 = arith.constant 0 : index
    %c0_55 = arith.constant 0 : index
    %99 = vector.load %arg3[%c4_53, %c0_54, %c0_55] : memref<29x1x32xf32, #tpu.memory_space<vmem>>, vector<1x1x32xf32>
    %100 = vector.shape_cast %99 : vector<1x1x32xf32> to vector<1x32xf32>
    %c5 = arith.constant 5 : index
    %c0_56 = arith.constant 0 : index
    %c0_57 = arith.constant 0 : index
    %101 = vector.load %arg2[%c5, %c0_56, %c0_57] : memref<29x32x32xbf16, #tpu.memory_space<vmem>>, vector<1x32x32xbf16>
    %102 = vector.shape_cast %101 : vector<1x32x32xbf16> to vector<32x32xbf16>
    %c5_58 = arith.constant 5 : index
    %c0_59 = arith.constant 0 : index
    %c0_60 = arith.constant 0 : index
    %103 = vector.load %arg3[%c5_58, %c0_59, %c0_60] : memref<29x1x32xf32, #tpu.memory_space<vmem>>, vector<1x1x32xf32>
    %104 = vector.shape_cast %103 : vector<1x1x32xf32> to vector<1x32xf32>
    %c6 = arith.constant 6 : index
    %c0_61 = arith.constant 0 : index
    %c0_62 = arith.constant 0 : index
    %105 = vector.load %arg2[%c6, %c0_61, %c0_62] : memref<29x32x32xbf16, #tpu.memory_space<vmem>>, vector<1x32x32xbf16>
    %106 = vector.shape_cast %105 : vector<1x32x32xbf16> to vector<32x32xbf16>
    %c6_63 = arith.constant 6 : index
    %c0_64 = arith.constant 0 : index
    %c0_65 = arith.constant 0 : index
    %107 = vector.load %arg3[%c6_63, %c0_64, %c0_65] : memref<29x1x32xf32, #tpu.memory_space<vmem>>, vector<1x1x32xf32>
    %108 = vector.shape_cast %107 : vector<1x1x32xf32> to vector<1x32xf32>
    %c7 = arith.constant 7 : index
    %c0_66 = arith.constant 0 : index
    %c0_67 = arith.constant 0 : index
    %109 = vector.load %arg2[%c7, %c0_66, %c0_67] : memref<29x32x32xbf16, #tpu.memory_space<vmem>>, vector<1x32x32xbf16>
    %110 = vector.shape_cast %109 : vector<1x32x32xbf16> to vector<32x32xbf16>
    %c7_68 = arith.constant 7 : index
    %c0_69 = arith.constant 0 : index
    %c0_70 = arith.constant 0 : index
    %111 = vector.load %arg3[%c7_68, %c0_69, %c0_70] : memref<29x1x32xf32, #tpu.memory_space<vmem>>, vector<1x1x32xf32>
    %112 = vector.shape_cast %111 : vector<1x1x32xf32> to vector<1x32xf32>
    %113 = vector.shape_cast %96 : vector<2x8x32xf32> to vector<16x32xf32>
    %114 = arith.truncf %113 : vector<16x32xf32> to vector<16x32xbf16>
    %cst_71 = arith.constant dense<0.000000e+00> : vector<16x32xf32>
    %115 = tpu.matmul %114, %102, %cst_71 {dimension_numbers = #tpu.dot_dimension_numbers<[1], [0], [0], [1], [0, 0, 1, 1], [], []>} : vector<16x32xbf16>, vector<32x32xbf16>, vector<16x32xf32> -> vector<16x32xf32>
    %116 = vector.broadcast %104 : vector<1x32xf32> to vector<16x32xf32>
    %117 = arith.addf %115, %116 : vector<16x32xf32>
    %118 = arith.truncf %113 : vector<16x32xf32> to vector<16x32xbf16>
    %cst_72 = arith.constant dense<0.000000e+00> : vector<16x32xf32>
    %119 = tpu.matmul %118, %106, %cst_72 {dimension_numbers = #tpu.dot_dimension_numbers<[1], [0], [0], [1], [0, 0, 1, 1], [], []>} : vector<16x32xbf16>, vector<32x32xbf16>, vector<16x32xf32> -> vector<16x32xf32>
    %120 = vector.broadcast %108 : vector<1x32xf32> to vector<16x32xf32>
    %121 = arith.addf %119, %120 : vector<16x32xf32>
    %122 = vector.shape_cast %117 : vector<16x32xf32> to vector<2x8x32xf32>
    %123 = vector.shape_cast %121 : vector<16x32xf32> to vector<2x8x32xf32>
    %124 = vector.shape_cast %0 : vector<2x8x4xf32> to vector<16x4xf32>
    %125 = arith.truncf %124 : vector<16x4xf32> to vector<16x4xbf16>
    %cst_73 = arith.constant dense<0.000000e+00> : vector<16x32xf32>
    %126 = tpu.matmul %125, %98, %cst_73 {dimension_numbers = #tpu.dot_dimension_numbers<[1], [0], [0], [1], [0, 0, 1, 1], [], []>} : vector<16x4xbf16>, vector<4x32xbf16>, vector<16x32xf32> -> vector<16x32xf32>
    %127 = vector.broadcast %100 : vector<1x32xf32> to vector<16x32xf32>
    %128 = arith.addf %126, %127 : vector<16x32xf32>
    %129 = vector.shape_cast %128 : vector<16x32xf32> to vector<2x8x32xf32>
    %cst_74 = arith.constant 0.176776692 : f32
    %130 = vector.broadcast %cst_74 : f32 to vector<2x8x32xf32>
    %131 = arith.mulf %129, %130 : vector<2x8x32xf32>
    %132 = vector.extract_strided_slice %131 {offsets = [0, 0, 0], sizes = [2, 8, 16], strides = [1, 1, 1]} : vector<2x8x32xf32> to vector<2x8x16xf32>
    %133 = arith.truncf %132 : vector<2x8x16xf32> to vector<2x8x16xbf16>
    %134 = vector.extract_strided_slice %122 {offsets = [0, 0, 0], sizes = [2, 8, 16], strides = [1, 1, 1]} : vector<2x8x32xf32> to vector<2x8x16xf32>
    %135 = arith.truncf %134 : vector<2x8x16xf32> to vector<2x8x16xbf16>
    %136 = vector.extract_strided_slice %123 {offsets = [0, 0, 0], sizes = [2, 8, 16], strides = [1, 1, 1]} : vector<2x8x32xf32> to vector<2x8x16xf32>
    %137 = arith.truncf %136 : vector<2x8x16xf32> to vector<2x8x16xbf16>
    "tpu.trace_start"() <{level = 10 : i32, message = "bqd,bkd->bqk"}> : () -> ()
    %cst_75 = arith.constant dense<0.000000e+00> : vector<2x8x8xf32>
    %138 = tpu.matmul %133, %135, %cst_75 {dimension_numbers = #tpu.dot_dimension_numbers<[2], [2], [1], [1], [0, 0, 0, 1, 1, 1], [0], [0]>} : vector<2x8x16xbf16>, vector<2x8x16xbf16>, vector<2x8x8xf32> -> vector<2x8x8xf32>
    "tpu.trace_stop"() : () -> ()
    %cst_76 = arith.constant dense<0xFF800000> : vector<2x8xf32>
    %139 = vector.multi_reduction <maximumf>, %138, %cst_76 [2] : vector<2x8x8xf32> to vector<2x8xf32>
    %140 = vector.shape_cast %139 : vector<2x8xf32> to vector<2x8x1xf32>
    %141 = vector.broadcast %140 : vector<2x8x1xf32> to vector<2x8x8xf32>
    %142 = arith.subf %138, %141 : vector<2x8x8xf32>
    %143 = math.exp %142 : vector<2x8x8xf32>
    %cst_77 = arith.constant dense<0.000000e+00> : vector<2x8xf32>
    %144 = vector.multi_reduction <add>, %143, %cst_77 [2] : vector<2x8x8xf32> to vector<2x8xf32>
    %145 = vector.shape_cast %144 : vector<2x8xf32> to vector<2x8x1xf32>
    %146 = tpu.reciprocal %145 : vector<2x8x1xf32> -> vector<2x8x1xf32>
    %147 = vector.broadcast %146 : vector<2x8x1xf32> to vector<2x8x8xf32>
    %148 = arith.mulf %143, %147 : vector<2x8x8xf32>
    %149 = arith.truncf %148 : vector<2x8x8xf32> to vector<2x8x8xbf16>
    "tpu.trace_start"() <{level = 10 : i32, message = "bqk,bkd->bqd"}> : () -> ()
    %cst_78 = arith.constant dense<0.000000e+00> : vector<2x8x16xf32>
    %150 = tpu.matmul %149, %137, %cst_78 {dimension_numbers = #tpu.dot_dimension_numbers<[2], [1], [1], [2], [0, 0, 0, 1, 1, 2], [0], [0]>} : vector<2x8x8xbf16>, vector<2x8x16xbf16>, vector<2x8x16xf32> -> vector<2x8x16xf32>
    "tpu.trace_stop"() : () -> ()
    %151 = vector.extract_strided_slice %131 {offsets = [0, 0, 16], sizes = [2, 8, 16], strides = [1, 1, 1]} : vector<2x8x32xf32> to vector<2x8x16xf32>
    %152 = arith.truncf %151 : vector<2x8x16xf32> to vector<2x8x16xbf16>
    %153 = vector.extract_strided_slice %122 {offsets = [0, 0, 16], sizes = [2, 8, 16], strides = [1, 1, 1]} : vector<2x8x32xf32> to vector<2x8x16xf32>
    %154 = arith.truncf %153 : vector<2x8x16xf32> to vector<2x8x16xbf16>
    %155 = vector.extract_strided_slice %123 {offsets = [0, 0, 16], sizes = [2, 8, 16], strides = [1, 1, 1]} : vector<2x8x32xf32> to vector<2x8x16xf32>
    %156 = arith.truncf %155 : vector<2x8x16xf32> to vector<2x8x16xbf16>
    "tpu.trace_start"() <{level = 10 : i32, message = "bqd,bkd->bqk"}> : () -> ()
    %cst_79 = arith.constant dense<0.000000e+00> : vector<2x8x8xf32>
    %157 = tpu.matmul %152, %154, %cst_79 {dimension_numbers = #tpu.dot_dimension_numbers<[2], [2], [1], [1], [0, 0, 0, 1, 1, 1], [0], [0]>} : vector<2x8x16xbf16>, vector<2x8x16xbf16>, vector<2x8x8xf32> -> vector<2x8x8xf32>
    "tpu.trace_stop"() : () -> ()
    %cst_80 = arith.constant dense<0xFF800000> : vector<2x8xf32>
    %158 = vector.multi_reduction <maximumf>, %157, %cst_80 [2] : vector<2x8x8xf32> to vector<2x8xf32>
    %159 = vector.shape_cast %158 : vector<2x8xf32> to vector<2x8x1xf32>
    %160 = vector.broadcast %159 : vector<2x8x1xf32> to vector<2x8x8xf32>
    %161 = arith.subf %157, %160 : vector<2x8x8xf32>
    %162 = math.exp %161 : vector<2x8x8xf32>
    %cst_81 = arith.constant dense<0.000000e+00> : vector<2x8xf32>
    %163 = vector.multi_reduction <add>, %162, %cst_81 [2] : vector<2x8x8xf32> to vector<2x8xf32>
    %164 = vector.shape_cast %163 : vector<2x8xf32> to vector<2x8x1xf32>
    %165 = tpu.reciprocal %164 : vector<2x8x1xf32> -> vector<2x8x1xf32>
    %166 = vector.broadcast %165 : vector<2x8x1xf32> to vector<2x8x8xf32>
    %167 = arith.mulf %162, %166 : vector<2x8x8xf32>
    %168 = arith.truncf %167 : vector<2x8x8xf32> to vector<2x8x8xbf16>
    "tpu.trace_start"() <{level = 10 : i32, message = "bqk,bkd->bqd"}> : () -> ()
    %cst_82 = arith.constant dense<0.000000e+00> : vector<2x8x16xf32>
    %169 = tpu.matmul %168, %156, %cst_82 {dimension_numbers = #tpu.dot_dimension_numbers<[2], [1], [1], [2], [0, 0, 0, 1, 1, 2], [0], [0]>} : vector<2x8x8xbf16>, vector<2x8x16xbf16>, vector<2x8x16xf32> -> vector<2x8x16xf32>
    "tpu.trace_stop"() : () -> ()
    %170 = tpu.concatenate %150, %169 in 2 : vector<2x8x16xf32>, vector<2x8x16xf32> -> vector<2x8x32xf32>
    %171 = arith.addf %129, %170 : vector<2x8x32xf32>
    %172 = vector.shape_cast %171 : vector<2x8x32xf32> to vector<16x32xf32>
    %173 = arith.truncf %172 : vector<16x32xf32> to vector<16x32xbf16>
    %cst_83 = arith.constant dense<0.000000e+00> : vector<16x32xf32>
    %174 = tpu.matmul %173, %110, %cst_83 {dimension_numbers = #tpu.dot_dimension_numbers<[1], [0], [0], [1], [0, 0, 1, 1], [], []>} : vector<16x32xbf16>, vector<32x32xbf16>, vector<16x32xf32> -> vector<16x32xf32>
    %175 = vector.broadcast %112 : vector<1x32xf32> to vector<16x32xf32>
    %176 = arith.addf %174, %175 : vector<16x32xf32>
    %cst_84 = arith.constant 0.000000e+00 : f32
    %177 = vector.broadcast %cst_84 : f32 to vector<16x32xf32>
    %178 = arith.maximumf %176, %177 : vector<16x32xf32>
    %179 = arith.addf %172, %178 : vector<16x32xf32>
    %180 = vector.shape_cast %179 : vector<16x32xf32> to vector<2x8x32xf32>
    %c0_85 = arith.constant 0 : index
    %c0_86 = arith.constant 0 : index
    %c0_87 = arith.constant 0 : index
    %181 = vector.load %arg6[%c0_85, %c0_86, %c0_87] : memref<2x8x32xf32, #tpu.memory_space<vmem>>, vector<2x8x32xf32>
    tpu.vector_store %arg6[%c0_85, %c0_86, %c0_87], %180 {strides = array<i32>} : memref<2x8x32xf32, #tpu.memory_space<vmem>>, vector<2x8x32xf32>,
    %c0_88 = arith.constant 0 : index
    %c0_89 = arith.constant 0 : index
    %c0_90 = arith.constant 0 : index
    %182 = vector.load %arg6[%c0_88, %c0_89, %c0_90] : memref<2x8x32xf32, #tpu.memory_space<vmem>>, vector<2x8x32xf32>
    %c8 = arith.constant 8 : index
    %c0_91 = arith.constant 0 : index
    %c0_92 = arith.constant 0 : index
    %183 = vector.load %arg2[%c8, %c0_91, %c0_92] : memref<29x32x32xbf16, #tpu.memory_space<vmem>>, vector<1x32x32xbf16>
    %184 = vector.shape_cast %183 : vector<1x32x32xbf16> to vector<32x32xbf16>
    %c8_93 = arith.constant 8 : index
    %c0_94 = arith.constant 0 : index
    %c0_95 = arith.constant 0 : index
    %185 = vector.load %arg3[%c8_93, %c0_94, %c0_95] : memref<29x1x32xf32, #tpu.memory_space<vmem>>, vector<1x1x32xf32>
    %186 = vector.shape_cast %185 : vector<1x1x32xf32> to vector<1x32xf32>
    %c9 = arith.constant 9 : index
    %c0_96 = arith.constant 0 : index
    %c0_97 = arith.constant 0 : index
    %187 = vector.load %arg2[%c9, %c0_96, %c0_97] : memref<29x32x32xbf16, #tpu.memory_space<vmem>>, vector<1x32x32xbf16>
    %188 = vector.shape_cast %187 : vector<1x32x32xbf16> to vector<32x32xbf16>
    %c9_98 = arith.constant 9 : index
    %c0_99 = arith.constant 0 : index
    %c0_100 = arith.constant 0 : index
    %189 = vector.load %arg3[%c9_98, %c0_99, %c0_100] : memref<29x1x32xf32, #tpu.memory_space<vmem>>, vector<1x1x32xf32>
    %190 = vector.shape_cast %189 : vector<1x1x32xf32> to vector<1x32xf32>
    %c10 = arith.constant 10 : index
    %c0_101 = arith.constant 0 : index
    %c0_102 = arith.constant 0 : index
    %191 = vector.load %arg2[%c10, %c0_101, %c0_102] : memref<29x32x32xbf16, #tpu.memory_space<vmem>>, vector<1x32x32xbf16>
    %192 = vector.shape_cast %191 : vector<1x32x32xbf16> to vector<32x32xbf16>
    %c10_103 = arith.constant 10 : index
    %c0_104 = arith.constant 0 : index
    %c0_105 = arith.constant 0 : index
    %193 = vector.load %arg3[%c10_103, %c0_104, %c0_105] : memref<29x1x32xf32, #tpu.memory_space<vmem>>, vector<1x1x32xf32>
    %194 = vector.shape_cast %193 : vector<1x1x32xf32> to vector<1x32xf32>
    %c11 = arith.constant 11 : index
    %c0_106 = arith.constant 0 : index
    %c0_107 = arith.constant 0 : index
    %195 = vector.load %arg2[%c11, %c0_106, %c0_107] : memref<29x32x32xbf16, #tpu.memory_space<vmem>>, vector<1x32x32xbf16>
    %196 = vector.shape_cast %195 : vector<1x32x32xbf16> to vector<32x32xbf16>
    %c11_108 = arith.constant 11 : index
    %c0_109 = arith.constant 0 : index
    %c0_110 = arith.constant 0 : index
    %197 = vector.load %arg3[%c11_108, %c0_109, %c0_110] : memref<29x1x32xf32, #tpu.memory_space<vmem>>, vector<1x1x32xf32>
    %198 = vector.shape_cast %197 : vector<1x1x32xf32> to vector<1x32xf32>
    %199 = vector.shape_cast %182 : vector<2x8x32xf32> to vector<16x32xf32>
    %200 = arith.truncf %199 : vector<16x32xf32> to vector<16x32xbf16>
    %cst_111 = arith.constant dense<0.000000e+00> : vector<16x32xf32>
    %201 = tpu.matmul %200, %188, %cst_111 {dimension_numbers = #tpu.dot_dimension_numbers<[1], [0], [0], [1], [0, 0, 1, 1], [], []>} : vector<16x32xbf16>, vector<32x32xbf16>, vector<16x32xf32> -> vector<16x32xf32>
    %202 = vector.broadcast %190 : vector<1x32xf32> to vector<16x32xf32>
    %203 = arith.addf %201, %202 : vector<16x32xf32>
    %204 = arith.truncf %199 : vector<16x32xf32> to vector<16x32xbf16>
    %cst_112 = arith.constant dense<0.000000e+00> : vector<16x32xf32>
    %205 = tpu.matmul %204, %192, %cst_112 {dimension_numbers = #tpu.dot_dimension_numbers<[1], [0], [0], [1], [0, 0, 1, 1], [], []>} : vector<16x32xbf16>, vector<32x32xbf16>, vector<16x32xf32> -> vector<16x32xf32>
    %206 = vector.broadcast %194 : vector<1x32xf32> to vector<16x32xf32>
    %207 = arith.addf %205, %206 : vector<16x32xf32>
    %208 = vector.shape_cast %203 : vector<16x32xf32> to vector<2x8x32xf32>
    %209 = vector.shape_cast %207 : vector<16x32xf32> to vector<2x8x32xf32>
    %210 = arith.truncf %4 : vector<8x32xf32> to vector<8x32xbf16>
    %cst_113 = arith.constant dense<0.000000e+00> : vector<8x32xf32>
    %211 = tpu.matmul %210, %184, %cst_113 {dimension_numbers = #tpu.dot_dimension_numbers<[1], [0], [0], [1], [0, 0, 1, 1], [], []>} : vector<8x32xbf16>, vector<32x32xbf16>, vector<8x32xf32> -> vector<8x32xf32>
    %212 = vector.broadcast %186 : vector<1x32xf32> to vector<8x32xf32>
    %213 = arith.addf %211, %212 : vector<8x32xf32>
    %214 = vector.shape_cast %213 : vector<8x32xf32> to vector<1x8x32xf32>
    %215 = vector.shape_cast %214 : vector<1x8x32xf32> to vector<1x8x32xf32>
    %216 = vector.broadcast %215 : vector<1x8x32xf32> to vector<2x8x32xf32>
    %cst_114 = arith.constant 0.176776692 : f32
    %217 = vector.broadcast %cst_114 : f32 to vector<8x32xf32>
    %218 = arith.mulf %213, %217 : vector<8x32xf32>
    %219 = vector.shape_cast %218 : vector<8x32xf32> to vector<1x8x32xf32>
    %220 = vector.shape_cast %219 : vector<1x8x32xf32> to vector<1x8x32xf32>
    %221 = vector.broadcast %220 : vector<1x8x32xf32> to vector<2x8x32xf32>
    %222 = vector.extract_strided_slice %221 {offsets = [0, 0, 0], sizes = [2, 8, 16], strides = [1, 1, 1]} : vector<2x8x32xf32> to vector<2x8x16xf32>
    %223 = arith.truncf %222 : vector<2x8x16xf32> to vector<2x8x16xbf16>
    %224 = vector.extract_strided_slice %208 {offsets = [0, 0, 0], sizes = [2, 8, 16], strides = [1, 1, 1]} : vector<2x8x32xf32> to vector<2x8x16xf32>
    %225 = arith.truncf %224 : vector<2x8x16xf32> to vector<2x8x16xbf16>
    %226 = vector.extract_strided_slice %209 {offsets = [0, 0, 0], sizes = [2, 8, 16], strides = [1, 1, 1]} : vector<2x8x32xf32> to vector<2x8x16xf32>
    %227 = arith.truncf %226 : vector<2x8x16xf32> to vector<2x8x16xbf16>
    "tpu.trace_start"() <{level = 10 : i32, message = "bqd,bkd->bqk"}> : () -> ()
    %cst_115 = arith.constant dense<0.000000e+00> : vector<2x8x8xf32>
    %228 = tpu.matmul %223, %225, %cst_115 {dimension_numbers = #tpu.dot_dimension_numbers<[2], [2], [1], [1], [0, 0, 0, 1, 1, 1], [0], [0]>} : vector<2x8x16xbf16>, vector<2x8x16xbf16>, vector<2x8x8xf32> -> vector<2x8x8xf32>
    "tpu.trace_stop"() : () -> ()
    %cst_116 = arith.constant dense<0xFF800000> : vector<2x8xf32>
    %229 = vector.multi_reduction <maximumf>, %228, %cst_116 [2] : vector<2x8x8xf32> to vector<2x8xf32>
    %230 = vector.shape_cast %229 : vector<2x8xf32> to vector<2x8x1xf32>
    %231 = vector.broadcast %230 : vector<2x8x1xf32> to vector<2x8x8xf32>
    %232 = arith.subf %228, %231 : vector<2x8x8xf32>
    %233 = math.exp %232 : vector<2x8x8xf32>
    %cst_117 = arith.constant dense<0.000000e+00> : vector<2x8xf32>
    %234 = vector.multi_reduction <add>, %233, %cst_117 [2] : vector<2x8x8xf32> to vector<2x8xf32>
    %235 = vector.shape_cast %234 : vector<2x8xf32> to vector<2x8x1xf32>
    %236 = tpu.reciprocal %235 : vector<2x8x1xf32> -> vector<2x8x1xf32>
    %237 = vector.broadcast %236 : vector<2x8x1xf32> to vector<2x8x8xf32>
    %238 = arith.mulf %233, %237 : vector<2x8x8xf32>
    %239 = arith.truncf %238 : vector<2x8x8xf32> to vector<2x8x8xbf16>
    "tpu.trace_start"() <{level = 10 : i32, message = "bqk,bkd->bqd"}> : () -> ()
    %cst_118 = arith.constant dense<0.000000e+00> : vector<2x8x16xf32>
    %240 = tpu.matmul %239, %227, %cst_118 {dimension_numbers = #tpu.dot_dimension_numbers<[2], [1], [1], [2], [0, 0, 0, 1, 1, 2], [0], [0]>} : vector<2x8x8xbf16>, vector<2x8x16xbf16>, vector<2x8x16xf32> -> vector<2x8x16xf32>
    "tpu.trace_stop"() : () -> ()
    %241 = vector.extract_strided_slice %221 {offsets = [0, 0, 16], sizes = [2, 8, 16], strides = [1, 1, 1]} : vector<2x8x32xf32> to vector<2x8x16xf32>
    %242 = arith.truncf %241 : vector<2x8x16xf32> to vector<2x8x16xbf16>
    %243 = vector.extract_strided_slice %208 {offsets = [0, 0, 16], sizes = [2, 8, 16], strides = [1, 1, 1]} : vector<2x8x32xf32> to vector<2x8x16xf32>
    %244 = arith.truncf %243 : vector<2x8x16xf32> to vector<2x8x16xbf16>
    %245 = vector.extract_strided_slice %209 {offsets = [0, 0, 16], sizes = [2, 8, 16], strides = [1, 1, 1]} : vector<2x8x32xf32> to vector<2x8x16xf32>
    %246 = arith.truncf %245 : vector<2x8x16xf32> to vector<2x8x16xbf16>
    "tpu.trace_start"() <{level = 10 : i32, message = "bqd,bkd->bqk"}> : () -> ()
    %cst_119 = arith.constant dense<0.000000e+00> : vector<2x8x8xf32>
    %247 = tpu.matmul %242, %244, %cst_119 {dimension_numbers = #tpu.dot_dimension_numbers<[2], [2], [1], [1], [0, 0, 0, 1, 1, 1], [0], [0]>} : vector<2x8x16xbf16>, vector<2x8x16xbf16>, vector<2x8x8xf32> -> vector<2x8x8xf32>
    "tpu.trace_stop"() : () -> ()
    %cst_120 = arith.constant dense<0xFF800000> : vector<2x8xf32>
    %248 = vector.multi_reduction <maximumf>, %247, %cst_120 [2] : vector<2x8x8xf32> to vector<2x8xf32>
    %249 = vector.shape_cast %248 : vector<2x8xf32> to vector<2x8x1xf32>
    %250 = vector.broadcast %249 : vector<2x8x1xf32> to vector<2x8x8xf32>
    %251 = arith.subf %247, %250 : vector<2x8x8xf32>
    %252 = math.exp %251 : vector<2x8x8xf32>
    %cst_121 = arith.constant dense<0.000000e+00> : vector<2x8xf32>
    %253 = vector.multi_reduction <add>, %252, %cst_121 [2] : vector<2x8x8xf32> to vector<2x8xf32>
    %254 = vector.shape_cast %253 : vector<2x8xf32> to vector<2x8x1xf32>
    %255 = tpu.reciprocal %254 : vector<2x8x1xf32> -> vector<2x8x1xf32>
    %256 = vector.broadcast %255 : vector<2x8x1xf32> to vector<2x8x8xf32>
    %257 = arith.mulf %252, %256 : vector<2x8x8xf32>
    %258 = arith.truncf %257 : vector<2x8x8xf32> to vector<2x8x8xbf16>
    "tpu.trace_start"() <{level = 10 : i32, message = "bqk,bkd->bqd"}> : () -> ()
    %cst_122 = arith.constant dense<0.000000e+00> : vector<2x8x16xf32>
    %259 = tpu.matmul %258, %246, %cst_122 {dimension_numbers = #tpu.dot_dimension_numbers<[2], [1], [1], [2], [0, 0, 0, 1, 1, 2], [0], [0]>} : vector<2x8x8xbf16>, vector<2x8x16xbf16>, vector<2x8x16xf32> -> vector<2x8x16xf32>
    "tpu.trace_stop"() : () -> ()
    %260 = tpu.concatenate %240, %259 in 2 : vector<2x8x16xf32>, vector<2x8x16xf32> -> vector<2x8x32xf32>
    %261 = arith.addf %216, %260 : vector<2x8x32xf32>
    %262 = vector.shape_cast %261 : vector<2x8x32xf32> to vector<16x32xf32>
    %263 = arith.truncf %262 : vector<16x32xf32> to vector<16x32xbf16>
    %cst_123 = arith.constant dense<0.000000e+00> : vector<16x32xf32>
    %264 = tpu.matmul %263, %196, %cst_123 {dimension_numbers = #tpu.dot_dimension_numbers<[1], [0], [0], [1], [0, 0, 1, 1], [], []>} : vector<16x32xbf16>, vector<32x32xbf16>, vector<16x32xf32> -> vector<16x32xf32>
    %265 = vector.broadcast %198 : vector<1x32xf32> to vector<16x32xf32>
    %266 = arith.addf %264, %265 : vector<16x32xf32>
    %cst_124 = arith.constant 0.000000e+00 : f32
    %267 = vector.broadcast %cst_124 : f32 to vector<16x32xf32>
    %268 = arith.maximumf %266, %267 : vector<16x32xf32>
    %269 = arith.addf %262, %268 : vector<16x32xf32>
    %270 = vector.shape_cast %269 : vector<16x32xf32> to vector<2x8x32xf32>
    %c0_125 = arith.constant 0 : index
    %c0_126 = arith.constant 0 : index
    %c0_127 = arith.constant 0 : index
    %271 = vector.load %arg7[%c0_125, %c0_126, %c0_127] : memref<2x8x32xf32, #tpu.memory_space<vmem>>, vector<2x8x32xf32>
    tpu.vector_store %arg7[%c0_125, %c0_126, %c0_127], %270 {strides = array<i32>} : memref<2x8x32xf32, #tpu.memory_space<vmem>>, vector<2x8x32xf32>,
    %c0_128 = arith.constant 0 : index
    %c0_129 = arith.constant 0 : index
    %c0_130 = arith.constant 0 : index
    %272 = vector.load %arg6[%c0_128, %c0_129, %c0_130] : memref<2x8x32xf32, #tpu.memory_space<vmem>>, vector<2x8x32xf32>
    %c0_131 = arith.constant 0 : index
    %c0_132 = arith.constant 0 : index
    %c0_133 = arith.constant 0 : index
    %273 = vector.load %arg7[%c0_131, %c0_132, %c0_133] : memref<2x8x32xf32, #tpu.memory_space<vmem>>, vector<2x8x32xf32>
    %c12 = arith.constant 12 : index
    %c0_134 = arith.constant 0 : index
    %c0_135 = arith.constant 0 : index
    %274 = vector.load %arg2[%c12, %c0_134, %c0_135] : memref<29x32x32xbf16, #tpu.memory_space<vmem>>, vector<1x32x32xbf16>
    %275 = vector.shape_cast %274 : vector<1x32x32xbf16> to vector<32x32xbf16>
    %c12_136 = arith.constant 12 : index
    %c0_137 = arith.constant 0 : index
    %c0_138 = arith.constant 0 : index
    %276 = vector.load %arg3[%c12_136, %c0_137, %c0_138] : memref<29x1x32xf32, #tpu.memory_space<vmem>>, vector<1x1x32xf32>
    %277 = vector.shape_cast %276 : vector<1x1x32xf32> to vector<1x32xf32>
    %c13 = arith.constant 13 : index
    %c0_139 = arith.constant 0 : index
    %c0_140 = arith.constant 0 : index
    %278 = vector.load %arg2[%c13, %c0_139, %c0_140] : memref<29x32x32xbf16, #tpu.memory_space<vmem>>, vector<1x32x32xbf16>
    %279 = vector.shape_cast %278 : vector<1x32x32xbf16> to vector<32x32xbf16>
    %c13_141 = arith.constant 13 : index
    %c0_142 = arith.constant 0 : index
    %c0_143 = arith.constant 0 : index
    %280 = vector.load %arg3[%c13_141, %c0_142, %c0_143] : memref<29x1x32xf32, #tpu.memory_space<vmem>>, vector<1x1x32xf32>
    %281 = vector.shape_cast %280 : vector<1x1x32xf32> to vector<1x32xf32>
    %c14 = arith.constant 14 : index
    %c0_144 = arith.constant 0 : index
    %c0_145 = arith.constant 0 : index
    %282 = vector.load %arg2[%c14, %c0_144, %c0_145] : memref<29x32x32xbf16, #tpu.memory_space<vmem>>, vector<1x32x32xbf16>
    %283 = vector.shape_cast %282 : vector<1x32x32xbf16> to vector<32x32xbf16>
    %c14_146 = arith.constant 14 : index
    %c0_147 = arith.constant 0 : index
    %c0_148 = arith.constant 0 : index
    %284 = vector.load %arg3[%c14_146, %c0_147, %c0_148] : memref<29x1x32xf32, #tpu.memory_space<vmem>>, vector<1x1x32xf32>
    %285 = vector.shape_cast %284 : vector<1x1x32xf32> to vector<1x32xf32>
    %c15 = arith.constant 15 : index
    %c0_149 = arith.constant 0 : index
    %c0_150 = arith.constant 0 : index
    %286 = vector.load %arg2[%c15, %c0_149, %c0_150] : memref<29x32x32xbf16, #tpu.memory_space<vmem>>, vector<1x32x32xbf16>
    %287 = vector.shape_cast %286 : vector<1x32x32xbf16> to vector<32x32xbf16>
    %c15_151 = arith.constant 15 : index
    %c0_152 = arith.constant 0 : index
    %c0_153 = arith.constant 0 : index
    %288 = vector.load %arg3[%c15_151, %c0_152, %c0_153] : memref<29x1x32xf32, #tpu.memory_space<vmem>>, vector<1x1x32xf32>
    %289 = vector.shape_cast %288 : vector<1x1x32xf32> to vector<1x32xf32>
    %290 = vector.shape_cast %273 : vector<2x8x32xf32> to vector<16x32xf32>
    %291 = arith.truncf %290 : vector<16x32xf32> to vector<16x32xbf16>
    %cst_154 = arith.constant dense<0.000000e+00> : vector<16x32xf32>
    %292 = tpu.matmul %291, %279, %cst_154 {dimension_numbers = #tpu.dot_dimension_numbers<[1], [0], [0], [1], [0, 0, 1, 1], [], []>} : vector<16x32xbf16>, vector<32x32xbf16>, vector<16x32xf32> -> vector<16x32xf32>
    %293 = vector.broadcast %281 : vector<1x32xf32> to vector<16x32xf32>
    %294 = arith.addf %292, %293 : vector<16x32xf32>
    %295 = arith.truncf %290 : vector<16x32xf32> to vector<16x32xbf16>
    %cst_155 = arith.constant dense<0.000000e+00> : vector<16x32xf32>
    %296 = tpu.matmul %295, %283, %cst_155 {dimension_numbers = #tpu.dot_dimension_numbers<[1], [0], [0], [1], [0, 0, 1, 1], [], []>} : vector<16x32xbf16>, vector<32x32xbf16>, vector<16x32xf32> -> vector<16x32xf32>
    %297 = vector.broadcast %285 : vector<1x32xf32> to vector<16x32xf32>
    %298 = arith.addf %296, %297 : vector<16x32xf32>
    %299 = vector.shape_cast %294 : vector<16x32xf32> to vector<2x8x32xf32>
    %300 = vector.shape_cast %298 : vector<16x32xf32> to vector<2x8x32xf32>
    %301 = vector.shape_cast %272 : vector<2x8x32xf32> to vector<16x32xf32>
    %302 = arith.truncf %301 : vector<16x32xf32> to vector<16x32xbf16>
    %cst_156 = arith.constant dense<0.000000e+00> : vector<16x32xf32>
    %303 = tpu.matmul %302, %275, %cst_156 {dimension_numbers = #tpu.dot_dimension_numbers<[1], [0], [0], [1], [0, 0, 1, 1], [], []>} : vector<16x32xbf16>, vector<32x32xbf16>, vector<16x32xf32> -> vector<16x32xf32>
    %304 = vector.broadcast %277 : vector<1x32xf32> to vector<16x32xf32>
    %305 = arith.addf %303, %304 : vector<16x32xf32>
    %306 = vector.shape_cast %305 : vector<16x32xf32> to vector<2x8x32xf32>
    %cst_157 = arith.constant 0.176776692 : f32
    %307 = vector.broadcast %cst_157 : f32 to vector<2x8x32xf32>
    %308 = arith.mulf %306, %307 : vector<2x8x32xf32>
    %309 = vector.extract_strided_slice %308 {offsets = [0, 0, 0], sizes = [2, 8, 16], strides = [1, 1, 1]} : vector<2x8x32xf32> to vector<2x8x16xf32>
    %310 = arith.truncf %309 : vector<2x8x16xf32> to vector<2x8x16xbf16>
    %311 = vector.extract_strided_slice %299 {offsets = [0, 0, 0], sizes = [2, 8, 16], strides = [1, 1, 1]} : vector<2x8x32xf32> to vector<2x8x16xf32>
    %312 = arith.truncf %311 : vector<2x8x16xf32> to vector<2x8x16xbf16>
    %313 = vector.extract_strided_slice %300 {offsets = [0, 0, 0], sizes = [2, 8, 16], strides = [1, 1, 1]} : vector<2x8x32xf32> to vector<2x8x16xf32>
    %314 = arith.truncf %313 : vector<2x8x16xf32> to vector<2x8x16xbf16>
    "tpu.trace_start"() <{level = 10 : i32, message = "bqd,bkd->bqk"}> : () -> ()
    %cst_158 = arith.constant dense<0.000000e+00> : vector<2x8x8xf32>
    %315 = tpu.matmul %310, %312, %cst_158 {dimension_numbers = #tpu.dot_dimension_numbers<[2], [2], [1], [1], [0, 0, 0, 1, 1, 1], [0], [0]>} : vector<2x8x16xbf16>, vector<2x8x16xbf16>, vector<2x8x8xf32> -> vector<2x8x8xf32>
    "tpu.trace_stop"() : () -> ()
    %cst_159 = arith.constant dense<0xFF800000> : vector<2x8xf32>
    %316 = vector.multi_reduction <maximumf>, %315, %cst_159 [2] : vector<2x8x8xf32> to vector<2x8xf32>
    %317 = vector.shape_cast %316 : vector<2x8xf32> to vector<2x8x1xf32>
    %318 = vector.broadcast %317 : vector<2x8x1xf32> to vector<2x8x8xf32>
    %319 = arith.subf %315, %318 : vector<2x8x8xf32>
    %320 = math.exp %319 : vector<2x8x8xf32>
    %cst_160 = arith.constant dense<0.000000e+00> : vector<2x8xf32>
    %321 = vector.multi_reduction <add>, %320, %cst_160 [2] : vector<2x8x8xf32> to vector<2x8xf32>
    %322 = vector.shape_cast %321 : vector<2x8xf32> to vector<2x8x1xf32>
    %323 = tpu.reciprocal %322 : vector<2x8x1xf32> -> vector<2x8x1xf32>
    %324 = vector.broadcast %323 : vector<2x8x1xf32> to vector<2x8x8xf32>
    %325 = arith.mulf %320, %324 : vector<2x8x8xf32>
    %326 = arith.truncf %325 : vector<2x8x8xf32> to vector<2x8x8xbf16>
    "tpu.trace_start"() <{level = 10 : i32, message = "bqk,bkd->bqd"}> : () -> ()
    %cst_161 = arith.constant dense<0.000000e+00> : vector<2x8x16xf32>
    %327 = tpu.matmul %326, %314, %cst_161 {dimension_numbers = #tpu.dot_dimension_numbers<[2], [1], [1], [2], [0, 0, 0, 1, 1, 2], [0], [0]>} : vector<2x8x8xbf16>, vector<2x8x16xbf16>, vector<2x8x16xf32> -> vector<2x8x16xf32>
    "tpu.trace_stop"() : () -> ()
    %328 = vector.extract_strided_slice %308 {offsets = [0, 0, 16], sizes = [2, 8, 16], strides = [1, 1, 1]} : vector<2x8x32xf32> to vector<2x8x16xf32>
    %329 = arith.truncf %328 : vector<2x8x16xf32> to vector<2x8x16xbf16>
    %330 = vector.extract_strided_slice %299 {offsets = [0, 0, 16], sizes = [2, 8, 16], strides = [1, 1, 1]} : vector<2x8x32xf32> to vector<2x8x16xf32>
    %331 = arith.truncf %330 : vector<2x8x16xf32> to vector<2x8x16xbf16>
    %332 = vector.extract_strided_slice %300 {offsets = [0, 0, 16], sizes = [2, 8, 16], strides = [1, 1, 1]} : vector<2x8x32xf32> to vector<2x8x16xf32>
    %333 = arith.truncf %332 : vector<2x8x16xf32> to vector<2x8x16xbf16>
    "tpu.trace_start"() <{level = 10 : i32, message = "bqd,bkd->bqk"}> : () -> ()
    %cst_162 = arith.constant dense<0.000000e+00> : vector<2x8x8xf32>
    %334 = tpu.matmul %329, %331, %cst_162 {dimension_numbers = #tpu.dot_dimension_numbers<[2], [2], [1], [1], [0, 0, 0, 1, 1, 1], [0], [0]>} : vector<2x8x16xbf16>, vector<2x8x16xbf16>, vector<2x8x8xf32> -> vector<2x8x8xf32>
    "tpu.trace_stop"() : () -> ()
    %cst_163 = arith.constant dense<0xFF800000> : vector<2x8xf32>
    %335 = vector.multi_reduction <maximumf>, %334, %cst_163 [2] : vector<2x8x8xf32> to vector<2x8xf32>
    %336 = vector.shape_cast %335 : vector<2x8xf32> to vector<2x8x1xf32>
    %337 = vector.broadcast %336 : vector<2x8x1xf32> to vector<2x8x8xf32>
    %338 = arith.subf %334, %337 : vector<2x8x8xf32>
    %339 = math.exp %338 : vector<2x8x8xf32>
    %cst_164 = arith.constant dense<0.000000e+00> : vector<2x8xf32>
    %340 = vector.multi_reduction <add>, %339, %cst_164 [2] : vector<2x8x8xf32> to vector<2x8xf32>
    %341 = vector.shape_cast %340 : vector<2x8xf32> to vector<2x8x1xf32>
    %342 = tpu.reciprocal %341 : vector<2x8x1xf32> -> vector<2x8x1xf32>
    %343 = vector.broadcast %342 : vector<2x8x1xf32> to vector<2x8x8xf32>
    %344 = arith.mulf %339, %343 : vector<2x8x8xf32>
    %345 = arith.truncf %344 : vector<2x8x8xf32> to vector<2x8x8xbf16>
    "tpu.trace_start"() <{level = 10 : i32, message = "bqk,bkd->bqd"}> : () -> ()
    %cst_165 = arith.constant dense<0.000000e+00> : vector<2x8x16xf32>
    %346 = tpu.matmul %345, %333, %cst_165 {dimension_numbers = #tpu.dot_dimension_numbers<[2], [1], [1], [2], [0, 0, 0, 1, 1, 2], [0], [0]>} : vector<2x8x8xbf16>, vector<2x8x16xbf16>, vector<2x8x16xf32> -> vector<2x8x16xf32>
    "tpu.trace_stop"() : () -> ()
    %347 = tpu.concatenate %327, %346 in 2 : vector<2x8x16xf32>, vector<2x8x16xf32> -> vector<2x8x32xf32>
    %348 = arith.addf %306, %347 : vector<2x8x32xf32>
    %349 = vector.shape_cast %348 : vector<2x8x32xf32> to vector<16x32xf32>
    %350 = arith.truncf %349 : vector<16x32xf32> to vector<16x32xbf16>
    %cst_166 = arith.constant dense<0.000000e+00> : vector<16x32xf32>
    %351 = tpu.matmul %350, %287, %cst_166 {dimension_numbers = #tpu.dot_dimension_numbers<[1], [0], [0], [1], [0, 0, 1, 1], [], []>} : vector<16x32xbf16>, vector<32x32xbf16>, vector<16x32xf32> -> vector<16x32xf32>
    %352 = vector.broadcast %289 : vector<1x32xf32> to vector<16x32xf32>
    %353 = arith.addf %351, %352 : vector<16x32xf32>
    %cst_167 = arith.constant 0.000000e+00 : f32
    %354 = vector.broadcast %cst_167 : f32 to vector<16x32xf32>
    %355 = arith.maximumf %353, %354 : vector<16x32xf32>
    %356 = arith.addf %349, %355 : vector<16x32xf32>
    %357 = vector.shape_cast %356 : vector<16x32xf32> to vector<2x8x32xf32>
    %c0_168 = arith.constant 0 : index
    %c0_169 = arith.constant 0 : index
    %c0_170 = arith.constant 0 : index
    %358 = vector.load %arg6[%c0_168, %c0_169, %c0_170] : memref<2x8x32xf32, #tpu.memory_space<vmem>>, vector<2x8x32xf32>
    tpu.vector_store %arg6[%c0_168, %c0_169, %c0_170], %357 {strides = array<i32>} : memref<2x8x32xf32, #tpu.memory_space<vmem>>, vector<2x8x32xf32>,
    %c0_171 = arith.constant 0 : index
    %c0_172 = arith.constant 0 : index
    %c0_173 = arith.constant 0 : index
    %359 = vector.load %arg6[%c0_171, %c0_172, %c0_173] : memref<2x8x32xf32, #tpu.memory_space<vmem>>, vector<2x8x32xf32>
    %c16 = arith.constant 16 : index
    %c0_174 = arith.constant 0 : index
    %c0_175 = arith.constant 0 : index
    %360 = vector.load %arg2[%c16, %c0_174, %c0_175] : memref<29x32x32xbf16, #tpu.memory_space<vmem>>, vector<1x32x32xbf16>
    %361 = vector.shape_cast %360 : vector<1x32x32xbf16> to vector<32x32xbf16>
    %c16_176 = arith.constant 16 : index
    %c0_177 = arith.constant 0 : index
    %c0_178 = arith.constant 0 : index
    %362 = vector.load %arg3[%c16_176, %c0_177, %c0_178] : memref<29x1x32xf32, #tpu.memory_space<vmem>>, vector<1x1x32xf32>
    %363 = vector.shape_cast %362 : vector<1x1x32xf32> to vector<1x32xf32>
    %c17 = arith.constant 17 : index
    %c0_179 = arith.constant 0 : index
    %c0_180 = arith.constant 0 : index
    %364 = vector.load %arg2[%c17, %c0_179, %c0_180] : memref<29x32x32xbf16, #tpu.memory_space<vmem>>, vector<1x32x32xbf16>
    %365 = vector.shape_cast %364 : vector<1x32x32xbf16> to vector<32x32xbf16>
    %c17_181 = arith.constant 17 : index
    %c0_182 = arith.constant 0 : index
    %c0_183 = arith.constant 0 : index
    %366 = vector.load %arg3[%c17_181, %c0_182, %c0_183] : memref<29x1x32xf32, #tpu.memory_space<vmem>>, vector<1x1x32xf32>
    %367 = vector.shape_cast %366 : vector<1x1x32xf32> to vector<1x32xf32>
    %c18 = arith.constant 18 : index
    %c0_184 = arith.constant 0 : index
    %c0_185 = arith.constant 0 : index
    %368 = vector.load %arg2[%c18, %c0_184, %c0_185] : memref<29x32x32xbf16, #tpu.memory_space<vmem>>, vector<1x32x32xbf16>
    %369 = vector.shape_cast %368 : vector<1x32x32xbf16> to vector<32x32xbf16>
    %c18_186 = arith.constant 18 : index
    %c0_187 = arith.constant 0 : index
    %c0_188 = arith.constant 0 : index
    %370 = vector.load %arg3[%c18_186, %c0_187, %c0_188] : memref<29x1x32xf32, #tpu.memory_space<vmem>>, vector<1x1x32xf32>
    %371 = vector.shape_cast %370 : vector<1x1x32xf32> to vector<1x32xf32>
    %c19 = arith.constant 19 : index
    %c0_189 = arith.constant 0 : index
    %c0_190 = arith.constant 0 : index
    %372 = vector.load %arg2[%c19, %c0_189, %c0_190] : memref<29x32x32xbf16, #tpu.memory_space<vmem>>, vector<1x32x32xbf16>
    %373 = vector.shape_cast %372 : vector<1x32x32xbf16> to vector<32x32xbf16>
    %c19_191 = arith.constant 19 : index
    %c0_192 = arith.constant 0 : index
    %c0_193 = arith.constant 0 : index
    %374 = vector.load %arg3[%c19_191, %c0_192, %c0_193] : memref<29x1x32xf32, #tpu.memory_space<vmem>>, vector<1x1x32xf32>
    %375 = vector.shape_cast %374 : vector<1x1x32xf32> to vector<1x32xf32>
    %376 = vector.shape_cast %359 : vector<2x8x32xf32> to vector<16x32xf32>
    %377 = arith.truncf %376 : vector<16x32xf32> to vector<16x32xbf16>
    %cst_194 = arith.constant dense<0.000000e+00> : vector<16x32xf32>
    %378 = tpu.matmul %377, %365, %cst_194 {dimension_numbers = #tpu.dot_dimension_numbers<[1], [0], [0], [1], [0, 0, 1, 1], [], []>} : vector<16x32xbf16>, vector<32x32xbf16>, vector<16x32xf32> -> vector<16x32xf32>
    %379 = vector.broadcast %367 : vector<1x32xf32> to vector<16x32xf32>
    %380 = arith.addf %378, %379 : vector<16x32xf32>
    %381 = arith.truncf %376 : vector<16x32xf32> to vector<16x32xbf16>
    %cst_195 = arith.constant dense<0.000000e+00> : vector<16x32xf32>
    %382 = tpu.matmul %381, %369, %cst_195 {dimension_numbers = #tpu.dot_dimension_numbers<[1], [0], [0], [1], [0, 0, 1, 1], [], []>} : vector<16x32xbf16>, vector<32x32xbf16>, vector<16x32xf32> -> vector<16x32xf32>
    %383 = vector.broadcast %371 : vector<1x32xf32> to vector<16x32xf32>
    %384 = arith.addf %382, %383 : vector<16x32xf32>
    %385 = vector.shape_cast %380 : vector<16x32xf32> to vector<2x8x32xf32>
    %386 = vector.shape_cast %384 : vector<16x32xf32> to vector<2x8x32xf32>
    %387 = arith.truncf %6 : vector<4x32xf32> to vector<4x32xbf16>
    %cst_196 = arith.constant dense<0.000000e+00> : vector<4x32xf32>
    %388 = tpu.matmul %387, %361, %cst_196 {dimension_numbers = #tpu.dot_dimension_numbers<[1], [0], [0], [1], [0, 0, 1, 1], [], []>} : vector<4x32xbf16>, vector<32x32xbf16>, vector<4x32xf32> -> vector<4x32xf32>
    %389 = vector.broadcast %363 : vector<1x32xf32> to vector<4x32xf32>
    %390 = arith.addf %388, %389 : vector<4x32xf32>
    %391 = vector.shape_cast %390 : vector<4x32xf32> to vector<1x4x32xf32>
    %392 = vector.shape_cast %391 : vector<1x4x32xf32> to vector<1x4x32xf32>
    %393 = vector.broadcast %392 : vector<1x4x32xf32> to vector<2x4x32xf32>
    %cst_197 = arith.constant 0.176776692 : f32
    %394 = vector.broadcast %cst_197 : f32 to vector<4x32xf32>
    %395 = arith.mulf %390, %394 : vector<4x32xf32>
    %396 = vector.shape_cast %395 : vector<4x32xf32> to vector<1x4x32xf32>
    %397 = vector.shape_cast %396 : vector<1x4x32xf32> to vector<1x4x32xf32>
    %398 = vector.broadcast %397 : vector<1x4x32xf32> to vector<2x4x32xf32>
    %399 = vector.extract_strided_slice %398 {offsets = [0, 0, 0], sizes = [2, 4, 16], strides = [1, 1, 1]} : vector<2x4x32xf32> to vector<2x4x16xf32>
    %400 = arith.truncf %399 : vector<2x4x16xf32> to vector<2x4x16xbf16>
    %401 = vector.extract_strided_slice %385 {offsets = [0, 0, 0], sizes = [2, 8, 16], strides = [1, 1, 1]} : vector<2x8x32xf32> to vector<2x8x16xf32>
    %402 = arith.truncf %401 : vector<2x8x16xf32> to vector<2x8x16xbf16>
    %403 = vector.extract_strided_slice %386 {offsets = [0, 0, 0], sizes = [2, 8, 16], strides = [1, 1, 1]} : vector<2x8x32xf32> to vector<2x8x16xf32>
    %404 = arith.truncf %403 : vector<2x8x16xf32> to vector<2x8x16xbf16>
    "tpu.trace_start"() <{level = 10 : i32, message = "bqd,bkd->bqk"}> : () -> ()
    %cst_198 = arith.constant dense<0.000000e+00> : vector<2x4x8xf32>
    %405 = tpu.matmul %400, %402, %cst_198 {dimension_numbers = #tpu.dot_dimension_numbers<[2], [2], [1], [1], [0, 0, 0, 1, 1, 1], [0], [0]>} : vector<2x4x16xbf16>, vector<2x8x16xbf16>, vector<2x4x8xf32> -> vector<2x4x8xf32>
    "tpu.trace_stop"() : () -> ()
    %cst_199 = arith.constant dense<0xFF800000> : vector<2x4xf32>
    %406 = vector.multi_reduction <maximumf>, %405, %cst_199 [2] : vector<2x4x8xf32> to vector<2x4xf32>
    %407 = vector.shape_cast %406 : vector<2x4xf32> to vector<2x4x1xf32>
    %408 = vector.broadcast %407 : vector<2x4x1xf32> to vector<2x4x8xf32>
    %409 = arith.subf %405, %408 : vector<2x4x8xf32>
    %410 = math.exp %409 : vector<2x4x8xf32>
    %cst_200 = arith.constant dense<0.000000e+00> : vector<2x4xf32>
    %411 = vector.multi_reduction <add>, %410, %cst_200 [2] : vector<2x4x8xf32> to vector<2x4xf32>
    %412 = vector.shape_cast %411 : vector<2x4xf32> to vector<2x4x1xf32>
    %413 = tpu.reciprocal %412 : vector<2x4x1xf32> -> vector<2x4x1xf32>
    %414 = vector.broadcast %413 : vector<2x4x1xf32> to vector<2x4x8xf32>
    %415 = arith.mulf %410, %414 : vector<2x4x8xf32>
    %416 = arith.truncf %415 : vector<2x4x8xf32> to vector<2x4x8xbf16>
    "tpu.trace_start"() <{level = 10 : i32, message = "bqk,bkd->bqd"}> : () -> ()
    %cst_201 = arith.constant dense<0.000000e+00> : vector<2x4x16xf32>
    %417 = tpu.matmul %416, %404, %cst_201 {dimension_numbers = #tpu.dot_dimension_numbers<[2], [1], [1], [2], [0, 0, 0, 1, 1, 2], [0], [0]>} : vector<2x4x8xbf16>, vector<2x8x16xbf16>, vector<2x4x16xf32> -> vector<2x4x16xf32>
    "tpu.trace_stop"() : () -> ()
    %418 = vector.extract_strided_slice %398 {offsets = [0, 0, 16], sizes = [2, 4, 16], strides = [1, 1, 1]} : vector<2x4x32xf32> to vector<2x4x16xf32>
    %419 = arith.truncf %418 : vector<2x4x16xf32> to vector<2x4x16xbf16>
    %420 = vector.extract_strided_slice %385 {offsets = [0, 0, 16], sizes = [2, 8, 16], strides = [1, 1, 1]} : vector<2x8x32xf32> to vector<2x8x16xf32>
    %421 = arith.truncf %420 : vector<2x8x16xf32> to vector<2x8x16xbf16>
    %422 = vector.extract_strided_slice %386 {offsets = [0, 0, 16], sizes = [2, 8, 16], strides = [1, 1, 1]} : vector<2x8x32xf32> to vector<2x8x16xf32>
    %423 = arith.truncf %422 : vector<2x8x16xf32> to vector<2x8x16xbf16>
    "tpu.trace_start"() <{level = 10 : i32, message = "bqd,bkd->bqk"}> : () -> ()
    %cst_202 = arith.constant dense<0.000000e+00> : vector<2x4x8xf32>
    %424 = tpu.matmul %419, %421, %cst_202 {dimension_numbers = #tpu.dot_dimension_numbers<[2], [2], [1], [1], [0, 0, 0, 1, 1, 1], [0], [0]>} : vector<2x4x16xbf16>, vector<2x8x16xbf16>, vector<2x4x8xf32> -> vector<2x4x8xf32>
    "tpu.trace_stop"() : () -> ()
    %cst_203 = arith.constant dense<0xFF800000> : vector<2x4xf32>
    %425 = vector.multi_reduction <maximumf>, %424, %cst_203 [2] : vector<2x4x8xf32> to vector<2x4xf32>
    %426 = vector.shape_cast %425 : vector<2x4xf32> to vector<2x4x1xf32>
    %427 = vector.broadcast %426 : vector<2x4x1xf32> to vector<2x4x8xf32>
    %428 = arith.subf %424, %427 : vector<2x4x8xf32>
    %429 = math.exp %428 : vector<2x4x8xf32>
    %cst_204 = arith.constant dense<0.000000e+00> : vector<2x4xf32>
    %430 = vector.multi_reduction <add>, %429, %cst_204 [2] : vector<2x4x8xf32> to vector<2x4xf32>
    %431 = vector.shape_cast %430 : vector<2x4xf32> to vector<2x4x1xf32>
    %432 = tpu.reciprocal %431 : vector<2x4x1xf32> -> vector<2x4x1xf32>
    %433 = vector.broadcast %432 : vector<2x4x1xf32> to vector<2x4x8xf32>
    %434 = arith.mulf %429, %433 : vector<2x4x8xf32>
    %435 = arith.truncf %434 : vector<2x4x8xf32> to vector<2x4x8xbf16>
    "tpu.trace_start"() <{level = 10 : i32, message = "bqk,bkd->bqd"}> : () -> ()
    %cst_205 = arith.constant dense<0.000000e+00> : vector<2x4x16xf32>
    %436 = tpu.matmul %435, %423, %cst_205 {dimension_numbers = #tpu.dot_dimension_numbers<[2], [1], [1], [2], [0, 0, 0, 1, 1, 2], [0], [0]>} : vector<2x4x8xbf16>, vector<2x8x16xbf16>, vector<2x4x16xf32> -> vector<2x4x16xf32>
    "tpu.trace_stop"() : () -> ()
    %437 = tpu.concatenate %417, %436 in 2 : vector<2x4x16xf32>, vector<2x4x16xf32> -> vector<2x4x32xf32>
    %438 = arith.addf %393, %437 : vector<2x4x32xf32>
    %439 = vector.shape_cast %438 : vector<2x4x32xf32> to vector<8x32xf32>
    %440 = arith.truncf %439 : vector<8x32xf32> to vector<8x32xbf16>
    %cst_206 = arith.constant dense<0.000000e+00> : vector<8x32xf32>
    %441 = tpu.matmul %440, %373, %cst_206 {dimension_numbers = #tpu.dot_dimension_numbers<[1], [0], [0], [1], [0, 0, 1, 1], [], []>} : vector<8x32xbf16>, vector<32x32xbf16>, vector<8x32xf32> -> vector<8x32xf32>
    %442 = vector.broadcast %375 : vector<1x32xf32> to vector<8x32xf32>
    %443 = arith.addf %441, %442 : vector<8x32xf32>
    %cst_207 = arith.constant 0.000000e+00 : f32
    %444 = vector.broadcast %cst_207 : f32 to vector<8x32xf32>
    %445 = arith.maximumf %443, %444 : vector<8x32xf32>
    %446 = arith.addf %439, %445 : vector<8x32xf32>
    %447 = vector.shape_cast %446 : vector<8x32xf32> to vector<2x4x32xf32>
    %c20 = arith.constant 20 : index
    %c0_208 = arith.constant 0 : index
    %c0_209 = arith.constant 0 : index
    %448 = vector.load %arg2[%c20, %c0_208, %c0_209] : memref<29x32x32xbf16, #tpu.memory_space<vmem>>, vector<1x32x32xbf16>
    %449 = vector.shape_cast %448 : vector<1x32x32xbf16> to vector<32x32xbf16>
    %c20_210 = arith.constant 20 : index
    %c0_211 = arith.constant 0 : index
    %c0_212 = arith.constant 0 : index
    %450 = vector.load %arg3[%c20_210, %c0_211, %c0_212] : memref<29x1x32xf32, #tpu.memory_space<vmem>>, vector<1x1x32xf32>
    %451 = vector.shape_cast %450 : vector<1x1x32xf32> to vector<1x32xf32>
    %c21 = arith.constant 21 : index
    %c0_213 = arith.constant 0 : index
    %c0_214 = arith.constant 0 : index
    %452 = vector.load %arg2[%c21, %c0_213, %c0_214] : memref<29x32x32xbf16, #tpu.memory_space<vmem>>, vector<1x32x32xbf16>
    %453 = vector.shape_cast %452 : vector<1x32x32xbf16> to vector<32x32xbf16>
    %c21_215 = arith.constant 21 : index
    %c0_216 = arith.constant 0 : index
    %c0_217 = arith.constant 0 : index
    %454 = vector.load %arg3[%c21_215, %c0_216, %c0_217] : memref<29x1x32xf32, #tpu.memory_space<vmem>>, vector<1x1x32xf32>
    %455 = vector.shape_cast %454 : vector<1x1x32xf32> to vector<1x32xf32>
    %c22 = arith.constant 22 : index
    %c0_218 = arith.constant 0 : index
    %c0_219 = arith.constant 0 : index
    %456 = vector.load %arg2[%c22, %c0_218, %c0_219] : memref<29x32x32xbf16, #tpu.memory_space<vmem>>, vector<1x32x32xbf16>
    %457 = vector.shape_cast %456 : vector<1x32x32xbf16> to vector<32x32xbf16>
    %c22_220 = arith.constant 22 : index
    %c0_221 = arith.constant 0 : index
    %c0_222 = arith.constant 0 : index
    %458 = vector.load %arg3[%c22_220, %c0_221, %c0_222] : memref<29x1x32xf32, #tpu.memory_space<vmem>>, vector<1x1x32xf32>
    %459 = vector.shape_cast %458 : vector<1x1x32xf32> to vector<1x32xf32>
    %c23 = arith.constant 23 : index
    %c0_223 = arith.constant 0 : index
    %c0_224 = arith.constant 0 : index
    %460 = vector.load %arg2[%c23, %c0_223, %c0_224] : memref<29x32x32xbf16, #tpu.memory_space<vmem>>, vector<1x32x32xbf16>
    %461 = vector.shape_cast %460 : vector<1x32x32xbf16> to vector<32x32xbf16>
    %c23_225 = arith.constant 23 : index
    %c0_226 = arith.constant 0 : index
    %c0_227 = arith.constant 0 : index
    %462 = vector.load %arg3[%c23_225, %c0_226, %c0_227] : memref<29x1x32xf32, #tpu.memory_space<vmem>>, vector<1x1x32xf32>
    %463 = vector.shape_cast %462 : vector<1x1x32xf32> to vector<1x32xf32>
    %464 = vector.shape_cast %447 : vector<2x4x32xf32> to vector<8x32xf32>
    %465 = arith.truncf %464 : vector<8x32xf32> to vector<8x32xbf16>
    %cst_228 = arith.constant dense<0.000000e+00> : vector<8x32xf32>
    %466 = tpu.matmul %465, %453, %cst_228 {dimension_numbers = #tpu.dot_dimension_numbers<[1], [0], [0], [1], [0, 0, 1, 1], [], []>} : vector<8x32xbf16>, vector<32x32xbf16>, vector<8x32xf32> -> vector<8x32xf32>
    %467 = vector.broadcast %455 : vector<1x32xf32> to vector<8x32xf32>
    %468 = arith.addf %466, %467 : vector<8x32xf32>
    %469 = arith.truncf %464 : vector<8x32xf32> to vector<8x32xbf16>
    %cst_229 = arith.constant dense<0.000000e+00> : vector<8x32xf32>
    %470 = tpu.matmul %469, %457, %cst_229 {dimension_numbers = #tpu.dot_dimension_numbers<[1], [0], [0], [1], [0, 0, 1, 1], [], []>} : vector<8x32xbf16>, vector<32x32xbf16>, vector<8x32xf32> -> vector<8x32xf32>
    %471 = vector.broadcast %459 : vector<1x32xf32> to vector<8x32xf32>
    %472 = arith.addf %470, %471 : vector<8x32xf32>
    %473 = vector.shape_cast %468 : vector<8x32xf32> to vector<2x4x32xf32>
    %474 = vector.shape_cast %472 : vector<8x32xf32> to vector<2x4x32xf32>
    %475 = vector.shape_cast %447 : vector<2x4x32xf32> to vector<8x32xf32>
    %476 = arith.truncf %475 : vector<8x32xf32> to vector<8x32xbf16>
    %cst_230 = arith.constant dense<0.000000e+00> : vector<8x32xf32>
    %477 = tpu.matmul %476, %449, %cst_230 {dimension_numbers = #tpu.dot_dimension_numbers<[1], [0], [0], [1], [0, 0, 1, 1], [], []>} : vector<8x32xbf16>, vector<32x32xbf16>, vector<8x32xf32> -> vector<8x32xf32>
    %478 = vector.broadcast %451 : vector<1x32xf32> to vector<8x32xf32>
    %479 = arith.addf %477, %478 : vector<8x32xf32>
    %480 = vector.shape_cast %479 : vector<8x32xf32> to vector<2x4x32xf32>
    %cst_231 = arith.constant 0.176776692 : f32
    %481 = vector.broadcast %cst_231 : f32 to vector<2x4x32xf32>
    %482 = arith.mulf %480, %481 : vector<2x4x32xf32>
    %483 = vector.extract_strided_slice %482 {offsets = [0, 0, 0], sizes = [2, 4, 16], strides = [1, 1, 1]} : vector<2x4x32xf32> to vector<2x4x16xf32>
    %484 = arith.truncf %483 : vector<2x4x16xf32> to vector<2x4x16xbf16>
    %485 = vector.extract_strided_slice %473 {offsets = [0, 0, 0], sizes = [2, 4, 16], strides = [1, 1, 1]} : vector<2x4x32xf32> to vector<2x4x16xf32>
    %486 = arith.truncf %485 : vector<2x4x16xf32> to vector<2x4x16xbf16>
    %487 = vector.extract_strided_slice %474 {offsets = [0, 0, 0], sizes = [2, 4, 16], strides = [1, 1, 1]} : vector<2x4x32xf32> to vector<2x4x16xf32>
    %488 = arith.truncf %487 : vector<2x4x16xf32> to vector<2x4x16xbf16>
    "tpu.trace_start"() <{level = 10 : i32, message = "bqd,bkd->bqk"}> : () -> ()
    %cst_232 = arith.constant dense<0.000000e+00> : vector<2x4x4xf32>
    %489 = tpu.matmul %484, %486, %cst_232 {dimension_numbers = #tpu.dot_dimension_numbers<[2], [2], [1], [1], [0, 0, 0, 1, 1, 1], [0], [0]>} : vector<2x4x16xbf16>, vector<2x4x16xbf16>, vector<2x4x4xf32> -> vector<2x4x4xf32>
    "tpu.trace_stop"() : () -> ()
    %cst_233 = arith.constant dense<0xFF800000> : vector<2x4xf32>
    %490 = vector.multi_reduction <maximumf>, %489, %cst_233 [2] : vector<2x4x4xf32> to vector<2x4xf32>
    %491 = vector.shape_cast %490 : vector<2x4xf32> to vector<2x4x1xf32>
    %492 = vector.broadcast %491 : vector<2x4x1xf32> to vector<2x4x4xf32>
    %493 = arith.subf %489, %492 : vector<2x4x4xf32>
    %494 = math.exp %493 : vector<2x4x4xf32>
    %cst_234 = arith.constant dense<0.000000e+00> : vector<2x4xf32>
    %495 = vector.multi_reduction <add>, %494, %cst_234 [2] : vector<2x4x4xf32> to vector<2x4xf32>
    %496 = vector.shape_cast %495 : vector<2x4xf32> to vector<2x4x1xf32>
    %497 = tpu.reciprocal %496 : vector<2x4x1xf32> -> vector<2x4x1xf32>
    %498 = vector.broadcast %497 : vector<2x4x1xf32> to vector<2x4x4xf32>
    %499 = arith.mulf %494, %498 : vector<2x4x4xf32>
    %500 = arith.truncf %499 : vector<2x4x4xf32> to vector<2x4x4xbf16>
    "tpu.trace_start"() <{level = 10 : i32, message = "bqk,bkd->bqd"}> : () -> ()
    %cst_235 = arith.constant dense<0.000000e+00> : vector<2x4x16xf32>
    %501 = tpu.matmul %500, %488, %cst_235 {dimension_numbers = #tpu.dot_dimension_numbers<[2], [1], [1], [2], [0, 0, 0, 1, 1, 2], [0], [0]>} : vector<2x4x4xbf16>, vector<2x4x16xbf16>, vector<2x4x16xf32> -> vector<2x4x16xf32>
    "tpu.trace_stop"() : () -> ()
    %502 = vector.extract_strided_slice %482 {offsets = [0, 0, 16], sizes = [2, 4, 16], strides = [1, 1, 1]} : vector<2x4x32xf32> to vector<2x4x16xf32>
    %503 = arith.truncf %502 : vector<2x4x16xf32> to vector<2x4x16xbf16>
    %504 = vector.extract_strided_slice %473 {offsets = [0, 0, 16], sizes = [2, 4, 16], strides = [1, 1, 1]} : vector<2x4x32xf32> to vector<2x4x16xf32>
    %505 = arith.truncf %504 : vector<2x4x16xf32> to vector<2x4x16xbf16>
    %506 = vector.extract_strided_slice %474 {offsets = [0, 0, 16], sizes = [2, 4, 16], strides = [1, 1, 1]} : vector<2x4x32xf32> to vector<2x4x16xf32>
    %507 = arith.truncf %506 : vector<2x4x16xf32> to vector<2x4x16xbf16>
    "tpu.trace_start"() <{level = 10 : i32, message = "bqd,bkd->bqk"}> : () -> ()
    %cst_236 = arith.constant dense<0.000000e+00> : vector<2x4x4xf32>
    %508 = tpu.matmul %503, %505, %cst_236 {dimension_numbers = #tpu.dot_dimension_numbers<[2], [2], [1], [1], [0, 0, 0, 1, 1, 1], [0], [0]>} : vector<2x4x16xbf16>, vector<2x4x16xbf16>, vector<2x4x4xf32> -> vector<2x4x4xf32>
    "tpu.trace_stop"() : () -> ()
    %cst_237 = arith.constant dense<0xFF800000> : vector<2x4xf32>
    %509 = vector.multi_reduction <maximumf>, %508, %cst_237 [2] : vector<2x4x4xf32> to vector<2x4xf32>
    %510 = vector.shape_cast %509 : vector<2x4xf32> to vector<2x4x1xf32>
    %511 = vector.broadcast %510 : vector<2x4x1xf32> to vector<2x4x4xf32>
    %512 = arith.subf %508, %511 : vector<2x4x4xf32>
    %513 = math.exp %512 : vector<2x4x4xf32>
    %cst_238 = arith.constant dense<0.000000e+00> : vector<2x4xf32>
    %514 = vector.multi_reduction <add>, %513, %cst_238 [2] : vector<2x4x4xf32> to vector<2x4xf32>
    %515 = vector.shape_cast %514 : vector<2x4xf32> to vector<2x4x1xf32>
    %516 = tpu.reciprocal %515 : vector<2x4x1xf32> -> vector<2x4x1xf32>
    %517 = vector.broadcast %516 : vector<2x4x1xf32> to vector<2x4x4xf32>
    %518 = arith.mulf %513, %517 : vector<2x4x4xf32>
    %519 = arith.truncf %518 : vector<2x4x4xf32> to vector<2x4x4xbf16>
    "tpu.trace_start"() <{level = 10 : i32, message = "bqk,bkd->bqd"}> : () -> ()
    %cst_239 = arith.constant dense<0.000000e+00> : vector<2x4x16xf32>
    %520 = tpu.matmul %519, %507, %cst_239 {dimension_numbers = #tpu.dot_dimension_numbers<[2], [1], [1], [2], [0, 0, 0, 1, 1, 2], [0], [0]>} : vector<2x4x4xbf16>, vector<2x4x16xbf16>, vector<2x4x16xf32> -> vector<2x4x16xf32>
    "tpu.trace_stop"() : () -> ()
    %521 = tpu.concatenate %501, %520 in 2 : vector<2x4x16xf32>, vector<2x4x16xf32> -> vector<2x4x32xf32>
    %522 = arith.addf %480, %521 : vector<2x4x32xf32>
    %523 = vector.shape_cast %522 : vector<2x4x32xf32> to vector<8x32xf32>
    %524 = arith.truncf %523 : vector<8x32xf32> to vector<8x32xbf16>
    %cst_240 = arith.constant dense<0.000000e+00> : vector<8x32xf32>
    %525 = tpu.matmul %524, %461, %cst_240 {dimension_numbers = #tpu.dot_dimension_numbers<[1], [0], [0], [1], [0, 0, 1, 1], [], []>} : vector<8x32xbf16>, vector<32x32xbf16>, vector<8x32xf32> -> vector<8x32xf32>
    %526 = vector.broadcast %463 : vector<1x32xf32> to vector<8x32xf32>
    %527 = arith.addf %525, %526 : vector<8x32xf32>
    %cst_241 = arith.constant 0.000000e+00 : f32
    %528 = vector.broadcast %cst_241 : f32 to vector<8x32xf32>
    %529 = arith.maximumf %527, %528 : vector<8x32xf32>
    %530 = arith.addf %523, %529 : vector<8x32xf32>
    %531 = vector.shape_cast %530 : vector<8x32xf32> to vector<2x4x32xf32>
    %c24 = arith.constant 24 : index
    %c0_242 = arith.constant 0 : index
    %c0_243 = arith.constant 0 : index
    %532 = vector.load %arg2[%c24, %c0_242, %c0_243] : memref<29x32x32xbf16, #tpu.memory_space<vmem>>, vector<1x32x32xbf16>
    %533 = vector.shape_cast %532 : vector<1x32x32xbf16> to vector<32x32xbf16>
    %c24_244 = arith.constant 24 : index
    %c0_245 = arith.constant 0 : index
    %c0_246 = arith.constant 0 : index
    %534 = vector.load %arg3[%c24_244, %c0_245, %c0_246] : memref<29x1x32xf32, #tpu.memory_space<vmem>>, vector<1x1x32xf32>
    %535 = vector.shape_cast %534 : vector<1x1x32xf32> to vector<1x32xf32>
    %c25 = arith.constant 25 : index
    %c0_247 = arith.constant 0 : index
    %c0_248 = arith.constant 0 : index
    %536 = vector.load %arg2[%c25, %c0_247, %c0_248] : memref<29x32x32xbf16, #tpu.memory_space<vmem>>, vector<1x32x32xbf16>
    %537 = vector.shape_cast %536 : vector<1x32x32xbf16> to vector<32x32xbf16>
    %c25_249 = arith.constant 25 : index
    %c0_250 = arith.constant 0 : index
    %c0_251 = arith.constant 0 : index
    %538 = vector.load %arg3[%c25_249, %c0_250, %c0_251] : memref<29x1x32xf32, #tpu.memory_space<vmem>>, vector<1x1x32xf32>
    %539 = vector.shape_cast %538 : vector<1x1x32xf32> to vector<1x32xf32>
    %c26 = arith.constant 26 : index
    %c0_252 = arith.constant 0 : index
    %c0_253 = arith.constant 0 : index
    %540 = vector.load %arg2[%c26, %c0_252, %c0_253] : memref<29x32x32xbf16, #tpu.memory_space<vmem>>, vector<1x32x32xbf16>
    %541 = vector.shape_cast %540 : vector<1x32x32xbf16> to vector<32x32xbf16>
    %c26_254 = arith.constant 26 : index
    %c0_255 = arith.constant 0 : index
    %c0_256 = arith.constant 0 : index
    %542 = vector.load %arg3[%c26_254, %c0_255, %c0_256] : memref<29x1x32xf32, #tpu.memory_space<vmem>>, vector<1x1x32xf32>
    %543 = vector.shape_cast %542 : vector<1x1x32xf32> to vector<1x32xf32>
    %c27 = arith.constant 27 : index
    %c0_257 = arith.constant 0 : index
    %c0_258 = arith.constant 0 : index
    %544 = vector.load %arg2[%c27, %c0_257, %c0_258] : memref<29x32x32xbf16, #tpu.memory_space<vmem>>, vector<1x32x32xbf16>
    %545 = vector.shape_cast %544 : vector<1x32x32xbf16> to vector<32x32xbf16>
    %c27_259 = arith.constant 27 : index
    %c0_260 = arith.constant 0 : index
    %c0_261 = arith.constant 0 : index
    %546 = vector.load %arg3[%c27_259, %c0_260, %c0_261] : memref<29x1x32xf32, #tpu.memory_space<vmem>>, vector<1x1x32xf32>
    %547 = vector.shape_cast %546 : vector<1x1x32xf32> to vector<1x32xf32>
    %548 = vector.shape_cast %531 : vector<2x4x32xf32> to vector<8x32xf32>
    %549 = arith.truncf %548 : vector<8x32xf32> to vector<8x32xbf16>
    %cst_262 = arith.constant dense<0.000000e+00> : vector<8x32xf32>
    %550 = tpu.matmul %549, %537, %cst_262 {dimension_numbers = #tpu.dot_dimension_numbers<[1], [0], [0], [1], [0, 0, 1, 1], [], []>} : vector<8x32xbf16>, vector<32x32xbf16>, vector<8x32xf32> -> vector<8x32xf32>
    %551 = vector.broadcast %539 : vector<1x32xf32> to vector<8x32xf32>
    %552 = arith.addf %550, %551 : vector<8x32xf32>
    %553 = arith.truncf %548 : vector<8x32xf32> to vector<8x32xbf16>
    %cst_263 = arith.constant dense<0.000000e+00> : vector<8x32xf32>
    %554 = tpu.matmul %553, %541, %cst_263 {dimension_numbers = #tpu.dot_dimension_numbers<[1], [0], [0], [1], [0, 0, 1, 1], [], []>} : vector<8x32xbf16>, vector<32x32xbf16>, vector<8x32xf32> -> vector<8x32xf32>
    %555 = vector.broadcast %543 : vector<1x32xf32> to vector<8x32xf32>
    %556 = arith.addf %554, %555 : vector<8x32xf32>
    %557 = vector.shape_cast %552 : vector<8x32xf32> to vector<2x4x32xf32>
    %558 = vector.shape_cast %556 : vector<8x32xf32> to vector<2x4x32xf32>
    %559 = vector.shape_cast %531 : vector<2x4x32xf32> to vector<8x32xf32>
    %560 = arith.truncf %559 : vector<8x32xf32> to vector<8x32xbf16>
    %cst_264 = arith.constant dense<0.000000e+00> : vector<8x32xf32>
    %561 = tpu.matmul %560, %533, %cst_264 {dimension_numbers = #tpu.dot_dimension_numbers<[1], [0], [0], [1], [0, 0, 1, 1], [], []>} : vector<8x32xbf16>, vector<32x32xbf16>, vector<8x32xf32> -> vector<8x32xf32>
    %562 = vector.broadcast %535 : vector<1x32xf32> to vector<8x32xf32>
    %563 = arith.addf %561, %562 : vector<8x32xf32>
    %564 = vector.shape_cast %563 : vector<8x32xf32> to vector<2x4x32xf32>
    %cst_265 = arith.constant 0.176776692 : f32
    %565 = vector.broadcast %cst_265 : f32 to vector<2x4x32xf32>
    %566 = arith.mulf %564, %565 : vector<2x4x32xf32>
    %567 = vector.extract_strided_slice %566 {offsets = [0, 0, 0], sizes = [2, 4, 16], strides = [1, 1, 1]} : vector<2x4x32xf32> to vector<2x4x16xf32>
    %568 = arith.truncf %567 : vector<2x4x16xf32> to vector<2x4x16xbf16>
    %569 = vector.extract_strided_slice %557 {offsets = [0, 0, 0], sizes = [2, 4, 16], strides = [1, 1, 1]} : vector<2x4x32xf32> to vector<2x4x16xf32>
    %570 = arith.truncf %569 : vector<2x4x16xf32> to vector<2x4x16xbf16>
    %571 = vector.extract_strided_slice %558 {offsets = [0, 0, 0], sizes = [2, 4, 16], strides = [1, 1, 1]} : vector<2x4x32xf32> to vector<2x4x16xf32>
    %572 = arith.truncf %571 : vector<2x4x16xf32> to vector<2x4x16xbf16>
    "tpu.trace_start"() <{level = 10 : i32, message = "bqd,bkd->bqk"}> : () -> ()
    %cst_266 = arith.constant dense<0.000000e+00> : vector<2x4x4xf32>
    %573 = tpu.matmul %568, %570, %cst_266 {dimension_numbers = #tpu.dot_dimension_numbers<[2], [2], [1], [1], [0, 0, 0, 1, 1, 1], [0], [0]>} : vector<2x4x16xbf16>, vector<2x4x16xbf16>, vector<2x4x4xf32> -> vector<2x4x4xf32>
    "tpu.trace_stop"() : () -> ()
    %cst_267 = arith.constant dense<0xFF800000> : vector<2x4xf32>
    %574 = vector.multi_reduction <maximumf>, %573, %cst_267 [2] : vector<2x4x4xf32> to vector<2x4xf32>
    %575 = vector.shape_cast %574 : vector<2x4xf32> to vector<2x4x1xf32>
    %576 = vector.broadcast %575 : vector<2x4x1xf32> to vector<2x4x4xf32>
    %577 = arith.subf %573, %576 : vector<2x4x4xf32>
    %578 = math.exp %577 : vector<2x4x4xf32>
    %cst_268 = arith.constant dense<0.000000e+00> : vector<2x4xf32>
    %579 = vector.multi_reduction <add>, %578, %cst_268 [2] : vector<2x4x4xf32> to vector<2x4xf32>
    %580 = vector.shape_cast %579 : vector<2x4xf32> to vector<2x4x1xf32>
    %581 = tpu.reciprocal %580 : vector<2x4x1xf32> -> vector<2x4x1xf32>
    %582 = vector.broadcast %581 : vector<2x4x1xf32> to vector<2x4x4xf32>
    %583 = arith.mulf %578, %582 : vector<2x4x4xf32>
    %584 = arith.truncf %583 : vector<2x4x4xf32> to vector<2x4x4xbf16>
    "tpu.trace_start"() <{level = 10 : i32, message = "bqk,bkd->bqd"}> : () -> ()
    %cst_269 = arith.constant dense<0.000000e+00> : vector<2x4x16xf32>
    %585 = tpu.matmul %584, %572, %cst_269 {dimension_numbers = #tpu.dot_dimension_numbers<[2], [1], [1], [2], [0, 0, 0, 1, 1, 2], [0], [0]>} : vector<2x4x4xbf16>, vector<2x4x16xbf16>, vector<2x4x16xf32> -> vector<2x4x16xf32>
    "tpu.trace_stop"() : () -> ()
    %586 = vector.extract_strided_slice %566 {offsets = [0, 0, 16], sizes = [2, 4, 16], strides = [1, 1, 1]} : vector<2x4x32xf32> to vector<2x4x16xf32>
    %587 = arith.truncf %586 : vector<2x4x16xf32> to vector<2x4x16xbf16>
    %588 = vector.extract_strided_slice %557 {offsets = [0, 0, 16], sizes = [2, 4, 16], strides = [1, 1, 1]} : vector<2x4x32xf32> to vector<2x4x16xf32>
    %589 = arith.truncf %588 : vector<2x4x16xf32> to vector<2x4x16xbf16>
    %590 = vector.extract_strided_slice %558 {offsets = [0, 0, 16], sizes = [2, 4, 16], strides = [1, 1, 1]} : vector<2x4x32xf32> to vector<2x4x16xf32>
    %591 = arith.truncf %590 : vector<2x4x16xf32> to vector<2x4x16xbf16>
    "tpu.trace_start"() <{level = 10 : i32, message = "bqd,bkd->bqk"}> : () -> ()
    %cst_270 = arith.constant dense<0.000000e+00> : vector<2x4x4xf32>
    %592 = tpu.matmul %587, %589, %cst_270 {dimension_numbers = #tpu.dot_dimension_numbers<[2], [2], [1], [1], [0, 0, 0, 1, 1, 1], [0], [0]>} : vector<2x4x16xbf16>, vector<2x4x16xbf16>, vector<2x4x4xf32> -> vector<2x4x4xf32>
    "tpu.trace_stop"() : () -> ()
    %cst_271 = arith.constant dense<0xFF800000> : vector<2x4xf32>
    %593 = vector.multi_reduction <maximumf>, %592, %cst_271 [2] : vector<2x4x4xf32> to vector<2x4xf32>
    %594 = vector.shape_cast %593 : vector<2x4xf32> to vector<2x4x1xf32>
    %595 = vector.broadcast %594 : vector<2x4x1xf32> to vector<2x4x4xf32>
    %596 = arith.subf %592, %595 : vector<2x4x4xf32>
    %597 = math.exp %596 : vector<2x4x4xf32>
    %cst_272 = arith.constant dense<0.000000e+00> : vector<2x4xf32>
    %598 = vector.multi_reduction <add>, %597, %cst_272 [2] : vector<2x4x4xf32> to vector<2x4xf32>
    %599 = vector.shape_cast %598 : vector<2x4xf32> to vector<2x4x1xf32>
    %600 = tpu.reciprocal %599 : vector<2x4x1xf32> -> vector<2x4x1xf32>
    %601 = vector.broadcast %600 : vector<2x4x1xf32> to vector<2x4x4xf32>
    %602 = arith.mulf %597, %601 : vector<2x4x4xf32>
    %603 = arith.truncf %602 : vector<2x4x4xf32> to vector<2x4x4xbf16>
    "tpu.trace_start"() <{level = 10 : i32, message = "bqk,bkd->bqd"}> : () -> ()
    %cst_273 = arith.constant dense<0.000000e+00> : vector<2x4x16xf32>
    %604 = tpu.matmul %603, %591, %cst_273 {dimension_numbers = #tpu.dot_dimension_numbers<[2], [1], [1], [2], [0, 0, 0, 1, 1, 2], [0], [0]>} : vector<2x4x4xbf16>, vector<2x4x16xbf16>, vector<2x4x16xf32> -> vector<2x4x16xf32>
    "tpu.trace_stop"() : () -> ()
    %605 = tpu.concatenate %585, %604 in 2 : vector<2x4x16xf32>, vector<2x4x16xf32> -> vector<2x4x32xf32>
    %606 = arith.addf %564, %605 : vector<2x4x32xf32>
    %607 = vector.shape_cast %606 : vector<2x4x32xf32> to vector<8x32xf32>
    %608 = arith.truncf %607 : vector<8x32xf32> to vector<8x32xbf16>
    %cst_274 = arith.constant dense<0.000000e+00> : vector<8x32xf32>
    %609 = tpu.matmul %608, %545, %cst_274 {dimension_numbers = #tpu.dot_dimension_numbers<[1], [0], [0], [1], [0, 0, 1, 1], [], []>} : vector<8x32xbf16>, vector<32x32xbf16>, vector<8x32xf32> -> vector<8x32xf32>
    %610 = vector.broadcast %547 : vector<1x32xf32> to vector<8x32xf32>
    %611 = arith.addf %609, %610 : vector<8x32xf32>
    %cst_275 = arith.constant 0.000000e+00 : f32
    %612 = vector.broadcast %cst_275 : f32 to vector<8x32xf32>
    %613 = arith.maximumf %611, %612 : vector<8x32xf32>
    %614 = arith.addf %607, %613 : vector<8x32xf32>
    %615 = vector.shape_cast %614 : vector<8x32xf32> to vector<2x4x32xf32>
    %c28 = arith.constant 28 : index
    %c0_276 = arith.constant 0 : index
    %c0_277 = arith.constant 0 : index
    %616 = vector.load %arg2[%c28, %c0_276, %c0_277] : memref<29x32x32xbf16, #tpu.memory_space<vmem>>, vector<1x32x4xbf16>
    %617 = vector.shape_cast %616 : vector<1x32x4xbf16> to vector<32x4xbf16>
    %c28_278 = arith.constant 28 : index
    %c0_279 = arith.constant 0 : index
    %c0_280 = arith.constant 0 : index
    %618 = vector.load %arg3[%c28_278, %c0_279, %c0_280] : memref<29x1x32xf32, #tpu.memory_space<vmem>>, vector<1x1x4xf32>
    %619 = vector.shape_cast %618 : vector<1x1x4xf32> to vector<1x4xf32>
    %620 = vector.shape_cast %615 : vector<2x4x32xf32> to vector<8x32xf32>
    %621 = arith.truncf %620 : vector<8x32xf32> to vector<8x32xbf16>
    %cst_281 = arith.constant dense<0.000000e+00> : vector<8x4xf32>
    %622 = tpu.matmul %621, %617, %cst_281 {dimension_numbers = #tpu.dot_dimension_numbers<[1], [0], [0], [1], [0, 0, 1, 1], [], []>} : vector<8x32xbf16>, vector<32x4xbf16>, vector<8x4xf32> -> vector<8x4xf32>
    %623 = vector.broadcast %619 : vector<1x4xf32> to vector<8x4xf32>
    %624 = arith.addf %622, %623 : vector<8x4xf32>
    %625 = vector.shape_cast %624 : vector<8x4xf32> to vector<2x4x4xf32>
    %c0_282 = arith.constant 0 : index
    %c0_283 = arith.constant 0 : index
    %c0_284 = arith.constant 0 : index
    %626 = vector.load %arg5[%c0_282, %c0_283, %c0_284] : memref<2x4x4xf32, #tpu.memory_space<vmem>>, vector<2x4x4xf32>
    tpu.vector_store %arg5[%c0_282, %c0_283, %c0_284], %625 {strides = array<i32>} : memref<2x4x4xf32, #tpu.memory_space<vmem>>, vector<2x4x4xf32>,
    return
  }
  func.func @transform_0(%arg0: i32) -> (i32, i32, i32) {
    %c0_i32 = arith.constant 0 : i32
    %c0_i32_0 = arith.constant 0 : i32
    %c0_i32_1 = arith.constant 0 : i32
    return %arg0, %c0_i32, %c0_i32_0 : i32, i32, i32
  }
  func.func @transform_1(%arg0: i32) -> (i32, i32, i32) {
    %c0_i32 = arith.constant 0 : i32
    %c0_i32_0 = arith.constant 0 : i32
    %c0_i32_1 = arith.constant 0 : i32
    %c0_i32_2 = arith.constant 0 : i32
    return %c0_i32, %c0_i32_0, %c0_i32_1 : i32, i32, i32
  }
  func.func @transform_2(%arg0: i32) -> (i32, i32, i32) {
    %c0_i32 = arith.constant 0 : i32
    %c0_i32_0 = arith.constant 0 : i32
    %c0_i32_1 = arith.constant 0 : i32
    %c0_i32_2 = arith.constant 0 : i32
    return %c0_i32, %c0_i32_0, %c0_i32_1 : i32, i32, i32
  }
  func.func @transform_3(%arg0: i32) -> (i32, i32, i32) {
    %c0_i32 = arith.constant 0 : i32
    %c0_i32_0 = arith.constant 0 : i32
    %c0_i32_1 = arith.constant 0 : i32
    %c0_i32_2 = arith.constant 0 : i32
    return %c0_i32, %c0_i32_0, %c0_i32_1 : i32, i32, i32
  }
  func.func @transform_4(%arg0: i32) -> (i32, i32, i32) {
    %c0_i32 = arith.constant 0 : i32
    %c0_i32_0 = arith.constant 0 : i32
    %c0_i32_1 = arith.constant 0 : i32
    return %arg0, %c0_i32, %c0_i32_0 : i32, i32, i32
  }
}

module attributes {stable_mosaic.version = 11 : i64} {
  func.func @set_transformer_kernel(%arg0: i32, %arg1: memref<2x8x4xf32, #tpu.memory_space<vmem>>, %arg2: memref<29x32x32xbf16, #tpu.memory_space<vmem>>, %arg3: memref<29x1x32xf32, #tpu.memory_space<vmem>>, %arg4: memref<3x8x32xf32, #tpu.memory_space<vmem>>, %arg5: memref<2x4x4xf32, #tpu.memory_space<vmem>>, %arg6: memref<2x8x32xf32, #tpu.memory_space<vmem>>, %arg7: memref<2x8x32xf32, #tpu.memory_space<vmem>>) attributes {dimension_semantics = [#tpu.dimension_semantics<parallel>], iteration_bounds = array<i64: 1>, scalar_prefetch = 0 : i64, scratch_operands = 2 : i64, tpu.core_type = #tpu.core_type<tc>, window_params = [{transform_indices = @transform_0, window_bounds = array<i64: 2, 8, 4>}, {pipeline_mode = #tpu.pipeline_mode<synchronous>, transform_indices = @transform_1, window_bounds = array<i64: 29, 32, 32>}, {pipeline_mode = #tpu.pipeline_mode<synchronous>, transform_indices = @transform_2, window_bounds = array<i64: 29, 1, 32>}, {pipeline_mode = #tpu.pipeline_mode<synchronous>, transform_indices = @transform_3, window_bounds = array<i64: 3, 8, 32>}, {transform_indices = @transform_4, window_bounds = array<i64: 2, 4, 4>}]} {
    %c0 = arith.constant 0 : index
    %c0_0 = arith.constant 0 : index
    %c0_1 = arith.constant 0 : index
    %0 = vector.load %arg1[%c0, %c0_0, %c0_1] : memref<2x8x4xf32, #tpu.memory_space<vmem>>, vector<2x8x4xf32>
    %c0_2 = arith.constant 0 : index
    %c0_3 = arith.constant 0 : index
    %c0_4 = arith.constant 0 : index
    %1 = vector.load %arg4[%c0_2, %c0_3, %c0_4] : memref<3x8x32xf32, #tpu.memory_space<vmem>>, vector<1x8x32xf32>
    %2 = vector.shape_cast %1 : vector<1x8x32xf32> to vector<8x32xf32>
    %c1 = arith.constant 1 : index
    %c0_5 = arith.constant 0 : index
    %c0_6 = arith.constant 0 : index
    %3 = vector.load %arg4[%c1, %c0_5, %c0_6] : memref<3x8x32xf32, #tpu.memory_space<vmem>>, vector<1x8x32xf32>
    %4 = vector.shape_cast %3 : vector<1x8x32xf32> to vector<8x32xf32>
    %c2 = arith.constant 2 : index
    %c0_7 = arith.constant 0 : index
    %c0_8 = arith.constant 0 : index
    %5 = vector.load %arg4[%c2, %c0_7, %c0_8] : memref<3x8x32xf32, #tpu.memory_space<vmem>>, vector<1x4x32xf32>
    %6 = vector.shape_cast %5 : vector<1x4x32xf32> to vector<4x32xf32>
    %c0_9 = arith.constant 0 : index
    %c0_10 = arith.constant 0 : index
    %c0_11 = arith.constant 0 : index
    %7 = vector.load %arg2[%c0_9, %c0_10, %c0_11] : memref<29x32x32xbf16, #tpu.memory_space<vmem>>, vector<1x32x32xbf16>
    %8 = vector.shape_cast %7 : vector<1x32x32xbf16> to vector<32x32xbf16>
    %c0_12 = arith.constant 0 : index
    %c0_13 = arith.constant 0 : index
    %c0_14 = arith.constant 0 : index
    %9 = vector.load %arg3[%c0_12, %c0_13, %c0_14] : memref<29x1x32xf32, #tpu.memory_space<vmem>>, vector<1x1x32xf32>
    %10 = vector.shape_cast %9 : vector<1x1x32xf32> to vector<1x32xf32>
    %c1_15 = arith.constant 1 : index
    %c0_16 = arith.constant 0 : index
    %c0_17 = arith.constant 0 : index
    %11 = vector.load %arg2[%c1_15, %c0_16, %c0_17] : memref<29x32x32xbf16, #tpu.memory_space<vmem>>, vector<1x4x32xbf16>
    %12 = vector.shape_cast %11 : vector<1x4x32xbf16> to vector<4x32xbf16>
    %c1_18 = arith.constant 1 : index
    %c0_19 = arith.constant 0 : index
    %c0_20 = arith.constant 0 : index
    %13 = vector.load %arg3[%c1_18, %c0_19, %c0_20] : memref<29x1x32xf32, #tpu.memory_space<vmem>>, vector<1x1x32xf32>
    %14 = vector.shape_cast %13 : vector<1x1x32xf32> to vector<1x32xf32>
    %c2_21 = arith.constant 2 : index
    %c0_22 = arith.constant 0 : index
    %c0_23 = arith.constant 0 : index
    %15 = vector.load %arg2[%c2_21, %c0_22, %c0_23] : memref<29x32x32xbf16, #tpu.memory_space<vmem>>, vector<1x4x32xbf16>
    %16 = vector.shape_cast %15 : vector<1x4x32xbf16> to vector<4x32xbf16>
    %c2_24 = arith.constant 2 : index
    %c0_25 = arith.constant 0 : index
    %c0_26 = arith.constant 0 : index
    %17 = vector.load %arg3[%c2_24, %c0_25, %c0_26] : memref<29x1x32xf32, #tpu.memory_space<vmem>>, vector<1x1x32xf32>
    %18 = vector.shape_cast %17 : vector<1x1x32xf32> to vector<1x32xf32>
    %c3 = arith.constant 3 : index
    %c0_27 = arith.constant 0 : index
    %c0_28 = arith.constant 0 : index
    %19 = vector.load %arg2[%c3, %c0_27, %c0_28] : memref<29x32x32xbf16, #tpu.memory_space<vmem>>, vector<1x32x32xbf16>
    %20 = vector.shape_cast %19 : vector<1x32x32xbf16> to vector<32x32xbf16>
    %c3_29 = arith.constant 3 : index
    %c0_30 = arith.constant 0 : index
    %c0_31 = arith.constant 0 : index
    %21 = vector.load %arg3[%c3_29, %c0_30, %c0_31] : memref<29x1x32xf32, #tpu.memory_space<vmem>>, vector<1x1x32xf32>
    %22 = vector.shape_cast %21 : vector<1x1x32xf32> to vector<1x32xf32>
    %23 = vector.shape_cast %0 : vector<2x8x4xf32> to vector<16x4xf32>
    %24 = arith.truncf %23 : vector<16x4xf32> to vector<16x4xbf16>
    %cst = arith.constant dense<0.000000e+00> : vector<16x32xf32>
    %25 = tpu.matmul %24, %12, %cst {dimension_numbers = #tpu.dot_dimension_numbers<[1], [0], [0], [1], [0, 0, 1, 1], [], []>} : vector<16x4xbf16>, vector<4x32xbf16>, vector<16x32xf32> -> vector<16x32xf32>
    %26 = vector.broadcast %14 : vector<1x32xf32> to vector<16x32xf32>
    %27 = arith.addf %25, %26 : vector<16x32xf32>
    %28 = arith.truncf %23 : vector<16x4xf32> to vector<16x4xbf16>
    %cst_32 = arith.constant dense<0.000000e+00> : vector<16x32xf32>
    %29 = tpu.matmul %28, %16, %cst_32 {dimension_numbers = #tpu.dot_dimension_numbers<[1], [0], [0], [1], [0, 0, 1, 1], [], []>} : vector<16x4xbf16>, vector<4x32xbf16>, vector<16x32xf32> -> vector<16x32xf32>
    %30 = vector.broadcast %18 : vector<1x32xf32> to vector<16x32xf32>
    %31 = arith.addf %29, %30 : vector<16x32xf32>
    %32 = vector.shape_cast %27 : vector<16x32xf32> to vector<2x8x32xf32>
    %33 = vector.shape_cast %31 : vector<16x32xf32> to vector<2x8x32xf32>
    %34 = arith.truncf %2 : vector<8x32xf32> to vector<8x32xbf16>
    %cst_33 = arith.constant dense<0.000000e+00> : vector<8x32xf32>
    %35 = tpu.matmul %34, %8, %cst_33 {dimension_numbers = #tpu.dot_dimension_numbers<[1], [0], [0], [1], [0, 0, 1, 1], [], []>} : vector<8x32xbf16>, vector<32x32xbf16>, vector<8x32xf32> -> vector<8x32xf32>
    %36 = vector.broadcast %10 : vector<1x32xf32> to vector<8x32xf32>
    %37 = arith.addf %35, %36 : vector<8x32xf32>
    %38 = vector.shape_cast %37 : vector<8x32xf32> to vector<1x8x32xf32>
    %39 = vector.shape_cast %38 : vector<1x8x32xf32> to vector<1x8x32xf32>
    %40 = vector.broadcast %39 : vector<1x8x32xf32> to vector<2x8x32xf32>
    %cst_34 = arith.constant 0.176776692 : f32
    %41 = vector.broadcast %cst_34 : f32 to vector<8x32xf32>
    %42 = arith.mulf %37, %41 : vector<8x32xf32>
    %43 = vector.shape_cast %42 : vector<8x32xf32> to vector<1x8x32xf32>
    %44 = vector.shape_cast %43 : vector<1x8x32xf32> to vector<1x8x32xf32>
    %45 = vector.broadcast %44 : vector<1x8x32xf32> to vector<2x8x32xf32>
    %46 = vector.extract_strided_slice %45 {offsets = [0, 0, 0], sizes = [2, 8, 16], strides = [1, 1, 1]} : vector<2x8x32xf32> to vector<2x8x16xf32>
    %47 = arith.truncf %46 : vector<2x8x16xf32> to vector<2x8x16xbf16>
    %48 = vector.extract_strided_slice %32 {offsets = [0, 0, 0], sizes = [2, 8, 16], strides = [1, 1, 1]} : vector<2x8x32xf32> to vector<2x8x16xf32>
    %49 = arith.truncf %48 : vector<2x8x16xf32> to vector<2x8x16xbf16>
    %50 = vector.extract_strided_slice %33 {offsets = [0, 0, 0], sizes = [2, 8, 16], strides = [1, 1, 1]} : vector<2x8x32xf32> to vector<2x8x16xf32>
    %51 = arith.truncf %50 : vector<2x8x16xf32> to vector<2x8x16xbf16>
    "tpu.trace_start"() <{level = 10 : i32, message = "bqd,bkd->bqk"}> : () -> ()
    %cst_35 = arith.constant dense<0.000000e+00> : vector<2x8x8xf32>
    %52 = tpu.matmul %47, %49, %cst_35 {dimension_numbers = #tpu.dot_dimension_numbers<[2], [2], [1], [1], [0, 0, 0, 1, 1, 1], [0], [0]>} : vector<2x8x16xbf16>, vector<2x8x16xbf16>, vector<2x8x8xf32> -> vector<2x8x8xf32>
    "tpu.trace_stop"() : () -> ()
    %cst_36 = arith.constant dense<0xFF800000> : vector<2x8xf32>
    %53 = vector.multi_reduction <maximumf>, %52, %cst_36 [2] : vector<2x8x8xf32> to vector<2x8xf32>
    %54 = vector.shape_cast %53 : vector<2x8xf32> to vector<2x8x1xf32>
    %55 = vector.broadcast %54 : vector<2x8x1xf32> to vector<2x8x8xf32>
    %56 = arith.subf %52, %55 : vector<2x8x8xf32>
    %57 = math.exp %56 : vector<2x8x8xf32>
    %cst_37 = arith.constant dense<0.000000e+00> : vector<2x8xf32>
    %58 = vector.multi_reduction <add>, %57, %cst_37 [2] : vector<2x8x8xf32> to vector<2x8xf32>
    %59 = vector.shape_cast %58 : vector<2x8xf32> to vector<2x8x1xf32>
    %60 = tpu.reciprocal %59 : vector<2x8x1xf32> -> vector<2x8x1xf32>
    %61 = vector.broadcast %60 : vector<2x8x1xf32> to vector<2x8x8xf32>
    %62 = arith.mulf %57, %61 : vector<2x8x8xf32>
    %63 = arith.truncf %62 : vector<2x8x8xf32> to vector<2x8x8xbf16>
    "tpu.trace_start"() <{level = 10 : i32, message = "bqk,bkd->bqd"}> : () -> ()
    %cst_38 = arith.constant dense<0.000000e+00> : vector<2x8x16xf32>
    %64 = tpu.matmul %63, %51, %cst_38 {dimension_numbers = #tpu.dot_dimension_numbers<[2], [1], [1], [2], [0, 0, 0, 1, 1, 2], [0], [0]>} : vector<2x8x8xbf16>, vector<2x8x16xbf16>, vector<2x8x16xf32> -> vector<2x8x16xf32>
    "tpu.trace_stop"() : () -> ()
    %65 = vector.extract_strided_slice %45 {offsets = [0, 0, 16], sizes = [2, 8, 16], strides = [1, 1, 1]} : vector<2x8x32xf32> to vector<2x8x16xf32>
    %66 = arith.truncf %65 : vector<2x8x16xf32> to vector<2x8x16xbf16>
    %67 = vector.extract_strided_slice %32 {offsets = [0, 0, 16], sizes = [2, 8, 16], strides = [1, 1, 1]} : vector<2x8x32xf32> to vector<2x8x16xf32>
    %68 = arith.truncf %67 : vector<2x8x16xf32> to vector<2x8x16xbf16>
    %69 = vector.extract_strided_slice %33 {offsets = [0, 0, 16], sizes = [2, 8, 16], strides = [1, 1, 1]} : vector<2x8x32xf32> to vector<2x8x16xf32>
    %70 = arith.truncf %69 : vector<2x8x16xf32> to vector<2x8x16xbf16>
    "tpu.trace_start"() <{level = 10 : i32, message = "bqd,bkd->bqk"}> : () -> ()
    %cst_39 = arith.constant dense<0.000000e+00> : vector<2x8x8xf32>
    %71 = tpu.matmul %66, %68, %cst_39 {dimension_numbers = #tpu.dot_dimension_numbers<[2], [2], [1], [1], [0, 0, 0, 1, 1, 1], [0], [0]>} : vector<2x8x16xbf16>, vector<2x8x16xbf16>, vector<2x8x8xf32> -> vector<2x8x8xf32>
    "tpu.trace_stop"() : () -> ()
    %cst_40 = arith.constant dense<0xFF800000> : vector<2x8xf32>
    %72 = vector.multi_reduction <maximumf>, %71, %cst_40 [2] : vector<2x8x8xf32> to vector<2x8xf32>
    %73 = vector.shape_cast %72 : vector<2x8xf32> to vector<2x8x1xf32>
    %74 = vector.broadcast %73 : vector<2x8x1xf32> to vector<2x8x8xf32>
    %75 = arith.subf %71, %74 : vector<2x8x8xf32>
    %76 = math.exp %75 : vector<2x8x8xf32>
    %cst_41 = arith.constant dense<0.000000e+00> : vector<2x8xf32>
    %77 = vector.multi_reduction <add>, %76, %cst_41 [2] : vector<2x8x8xf32> to vector<2x8xf32>
    %78 = vector.shape_cast %77 : vector<2x8xf32> to vector<2x8x1xf32>
    %79 = tpu.reciprocal %78 : vector<2x8x1xf32> -> vector<2x8x1xf32>
    %80 = vector.broadcast %79 : vector<2x8x1xf32> to vector<2x8x8xf32>
    %81 = arith.mulf %76, %80 : vector<2x8x8xf32>
    %82 = arith.truncf %81 : vector<2x8x8xf32> to vector<2x8x8xbf16>
    "tpu.trace_start"() <{level = 10 : i32, message = "bqk,bkd->bqd"}> : () -> ()
    %cst_42 = arith.constant dense<0.000000e+00> : vector<2x8x16xf32>
    %83 = tpu.matmul %82, %70, %cst_42 {dimension_numbers = #tpu.dot_dimension_numbers<[2], [1], [1], [2], [0, 0, 0, 1, 1, 2], [0], [0]>} : vector<2x8x8xbf16>, vector<2x8x16xbf16>, vector<2x8x16xf32> -> vector<2x8x16xf32>
    "tpu.trace_stop"() : () -> ()
    %84 = tpu.concatenate %64, %83 in 2 : vector<2x8x16xf32>, vector<2x8x16xf32> -> vector<2x8x32xf32>
    %85 = arith.addf %40, %84 : vector<2x8x32xf32>
    %86 = vector.shape_cast %85 : vector<2x8x32xf32> to vector<16x32xf32>
    %87 = arith.truncf %86 : vector<16x32xf32> to vector<16x32xbf16>
    %cst_43 = arith.constant dense<0.000000e+00> : vector<16x32xf32>
    %88 = tpu.matmul %87, %20, %cst_43 {dimension_numbers = #tpu.dot_dimension_numbers<[1], [0], [0], [1], [0, 0, 1, 1], [], []>} : vector<16x32xbf16>, vector<32x32xbf16>, vector<16x32xf32> -> vector<16x32xf32>
    %89 = vector.broadcast %22 : vector<1x32xf32> to vector<16x32xf32>
    %90 = arith.addf %88, %89 : vector<16x32xf32>
    %cst_44 = arith.constant 0.000000e+00 : f32
    %91 = vector.broadcast %cst_44 : f32 to vector<16x32xf32>
    %92 = arith.maximumf %90, %91 : vector<16x32xf32>
    %93 = arith.addf %86, %92 : vector<16x32xf32>
    %94 = vector.shape_cast %93 : vector<16x32xf32> to vector<2x8x32xf32>
    %c0_45 = arith.constant 0 : index
    %c0_46 = arith.constant 0 : index
    %c0_47 = arith.constant 0 : index
    %95 = vector.load %arg7[%c0_45, %c0_46, %c0_47] : memref<2x8x32xf32, #tpu.memory_space<vmem>>, vector<2x8x32xf32>
    tpu.vector_store %arg7[%c0_45, %c0_46, %c0_47], %94 {strides = array<i32>} : memref<2x8x32xf32, #tpu.memory_space<vmem>>, vector<2x8x32xf32>,
    %c0_48 = arith.constant 0 : index
    %c0_49 = arith.constant 0 : index
    %c0_50 = arith.constant 0 : index
    %96 = vector.load %arg7[%c0_48, %c0_49, %c0_50] : memref<2x8x32xf32, #tpu.memory_space<vmem>>, vector<2x8x32xf32>
    %c4 = arith.constant 4 : index
    %c0_51 = arith.constant 0 : index
    %c0_52 = arith.constant 0 : index
    %97 = vector.load %arg2[%c4, %c0_51, %c0_52] : memref<29x32x32xbf16, #tpu.memory_space<vmem>>, vector<1x4x32xbf16>
    %98 = vector.shape_cast %97 : vector<1x4x32xbf16> to vector<4x32xbf16>
    %c4_53 = arith.constant 4 : index
    %c0_54 = arith.constant 0 : index
    %c0_55 = arith.constant 0 : index
    %99 = vector.load %arg3[%c4_53, %c0_54, %c0_55] : memref<29x1x32xf32, #tpu.memory_space<vmem>>, vector<1x1x32xf32>
    %100 = vector.shape_cast %99 : vector<1x1x32xf32> to vector<1x32xf32>
    %c5 = arith.constant 5 : index
    %c0_56 = arith.constant 0 : index
    %c0_57 = arith.constant 0 : index
    %101 = vector.load %arg2[%c5, %c0_56, %c0_57] : memref<29x32x32xbf16, #tpu.memory_space<vmem>>, vector<1x32x32xbf16>
    %102 = vector.shape_cast %101 : vector<1x32x32xbf16> to vector<32x32xbf16>
    %c5_58 = arith.constant 5 : index
    %c0_59 = arith.constant 0 : index
    %c0_60 = arith.constant 0 : index
    %103 = vector.load %arg3[%c5_58, %c0_59, %c0_60] : memref<29x1x32xf32, #tpu.memory_space<vmem>>, vector<1x1x32xf32>
    %104 = vector.shape_cast %103 : vector<1x1x32xf32> to vector<1x32xf32>
    %c6 = arith.constant 6 : index
    %c0_61 = arith.constant 0 : index
    %c0_62 = arith.constant 0 : index
    %105 = vector.load %arg2[%c6, %c0_61, %c0_62] : memref<29x32x32xbf16, #tpu.memory_space<vmem>>, vector<1x32x32xbf16>
    %106 = vector.shape_cast %105 : vector<1x32x32xbf16> to vector<32x32xbf16>
    %c6_63 = arith.constant 6 : index
    %c0_64 = arith.constant 0 : index
    %c0_65 = arith.constant 0 : index
    %107 = vector.load %arg3[%c6_63, %c0_64, %c0_65] : memref<29x1x32xf32, #tpu.memory_space<vmem>>, vector<1x1x32xf32>
    %108 = vector.shape_cast %107 : vector<1x1x32xf32> to vector<1x32xf32>
    %c7 = arith.constant 7 : index
    %c0_66 = arith.constant 0 : index
    %c0_67 = arith.constant 0 : index
    %109 = vector.load %arg2[%c7, %c0_66, %c0_67] : memref<29x32x32xbf16, #tpu.memory_space<vmem>>, vector<1x32x32xbf16>
    %110 = vector.shape_cast %109 : vector<1x32x32xbf16> to vector<32x32xbf16>
    %c7_68 = arith.constant 7 : index
    %c0_69 = arith.constant 0 : index
    %c0_70 = arith.constant 0 : index
    %111 = vector.load %arg3[%c7_68, %c0_69, %c0_70] : memref<29x1x32xf32, #tpu.memory_space<vmem>>, vector<1x1x32xf32>
    %112 = vector.shape_cast %111 : vector<1x1x32xf32> to vector<1x32xf32>
    %113 = vector.shape_cast %96 : vector<2x8x32xf32> to vector<16x32xf32>
    %114 = arith.truncf %113 : vector<16x32xf32> to vector<16x32xbf16>
    %cst_71 = arith.constant dense<0.000000e+00> : vector<16x32xf32>
    %115 = tpu.matmul %114, %102, %cst_71 {dimension_numbers = #tpu.dot_dimension_numbers<[1], [0], [0], [1], [0, 0, 1, 1], [], []>} : vector<16x32xbf16>, vector<32x32xbf16>, vector<16x32xf32> -> vector<16x32xf32>
    %116 = vector.broadcast %104 : vector<1x32xf32> to vector<16x32xf32>
    %117 = arith.addf %115, %116 : vector<16x32xf32>
    %118 = arith.truncf %113 : vector<16x32xf32> to vector<16x32xbf16>
    %cst_72 = arith.constant dense<0.000000e+00> : vector<16x32xf32>
    %119 = tpu.matmul %118, %106, %cst_72 {dimension_numbers = #tpu.dot_dimension_numbers<[1], [0], [0], [1], [0, 0, 1, 1], [], []>} : vector<16x32xbf16>, vector<32x32xbf16>, vector<16x32xf32> -> vector<16x32xf32>
    %120 = vector.broadcast %108 : vector<1x32xf32> to vector<16x32xf32>
    %121 = arith.addf %119, %120 : vector<16x32xf32>
    %122 = vector.shape_cast %117 : vector<16x32xf32> to vector<2x8x32xf32>
    %123 = vector.shape_cast %121 : vector<16x32xf32> to vector<2x8x32xf32>
    %124 = vector.shape_cast %0 : vector<2x8x4xf32> to vector<16x4xf32>
    %125 = arith.truncf %124 : vector<16x4xf32> to vector<16x4xbf16>
    %cst_73 = arith.constant dense<0.000000e+00> : vector<16x32xf32>
    %126 = tpu.matmul %125, %98, %cst_73 {dimension_numbers = #tpu.dot_dimension_numbers<[1], [0], [0], [1], [0, 0, 1, 1], [], []>} : vector<16x4xbf16>, vector<4x32xbf16>, vector<16x32xf32> -> vector<16x32xf32>
    %127 = vector.broadcast %100 : vector<1x32xf32> to vector<16x32xf32>
    %128 = arith.addf %126, %127 : vector<16x32xf32>
    %129 = vector.shape_cast %128 : vector<16x32xf32> to vector<2x8x32xf32>
    %cst_74 = arith.constant 0.176776692 : f32
    %130 = vector.broadcast %cst_74 : f32 to vector<2x8x32xf32>
    %131 = arith.mulf %129, %130 : vector<2x8x32xf32>
    %132 = vector.extract_strided_slice %131 {offsets = [0, 0, 0], sizes = [2, 8, 16], strides = [1, 1, 1]} : vector<2x8x32xf32> to vector<2x8x16xf32>
    %133 = arith.truncf %132 : vector<2x8x16xf32> to vector<2x8x16xbf16>
    %134 = vector.extract_strided_slice %122 {offsets = [0, 0, 0], sizes = [2, 8, 16], strides = [1, 1, 1]} : vector<2x8x32xf32> to vector<2x8x16xf32>
    %135 = arith.truncf %134 : vector<2x8x16xf32> to vector<2x8x16xbf16>
    %136 = vector.extract_strided_slice %123 {offsets = [0, 0, 0], sizes = [2, 8, 16], strides = [1, 1, 1]} : vector<2x8x32xf32> to vector<2x8x16xf32>
    %137 = arith.truncf %136 : vector<2x8x16xf32> to vector<2x8x16xbf16>
    "tpu.trace_start"() <{level = 10 : i32, message = "bqd,bkd->bqk"}> : () -> ()
    %cst_75 = arith.constant dense<0.000000e+00> : vector<2x8x8xf32>
    %138 = tpu.matmul %133, %135, %cst_75 {dimension_numbers = #tpu.dot_dimension_numbers<[2], [2], [1], [1], [0, 0, 0, 1, 1, 1], [0], [0]>} : vector<2x8x16xbf16>, vector<2x8x16xbf16>, vector<2x8x8xf32> -> vector<2x8x8xf32>
    "tpu.trace_stop"() : () -> ()
    %cst_76 = arith.constant dense<0xFF800000> : vector<2x8xf32>
    %139 = vector.multi_reduction <maximumf>, %138, %cst_76 [2] : vector<2x8x8xf32> to vector<2x8xf32>
    %140 = vector.shape_cast %139 : vector<2x8xf32> to vector<2x8x1xf32>
    %141 = vector.broadcast %140 : vector<2x8x1xf32> to vector<2x8x8xf32>
    %142 = arith.subf %138, %141 : vector<2x8x8xf32>
    %143 = math.exp %142 : vector<2x8x8xf32>
    %cst_77 = arith.constant dense<0.000000e+00> : vector<2x8xf32>
    %144 = vector.multi_reduction <add>, %143, %cst_77 [2] : vector<2x8x8xf32> to vector<2x8xf32>
    %145 = vector.shape_cast %144 : vector<2x8xf32> to vector<2x8x1xf32>
    %146 = tpu.reciprocal %145 : vector<2x8x1xf32> -> vector<2x8x1xf32>
    %147 = vector.broadcast %146 : vector<2x8x1xf32> to vector<2x8x8xf32>
    %148 = arith.mulf %143, %147 : vector<2x8x8xf32>
    %149 = arith.truncf %148 : vector<2x8x8xf32> to vector<2x8x8xbf16>
    "tpu.trace_start"() <{level = 10 : i32, message = "bqk,bkd->bqd"}> : () -> ()
    %cst_78 = arith.constant dense<0.000000e+00> : vector<2x8x16xf32>
    %150 = tpu.matmul %149, %137, %cst_78 {dimension_numbers = #tpu.dot_dimension_numbers<[2], [1], [1], [2], [0, 0, 0, 1, 1, 2], [0], [0]>} : vector<2x8x8xbf16>, vector<2x8x16xbf16>, vector<2x8x16xf32> -> vector<2x8x16xf32>
    "tpu.trace_stop"() : () -> ()
    %151 = vector.extract_strided_slice %131 {offsets = [0, 0, 16], sizes = [2, 8, 16], strides = [1, 1, 1]} : vector<2x8x32xf32> to vector<2x8x16xf32>
    %152 = arith.truncf %151 : vector<2x8x16xf32> to vector<2x8x16xbf16>
    %153 = vector.extract_strided_slice %122 {offsets = [0, 0, 16], sizes = [2, 8, 16], strides = [1, 1, 1]} : vector<2x8x32xf32> to vector<2x8x16xf32>
    %154 = arith.truncf %153 : vector<2x8x16xf32> to vector<2x8x16xbf16>
    %155 = vector.extract_strided_slice %123 {offsets = [0, 0, 16], sizes = [2, 8, 16], strides = [1, 1, 1]} : vector<2x8x32xf32> to vector<2x8x16xf32>
    %156 = arith.truncf %155 : vector<2x8x16xf32> to vector<2x8x16xbf16>
    "tpu.trace_start"() <{level = 10 : i32, message = "bqd,bkd->bqk"}> : () -> ()
    %cst_79 = arith.constant dense<0.000000e+00> : vector<2x8x8xf32>
    %157 = tpu.matmul %152, %154, %cst_79 {dimension_numbers = #tpu.dot_dimension_numbers<[2], [2], [1], [1], [0, 0, 0, 1, 1, 1], [0], [0]>} : vector<2x8x16xbf16>, vector<2x8x16xbf16>, vector<2x8x8xf32> -> vector<2x8x8xf32>
    "tpu.trace_stop"() : () -> ()
    %cst_80 = arith.constant dense<0xFF800000> : vector<2x8xf32>
    %158 = vector.multi_reduction <maximumf>, %157, %cst_80 [2] : vector<2x8x8xf32> to vector<2x8xf32>
    %159 = vector.shape_cast %158 : vector<2x8xf32> to vector<2x8x1xf32>
    %160 = vector.broadcast %159 : vector<2x8x1xf32> to vector<2x8x8xf32>
    %161 = arith.subf %157, %160 : vector<2x8x8xf32>
    %162 = math.exp %161 : vector<2x8x8xf32>
    %cst_81 = arith.constant dense<0.000000e+00> : vector<2x8xf32>
    %163 = vector.multi_reduction <add>, %162, %cst_81 [2] : vector<2x8x8xf32> to vector<2x8xf32>
    %164 = vector.shape_cast %163 : vector<2x8xf32> to vector<2x8x1xf32>
    %165 = tpu.reciprocal %164 : vector<2x8x1xf32> -> vector<2x8x1xf32>
    %166 = vector.broadcast %165 : vector<2x8x1xf32> to vector<2x8x8xf32>
    %167 = arith.mulf %162, %166 : vector<2x8x8xf32>
    %168 = arith.truncf %167 : vector<2x8x8xf32> to vector<2x8x8xbf16>
    "tpu.trace_start"() <{level = 10 : i32, message = "bqk,bkd->bqd"}> : () -> ()
    %cst_82 = arith.constant dense<0.000000e+00> : vector<2x8x16xf32>
    %169 = tpu.matmul %168, %156, %cst_82 {dimension_numbers = #tpu.dot_dimension_numbers<[2], [1], [1], [2], [0, 0, 0, 1, 1, 2], [0], [0]>} : vector<2x8x8xbf16>, vector<2x8x16xbf16>, vector<2x8x16xf32> -> vector<2x8x16xf32>
    "tpu.trace_stop"() : () -> ()
    %170 = tpu.concatenate %150, %169 in 2 : vector<2x8x16xf32>, vector<2x8x16xf32> -> vector<2x8x32xf32>
    %171 = arith.addf %129, %170 : vector<2x8x32xf32>
    %172 = vector.shape_cast %171 : vector<2x8x32xf32> to vector<16x32xf32>
    %173 = arith.truncf %172 : vector<16x32xf32> to vector<16x32xbf16>
    %cst_83 = arith.constant dense<0.000000e+00> : vector<16x32xf32>
    %174 = tpu.matmul %173, %110, %cst_83 {dimension_numbers = #tpu.dot_dimension_numbers<[1], [0], [0], [1], [0, 0, 1, 1], [], []>} : vector<16x32xbf16>, vector<32x32xbf16>, vector<16x32xf32> -> vector<16x32xf32>
    %175 = vector.broadcast %112 : vector<1x32xf32> to vector<16x32xf32>
    %176 = arith.addf %174, %175 : vector<16x32xf32>
    %cst_84 = arith.constant 0.000000e+00 : f32
    %177 = vector.broadcast %cst_84 : f32 to vector<16x32xf32>
    %178 = arith.maximumf %176, %177 : vector<16x32xf32>
    %179 = arith.addf %172, %178 : vector<16x32xf32>
    %180 = vector.shape_cast %179 : vector<16x32xf32> to vector<2x8x32xf32>
    %c0_85 = arith.constant 0 : index
    %c0_86 = arith.constant 0 : index
    %c0_87 = arith.constant 0 : index
    %181 = vector.load %arg6[%c0_85, %c0_86, %c0_87] : memref<2x8x32xf32, #tpu.memory_space<vmem>>, vector<2x8x32xf32>
    tpu.vector_store %arg6[%c0_85, %c0_86, %c0_87], %180 {strides = array<i32>} : memref<2x8x32xf32, #tpu.memory_space<vmem>>, vector<2x8x32xf32>,
    %c0_88 = arith.constant 0 : index
    %c0_89 = arith.constant 0 : index
    %c0_90 = arith.constant 0 : index
    %182 = vector.load %arg6[%c0_88, %c0_89, %c0_90] : memref<2x8x32xf32, #tpu.memory_space<vmem>>, vector<2x8x32xf32>
    %c8 = arith.constant 8 : index
    %c0_91 = arith.constant 0 : index
    %c0_92 = arith.constant 0 : index
    %183 = vector.load %arg2[%c8, %c0_91, %c0_92] : memref<29x32x32xbf16, #tpu.memory_space<vmem>>, vector<1x32x32xbf16>
    %184 = vector.shape_cast %183 : vector<1x32x32xbf16> to vector<32x32xbf16>
    %c8_93 = arith.constant 8 : index
    %c0_94 = arith.constant 0 : index
    %c0_95 = arith.constant 0 : index
    %185 = vector.load %arg3[%c8_93, %c0_94, %c0_95] : memref<29x1x32xf32, #tpu.memory_space<vmem>>, vector<1x1x32xf32>
    %186 = vector.shape_cast %185 : vector<1x1x32xf32> to vector<1x32xf32>
    %c9 = arith.constant 9 : index
    %c0_96 = arith.constant 0 : index
    %c0_97 = arith.constant 0 : index
    %187 = vector.load %arg2[%c9, %c0_96, %c0_97] : memref<29x32x32xbf16, #tpu.memory_space<vmem>>, vector<1x32x32xbf16>
    %188 = vector.shape_cast %187 : vector<1x32x32xbf16> to vector<32x32xbf16>
    %c9_98 = arith.constant 9 : index
    %c0_99 = arith.constant 0 : index
    %c0_100 = arith.constant 0 : index
    %189 = vector.load %arg3[%c9_98, %c0_99, %c0_100] : memref<29x1x32xf32, #tpu.memory_space<vmem>>, vector<1x1x32xf32>
    %190 = vector.shape_cast %189 : vector<1x1x32xf32> to vector<1x32xf32>
    %c10 = arith.constant 10 : index
    %c0_101 = arith.constant 0 : index
    %c0_102 = arith.constant 0 : index
    %191 = vector.load %arg2[%c10, %c0_101, %c0_102] : memref<29x32x32xbf16, #tpu.memory_space<vmem>>, vector<1x32x32xbf16>
    %192 = vector.shape_cast %191 : vector<1x32x32xbf16> to vector<32x32xbf16>
    %c10_103 = arith.constant 10 : index
    %c0_104 = arith.constant 0 : index
    %c0_105 = arith.constant 0 : index
    %193 = vector.load %arg3[%c10_103, %c0_104, %c0_105] : memref<29x1x32xf32, #tpu.memory_space<vmem>>, vector<1x1x32xf32>
    %194 = vector.shape_cast %193 : vector<1x1x32xf32> to vector<1x32xf32>
    %c11 = arith.constant 11 : index
    %c0_106 = arith.constant 0 : index
    %c0_107 = arith.constant 0 : index
    %195 = vector.load %arg2[%c11, %c0_106, %c0_107] : memref<29x32x32xbf16, #tpu.memory_space<vmem>>, vector<1x32x32xbf16>
    %196 = vector.shape_cast %195 : vector<1x32x32xbf16> to vector<32x32xbf16>
    %c11_108 = arith.constant 11 : index
    %c0_109 = arith.constant 0 : index
    %c0_110 = arith.constant 0 : index
    %197 = vector.load %arg3[%c11_108, %c0_109, %c0_110] : memref<29x1x32xf32, #tpu.memory_space<vmem>>, vector<1x1x32xf32>
    %198 = vector.shape_cast %197 : vector<1x1x32xf32> to vector<1x32xf32>
    %199 = vector.shape_cast %182 : vector<2x8x32xf32> to vector<16x32xf32>
    %200 = arith.truncf %199 : vector<16x32xf32> to vector<16x32xbf16>
    %cst_111 = arith.constant dense<0.000000e+00> : vector<16x32xf32>
    %201 = tpu.matmul %200, %188, %cst_111 {dimension_numbers = #tpu.dot_dimension_numbers<[1], [0], [0], [1], [0, 0, 1, 1], [], []>} : vector<16x32xbf16>, vector<32x32xbf16>, vector<16x32xf32> -> vector<16x32xf32>
    %202 = vector.broadcast %190 : vector<1x32xf32> to vector<16x32xf32>
    %203 = arith.addf %201, %202 : vector<16x32xf32>
    %204 = arith.truncf %199 : vector<16x32xf32> to vector<16x32xbf16>
    %cst_112 = arith.constant dense<0.000000e+00> : vector<16x32xf32>
    %205 = tpu.matmul %204, %192, %cst_112 {dimension_numbers = #tpu.dot_dimension_numbers<[1], [0], [0], [1], [0, 0, 1, 1], [], []>} : vector<16x32xbf16>, vector<32x32xbf16>, vector<16x32xf32> -> vector<16x32xf32>
    %206 = vector.broadcast %194 : vector<1x32xf32> to vector<16x32xf32>
    %207 = arith.addf %205, %206 : vector<16x32xf32>
    %208 = vector.shape_cast %203 : vector<16x32xf32> to vector<2x8x32xf32>
    %209 = vector.shape_cast %207 : vector<16x32xf32> to vector<2x8x32xf32>
    %210 = arith.truncf %4 : vector<8x32xf32> to vector<8x32xbf16>
    %cst_113 = arith.constant dense<0.000000e+00> : vector<8x32xf32>
    %211 = tpu.matmul %210, %184, %cst_113 {dimension_numbers = #tpu.dot_dimension_numbers<[1], [0], [0], [1], [0, 0, 1, 1], [], []>} : vector<8x32xbf16>, vector<32x32xbf16>, vector<8x32xf32> -> vector<8x32xf32>
    %212 = vector.broadcast %186 : vector<1x32xf32> to vector<8x32xf32>
    %213 = arith.addf %211, %212 : vector<8x32xf32>
    %214 = vector.shape_cast %213 : vector<8x32xf32> to vector<1x8x32xf32>
    %215 = vector.shape_cast %214 : vector<1x8x32xf32> to vector<1x8x32xf32>
    %216 = vector.broadcast %215 : vector<1x8x32xf32> to vector<2x8x32xf32>
    %cst_114 = arith.constant 0.176776692 : f32
    %217 = vector.broadcast %cst_114 : f32 to vector<8x32xf32>
    %218 = arith.mulf %213, %217 : vector<8x32xf32>
    %219 = vector.shape_cast %218 : vector<8x32xf32> to vector<1x8x32xf32>
    %220 = vector.shape_cast %219 : vector<1x8x32xf32> to vector<1x8x32xf32>
    %221 = vector.broadcast %220 : vector<1x8x32xf32> to vector<2x8x32xf32>
    %222 = vector.extract_strided_slice %221 {offsets = [0, 0, 0], sizes = [2, 8, 16], strides = [1, 1, 1]} : vector<2x8x32xf32> to vector<2x8x16xf32>
    %223 = arith.truncf %222 : vector<2x8x16xf32> to vector<2x8x16xbf16>
    %224 = vector.extract_strided_slice %208 {offsets = [0, 0, 0], sizes = [2, 8, 16], strides = [1, 1, 1]} : vector<2x8x32xf32> to vector<2x8x16xf32>
    %225 = arith.truncf %224 : vector<2x8x16xf32> to vector<2x8x16xbf16>
    %226 = vector.extract_strided_slice %209 {offsets = [0, 0, 0], sizes = [2, 8, 16], strides = [1, 1, 1]} : vector<2x8x32xf32> to vector<2x8x16xf32>
    %227 = arith.truncf %226 : vector<2x8x16xf32> to vector<2x8x16xbf16>
    "tpu.trace_start"() <{level = 10 : i32, message = "bqd,bkd->bqk"}> : () -> ()
    %cst_115 = arith.constant dense<0.000000e+00> : vector<2x8x8xf32>
    %228 = tpu.matmul %223, %225, %cst_115 {dimension_numbers = #tpu.dot_dimension_numbers<[2], [2], [1], [1], [0, 0, 0, 1, 1, 1], [0], [0]>} : vector<2x8x16xbf16>, vector<2x8x16xbf16>, vector<2x8x8xf32> -> vector<2x8x8xf32>
    "tpu.trace_stop"() : () -> ()
    %cst_116 = arith.constant dense<0xFF800000> : vector<2x8xf32>
    %229 = vector.multi_reduction <maximumf>, %228, %cst_116 [2] : vector<2x8x8xf32> to vector<2x8xf32>
    %230 = vector.shape_cast %229 : vector<2x8xf32> to vector<2x8x1xf32>
    %231 = vector.broadcast %230 : vector<2x8x1xf32> to vector<2x8x8xf32>
    %232 = arith.subf %228, %231 : vector<2x8x8xf32>
    %233 = math.exp %232 : vector<2x8x8xf32>
    %cst_117 = arith.constant dense<0.000000e+00> : vector<2x8xf32>
    %234 = vector.multi_reduction <add>, %233, %cst_117 [2] : vector<2x8x8xf32> to vector<2x8xf32>
    %235 = vector.shape_cast %234 : vector<2x8xf32> to vector<2x8x1xf32>
    %236 = tpu.reciprocal %235 : vector<2x8x1xf32> -> vector<2x8x1xf32>
    %237 = vector.broadcast %236 : vector<2x8x1xf32> to vector<2x8x8xf32>
    %238 = arith.mulf %233, %237 : vector<2x8x8xf32>
    %239 = arith.truncf %238 : vector<2x8x8xf32> to vector<2x8x8xbf16>
    "tpu.trace_start"() <{level = 10 : i32, message = "bqk,bkd->bqd"}> : () -> ()
    %cst_118 = arith.constant dense<0.000000e+00> : vector<2x8x16xf32>
    %240 = tpu.matmul %239, %227, %cst_118 {dimension_numbers = #tpu.dot_dimension_numbers<[2], [1], [1], [2], [0, 0, 0, 1, 1, 2], [0], [0]>} : vector<2x8x8xbf16>, vector<2x8x16xbf16>, vector<2x8x16xf32> -> vector<2x8x16xf32>
    "tpu.trace_stop"() : () -> ()
    %241 = vector.extract_strided_slice %221 {offsets = [0, 0, 16], sizes = [2, 8, 16], strides = [1, 1, 1]} : vector<2x8x32xf32> to vector<2x8x16xf32>
    %242 = arith.truncf %241 : vector<2x8x16xf32> to vector<2x8x16xbf16>
    %243 = vector.extract_strided_slice %208 {offsets = [0, 0, 16], sizes = [2, 8, 16], strides = [1, 1, 1]} : vector<2x8x32xf32> to vector<2x8x16xf32>
    %244 = arith.truncf %243 : vector<2x8x16xf32> to vector<2x8x16xbf16>
    %245 = vector.extract_strided_slice %209 {offsets = [0, 0, 16], sizes = [2, 8, 16], strides = [1, 1, 1]} : vector<2x8x32xf32> to vector<2x8x16xf32>
    %246 = arith.truncf %245 : vector<2x8x16xf32> to vector<2x8x16xbf16>
    "tpu.trace_start"() <{level = 10 : i32, message = "bqd,bkd->bqk"}> : () -> ()
    %cst_119 = arith.constant dense<0.000000e+00> : vector<2x8x8xf32>
    %247 = tpu.matmul %242, %244, %cst_119 {dimension_numbers = #tpu.dot_dimension_numbers<[2], [2], [1], [1], [0, 0, 0, 1, 1, 1], [0], [0]>} : vector<2x8x16xbf16>, vector<2x8x16xbf16>, vector<2x8x8xf32> -> vector<2x8x8xf32>
    "tpu.trace_stop"() : () -> ()
    %cst_120 = arith.constant dense<0xFF800000> : vector<2x8xf32>
    %248 = vector.multi_reduction <maximumf>, %247, %cst_120 [2] : vector<2x8x8xf32> to vector<2x8xf32>
    %249 = vector.shape_cast %248 : vector<2x8xf32> to vector<2x8x1xf32>
    %250 = vector.broadcast %249 : vector<2x8x1xf32> to vector<2x8x8xf32>
    %251 = arith.subf %247, %250 : vector<2x8x8xf32>
    %252 = math.exp %251 : vector<2x8x8xf32>
    %cst_121 = arith.constant dense<0.000000e+00> : vector<2x8xf32>
    %253 = vector.multi_reduction <add>, %252, %cst_121 [2] : vector<2x8x8xf32> to vector<2x8xf32>
    %254 = vector.shape_cast %253 : vector<2x8xf32> to vector<2x8x1xf32>
    %255 = tpu.reciprocal %254 : vector<2x8x1xf32> -> vector<2x8x1xf32>
    %256 = vector.broadcast %255 : vector<2x8x1xf32> to vector<2x8x8xf32>
    %257 = arith.mulf %252, %256 : vector<2x8x8xf32>
    %258 = arith.truncf %257 : vector<2x8x8xf32> to vector<2x8x8xbf16>
    "tpu.trace_start"() <{level = 10 : i32, message = "bqk,bkd->bqd"}> : () -> ()
    %cst_122 = arith.constant dense<0.000000e+00> : vector<2x8x16xf32>
    %259 = tpu.matmul %258, %246, %cst_122 {dimension_numbers = #tpu.dot_dimension_numbers<[2], [1], [1], [2], [0, 0, 0, 1, 1, 2], [0], [0]>} : vector<2x8x8xbf16>, vector<2x8x16xbf16>, vector<2x8x16xf32> -> vector<2x8x16xf32>
    "tpu.trace_stop"() : () -> ()
    %260 = tpu.concatenate %240, %259 in 2 : vector<2x8x16xf32>, vector<2x8x16xf32> -> vector<2x8x32xf32>
    %261 = arith.addf %216, %260 : vector<2x8x32xf32>
    %262 = vector.shape_cast %261 : vector<2x8x32xf32> to vector<16x32xf32>
    %263 = arith.truncf %262 : vector<16x32xf32> to vector<16x32xbf16>
    %cst_123 = arith.constant dense<0.000000e+00> : vector<16x32xf32>
    %264 = tpu.matmul %263, %196, %cst_123 {dimension_numbers = #tpu.dot_dimension_numbers<[1], [0], [0], [1], [0, 0, 1, 1], [], []>} : vector<16x32xbf16>, vector<32x32xbf16>, vector<16x32xf32> -> vector<16x32xf32>
    %265 = vector.broadcast %198 : vector<1x32xf32> to vector<16x32xf32>
    %266 = arith.addf %264, %265 : vector<16x32xf32>
    %cst_124 = arith.constant 0.000000e+00 : f32
    %267 = vector.broadcast %cst_124 : f32 to vector<16x32xf32>
    %268 = arith.maximumf %266, %267 : vector<16x32xf32>
    %269 = arith.addf %262, %268 : vector<16x32xf32>
    %270 = vector.shape_cast %269 : vector<16x32xf32> to vector<2x8x32xf32>
    %c0_125 = arith.constant 0 : index
    %c0_126 = arith.constant 0 : index
    %c0_127 = arith.constant 0 : index
    %271 = vector.load %arg7[%c0_125, %c0_126, %c0_127] : memref<2x8x32xf32, #tpu.memory_space<vmem>>, vector<2x8x32xf32>
    tpu.vector_store %arg7[%c0_125, %c0_126, %c0_127], %270 {strides = array<i32>} : memref<2x8x32xf32, #tpu.memory_space<vmem>>, vector<2x8x32xf32>,
    %c0_128 = arith.constant 0 : index
    %c0_129 = arith.constant 0 : index
    %c0_130 = arith.constant 0 : index
    %272 = vector.load %arg6[%c0_128, %c0_129, %c0_130] : memref<2x8x32xf32, #tpu.memory_space<vmem>>, vector<2x8x32xf32>
    %c0_131 = arith.constant 0 : index
    %c0_132 = arith.constant 0 : index
    %c0_133 = arith.constant 0 : index
    %273 = vector.load %arg7[%c0_131, %c0_132, %c0_133] : memref<2x8x32xf32, #tpu.memory_space<vmem>>, vector<2x8x32xf32>
    %c12 = arith.constant 12 : index
    %c0_134 = arith.constant 0 : index
    %c0_135 = arith.constant 0 : index
    %274 = vector.load %arg2[%c12, %c0_134, %c0_135] : memref<29x32x32xbf16, #tpu.memory_space<vmem>>, vector<1x32x32xbf16>
    %275 = vector.shape_cast %274 : vector<1x32x32xbf16> to vector<32x32xbf16>
    %c12_136 = arith.constant 12 : index
    %c0_137 = arith.constant 0 : index
    %c0_138 = arith.constant 0 : index
    %276 = vector.load %arg3[%c12_136, %c0_137, %c0_138] : memref<29x1x32xf32, #tpu.memory_space<vmem>>, vector<1x1x32xf32>
    %277 = vector.shape_cast %276 : vector<1x1x32xf32> to vector<1x32xf32>
    %c13 = arith.constant 13 : index
    %c0_139 = arith.constant 0 : index
    %c0_140 = arith.constant 0 : index
    %278 = vector.load %arg2[%c13, %c0_139, %c0_140] : memref<29x32x32xbf16, #tpu.memory_space<vmem>>, vector<1x32x32xbf16>
    %279 = vector.shape_cast %278 : vector<1x32x32xbf16> to vector<32x32xbf16>
    %c13_141 = arith.constant 13 : index
    %c0_142 = arith.constant 0 : index
    %c0_143 = arith.constant 0 : index
    %280 = vector.load %arg3[%c13_141, %c0_142, %c0_143] : memref<29x1x32xf32, #tpu.memory_space<vmem>>, vector<1x1x32xf32>
    %281 = vector.shape_cast %280 : vector<1x1x32xf32> to vector<1x32xf32>
    %c14 = arith.constant 14 : index
    %c0_144 = arith.constant 0 : index
    %c0_145 = arith.constant 0 : index
    %282 = vector.load %arg2[%c14, %c0_144, %c0_145] : memref<29x32x32xbf16, #tpu.memory_space<vmem>>, vector<1x32x32xbf16>
    %283 = vector.shape_cast %282 : vector<1x32x32xbf16> to vector<32x32xbf16>
    %c14_146 = arith.constant 14 : index
    %c0_147 = arith.constant 0 : index
    %c0_148 = arith.constant 0 : index
    %284 = vector.load %arg3[%c14_146, %c0_147, %c0_148] : memref<29x1x32xf32, #tpu.memory_space<vmem>>, vector<1x1x32xf32>
    %285 = vector.shape_cast %284 : vector<1x1x32xf32> to vector<1x32xf32>
    %c15 = arith.constant 15 : index
    %c0_149 = arith.constant 0 : index
    %c0_150 = arith.constant 0 : index
    %286 = vector.load %arg2[%c15, %c0_149, %c0_150] : memref<29x32x32xbf16, #tpu.memory_space<vmem>>, vector<1x32x32xbf16>
    %287 = vector.shape_cast %286 : vector<1x32x32xbf16> to vector<32x32xbf16>
    %c15_151 = arith.constant 15 : index
    %c0_152 = arith.constant 0 : index
    %c0_153 = arith.constant 0 : index
    %288 = vector.load %arg3[%c15_151, %c0_152, %c0_153] : memref<29x1x32xf32, #tpu.memory_space<vmem>>, vector<1x1x32xf32>
    %289 = vector.shape_cast %288 : vector<1x1x32xf32> to vector<1x32xf32>
    %290 = vector.shape_cast %273 : vector<2x8x32xf32> to vector<16x32xf32>
    %291 = arith.truncf %290 : vector<16x32xf32> to vector<16x32xbf16>
    %cst_154 = arith.constant dense<0.000000e+00> : vector<16x32xf32>
    %292 = tpu.matmul %291, %279, %cst_154 {dimension_numbers = #tpu.dot_dimension_numbers<[1], [0], [0], [1], [0, 0, 1, 1], [], []>} : vector<16x32xbf16>, vector<32x32xbf16>, vector<16x32xf32> -> vector<16x32xf32>
    %293 = vector.broadcast %281 : vector<1x32xf32> to vector<16x32xf32>
    %294 = arith.addf %292, %293 : vector<16x32xf32>
    %295 = arith.truncf %290 : vector<16x32xf32> to vector<16x32xbf16>
    %cst_155 = arith.constant dense<0.000000e+00> : vector<16x32xf32>
    %296 = tpu.matmul %295, %283, %cst_155 {dimension_numbers = #tpu.dot_dimension_numbers<[1], [0], [0], [1], [0, 0, 1, 1], [], []>} : vector<16x32xbf16>, vector<32x32xbf16>, vector<16x32xf32> -> vector<16x32xf32>
    %297 = vector.broadcast %285 : vector<1x32xf32> to vector<16x32xf32>
    %298 = arith.addf %296, %297 : vector<16x32xf32>
    %299 = vector.shape_cast %294 : vector<16x32xf32> to vector<2x8x32xf32>
    %300 = vector.shape_cast %298 : vector<16x32xf32> to vector<2x8x32xf32>
    %301 = vector.shape_cast %272 : vector<2x8x32xf32> to vector<16x32xf32>
    %302 = arith.truncf %301 : vector<16x32xf32> to vector<16x32xbf16>
    %cst_156 = arith.constant dense<0.000000e+00> : vector<16x32xf32>
    %303 = tpu.matmul %302, %275, %cst_156 {dimension_numbers = #tpu.dot_dimension_numbers<[1], [0], [0], [1], [0, 0, 1, 1], [], []>} : vector<16x32xbf16>, vector<32x32xbf16>, vector<16x32xf32> -> vector<16x32xf32>
    %304 = vector.broadcast %277 : vector<1x32xf32> to vector<16x32xf32>
    %305 = arith.addf %303, %304 : vector<16x32xf32>
    %306 = vector.shape_cast %305 : vector<16x32xf32> to vector<2x8x32xf32>
    %cst_157 = arith.constant 0.176776692 : f32
    %307 = vector.broadcast %cst_157 : f32 to vector<2x8x32xf32>
    %308 = arith.mulf %306, %307 : vector<2x8x32xf32>
    %309 = vector.extract_strided_slice %308 {offsets = [0, 0, 0], sizes = [2, 8, 16], strides = [1, 1, 1]} : vector<2x8x32xf32> to vector<2x8x16xf32>
    %310 = arith.truncf %309 : vector<2x8x16xf32> to vector<2x8x16xbf16>
    %311 = vector.extract_strided_slice %299 {offsets = [0, 0, 0], sizes = [2, 8, 16], strides = [1, 1, 1]} : vector<2x8x32xf32> to vector<2x8x16xf32>
    %312 = arith.truncf %311 : vector<2x8x16xf32> to vector<2x8x16xbf16>
    %313 = vector.extract_strided_slice %300 {offsets = [0, 0, 0], sizes = [2, 8, 16], strides = [1, 1, 1]} : vector<2x8x32xf32> to vector<2x8x16xf32>
    %314 = arith.truncf %313 : vector<2x8x16xf32> to vector<2x8x16xbf16>
    "tpu.trace_start"() <{level = 10 : i32, message = "bqd,bkd->bqk"}> : () -> ()
    %cst_158 = arith.constant dense<0.000000e+00> : vector<2x8x8xf32>
    %315 = tpu.matmul %310, %312, %cst_158 {dimension_numbers = #tpu.dot_dimension_numbers<[2], [2], [1], [1], [0, 0, 0, 1, 1, 1], [0], [0]>} : vector<2x8x16xbf16>, vector<2x8x16xbf16>, vector<2x8x8xf32> -> vector<2x8x8xf32>
    "tpu.trace_stop"() : () -> ()
    %cst_159 = arith.constant dense<0xFF800000> : vector<2x8xf32>
    %316 = vector.multi_reduction <maximumf>, %315, %cst_159 [2] : vector<2x8x8xf32> to vector<2x8xf32>
    %317 = vector.shape_cast %316 : vector<2x8xf32> to vector<2x8x1xf32>
    %318 = vector.broadcast %317 : vector<2x8x1xf32> to vector<2x8x8xf32>
    %319 = arith.subf %315, %318 : vector<2x8x8xf32>
    %320 = math.exp %319 : vector<2x8x8xf32>
    %cst_160 = arith.constant dense<0.000000e+00> : vector<2x8xf32>
    %321 = vector.multi_reduction <add>, %320, %cst_160 [2] : vector<2x8x8xf32> to vector<2x8xf32>
    %322 = vector.shape_cast %321 : vector<2x8xf32> to vector<2x8x1xf32>
    %323 = tpu.reciprocal %322 : vector<2x8x1xf32> -> vector<2x8x1xf32>
    %324 = vector.broadcast %323 : vector<2x8x1xf32> to vector<2x8x8xf32>
    %325 = arith.mulf %320, %324 : vector<2x8x8xf32>
    %326 = arith.truncf %325 : vector<2x8x8xf32> to vector<2x8x8xbf16>
    "tpu.trace_start"() <{level = 10 : i32, message = "bqk,bkd->bqd"}> : () -> ()
    %cst_161 = arith.constant dense<0.000000e+00> : vector<2x8x16xf32>
    %327 = tpu.matmul %326, %314, %cst_161 {dimension_numbers = #tpu.dot_dimension_numbers<[2], [1], [1], [2], [0, 0, 0, 1, 1, 2], [0], [0]>} : vector<2x8x8xbf16>, vector<2x8x16xbf16>, vector<2x8x16xf32> -> vector<2x8x16xf32>
    "tpu.trace_stop"() : () -> ()
    %328 = vector.extract_strided_slice %308 {offsets = [0, 0, 16], sizes = [2, 8, 16], strides = [1, 1, 1]} : vector<2x8x32xf32> to vector<2x8x16xf32>
    %329 = arith.truncf %328 : vector<2x8x16xf32> to vector<2x8x16xbf16>
    %330 = vector.extract_strided_slice %299 {offsets = [0, 0, 16], sizes = [2, 8, 16], strides = [1, 1, 1]} : vector<2x8x32xf32> to vector<2x8x16xf32>
    %331 = arith.truncf %330 : vector<2x8x16xf32> to vector<2x8x16xbf16>
    %332 = vector.extract_strided_slice %300 {offsets = [0, 0, 16], sizes = [2, 8, 16], strides = [1, 1, 1]} : vector<2x8x32xf32> to vector<2x8x16xf32>
    %333 = arith.truncf %332 : vector<2x8x16xf32> to vector<2x8x16xbf16>
    "tpu.trace_start"() <{level = 10 : i32, message = "bqd,bkd->bqk"}> : () -> ()
    %cst_162 = arith.constant dense<0.000000e+00> : vector<2x8x8xf32>
    %334 = tpu.matmul %329, %331, %cst_162 {dimension_numbers = #tpu.dot_dimension_numbers<[2], [2], [1], [1], [0, 0, 0, 1, 1, 1], [0], [0]>} : vector<2x8x16xbf16>, vector<2x8x16xbf16>, vector<2x8x8xf32> -> vector<2x8x8xf32>
    "tpu.trace_stop"() : () -> ()
    %cst_163 = arith.constant dense<0xFF800000> : vector<2x8xf32>
    %335 = vector.multi_reduction <maximumf>, %334, %cst_163 [2] : vector<2x8x8xf32> to vector<2x8xf32>
    %336 = vector.shape_cast %335 : vector<2x8xf32> to vector<2x8x1xf32>
    %337 = vector.broadcast %336 : vector<2x8x1xf32> to vector<2x8x8xf32>
    %338 = arith.subf %334, %337 : vector<2x8x8xf32>
    %339 = math.exp %338 : vector<2x8x8xf32>
    %cst_164 = arith.constant dense<0.000000e+00> : vector<2x8xf32>
    %340 = vector.multi_reduction <add>, %339, %cst_164 [2] : vector<2x8x8xf32> to vector<2x8xf32>
    %341 = vector.shape_cast %340 : vector<2x8xf32> to vector<2x8x1xf32>
    %342 = tpu.reciprocal %341 : vector<2x8x1xf32> -> vector<2x8x1xf32>
    %343 = vector.broadcast %342 : vector<2x8x1xf32> to vector<2x8x8xf32>
    %344 = arith.mulf %339, %343 : vector<2x8x8xf32>
    %345 = arith.truncf %344 : vector<2x8x8xf32> to vector<2x8x8xbf16>
    "tpu.trace_start"() <{level = 10 : i32, message = "bqk,bkd->bqd"}> : () -> ()
    %cst_165 = arith.constant dense<0.000000e+00> : vector<2x8x16xf32>
    %346 = tpu.matmul %345, %333, %cst_165 {dimension_numbers = #tpu.dot_dimension_numbers<[2], [1], [1], [2], [0, 0, 0, 1, 1, 2], [0], [0]>} : vector<2x8x8xbf16>, vector<2x8x16xbf16>, vector<2x8x16xf32> -> vector<2x8x16xf32>
    "tpu.trace_stop"() : () -> ()
    %347 = tpu.concatenate %327, %346 in 2 : vector<2x8x16xf32>, vector<2x8x16xf32> -> vector<2x8x32xf32>
    %348 = arith.addf %306, %347 : vector<2x8x32xf32>
    %349 = vector.shape_cast %348 : vector<2x8x32xf32> to vector<16x32xf32>
    %350 = arith.truncf %349 : vector<16x32xf32> to vector<16x32xbf16>
    %cst_166 = arith.constant dense<0.000000e+00> : vector<16x32xf32>
    %351 = tpu.matmul %350, %287, %cst_166 {dimension_numbers = #tpu.dot_dimension_numbers<[1], [0], [0], [1], [0, 0, 1, 1], [], []>} : vector<16x32xbf16>, vector<32x32xbf16>, vector<16x32xf32> -> vector<16x32xf32>
    %352 = vector.broadcast %289 : vector<1x32xf32> to vector<16x32xf32>
    %353 = arith.addf %351, %352 : vector<16x32xf32>
    %cst_167 = arith.constant 0.000000e+00 : f32
    %354 = vector.broadcast %cst_167 : f32 to vector<16x32xf32>
    %355 = arith.maximumf %353, %354 : vector<16x32xf32>
    %356 = arith.addf %349, %355 : vector<16x32xf32>
    %357 = vector.shape_cast %356 : vector<16x32xf32> to vector<2x8x32xf32>
    %c0_168 = arith.constant 0 : index
    %c0_169 = arith.constant 0 : index
    %c0_170 = arith.constant 0 : index
    %358 = vector.load %arg6[%c0_168, %c0_169, %c0_170] : memref<2x8x32xf32, #tpu.memory_space<vmem>>, vector<2x8x32xf32>
    tpu.vector_store %arg6[%c0_168, %c0_169, %c0_170], %357 {strides = array<i32>} : memref<2x8x32xf32, #tpu.memory_space<vmem>>, vector<2x8x32xf32>,
    %c0_171 = arith.constant 0 : index
    %c0_172 = arith.constant 0 : index
    %c0_173 = arith.constant 0 : index
    %359 = vector.load %arg6[%c0_171, %c0_172, %c0_173] : memref<2x8x32xf32, #tpu.memory_space<vmem>>, vector<2x8x32xf32>
    %c16 = arith.constant 16 : index
    %c0_174 = arith.constant 0 : index
    %c0_175 = arith.constant 0 : index
    %360 = vector.load %arg2[%c16, %c0_174, %c0_175] : memref<29x32x32xbf16, #tpu.memory_space<vmem>>, vector<1x32x32xbf16>
    %361 = vector.shape_cast %360 : vector<1x32x32xbf16> to vector<32x32xbf16>
    %c16_176 = arith.constant 16 : index
    %c0_177 = arith.constant 0 : index
    %c0_178 = arith.constant 0 : index
    %362 = vector.load %arg3[%c16_176, %c0_177, %c0_178] : memref<29x1x32xf32, #tpu.memory_space<vmem>>, vector<1x1x32xf32>
    %363 = vector.shape_cast %362 : vector<1x1x32xf32> to vector<1x32xf32>
    %c17 = arith.constant 17 : index
    %c0_179 = arith.constant 0 : index
    %c0_180 = arith.constant 0 : index
    %364 = vector.load %arg2[%c17, %c0_179, %c0_180] : memref<29x32x32xbf16, #tpu.memory_space<vmem>>, vector<1x32x32xbf16>
    %365 = vector.shape_cast %364 : vector<1x32x32xbf16> to vector<32x32xbf16>
    %c17_181 = arith.constant 17 : index
    %c0_182 = arith.constant 0 : index
    %c0_183 = arith.constant 0 : index
    %366 = vector.load %arg3[%c17_181, %c0_182, %c0_183] : memref<29x1x32xf32, #tpu.memory_space<vmem>>, vector<1x1x32xf32>
    %367 = vector.shape_cast %366 : vector<1x1x32xf32> to vector<1x32xf32>
    %c18 = arith.constant 18 : index
    %c0_184 = arith.constant 0 : index
    %c0_185 = arith.constant 0 : index
    %368 = vector.load %arg2[%c18, %c0_184, %c0_185] : memref<29x32x32xbf16, #tpu.memory_space<vmem>>, vector<1x32x32xbf16>
    %369 = vector.shape_cast %368 : vector<1x32x32xbf16> to vector<32x32xbf16>
    %c18_186 = arith.constant 18 : index
    %c0_187 = arith.constant 0 : index
    %c0_188 = arith.constant 0 : index
    %370 = vector.load %arg3[%c18_186, %c0_187, %c0_188] : memref<29x1x32xf32, #tpu.memory_space<vmem>>, vector<1x1x32xf32>
    %371 = vector.shape_cast %370 : vector<1x1x32xf32> to vector<1x32xf32>
    %c19 = arith.constant 19 : index
    %c0_189 = arith.constant 0 : index
    %c0_190 = arith.constant 0 : index
    %372 = vector.load %arg2[%c19, %c0_189, %c0_190] : memref<29x32x32xbf16, #tpu.memory_space<vmem>>, vector<1x32x32xbf16>
    %373 = vector.shape_cast %372 : vector<1x32x32xbf16> to vector<32x32xbf16>
    %c19_191 = arith.constant 19 : index
    %c0_192 = arith.constant 0 : index
    %c0_193 = arith.constant 0 : index
    %374 = vector.load %arg3[%c19_191, %c0_192, %c0_193] : memref<29x1x32xf32, #tpu.memory_space<vmem>>, vector<1x1x32xf32>
    %375 = vector.shape_cast %374 : vector<1x1x32xf32> to vector<1x32xf32>
    %376 = vector.shape_cast %359 : vector<2x8x32xf32> to vector<16x32xf32>
    %377 = arith.truncf %376 : vector<16x32xf32> to vector<16x32xbf16>
    %cst_194 = arith.constant dense<0.000000e+00> : vector<16x32xf32>
    %378 = tpu.matmul %377, %365, %cst_194 {dimension_numbers = #tpu.dot_dimension_numbers<[1], [0], [0], [1], [0, 0, 1, 1], [], []>} : vector<16x32xbf16>, vector<32x32xbf16>, vector<16x32xf32> -> vector<16x32xf32>
    %379 = vector.broadcast %367 : vector<1x32xf32> to vector<16x32xf32>
    %380 = arith.addf %378, %379 : vector<16x32xf32>
    %381 = arith.truncf %376 : vector<16x32xf32> to vector<16x32xbf16>
    %cst_195 = arith.constant dense<0.000000e+00> : vector<16x32xf32>
    %382 = tpu.matmul %381, %369, %cst_195 {dimension_numbers = #tpu.dot_dimension_numbers<[1], [0], [0], [1], [0, 0, 1, 1], [], []>} : vector<16x32xbf16>, vector<32x32xbf16>, vector<16x32xf32> -> vector<16x32xf32>
    %383 = vector.broadcast %371 : vector<1x32xf32> to vector<16x32xf32>
    %384 = arith.addf %382, %383 : vector<16x32xf32>
    %385 = vector.shape_cast %380 : vector<16x32xf32> to vector<2x8x32xf32>
    %386 = vector.shape_cast %384 : vector<16x32xf32> to vector<2x8x32xf32>
    %387 = arith.truncf %6 : vector<4x32xf32> to vector<4x32xbf16>
    %cst_196 = arith.constant dense<0.000000e+00> : vector<4x32xf32>
    %388 = tpu.matmul %387, %361, %cst_196 {dimension_numbers = #tpu.dot_dimension_numbers<[1], [0], [0], [1], [0, 0, 1, 1], [], []>} : vector<4x32xbf16>, vector<32x32xbf16>, vector<4x32xf32> -> vector<4x32xf32>
    %389 = vector.broadcast %363 : vector<1x32xf32> to vector<4x32xf32>
    %390 = arith.addf %388, %389 : vector<4x32xf32>
    %391 = vector.shape_cast %390 : vector<4x32xf32> to vector<1x4x32xf32>
    %392 = vector.shape_cast %391 : vector<1x4x32xf32> to vector<1x4x32xf32>
    %393 = vector.broadcast %392 : vector<1x4x32xf32> to vector<2x4x32xf32>
    %cst_197 = arith.constant 0.176776692 : f32
    %394 = vector.broadcast %cst_197 : f32 to vector<4x32xf32>
    %395 = arith.mulf %390, %394 : vector<4x32xf32>
    %396 = vector.shape_cast %395 : vector<4x32xf32> to vector<1x4x32xf32>
    %397 = vector.shape_cast %396 : vector<1x4x32xf32> to vector<1x4x32xf32>
    %398 = vector.broadcast %397 : vector<1x4x32xf32> to vector<2x4x32xf32>
    %399 = vector.extract_strided_slice %398 {offsets = [0, 0, 0], sizes = [2, 4, 16], strides = [1, 1, 1]} : vector<2x4x32xf32> to vector<2x4x16xf32>
    %400 = arith.truncf %399 : vector<2x4x16xf32> to vector<2x4x16xbf16>
    %401 = vector.extract_strided_slice %385 {offsets = [0, 0, 0], sizes = [2, 8, 16], strides = [1, 1, 1]} : vector<2x8x32xf32> to vector<2x8x16xf32>
    %402 = arith.truncf %401 : vector<2x8x16xf32> to vector<2x8x16xbf16>
    %403 = vector.extract_strided_slice %386 {offsets = [0, 0, 0], sizes = [2, 8, 16], strides = [1, 1, 1]} : vector<2x8x32xf32> to vector<2x8x16xf32>
    %404 = arith.truncf %403 : vector<2x8x16xf32> to vector<2x8x16xbf16>
    "tpu.trace_start"() <{level = 10 : i32, message = "bqd,bkd->bqk"}> : () -> ()
    %cst_198 = arith.constant dense<0.000000e+00> : vector<2x4x8xf32>
    %405 = tpu.matmul %400, %402, %cst_198 {dimension_numbers = #tpu.dot_dimension_numbers<[2], [2], [1], [1], [0, 0, 0, 1, 1, 1], [0], [0]>} : vector<2x4x16xbf16>, vector<2x8x16xbf16>, vector<2x4x8xf32> -> vector<2x4x8xf32>
    "tpu.trace_stop"() : () -> ()
    %cst_199 = arith.constant dense<0xFF800000> : vector<2x4xf32>
    %406 = vector.multi_reduction <maximumf>, %405, %cst_199 [2] : vector<2x4x8xf32> to vector<2x4xf32>
    %407 = vector.shape_cast %406 : vector<2x4xf32> to vector<2x4x1xf32>
    %408 = vector.broadcast %407 : vector<2x4x1xf32> to vector<2x4x8xf32>
    %409 = arith.subf %405, %408 : vector<2x4x8xf32>
    %410 = math.exp %409 : vector<2x4x8xf32>
    %cst_200 = arith.constant dense<0.000000e+00> : vector<2x4xf32>
    %411 = vector.multi_reduction <add>, %410, %cst_200 [2] : vector<2x4x8xf32> to vector<2x4xf32>
    %412 = vector.shape_cast %411 : vector<2x4xf32> to vector<2x4x1xf32>
    %413 = tpu.reciprocal %412 : vector<2x4x1xf32> -> vector<2x4x1xf32>
    %414 = vector.broadcast %413 : vector<2x4x1xf32> to vector<2x4x8xf32>
    %415 = arith.mulf %410, %414 : vector<2x4x8xf32>
    %416 = arith.truncf %415 : vector<2x4x8xf32> to vector<2x4x8xbf16>
    "tpu.trace_start"() <{level = 10 : i32, message = "bqk,bkd->bqd"}> : () -> ()
    %cst_201 = arith.constant dense<0.000000e+00> : vector<2x4x16xf32>
    %417 = tpu.matmul %416, %404, %cst_201 {dimension_numbers = #tpu.dot_dimension_numbers<[2], [1], [1], [2], [0, 0, 0, 1, 1, 2], [0], [0]>} : vector<2x4x8xbf16>, vector<2x8x16xbf16>, vector<2x4x16xf32> -> vector<2x4x16xf32>
    "tpu.trace_stop"() : () -> ()
    %418 = vector.extract_strided_slice %398 {offsets = [0, 0, 16], sizes = [2, 4, 16], strides = [1, 1, 1]} : vector<2x4x32xf32> to vector<2x4x16xf32>
    %419 = arith.truncf %418 : vector<2x4x16xf32> to vector<2x4x16xbf16>
    %420 = vector.extract_strided_slice %385 {offsets = [0, 0, 16], sizes = [2, 8, 16], strides = [1, 1, 1]} : vector<2x8x32xf32> to vector<2x8x16xf32>
    %421 = arith.truncf %420 : vector<2x8x16xf32> to vector<2x8x16xbf16>
    %422 = vector.extract_strided_slice %386 {offsets = [0, 0, 16], sizes = [2, 8, 16], strides = [1, 1, 1]} : vector<2x8x32xf32> to vector<2x8x16xf32>
    %423 = arith.truncf %422 : vector<2x8x16xf32> to vector<2x8x16xbf16>
    "tpu.trace_start"() <{level = 10 : i32, message = "bqd,bkd->bqk"}> : () -> ()
    %cst_202 = arith.constant dense<0.000000e+00> : vector<2x4x8xf32>
    %424 = tpu.matmul %419, %421, %cst_202 {dimension_numbers = #tpu.dot_dimension_numbers<[2], [2], [1], [1], [0, 0, 0, 1, 1, 1], [0], [0]>} : vector<2x4x16xbf16>, vector<2x8x16xbf16>, vector<2x4x8xf32> -> vector<2x4x8xf32>
    "tpu.trace_stop"() : () -> ()
    %cst_203 = arith.constant dense<0xFF800000> : vector<2x4xf32>
    %425 = vector.multi_reduction <maximumf>, %424, %cst_203 [2] : vector<2x4x8xf32> to vector<2x4xf32>
    %426 = vector.shape_cast %425 : vector<2x4xf32> to vector<2x4x1xf32>
    %427 = vector.broadcast %426 : vector<2x4x1xf32> to vector<2x4x8xf32>
    %428 = arith.subf %424, %427 : vector<2x4x8xf32>
    %429 = math.exp %428 : vector<2x4x8xf32>
    %cst_204 = arith.constant dense<0.000000e+00> : vector<2x4xf32>
    %430 = vector.multi_reduction <add>, %429, %cst_204 [2] : vector<2x4x8xf32> to vector<2x4xf32>
    %431 = vector.shape_cast %430 : vector<2x4xf32> to vector<2x4x1xf32>
    %432 = tpu.reciprocal %431 : vector<2x4x1xf32> -> vector<2x4x1xf32>
    %433 = vector.broadcast %432 : vector<2x4x1xf32> to vector<2x4x8xf32>
    %434 = arith.mulf %429, %433 : vector<2x4x8xf32>
    %435 = arith.truncf %434 : vector<2x4x8xf32> to vector<2x4x8xbf16>
    "tpu.trace_start"() <{level = 10 : i32, message = "bqk,bkd->bqd"}> : () -> ()
    %cst_205 = arith.constant dense<0.000000e+00> : vector<2x4x16xf32>
    %436 = tpu.matmul %435, %423, %cst_205 {dimension_numbers = #tpu.dot_dimension_numbers<[2], [1], [1], [2], [0, 0, 0, 1, 1, 2], [0], [0]>} : vector<2x4x8xbf16>, vector<2x8x16xbf16>, vector<2x4x16xf32> -> vector<2x4x16xf32>
    "tpu.trace_stop"() : () -> ()
    %437 = tpu.concatenate %417, %436 in 2 : vector<2x4x16xf32>, vector<2x4x16xf32> -> vector<2x4x32xf32>
    %438 = arith.addf %393, %437 : vector<2x4x32xf32>
    %439 = vector.shape_cast %438 : vector<2x4x32xf32> to vector<8x32xf32>
    %440 = arith.truncf %439 : vector<8x32xf32> to vector<8x32xbf16>
    %cst_206 = arith.constant dense<0.000000e+00> : vector<8x32xf32>
    %441 = tpu.matmul %440, %373, %cst_206 {dimension_numbers = #tpu.dot_dimension_numbers<[1], [0], [0], [1], [0, 0, 1, 1], [], []>} : vector<8x32xbf16>, vector<32x32xbf16>, vector<8x32xf32> -> vector<8x32xf32>
    %442 = vector.broadcast %375 : vector<1x32xf32> to vector<8x32xf32>
    %443 = arith.addf %441, %442 : vector<8x32xf32>
    %cst_207 = arith.constant 0.000000e+00 : f32
    %444 = vector.broadcast %cst_207 : f32 to vector<8x32xf32>
    %445 = arith.maximumf %443, %444 : vector<8x32xf32>
    %446 = arith.addf %439, %445 : vector<8x32xf32>
    %447 = vector.shape_cast %446 : vector<8x32xf32> to vector<2x4x32xf32>
    %c20 = arith.constant 20 : index
    %c0_208 = arith.constant 0 : index
    %c0_209 = arith.constant 0 : index
    %448 = vector.load %arg2[%c20, %c0_208, %c0_209] : memref<29x32x32xbf16, #tpu.memory_space<vmem>>, vector<1x32x32xbf16>
    %449 = vector.shape_cast %448 : vector<1x32x32xbf16> to vector<32x32xbf16>
    %c20_210 = arith.constant 20 : index
    %c0_211 = arith.constant 0 : index
    %c0_212 = arith.constant 0 : index
    %450 = vector.load %arg3[%c20_210, %c0_211, %c0_212] : memref<29x1x32xf32, #tpu.memory_space<vmem>>, vector<1x1x32xf32>
    %451 = vector.shape_cast %450 : vector<1x1x32xf32> to vector<1x32xf32>
    %c21 = arith.constant 21 : index
    %c0_213 = arith.constant 0 : index
    %c0_214 = arith.constant 0 : index
    %452 = vector.load %arg2[%c21, %c0_213, %c0_214] : memref<29x32x32xbf16, #tpu.memory_space<vmem>>, vector<1x32x32xbf16>
    %453 = vector.shape_cast %452 : vector<1x32x32xbf16> to vector<32x32xbf16>
    %c21_215 = arith.constant 21 : index
    %c0_216 = arith.constant 0 : index
    %c0_217 = arith.constant 0 : index
    %454 = vector.load %arg3[%c21_215, %c0_216, %c0_217] : memref<29x1x32xf32, #tpu.memory_space<vmem>>, vector<1x1x32xf32>
    %455 = vector.shape_cast %454 : vector<1x1x32xf32> to vector<1x32xf32>
    %c22 = arith.constant 22 : index
    %c0_218 = arith.constant 0 : index
    %c0_219 = arith.constant 0 : index
    %456 = vector.load %arg2[%c22, %c0_218, %c0_219] : memref<29x32x32xbf16, #tpu.memory_space<vmem>>, vector<1x32x32xbf16>
    %457 = vector.shape_cast %456 : vector<1x32x32xbf16> to vector<32x32xbf16>
    %c22_220 = arith.constant 22 : index
    %c0_221 = arith.constant 0 : index
    %c0_222 = arith.constant 0 : index
    %458 = vector.load %arg3[%c22_220, %c0_221, %c0_222] : memref<29x1x32xf32, #tpu.memory_space<vmem>>, vector<1x1x32xf32>
    %459 = vector.shape_cast %458 : vector<1x1x32xf32> to vector<1x32xf32>
    %c23 = arith.constant 23 : index
    %c0_223 = arith.constant 0 : index
    %c0_224 = arith.constant 0 : index
    %460 = vector.load %arg2[%c23, %c0_223, %c0_224] : memref<29x32x32xbf16, #tpu.memory_space<vmem>>, vector<1x32x32xbf16>
    %461 = vector.shape_cast %460 : vector<1x32x32xbf16> to vector<32x32xbf16>
    %c23_225 = arith.constant 23 : index
    %c0_226 = arith.constant 0 : index
    %c0_227 = arith.constant 0 : index
    %462 = vector.load %arg3[%c23_225, %c0_226, %c0_227] : memref<29x1x32xf32, #tpu.memory_space<vmem>>, vector<1x1x32xf32>
    %463 = vector.shape_cast %462 : vector<1x1x32xf32> to vector<1x32xf32>
    %464 = vector.shape_cast %447 : vector<2x4x32xf32> to vector<8x32xf32>
    %465 = arith.truncf %464 : vector<8x32xf32> to vector<8x32xbf16>
    %cst_228 = arith.constant dense<0.000000e+00> : vector<8x32xf32>
    %466 = tpu.matmul %465, %453, %cst_228 {dimension_numbers = #tpu.dot_dimension_numbers<[1], [0], [0], [1], [0, 0, 1, 1], [], []>} : vector<8x32xbf16>, vector<32x32xbf16>, vector<8x32xf32> -> vector<8x32xf32>
    %467 = vector.broadcast %455 : vector<1x32xf32> to vector<8x32xf32>
    %468 = arith.addf %466, %467 : vector<8x32xf32>
    %469 = arith.truncf %464 : vector<8x32xf32> to vector<8x32xbf16>
    %cst_229 = arith.constant dense<0.000000e+00> : vector<8x32xf32>
    %470 = tpu.matmul %469, %457, %cst_229 {dimension_numbers = #tpu.dot_dimension_numbers<[1], [0], [0], [1], [0, 0, 1, 1], [], []>} : vector<8x32xbf16>, vector<32x32xbf16>, vector<8x32xf32> -> vector<8x32xf32>
    %471 = vector.broadcast %459 : vector<1x32xf32> to vector<8x32xf32>
    %472 = arith.addf %470, %471 : vector<8x32xf32>
    %473 = vector.shape_cast %468 : vector<8x32xf32> to vector<2x4x32xf32>
    %474 = vector.shape_cast %472 : vector<8x32xf32> to vector<2x4x32xf32>
    %475 = vector.shape_cast %447 : vector<2x4x32xf32> to vector<8x32xf32>
    %476 = arith.truncf %475 : vector<8x32xf32> to vector<8x32xbf16>
    %cst_230 = arith.constant dense<0.000000e+00> : vector<8x32xf32>
    %477 = tpu.matmul %476, %449, %cst_230 {dimension_numbers = #tpu.dot_dimension_numbers<[1], [0], [0], [1], [0, 0, 1, 1], [], []>} : vector<8x32xbf16>, vector<32x32xbf16>, vector<8x32xf32> -> vector<8x32xf32>
    %478 = vector.broadcast %451 : vector<1x32xf32> to vector<8x32xf32>
    %479 = arith.addf %477, %478 : vector<8x32xf32>
    %480 = vector.shape_cast %479 : vector<8x32xf32> to vector<2x4x32xf32>
    %cst_231 = arith.constant 0.176776692 : f32
    %481 = vector.broadcast %cst_231 : f32 to vector<2x4x32xf32>
    %482 = arith.mulf %480, %481 : vector<2x4x32xf32>
    %483 = vector.extract_strided_slice %482 {offsets = [0, 0, 0], sizes = [2, 4, 16], strides = [1, 1, 1]} : vector<2x4x32xf32> to vector<2x4x16xf32>
    %484 = arith.truncf %483 : vector<2x4x16xf32> to vector<2x4x16xbf16>
    %485 = vector.extract_strided_slice %473 {offsets = [0, 0, 0], sizes = [2, 4, 16], strides = [1, 1, 1]} : vector<2x4x32xf32> to vector<2x4x16xf32>
    %486 = arith.truncf %485 : vector<2x4x16xf32> to vector<2x4x16xbf16>
    %487 = vector.extract_strided_slice %474 {offsets = [0, 0, 0], sizes = [2, 4, 16], strides = [1, 1, 1]} : vector<2x4x32xf32> to vector<2x4x16xf32>
    %488 = arith.truncf %487 : vector<2x4x16xf32> to vector<2x4x16xbf16>
    "tpu.trace_start"() <{level = 10 : i32, message = "bqd,bkd->bqk"}> : () -> ()
    %cst_232 = arith.constant dense<0.000000e+00> : vector<2x4x4xf32>
    %489 = tpu.matmul %484, %486, %cst_232 {dimension_numbers = #tpu.dot_dimension_numbers<[2], [2], [1], [1], [0, 0, 0, 1, 1, 1], [0], [0]>} : vector<2x4x16xbf16>, vector<2x4x16xbf16>, vector<2x4x4xf32> -> vector<2x4x4xf32>
    "tpu.trace_stop"() : () -> ()
    %cst_233 = arith.constant dense<0xFF800000> : vector<2x4xf32>
    %490 = vector.multi_reduction <maximumf>, %489, %cst_233 [2] : vector<2x4x4xf32> to vector<2x4xf32>
    %491 = vector.shape_cast %490 : vector<2x4xf32> to vector<2x4x1xf32>
    %492 = vector.broadcast %491 : vector<2x4x1xf32> to vector<2x4x4xf32>
    %493 = arith.subf %489, %492 : vector<2x4x4xf32>
    %494 = math.exp %493 : vector<2x4x4xf32>
    %cst_234 = arith.constant dense<0.000000e+00> : vector<2x4xf32>
    %495 = vector.multi_reduction <add>, %494, %cst_234 [2] : vector<2x4x4xf32> to vector<2x4xf32>
    %496 = vector.shape_cast %495 : vector<2x4xf32> to vector<2x4x1xf32>
    %497 = tpu.reciprocal %496 : vector<2x4x1xf32> -> vector<2x4x1xf32>
    %498 = vector.broadcast %497 : vector<2x4x1xf32> to vector<2x4x4xf32>
    %499 = arith.mulf %494, %498 : vector<2x4x4xf32>
    %500 = arith.truncf %499 : vector<2x4x4xf32> to vector<2x4x4xbf16>
    "tpu.trace_start"() <{level = 10 : i32, message = "bqk,bkd->bqd"}> : () -> ()
    %cst_235 = arith.constant dense<0.000000e+00> : vector<2x4x16xf32>
    %501 = tpu.matmul %500, %488, %cst_235 {dimension_numbers = #tpu.dot_dimension_numbers<[2], [1], [1], [2], [0, 0, 0, 1, 1, 2], [0], [0]>} : vector<2x4x4xbf16>, vector<2x4x16xbf16>, vector<2x4x16xf32> -> vector<2x4x16xf32>
    "tpu.trace_stop"() : () -> ()
    %502 = vector.extract_strided_slice %482 {offsets = [0, 0, 16], sizes = [2, 4, 16], strides = [1, 1, 1]} : vector<2x4x32xf32> to vector<2x4x16xf32>
    %503 = arith.truncf %502 : vector<2x4x16xf32> to vector<2x4x16xbf16>
    %504 = vector.extract_strided_slice %473 {offsets = [0, 0, 16], sizes = [2, 4, 16], strides = [1, 1, 1]} : vector<2x4x32xf32> to vector<2x4x16xf32>
    %505 = arith.truncf %504 : vector<2x4x16xf32> to vector<2x4x16xbf16>
    %506 = vector.extract_strided_slice %474 {offsets = [0, 0, 16], sizes = [2, 4, 16], strides = [1, 1, 1]} : vector<2x4x32xf32> to vector<2x4x16xf32>
    %507 = arith.truncf %506 : vector<2x4x16xf32> to vector<2x4x16xbf16>
    "tpu.trace_start"() <{level = 10 : i32, message = "bqd,bkd->bqk"}> : () -> ()
    %cst_236 = arith.constant dense<0.000000e+00> : vector<2x4x4xf32>
    %508 = tpu.matmul %503, %505, %cst_236 {dimension_numbers = #tpu.dot_dimension_numbers<[2], [2], [1], [1], [0, 0, 0, 1, 1, 1], [0], [0]>} : vector<2x4x16xbf16>, vector<2x4x16xbf16>, vector<2x4x4xf32> -> vector<2x4x4xf32>
    "tpu.trace_stop"() : () -> ()
    %cst_237 = arith.constant dense<0xFF800000> : vector<2x4xf32>
    %509 = vector.multi_reduction <maximumf>, %508, %cst_237 [2] : vector<2x4x4xf32> to vector<2x4xf32>
    %510 = vector.shape_cast %509 : vector<2x4xf32> to vector<2x4x1xf32>
    %511 = vector.broadcast %510 : vector<2x4x1xf32> to vector<2x4x4xf32>
    %512 = arith.subf %508, %511 : vector<2x4x4xf32>
    %513 = math.exp %512 : vector<2x4x4xf32>
    %cst_238 = arith.constant dense<0.000000e+00> : vector<2x4xf32>
    %514 = vector.multi_reduction <add>, %513, %cst_238 [2] : vector<2x4x4xf32> to vector<2x4xf32>
    %515 = vector.shape_cast %514 : vector<2x4xf32> to vector<2x4x1xf32>
    %516 = tpu.reciprocal %515 : vector<2x4x1xf32> -> vector<2x4x1xf32>
    %517 = vector.broadcast %516 : vector<2x4x1xf32> to vector<2x4x4xf32>
    %518 = arith.mulf %513, %517 : vector<2x4x4xf32>
    %519 = arith.truncf %518 : vector<2x4x4xf32> to vector<2x4x4xbf16>
    "tpu.trace_start"() <{level = 10 : i32, message = "bqk,bkd->bqd"}> : () -> ()
    %cst_239 = arith.constant dense<0.000000e+00> : vector<2x4x16xf32>
    %520 = tpu.matmul %519, %507, %cst_239 {dimension_numbers = #tpu.dot_dimension_numbers<[2], [1], [1], [2], [0, 0, 0, 1, 1, 2], [0], [0]>} : vector<2x4x4xbf16>, vector<2x4x16xbf16>, vector<2x4x16xf32> -> vector<2x4x16xf32>
    "tpu.trace_stop"() : () -> ()
    %521 = tpu.concatenate %501, %520 in 2 : vector<2x4x16xf32>, vector<2x4x16xf32> -> vector<2x4x32xf32>
    %522 = arith.addf %480, %521 : vector<2x4x32xf32>
    %523 = vector.shape_cast %522 : vector<2x4x32xf32> to vector<8x32xf32>
    %524 = arith.truncf %523 : vector<8x32xf32> to vector<8x32xbf16>
    %cst_240 = arith.constant dense<0.000000e+00> : vector<8x32xf32>
    %525 = tpu.matmul %524, %461, %cst_240 {dimension_numbers = #tpu.dot_dimension_numbers<[1], [0], [0], [1], [0, 0, 1, 1], [], []>} : vector<8x32xbf16>, vector<32x32xbf16>, vector<8x32xf32> -> vector<8x32xf32>
    %526 = vector.broadcast %463 : vector<1x32xf32> to vector<8x32xf32>
    %527 = arith.addf %525, %526 : vector<8x32xf32>
    %cst_241 = arith.constant 0.000000e+00 : f32
    %528 = vector.broadcast %cst_241 : f32 to vector<8x32xf32>
    %529 = arith.maximumf %527, %528 : vector<8x32xf32>
    %530 = arith.addf %523, %529 : vector<8x32xf32>
    %531 = vector.shape_cast %530 : vector<8x32xf32> to vector<2x4x32xf32>
    %c24 = arith.constant 24 : index
    %c0_242 = arith.constant 0 : index
    %c0_243 = arith.constant 0 : index
    %532 = vector.load %arg2[%c24, %c0_242, %c0_243] : memref<29x32x32xbf16, #tpu.memory_space<vmem>>, vector<1x32x32xbf16>
    %533 = vector.shape_cast %532 : vector<1x32x32xbf16> to vector<32x32xbf16>
    %c24_244 = arith.constant 24 : index
    %c0_245 = arith.constant 0 : index
    %c0_246 = arith.constant 0 : index
    %534 = vector.load %arg3[%c24_244, %c0_245, %c0_246] : memref<29x1x32xf32, #tpu.memory_space<vmem>>, vector<1x1x32xf32>
    %535 = vector.shape_cast %534 : vector<1x1x32xf32> to vector<1x32xf32>
    %c25 = arith.constant 25 : index
    %c0_247 = arith.constant 0 : index
    %c0_248 = arith.constant 0 : index
    %536 = vector.load %arg2[%c25, %c0_247, %c0_248] : memref<29x32x32xbf16, #tpu.memory_space<vmem>>, vector<1x32x32xbf16>
    %537 = vector.shape_cast %536 : vector<1x32x32xbf16> to vector<32x32xbf16>
    %c25_249 = arith.constant 25 : index
    %c0_250 = arith.constant 0 : index
    %c0_251 = arith.constant 0 : index
    %538 = vector.load %arg3[%c25_249, %c0_250, %c0_251] : memref<29x1x32xf32, #tpu.memory_space<vmem>>, vector<1x1x32xf32>
    %539 = vector.shape_cast %538 : vector<1x1x32xf32> to vector<1x32xf32>
    %c26 = arith.constant 26 : index
    %c0_252 = arith.constant 0 : index
    %c0_253 = arith.constant 0 : index
    %540 = vector.load %arg2[%c26, %c0_252, %c0_253] : memref<29x32x32xbf16, #tpu.memory_space<vmem>>, vector<1x32x32xbf16>
    %541 = vector.shape_cast %540 : vector<1x32x32xbf16> to vector<32x32xbf16>
    %c26_254 = arith.constant 26 : index
    %c0_255 = arith.constant 0 : index
    %c0_256 = arith.constant 0 : index
    %542 = vector.load %arg3[%c26_254, %c0_255, %c0_256] : memref<29x1x32xf32, #tpu.memory_space<vmem>>, vector<1x1x32xf32>
    %543 = vector.shape_cast %542 : vector<1x1x32xf32> to vector<1x32xf32>
    %c27 = arith.constant 27 : index
    %c0_257 = arith.constant 0 : index
    %c0_258 = arith.constant 0 : index
    %544 = vector.load %arg2[%c27, %c0_257, %c0_258] : memref<29x32x32xbf16, #tpu.memory_space<vmem>>, vector<1x32x32xbf16>
    %545 = vector.shape_cast %544 : vector<1x32x32xbf16> to vector<32x32xbf16>
    %c27_259 = arith.constant 27 : index
    %c0_260 = arith.constant 0 : index
    %c0_261 = arith.constant 0 : index
    %546 = vector.load %arg3[%c27_259, %c0_260, %c0_261] : memref<29x1x32xf32, #tpu.memory_space<vmem>>, vector<1x1x32xf32>
    %547 = vector.shape_cast %546 : vector<1x1x32xf32> to vector<1x32xf32>
    %548 = vector.shape_cast %531 : vector<2x4x32xf32> to vector<8x32xf32>
    %549 = arith.truncf %548 : vector<8x32xf32> to vector<8x32xbf16>
    %cst_262 = arith.constant dense<0.000000e+00> : vector<8x32xf32>
    %550 = tpu.matmul %549, %537, %cst_262 {dimension_numbers = #tpu.dot_dimension_numbers<[1], [0], [0], [1], [0, 0, 1, 1], [], []>} : vector<8x32xbf16>, vector<32x32xbf16>, vector<8x32xf32> -> vector<8x32xf32>
    %551 = vector.broadcast %539 : vector<1x32xf32> to vector<8x32xf32>
    %552 = arith.addf %550, %551 : vector<8x32xf32>
    %553 = arith.truncf %548 : vector<8x32xf32> to vector<8x32xbf16>
    %cst_263 = arith.constant dense<0.000000e+00> : vector<8x32xf32>
    %554 = tpu.matmul %553, %541, %cst_263 {dimension_numbers = #tpu.dot_dimension_numbers<[1], [0], [0], [1], [0, 0, 1, 1], [], []>} : vector<8x32xbf16>, vector<32x32xbf16>, vector<8x32xf32> -> vector<8x32xf32>
    %555 = vector.broadcast %543 : vector<1x32xf32> to vector<8x32xf32>
    %556 = arith.addf %554, %555 : vector<8x32xf32>
    %557 = vector.shape_cast %552 : vector<8x32xf32> to vector<2x4x32xf32>
    %558 = vector.shape_cast %556 : vector<8x32xf32> to vector<2x4x32xf32>
    %559 = vector.shape_cast %531 : vector<2x4x32xf32> to vector<8x32xf32>
    %560 = arith.truncf %559 : vector<8x32xf32> to vector<8x32xbf16>
    %cst_264 = arith.constant dense<0.000000e+00> : vector<8x32xf32>
    %561 = tpu.matmul %560, %533, %cst_264 {dimension_numbers = #tpu.dot_dimension_numbers<[1], [0], [0], [1], [0, 0, 1, 1], [], []>} : vector<8x32xbf16>, vector<32x32xbf16>, vector<8x32xf32> -> vector<8x32xf32>
    %562 = vector.broadcast %535 : vector<1x32xf32> to vector<8x32xf32>
    %563 = arith.addf %561, %562 : vector<8x32xf32>
    %564 = vector.shape_cast %563 : vector<8x32xf32> to vector<2x4x32xf32>
    %cst_265 = arith.constant 0.176776692 : f32
    %565 = vector.broadcast %cst_265 : f32 to vector<2x4x32xf32>
    %566 = arith.mulf %564, %565 : vector<2x4x32xf32>
    %567 = vector.extract_strided_slice %566 {offsets = [0, 0, 0], sizes = [2, 4, 16], strides = [1, 1, 1]} : vector<2x4x32xf32> to vector<2x4x16xf32>
    %568 = arith.truncf %567 : vector<2x4x16xf32> to vector<2x4x16xbf16>
    %569 = vector.extract_strided_slice %557 {offsets = [0, 0, 0], sizes = [2, 4, 16], strides = [1, 1, 1]} : vector<2x4x32xf32> to vector<2x4x16xf32>
    %570 = arith.truncf %569 : vector<2x4x16xf32> to vector<2x4x16xbf16>
    %571 = vector.extract_strided_slice %558 {offsets = [0, 0, 0], sizes = [2, 4, 16], strides = [1, 1, 1]} : vector<2x4x32xf32> to vector<2x4x16xf32>
    %572 = arith.truncf %571 : vector<2x4x16xf32> to vector<2x4x16xbf16>
    "tpu.trace_start"() <{level = 10 : i32, message = "bqd,bkd->bqk"}> : () -> ()
    %cst_266 = arith.constant dense<0.000000e+00> : vector<2x4x4xf32>
    %573 = tpu.matmul %568, %570, %cst_266 {dimension_numbers = #tpu.dot_dimension_numbers<[2], [2], [1], [1], [0, 0, 0, 1, 1, 1], [0], [0]>} : vector<2x4x16xbf16>, vector<2x4x16xbf16>, vector<2x4x4xf32> -> vector<2x4x4xf32>
    "tpu.trace_stop"() : () -> ()
    %cst_267 = arith.constant dense<0xFF800000> : vector<2x4xf32>
    %574 = vector.multi_reduction <maximumf>, %573, %cst_267 [2] : vector<2x4x4xf32> to vector<2x4xf32>
    %575 = vector.shape_cast %574 : vector<2x4xf32> to vector<2x4x1xf32>
    %576 = vector.broadcast %575 : vector<2x4x1xf32> to vector<2x4x4xf32>
    %577 = arith.subf %573, %576 : vector<2x4x4xf32>
    %578 = math.exp %577 : vector<2x4x4xf32>
    %cst_268 = arith.constant dense<0.000000e+00> : vector<2x4xf32>
    %579 = vector.multi_reduction <add>, %578, %cst_268 [2] : vector<2x4x4xf32> to vector<2x4xf32>
    %580 = vector.shape_cast %579 : vector<2x4xf32> to vector<2x4x1xf32>
    %581 = tpu.reciprocal %580 : vector<2x4x1xf32> -> vector<2x4x1xf32>
    %582 = vector.broadcast %581 : vector<2x4x1xf32> to vector<2x4x4xf32>
    %583 = arith.mulf %578, %582 : vector<2x4x4xf32>
    %584 = arith.truncf %583 : vector<2x4x4xf32> to vector<2x4x4xbf16>
    "tpu.trace_start"() <{level = 10 : i32, message = "bqk,bkd->bqd"}> : () -> ()
    %cst_269 = arith.constant dense<0.000000e+00> : vector<2x4x16xf32>
    %585 = tpu.matmul %584, %572, %cst_269 {dimension_numbers = #tpu.dot_dimension_numbers<[2], [1], [1], [2], [0, 0, 0, 1, 1, 2], [0], [0]>} : vector<2x4x4xbf16>, vector<2x4x16xbf16>, vector<2x4x16xf32> -> vector<2x4x16xf32>
    "tpu.trace_stop"() : () -> ()
    %586 = vector.extract_strided_slice %566 {offsets = [0, 0, 16], sizes = [2, 4, 16], strides = [1, 1, 1]} : vector<2x4x32xf32> to vector<2x4x16xf32>
    %587 = arith.truncf %586 : vector<2x4x16xf32> to vector<2x4x16xbf16>
    %588 = vector.extract_strided_slice %557 {offsets = [0, 0, 16], sizes = [2, 4, 16], strides = [1, 1, 1]} : vector<2x4x32xf32> to vector<2x4x16xf32>
    %589 = arith.truncf %588 : vector<2x4x16xf32> to vector<2x4x16xbf16>
    %590 = vector.extract_strided_slice %558 {offsets = [0, 0, 16], sizes = [2, 4, 16], strides = [1, 1, 1]} : vector<2x4x32xf32> to vector<2x4x16xf32>
    %591 = arith.truncf %590 : vector<2x4x16xf32> to vector<2x4x16xbf16>
    "tpu.trace_start"() <{level = 10 : i32, message = "bqd,bkd->bqk"}> : () -> ()
    %cst_270 = arith.constant dense<0.000000e+00> : vector<2x4x4xf32>
    %592 = tpu.matmul %587, %589, %cst_270 {dimension_numbers = #tpu.dot_dimension_numbers<[2], [2], [1], [1], [0, 0, 0, 1, 1, 1], [0], [0]>} : vector<2x4x16xbf16>, vector<2x4x16xbf16>, vector<2x4x4xf32> -> vector<2x4x4xf32>
    "tpu.trace_stop"() : () -> ()
    %cst_271 = arith.constant dense<0xFF800000> : vector<2x4xf32>
    %593 = vector.multi_reduction <maximumf>, %592, %cst_271 [2] : vector<2x4x4xf32> to vector<2x4xf32>
    %594 = vector.shape_cast %593 : vector<2x4xf32> to vector<2x4x1xf32>
    %595 = vector.broadcast %594 : vector<2x4x1xf32> to vector<2x4x4xf32>
    %596 = arith.subf %592, %595 : vector<2x4x4xf32>
    %597 = math.exp %596 : vector<2x4x4xf32>
    %cst_272 = arith.constant dense<0.000000e+00> : vector<2x4xf32>
    %598 = vector.multi_reduction <add>, %597, %cst_272 [2] : vector<2x4x4xf32> to vector<2x4xf32>
    %599 = vector.shape_cast %598 : vector<2x4xf32> to vector<2x4x1xf32>
    %600 = tpu.reciprocal %599 : vector<2x4x1xf32> -> vector<2x4x1xf32>
    %601 = vector.broadcast %600 : vector<2x4x1xf32> to vector<2x4x4xf32>
    %602 = arith.mulf %597, %601 : vector<2x4x4xf32>
    %603 = arith.truncf %602 : vector<2x4x4xf32> to vector<2x4x4xbf16>
    "tpu.trace_start"() <{level = 10 : i32, message = "bqk,bkd->bqd"}> : () -> ()
    %cst_273 = arith.constant dense<0.000000e+00> : vector<2x4x16xf32>
    %604 = tpu.matmul %603, %591, %cst_273 {dimension_numbers = #tpu.dot_dimension_numbers<[2], [1], [1], [2], [0, 0, 0, 1, 1, 2], [0], [0]>} : vector<2x4x4xbf16>, vector<2x4x16xbf16>, vector<2x4x16xf32> -> vector<2x4x16xf32>
    "tpu.trace_stop"() : () -> ()
    %605 = tpu.concatenate %585, %604 in 2 : vector<2x4x16xf32>, vector<2x4x16xf32> -> vector<2x4x32xf32>
    %606 = arith.addf %564, %605 : vector<2x4x32xf32>
    %607 = vector.shape_cast %606 : vector<2x4x32xf32> to vector<8x32xf32>
    %608 = arith.truncf %607 : vector<8x32xf32> to vector<8x32xbf16>
    %cst_274 = arith.constant dense<0.000000e+00> : vector<8x32xf32>
    %609 = tpu.matmul %608, %545, %cst_274 {dimension_numbers = #tpu.dot_dimension_numbers<[1], [0], [0], [1], [0, 0, 1, 1], [], []>} : vector<8x32xbf16>, vector<32x32xbf16>, vector<8x32xf32> -> vector<8x32xf32>
    %610 = vector.broadcast %547 : vector<1x32xf32> to vector<8x32xf32>
    %611 = arith.addf %609, %610 : vector<8x32xf32>
    %cst_275 = arith.constant 0.000000e+00 : f32
    %612 = vector.broadcast %cst_275 : f32 to vector<8x32xf32>
    %613 = arith.maximumf %611, %612 : vector<8x32xf32>
    %614 = arith.addf %607, %613 : vector<8x32xf32>
    %615 = vector.shape_cast %614 : vector<8x32xf32> to vector<2x4x32xf32>
    %c28 = arith.constant 28 : index
    %c0_276 = arith.constant 0 : index
    %c0_277 = arith.constant 0 : index
    %616 = vector.load %arg2[%c28, %c0_276, %c0_277] : memref<29x32x32xbf16, #tpu.memory_space<vmem>>, vector<1x32x4xbf16>
    %617 = vector.shape_cast %616 : vector<1x32x4xbf16> to vector<32x4xbf16>
    %c28_278 = arith.constant 28 : index
    %c0_279 = arith.constant 0 : index
    %c0_280 = arith.constant 0 : index
    %618 = vector.load %arg3[%c28_278, %c0_279, %c0_280] : memref<29x1x32xf32, #tpu.memory_space<vmem>>, vector<1x1x4xf32>
    %619 = vector.shape_cast %618 : vector<1x1x4xf32> to vector<1x4xf32>
    %620 = vector.shape_cast %615 : vector<2x4x32xf32> to vector<8x32xf32>
    %621 = arith.truncf %620 : vector<8x32xf32> to vector<8x32xbf16>
    %cst_281 = arith.constant dense<0.000000e+00> : vector<8x4xf32>
    %622 = tpu.matmul %621, %617, %cst_281 {dimension_numbers = #tpu.dot_dimension_numbers<[1], [0], [0], [1], [0, 0, 1, 1], [], []>} : vector<8x32xbf16>, vector<32x4xbf16>, vector<8x4xf32> -> vector<8x4xf32>
    %623 = vector.broadcast %619 : vector<1x4xf32> to vector<8x4xf32>
    %624 = arith.addf %622, %623 : vector<8x4xf32>
    %625 = vector.shape_cast %624 : vector<8x4xf32> to vector<2x4x4xf32>
    %c0_282 = arith.constant 0 : index
    %c0_283 = arith.constant 0 : index
    %c0_284 = arith.constant 0 : index
    %626 = vector.load %arg5[%c0_282, %c0_283, %c0_284] : memref<2x4x4xf32, #tpu.memory_space<vmem>>, vector<2x4x4xf32>
    tpu.vector_store %arg5[%c0_282, %c0_283, %c0_284], %625 {strides = array<i32>} : memref<2x4x4xf32, #tpu.memory_space<vmem>>, vector<2x4x4xf32>,
    return
  }
  func.func @transform_0(%arg0: i32) -> (i32, i32, i32) {
    %c0_i32 = arith.constant 0 : i32
    %c0_i32_0 = arith.constant 0 : i32
    %c0_i32_1 = arith.constant 0 : i32
    return %arg0, %c0_i32, %c0_i32_0 : i32, i32, i32
  }
  func.func @transform_1(%arg0: i32) -> (i32, i32, i32) {
    %c0_i32 = arith.constant 0 : i32
    %c0_i32_0 = arith.constant 0 : i32
    %c0_i32_1 = arith.constant 0 : i32
    %c0_i32_2 = arith.constant 0 : i32
    return %c0_i32, %c0_i32_0, %c0_i32_1 : i32, i32, i32
  }
  func.func @transform_2(%arg0: i32) -> (i32, i32, i32) {
    %c0_i32 = arith.constant 0 : i32
    %c0_i32_0 = arith.constant 0 : i32
    %c0_i32_1 = arith.constant 0 : i32
    %c0_i32_2 = arith.constant 0 : i32
    return %c0_i32, %c0_i32_0, %c0_i32_1 : i32, i32, i32
  }
  func.func @transform_3(%arg0: i32) -> (i32, i32, i32) {
    %c0_i32 = arith.constant 0 : i32
    %c0_i32_0 = arith.constant 0 : i32
    %c0_i32_1 = arith.constant 0 : i32
    %c0_i32_2 = arith.constant 0 : i32
    return %c0_i32, %c0_i32_0, %c0_i32_1 : i32, i32, i32
  }
  func.func @transform_4(%arg0: i32) -> (i32, i32, i32) {
    %c0_i32 = arith.constant 0 : i32
    %c0_i32_0 = arith.constant 0 : i32
    %c0_i32_1 = arith.constant 0 : i32
    return %arg0, %c0_i32, %c0_i32_0 : i32, i32, i32
  }
}

</mosaic_0001>

<bundles_post_ra>
// kernel: set_transformer_forward.1
= control target key start
LH: loop header
LB: loop body
LE: loop exit
PB: predicated region body
PF: predicated region fallthrough
CT: control target
= control target key end

     0   :  { %vm57_vm0 = vcmask 1041408   ;;  %v6485_v2 = vmov 0.0   ;;  %vm6486_vm1 = vmmov 0   ;;  %vm53_vm2 = vcmask 31744   ;;  %s7517_s0 = inlined_call_operand.vmem [shape: f32[2,8,4], index: 0, kind: input, shape index: {}]   ;;  %s7518_s1 = inlined_call_operand.vmem [shape: bf16[29,32,32], index: 1, kind: input, shape index: {}]   ;;  %s7519_s2 = inlined_call_operand.vmem [shape: f32[29,1,32], index: 2, kind: input, shape index: {}]   ;;  %s7520_s3 = inlined_call_operand.vmem [shape: f32[3,8,32], index: 3, kind: input, shape index: {}]   ;;  %s7521_s4 = inlined_call_operand.hbm [shape: f32[2,4,4], index: 4, kind: output, shape index: {}]  }
   0x1   :  { %v5235_v0 = vld [vmem:[%s7518_s1 + $0x10] sm:$0x3]  ;;  %v19_v1 = vld [vmem:[%s7517_s0] sm:$0xff]  ;;  %5728 = vmatprep.subr.bf16.mxu0 %v6485_v2  ;;  %5730 = vmatprep.mubr.msk.bf16.mxu0 %vm6486_vm1, %v6485_v2  ;;  %v20_v4 = vld [vmem:[%s7517_s0 + $0x8] sm:$0xff]  ;;  %vm171_vm3 = vcmask 261120  }
   0x2   :  { %v59_v3 = vsel %vm57_vm0, %v5235_v0, 0  ;;  %v6297_v5 = vld [vmem:[%s7518_s1] sm:$0xff]   ;;  %v6533_v6 = vpack.c.bf16 %v20_v4, %v19_v1  ;;  %5734 = vmatprep.subr.bf16.mxu1 %v6485_v2  ;;  %5736 = vmatprep.mubr.msk.bf16.mxu1 %vm6486_vm1, %v6485_v2  ;;  %v6298_v8 = vld [vmem:[%s7518_s1 + $0x8] sm:$0xff]  }
   0x3   :  { %5729 = vmatpush3.bf16.msra.mxu0 %v59_v3  ;;  %v5237_v7 = vld [vmem:[%s7518_s1 + $0x20] sm:$0x3] }
   0x4   :  { %5740 = vmatprep.subr.bf16.mxu0 %v6485_v2  ;;  %v21_v9 = vld [vmem:[%s7520_s3] sm:$0xff]  ;;  %v109_v10 = vsel %vm57_vm0, %v5237_v7, 0 }
   0x5   :  { %5735 = vmatpush3.bf16.msra.mxu1 %v109_v10  ;;  %v152_v11 = vpack.c.bf16 %v21_v9, %v21_v9 }
   0x6   :  { %5731 = vmatmul.mubr.msk.bf16.vlgmr.msra.gmra.mrb[0].mxu0 %vm53_vm2, %v6533_v6  ;;  %5748 = vmatprep.subr.bf16.mxu1 %v6485_v2 }
   0x7   :  { %5741 = vmatpush3.bf16.msra.mxu0 %v6297_v5  ;;  %5744 = vmatprep.mubr.msk.bf16.mxu0 %vm6486_vm1, %v6485_v2 }
   0x8   :  { %5742 = vmatprep.subr.bf16.mxu0 %v6485_v2  ;;  %5737 = vmatmul.mubr.msk.bf16.vlgmr.msra.gmra.mrb[0].mxu1 %vm53_vm2, %v6533_v6 }
   0x9   :  { %5750 = vmatprep.mubr.msk.bf16.mxu1 %vm6486_vm1, %v6485_v2 }
   0xb   :  { %5743 = vmatpush3.bf16.msra.mxu0 %v6298_v8 }
   0xc   :  { %5754 = vmatprep.subr.bf16.mxu0 %v6485_v2 }
   0xe   :  { %5745 = vmatmul.mubr.msk.bf16.vlgmr.msra.gmra.mrb[4].mxu0 %vm171_vm3, %v152_v11 }
   0xf   :  { %5756 = vmatprep.mubr.msk.bf16.mxu0 %vm6486_vm1, %v6485_v2 }
  0x10   :  { %9 = vsyncpa [#allocation5], 0  ;;  %v5244_v12 = vld [vmem:[%s7519_s2 + $0x1] ss:$0 sm:$0xff]  ;;  %vm221_vm4 = vcmask 130048   ;;  %vm339_vm5 = vcmask 1043456  }
  0x11   :  { %v5246_v17 = vld [vmem:[%s7519_s2 + $0x2] ss:$0 sm:$0xff]  ;;  %v5248_v27 = vld [vmem:[%s7519_s2] ss:$0 sm:$0xff]  ;;  %vm311_vm6 = vcmask 64512   ;;  %s6487_s8 = smov 112  }
  0x12   :  { %s6488_s13 = smov 16   ;;  %vm3227_vm7 = vcmask 60416   ;;  %vm3967_vm8 = vcmask 27648   ;;  %s6489_s11 = smov [#allocation4]  }
  0x13   :  { %s5222_s12 = sshll.u32 %s6489_s11, 4  ;;  %s5223_s12 = int_to_ptr.vmem [resolvable:$true] %s5222_s12 }
  0x14   :  { %s6461_s14 = scalar_lea.vmem %s5223_s12, 128  ;;  %p6466_p1 = scmp.lt.s32.totalorder %s5223_s12, %s5223_s12 }
  0x15   :  { %p6462_p0 = scmp.ne.s32.totalorder %s5223_s12, %s6461_s14  ;;  %p6467_p2 = scmp.lt.s32.totalorder %s6461_s14, %s6461_s14 }
  0x17   :  { %p6468_p3 = por %p6467_p2, %p6466_p1 }
  0x19   :  { %p6469_p4 = pnand %p6468_p3, %p6462_p0 }
  0xd9   :  { %v95_v13 = vpop.f32.mrb[0].mxu0 }
  0xda   :  { %v96_v14 = vadd.f32 %v5244_v12, %v95_v13  ;;  %v5732_v15 = vpop.f32.mrb[1].mxu0 }
  0xdb   :  { %v98_v16 = vpop.f32.mrb[2].mxu0  ;;  %v145_v21 = vpop.f32.mrb[0].mxu1 }
  0xdc   :  { %v217_v18 = vpack.c.bf16 %v96_v14, %v96_v14  ;;  %v99_v19 = vadd.f32 %v5244_v12, %v98_v16  ;;  %v5733_v20 = vpop.f32.mrb[3].mxu0  ;;  %v5738_v22 = vpop.f32.mrb[1].mxu1  ;;  %v146_v25 = vadd.f32 %v5246_v17, %v145_v21 }
  0xdd   :  { %v148_v26 = vpop.f32.mrb[2].mxu1 }
  0xde   :  { %v226_v23 = vsel %vm221_vm4, %v217_v18, 0  ;;  %v218_v24 = vpack.c.bf16 %v99_v19, %v99_v19  ;;  %v149_v28 = vadd.f32 %v5246_v17, %v148_v26  ;;  %v5739_v29 = vpop.f32.mrb[3].mxu1  ;;  %v6577_v34 = vpack.c.bf16 %v146_v25, %v146_v25 }
  0xdf   :  { %5749 = vmatpush3.bf16.xpose.msra.mxu1 %v226_v23 }
  0xe0   :  { %v269_v30 = vsel %vm221_vm4, %v218_v24, 0  ;;  %5760 = vmatprep.subr.bf16.mxu1 %v6485_v2  ;;  %v6579_v35 = vpack.c.bf16 %v149_v28, %v149_v28  ;;  %v341_v40 = vsel %vm339_vm5, %v6577_v34, 0 }
  0xe1   :  { %v209_v31 = vpop.f32.mrb[4].mxu0  ;;  %5755 = vmatpush3.bf16.xpose.msra.mxu0 %v269_v30 }
  0xe2   :  { %v6575_v32 = vadd.f32 %v5248_v27, %v209_v31  ;;  %v5746_v33 = vpop.f32.mrb[5].mxu0  ;;  %5766 = vmatprep.subr.bf16.mxu0 %v6485_v2  ;;  %v387_v41 = vsel %vm339_vm5, %v6579_v35, 0 }
  0xe3   :  { %v212_v36 = vpop.f32.mrb[6].mxu0 }
  0xe4   :  { %v215_v37 = vmul.f32 0.17677669, %v6575_v32  ;;  %v5747_v38 = vpop.f32.mrb[7].mxu0 }
  0xe6   :  { %v216_v39 = vpack.c.bf16 %v215_v37, %v215_v37 }
  0xe8   :  { %5751 = vmatmul.mubr.msk.bf16.vlgmr.msra.gmra.mrb[4].mxu1 %vm221_vm4, %v216_v39  ;;  %5757 = vmatmul.mubr.msk.bf16.vlgmr.msra.gmra.mrb[8].mxu0 %vm221_vm4, %v216_v39 }
  0xe9   :  { %5761 = vmatpush3.bf16.msra.mxu1 %v341_v40  ;;  %5767 = vmatpush3.bf16.msra.mxu0 %v387_v41 }
  0xea   :  { %5762 = vmatprep.mubr.msk.bf16.mxu1 %vm6486_vm1, %v6485_v2  ;;  %5772 = vmatprep.subr.bf16.mxu1 %v6485_v2 }
  0xeb   :  { %5768 = vmatprep.mubr.msk.bf16.mxu0 %vm6486_vm1, %v6485_v2  ;;  %5778 = vmatprep.subr.bf16.mxu0 %v6485_v2 }
 0x1bb   :  { %v262_v42 = vpop.f32.mrb[4].mxu1  ;;  %v305_v43 = vpop.f32.mrb[8].mxu0 }
 0x1bc   :  { %v5752_v44 = vpop.f32.mrb[5].mxu1  ;;  %v5758_v45 = vpop.f32.mrb[9].mxu0  ;;  %v312_v46 = vsel %vm311_vm6, %v262_v42, -inf  ;;  %v315_v51 = vsel %vm311_vm6, %v305_v43, -inf }
 0x1bd   :  { %313 = vmax.xlane.f32.xlu0 %v312_v46  ;;  %v265_v47 = vpop.f32.mrb[6].mxu1  ;;  %v308_v48 = vpop.f32.mrb[10].mxu0 }
 0x1be   :  { %v5753_v49 = vpop.f32.mrb[7].mxu1  ;;  %v5759_v50 = vpop.f32.mrb[11].mxu0 }
 0x1c1   :  { %316 = vmax.xlane.f32.xlu0 %v315_v51 }
 0x1d7   :  { %433 = vrot.lane.b32.xlu0 %v217_v18, %s6487_s8 }
 0x24a   :  { %v314_v52 = vpop.xlane.xlu0 %313 }
 0x24b   :  { %v318_v53 = vsub.f32 %v262_v42, %v314_v52 }
 0x24d   :  { %v320_v54 = vmul.f32 1.442695, %v318_v53 }
 0x24e   :  { %v317_v55 = vpop.xlane.xlu0 %316 }
 0x24f   :  { %6349 = vpow2.f32 %v320_v54  ;;  %v319_v56 = vsub.f32 %v305_v43, %v317_v55  ;;  %v6299_v54 = vld [vmem:[%s7518_s1 + $0x30] sm:$0xff]   ;;  %v6300_v55 = vld [vmem:[%s7518_s1 + $0x38] sm:$0xff]  }
 0x251   :  { %v322_v57 = vmul.f32 1.442695, %v319_v56 }
 0x252   :  { %v434_v3 = vpop.permute.xlu0 %433 }
 0x253   :  { %6351 = vpow2.f32 %v322_v57  ;;  %v439_v7 = vsel %vm221_vm4, %v434_v3, 0 }
 0x259   :  { %v6350_v58 = vpop.eup %6349 }
 0x25a   :  { %v324_v59 = vsel %vm311_vm6, %v6350_v58, 0.0 }
 0x25b   :  { %325 = vadd.xlane.f32.xlu1 %v324_v59 }
 0x25d   :  { %v6352_v60 = vpop.eup %6351 }
 0x25e   :  { %v327_v61 = vsel %vm311_vm6, %v6352_v60, 0.0 }
 0x25f   :  { %328 = vadd.xlane.f32.xlu1 %v327_v61 }
 0x270   :  { %482 = vrot.lane.b32.xlu1 %v218_v24, %s6487_s8 }
 0x274   :  { %430 = vrot.lane.b32.xlu1 %v216_v39, %s6487_s8 }
 0x2e8   :  { %v326_v62 = vpop.xlane.xlu1 %325 }
 0x2e9   :  { %6353 = vrcp.f32 %v326_v62 }
 0x2ec   :  { %v329_v63 = vpop.xlane.xlu1 %328 }
 0x2ed   :  { %6355 = vrcp.f32 %v329_v63 }
 0x2f0   :  { %v483_v9 = vpop.permute.xlu1 %482 }
 0x2f1   :  { %v485_v11 = vsel %vm221_vm4, %v483_v9, 0  ;;  %v6301_v9 = vld [vmem:[%s7518_s1 + $0x50] sm:$0xff]  }
 0x2f3   :  { %v6354_v0 = vpop.eup %6353 }
 0x2f4   :  { %v332_v1 = vmul.f32 %v6354_v0, %v6350_v58  ;;  %v431_v12 = vpop.permute.xlu1 %430 }
 0x2f6   :  { %v334_v4 = vpack.c.bf16 %v332_v1, %v332_v1 }
 0x2f7   :  { %v6356_v5 = vpop.eup %6355 }
 0x2f8   :  { %5763 = vmatmul.mubr.msk.bf16.vlgmr.msra.gmra.mrb[8].mxu1 %vm311_vm6, %v334_v4  ;;  %v333_v8 = vmul.f32 %v6356_v5, %v6352_v60 }
 0x2f9   :  { %5773 = vmatpush3.bf16.xpose.msra.mxu1 %v439_v7  ;;  %5774 = vmatprep.mubr.msk.bf16.mxu1 %vm6486_vm1, %v6485_v2 }
 0x2fa   :  { %v335_v10 = vpack.c.bf16 %v333_v8, %v333_v8  ;;  %5784 = vmatprep.subr.bf16.mxu1 %v6485_v2 }
 0x2fc   :  { %5769 = vmatmul.mubr.msk.bf16.vlgmr.msra.gmra.mrb[12].mxu0 %vm311_vm6, %v335_v10  ;;  %v6302_v10 = vld [vmem:[%s7518_s1 + $0x60] sm:$0xff]  }
 0x2fd   :  { %5779 = vmatpush3.bf16.xpose.msra.mxu0 %v485_v11  ;;  %5780 = vmatprep.mubr.msk.bf16.mxu0 %vm6486_vm1, %v6485_v2  ;;  %v6304_v11 = vld [vmem:[%s7518_s1 + $0x68] sm:$0xff]  }
 0x2fe   :  { %5790 = vmatprep.subr.bf16.mxu0 %v6485_v2 }
 0x300   :  { %5775 = vmatmul.mubr.msk.bf16.vlgmr.msra.gmra.mrb[12].mxu1 %vm221_vm4, %v431_v12 }
 0x301   :  { %5786 = vmatprep.mubr.msk.bf16.mxu1 %vm6486_vm1, %v6485_v2 }
 0x304   :  { %5781 = vmatmul.mubr.msk.bf16.vlgmr.msra.gmra.mrb[16].mxu0 %vm221_vm4, %v431_v12  ;;  %v5260_v12 = vld [vmem:[%s7519_s2 + $0x3] ss:$0 sm:$0xff] }
 0x305   :  { %5792 = vmatprep.mubr.msk.bf16.mxu0 %vm6486_vm1, %v6485_v2 }
 0x3cb   :  { %v6618_v13 = vpop.f32.mrb[8].mxu1 }
 0x3cc   :  { %v5764_v14 = vpop.f32.mrb[9].mxu1 }
 0x3cd   :  { %v380_v15 = vpop.f32.mrb[10].mxu1 }
 0x3ce   :  { %v5765_v16 = vpop.f32.mrb[11].mxu1 }
 0x3cf   :  { %v6620_v17 = vpop.f32.mrb[12].mxu0 }
 0x3d0   :  { %v5770_v18 = vpop.f32.mrb[13].mxu0 }
 0x3d1   :  { %v426_v19 = vpop.f32.mrb[14].mxu0 }
 0x3d2   :  { %v5771_v20 = vpop.f32.mrb[15].mxu0 }
 0x3d3   :  { %v475_v21 = vpop.f32.mrb[12].mxu1 }
 0x3d4   :  { %v5776_v22 = vpop.f32.mrb[13].mxu1  ;;  %v527_v23 = vsel %vm311_vm6, %v475_v21, -inf }
 0x3d5   :  { %528 = vmax.xlane.f32.xlu1 %v527_v23  ;;  %v478_v24 = vpop.f32.mrb[14].mxu1  ;;  %v5264_v23 = vld [vmem:[%s7518_s1 + $0x40] sm:$0x3] }
 0x3d6   :  { %v5777_v25 = vpop.f32.mrb[15].mxu1 }
 0x3d7   :  { %v521_v26 = vpop.f32.mrb[16].mxu0 }
 0x3d8   :  { %v5782_v27 = vpop.f32.mrb[17].mxu0  ;;  %v530_v28 = vsel %vm311_vm6, %v521_v26, -inf }
 0x3d9   :  { %531 = vmax.xlane.f32.xlu0 %v530_v28  ;;  %v524_v29 = vpop.f32.mrb[18].mxu0  ;;  %v886_v27 = vsel %vm57_vm0, %v5264_v23, 0  ;;  %v5281_v28 = vld [vmem:[%s7519_s2 + $0x5] ss:$0 sm:$0xff] }
 0x3da   :  { %v5783_v30 = vpop.f32.mrb[19].mxu0 }
 0x3e6   :  { %552 = vrot.lane.b32.xlu1 %v6577_v34, %s6487_s8 }
 0x462   :  { %v529_v31 = vpop.xlane.xlu1 %528 }
 0x463   :  { %v533_v33 = vsub.f32 %v475_v21, %v529_v31 }
 0x465   :  { %v535_v36 = vmul.f32 1.442695, %v533_v33 }
 0x466   :  { %v553_v37 = vpop.permute.xlu1 %552  ;;  %v532_v38 = vpop.xlane.xlu0 %531 }
 0x467   :  { %6357 = vpow2.f32 %v535_v36  ;;  %v558_v39 = vsel %vm339_vm5, %v553_v37, 0  ;;  %v534_v40 = vsub.f32 %v521_v26, %v532_v38 }
 0x468   :  { %5785 = vmatpush3.bf16.msra.mxu1 %v558_v39 }
 0x469   :  { %v537_v41 = vmul.f32 1.442695, %v534_v40  ;;  %5796 = vmatprep.subr.bf16.mxu1 %v6485_v2 }
 0x46b   :  { %6359 = vpow2.f32 %v537_v41 }
 0x471   :  { %v6358_v42 = vpop.eup %6357 }
 0x472   :  { %v539_v43 = vsel %vm311_vm6, %v6358_v42, 0.0 }
 0x473   :  { %540 = vadd.xlane.f32.xlu0 %v539_v43 }
 0x475   :  { %v6360_v44 = vpop.eup %6359 }
 0x476   :  { %v542_v34 = vsel %vm311_vm6, %v6360_v44, 0.0 }
 0x477   :  { %543 = vadd.xlane.f32.xlu0 %v542_v34  ;;  %v5289_v34 = vld [vmem:[%s7519_s2 + $0x4] ss:$0 sm:$0xff] }
 0x48d   :  { %601 = vrot.lane.b32.xlu0 %v6579_v35, %s6487_s8 }
 0x500   :  { %v541_v45 = vpop.xlane.xlu0 %540 }
 0x501   :  { %6361 = vrcp.f32 %v541_v45 }
 0x504   :  { %v544_v46 = vpop.xlane.xlu0 %543 }
 0x505   :  { %6363 = vrcp.f32 %v544_v46 }
 0x508   :  { %v602_v47 = vpop.permute.xlu0 %601 }
 0x509   :  { %v607_v48 = vsel %vm339_vm5, %v602_v47, 0 }
 0x50a   :  { %5791 = vmatpush3.bf16.msra.mxu0 %v607_v48 }
 0x50b   :  { %v6362_v49 = vpop.eup %6361  ;;  %5804 = vmatprep.subr.bf16.mxu0 %v6485_v2 }
 0x50c   :  { %v547_v50 = vmul.f32 %v6362_v49, %v6358_v42 }
 0x50e   :  { %v549_v51 = vpack.c.bf16 %v547_v50, %v547_v50 }
 0x50f   :  { %v6364_v52 = vpop.eup %6363 }
 0x510   :  { %v548_v53 = vmul.f32 %v6364_v52, %v6360_v44  ;;  %5787 = vmatmul.mubr.msk.bf16.vlgmr.msra.gmra.mrb[16].mxu1 %vm311_vm6, %v549_v51 }
 0x511   :  { %5800 = vmatprep.mubr.msk.bf16.mxu1 %vm6486_vm1, %v6485_v2  ;;  %5797 = vmatpush3.bf16.msra.mxu1 %v6299_v54 }
 0x512   :  { %v550_v35 = vpack.c.bf16 %v548_v53, %v548_v53  ;;  %5798 = vmatprep.subr.bf16.mxu1 %v6485_v2 }
 0x514   :  { %5793 = vmatmul.mubr.msk.bf16.vlgmr.msra.gmra.mrb[20].mxu0 %vm311_vm6, %v550_v35 }
 0x515   :  { %5808 = vmatprep.mubr.msk.bf16.mxu0 %vm6486_vm1, %v6485_v2  ;;  %5799 = vmatpush3.bf16.msra.mxu1 %v6300_v55 }
 0x516   :  { %5812 = vmatprep.subr.bf16.mxu1 %v6485_v2  ;;  %5805 = vmatpush3.bf16.msra.mxu0 %v6301_v9 }
 0x517   :  { %5806 = vmatprep.subr.bf16.mxu0 %v6485_v2 }
 0x5e3   :  { %v594_v56 = vpop.f32.mrb[16].mxu1 }
 0x5e4   :  { %651 = vrot.lane.b32.xlu1 %v594_v56, %s6488_s13  ;;  %v5788_v57 = vpop.f32.mrb[17].mxu1 }
 0x5e5   :  { %v597_v58 = vpop.f32.mrb[18].mxu1 }
 0x5e6   :  { %v5789_v59 = vpop.f32.mrb[19].mxu1 }
 0x5e7   :  { %v643_v60 = vpop.f32.mrb[20].mxu0 }
 0x5e8   :  { %653 = vrot.lane.b32.xlu1 %v643_v60, %s6488_s13  ;;  %v5794_v61 = vpop.f32.mrb[21].mxu0 }
 0x5e9   :  { %v646_v62 = vpop.f32.mrb[22].mxu0 }
 0x5ea   :  { %v5795_v63 = vpop.f32.mrb[23].mxu0 }
 0x656   :  { %v652_v0 = vpop.permute.xlu1 %651 }
 0x657   :  { %v657_v1 = vsel %vm221_vm4, %v6618_v13, %v652_v0 }
 0x658   :  { %v659_v5 = vadd.f32 %v657_v1, %v6575_v32 }
 0x65a   :  { %v654_v3 = vpop.permute.xlu1 %653 }
 0x65b   :  { %v658_v4 = vsel %vm221_vm4, %v6620_v17, %v654_v3 }
 0x65c   :  { %v660_v7 = vadd.f32 %v658_v4, %v6575_v32  ;;  %v6303_v32 = vld [vmem:[%s7518_s1 + $0x58] sm:$0xff]  }
 0x65d   :  { %5807 = vmatpush3.bf16.msra.mxu0 %v6303_v32 }
 0x65e   :  { %v661_v8 = vpack.c.bf16 %v660_v7, %v659_v5  ;;  %5820 = vmatprep.subr.bf16.mxu0 %v6485_v2 }
 0x660   :  { %5801 = vmatmul.mubr.msk.bf16.vlgmr.msra.gmra.mrb[20].mxu1 %vm171_vm3, %v661_v8 }
 0x661   :  { %5816 = vmatprep.mubr.msk.bf16.mxu1 %vm6486_vm1, %v6485_v2  ;;  %5813 = vmatpush3.bf16.msra.mxu1 %v6302_v10 }
 0x662   :  { %5814 = vmatprep.subr.bf16.mxu1 %v6485_v2 }
 0x665   :  { %5815 = vmatpush3.bf16.msra.mxu1 %v6304_v11 }
 0x666   :  { %5826 = vmatprep.subr.bf16.mxu1 %v6485_v2 }
 0x733   :  { %v717_v13 = vpop.f32.mrb[20].mxu1 }
 0x734   :  { %v718_v14 = vadd.f32 %v5260_v12, %v717_v13  ;;  %v5802_v15 = vpop.f32.mrb[21].mxu1 }
 0x735   :  { %v720_v16 = vpop.f32.mrb[22].mxu1 }
 0x736   :  { %v724_v17 = vmax.f32 %v718_v14, 0.0  ;;  %v721_v18 = vadd.f32 %v5260_v12, %v720_v16  ;;  %v5803_v19 = vpop.f32.mrb[23].mxu1 }
 0x738   :  { %v726_v20 = vadd.f32 %v724_v17, %v659_v5  ;;  %v725_v21 = vmax.f32 %v721_v18, 0.0 }
 0x73a   :  { %728 = vst.msk [vmem:[#allocation3] sm:$0xff] %vm171_vm3, %v726_v20  ;;  %v727_v22 = vadd.f32 %v725_v21, %v660_v7 }
 0x73c   :  { %729 = vst.msk [vmem:[#allocation3 + $0x8] sm:$0xff] %vm171_vm3, %v727_v22 }
 0x741   :  { %v730_v24 = vld [vmem:[#allocation3] sm:$0xff] }
 0x743   :  { %v731_v25 = vld [vmem:[#allocation3 + $0x8] sm:$0xff] }
 0x744   :  { %v757_v26 = vpack.c.bf16 %v731_v25, %v730_v24 }
 0x746   :  { %5809 = vmatmul.mubr.msk.bf16.vlgmr.msra.gmra.mrb[24].mxu0 %vm171_vm3, %v757_v26  ;;  %5817 = vmatmul.mubr.msk.bf16.vlgmr.msra.gmra.mrb[24].mxu1 %vm171_vm3, %v757_v26 }
 0x747   :  { %5821 = vmatpush3.bf16.msra.mxu0 %v886_v27  ;;  %5822 = vmatprep.mubr.msk.bf16.mxu0 %vm6486_vm1, %v6485_v2 }
 0x748   :  { %5832 = vmatprep.subr.bf16.mxu0 %v6485_v2  ;;  %5828 = vmatprep.mubr.msk.bf16.mxu1 %vm6486_vm1, %v6485_v2 }
 0x74e   :  { %5823 = vmatmul.mubr.msk.bf16.vlgmr.msra.gmra.mrb[28].mxu0 %vm53_vm2, %v6533_v6  ;;  %v5285_v6 = vld [vmem:[%s7519_s2 + $0x6] ss:$0 sm:$0xff] }
 0x74f   :  { %5834 = vmatprep.mubr.msk.bf16.mxu0 %vm6486_vm1, %v6485_v2 }
 0x819   :  { %v813_v29 = vpop.f32.mrb[24].mxu0  ;;  %v872_v30 = vpop.f32.mrb[24].mxu1 }
 0x81a   :  { %v814_v31 = vadd.f32 %v5281_v28, %v813_v29  ;;  %v5810_v33 = vpop.f32.mrb[25].mxu0  ;;  %v5818_v36 = vpop.f32.mrb[25].mxu1  ;;  %v873_v45 = vadd.f32 %v5285_v6, %v872_v30 }
 0x81b   :  { %v816_v37 = vpop.f32.mrb[26].mxu0  ;;  %v875_v38 = vpop.f32.mrb[26].mxu1 }
 0x81c   :  { %v933_v39 = vpack.c.bf16 %v814_v31, %v814_v31  ;;  %v817_v40 = vadd.f32 %v5281_v28, %v816_v37  ;;  %v5811_v41 = vpop.f32.mrb[27].mxu0  ;;  %v5819_v42 = vpop.f32.mrb[27].mxu1  ;;  %v876_v48 = vadd.f32 %v5285_v6, %v875_v38  ;;  %v6710_v52 = vpack.c.bf16 %v873_v45, %v873_v45 }
 0x81e   :  { %v941_v43 = vsel %vm221_vm4, %v933_v39, 0  ;;  %v934_v44 = vpack.c.bf16 %v817_v40, %v817_v40  ;;  %v6715_v55 = vpack.c.bf16 %v876_v48, %v876_v48  ;;  %v1057_v58 = vsel %vm339_vm5, %v6710_v52, 0 }
 0x81f   :  { %5827 = vmatpush3.bf16.xpose.msra.mxu1 %v941_v43 }
 0x820   :  { %v987_v46 = vsel %vm221_vm4, %v934_v44, 0  ;;  %5838 = vmatprep.subr.bf16.mxu1 %v6485_v2  ;;  %v1103_v60 = vsel %vm339_vm5, %v6715_v55, 0 }
 0x821   :  { %v922_v47 = vpop.f32.mrb[28].mxu0  ;;  %5833 = vmatpush3.bf16.xpose.msra.mxu0 %v987_v46 }
 0x822   :  { %v6707_v49 = vadd.f32 %v5289_v34, %v922_v47  ;;  %v5824_v50 = vpop.f32.mrb[29].mxu0  ;;  %5844 = vmatprep.subr.bf16.mxu0 %v6485_v2 }
 0x823   :  { %v925_v51 = vpop.f32.mrb[30].mxu0 }
 0x824   :  { %v929_v53 = vmul.f32 0.17677669, %v6707_v49  ;;  %v6713_v35 = vadd.f32 %v5289_v34, %v925_v51  ;;  %v5825_v54 = vpop.f32.mrb[31].mxu0 }
 0x826   :  { %v931_v56 = vpack.c.bf16 %v929_v53, %v929_v53  ;;  %v930_v57 = vmul.f32 0.17677669, %v6713_v35 }
 0x828   :  { %v932_v59 = vpack.c.bf16 %v930_v57, %v930_v57  ;;  %5829 = vmatmul.mubr.msk.bf16.vlgmr.msra.gmra.mrb[28].mxu1 %vm221_vm4, %v931_v56 }
 0x829   :  { %5839 = vmatpush3.bf16.msra.mxu1 %v1057_v58  ;;  %5840 = vmatprep.mubr.msk.bf16.mxu1 %vm6486_vm1, %v6485_v2 }
 0x82a   :  { %5835 = vmatmul.mubr.msk.bf16.vlgmr.msra.gmra.mrb[32].mxu0 %vm221_vm4, %v932_v59  ;;  %5850 = vmatprep.subr.bf16.mxu1 %v6485_v2 }
 0x82b   :  { %5845 = vmatpush3.bf16.msra.mxu0 %v1103_v60  ;;  %5846 = vmatprep.mubr.msk.bf16.mxu0 %vm6486_vm1, %v6485_v2 }
 0x82c   :  { %5856 = vmatprep.subr.bf16.mxu0 %v6485_v2 }
 0x8fb   :  { %v977_v61 = vpop.f32.mrb[28].mxu1 }
 0x8fc   :  { %v5830_v62 = vpop.f32.mrb[29].mxu1  ;;  %v1029_v63 = vsel %vm311_vm6, %v977_v61, -inf }
 0x8fd   :  { %1030 = vmax.xlane.f32.xlu1 %v1029_v63  ;;  %v980_v0 = vpop.f32.mrb[30].mxu1  ;;  %v1023_v1 = vpop.f32.mrb[32].mxu0 }
 0x8fe   :  { %v5831_v3 = vpop.f32.mrb[31].mxu1  ;;  %v5836_v4 = vpop.f32.mrb[33].mxu0  ;;  %v1032_v5 = vsel %vm311_vm6, %v1023_v1, -inf }
 0x8ff   :  { %1033 = vmax.xlane.f32.xlu0 %v1032_v5  ;;  %v1026_v7 = vpop.f32.mrb[34].mxu0 }
 0x900   :  { %v5837_v8 = vpop.f32.mrb[35].mxu0 }
 0x90e   :  { %1149 = vrot.lane.b32.xlu1 %v933_v39, %s6487_s8 }
 0x912   :  { %1146 = vrot.lane.b32.xlu1 %v931_v56, %s6487_s8 }
 0x916   :  { %1198 = vrot.lane.b32.xlu1 %v932_v59, %s6487_s8 }
 0x98a   :  { %v1031_v9 = vpop.xlane.xlu1 %1030 }
 0x98b   :  { %v1035_v10 = vsub.f32 %v977_v61, %v1031_v9 }
 0x98c   :  { %v1034_v32 = vpop.xlane.xlu0 %1033 }
 0x98d   :  { %v1037_v11 = vmul.f32 1.442695, %v1035_v10  ;;  %v1036_v12 = vsub.f32 %v1023_v1, %v1034_v32 }
 0x98e   :  { %v1150_v22 = vpop.permute.xlu1 %1149 }
 0x98f   :  { %6365 = vpow2.f32 %v1037_v11  ;;  %v1039_v13 = vmul.f32 1.442695, %v1036_v12  ;;  %v1155_v25 = vsel %vm221_vm4, %v1150_v22, 0  ;;  %v6305_v11 = vld [vmem:[%s7518_s1 + $0x70] sm:$0xff]   ;;  %v6306_v12 = vld [vmem:[%s7518_s1 + $0x78] sm:$0xff]  }
 0x991   :  { %6367 = vpow2.f32 %v1039_v13 }
 0x992   :  { %v1147_v30 = vpop.permute.xlu1 %1146 }
 0x996   :  { %v1199_v31 = vpop.permute.xlu1 %1198 }
 0x999   :  { %v6366_v14 = vpop.eup %6365 }
 0x99a   :  { %v1041_v15 = vsel %vm311_vm6, %v6366_v14, 0.0 }
 0x99b   :  { %v6368_v16 = vpop.eup %6367  ;;  %1042 = vadd.xlane.f32.xlu0 %v1041_v15 }
 0x99c   :  { %v1044_v17 = vsel %vm311_vm6, %v6368_v16, 0.0 }
 0x99f   :  { %1045 = vadd.xlane.f32.xlu0 %v1044_v17 }
 0x9b5   :  { %1201 = vrot.lane.b32.xlu0 %v934_v44, %s6487_s8 }
 0xa28   :  { %v1043_v18 = vpop.xlane.xlu0 %1042 }
 0xa29   :  { %6369 = vrcp.f32 %v1043_v18 }
 0xa2c   :  { %v1046_v19 = vpop.xlane.xlu0 %1045 }
 0xa2d   :  { %6371 = vrcp.f32 %v1046_v19 }
 0xa30   :  { %v1202_v27 = vpop.permute.xlu0 %1201 }
 0xa31   :  { %v1207_v29 = vsel %vm221_vm4, %v1202_v27, 0 }
 0xa33   :  { %v6370_v20 = vpop.eup %6369 }
 0xa34   :  { %v1049_v21 = vmul.f32 %v6370_v20, %v6366_v14 }
 0xa36   :  { %v1051_v23 = vpack.c.bf16 %v1049_v21, %v1049_v21 }
 0xa37   :  { %v6372_v24 = vpop.eup %6371 }
 0xa38   :  { %v1050_v26 = vmul.f32 %v6372_v24, %v6368_v16  ;;  %5841 = vmatmul.mubr.msk.bf16.vlgmr.msra.gmra.mrb[32].mxu1 %vm311_vm6, %v1051_v23 }
 0xa39   :  { %5851 = vmatpush3.bf16.xpose.msra.mxu1 %v1155_v25  ;;  %5852 = vmatprep.mubr.msk.bf16.mxu1 %vm6486_vm1, %v6485_v2 }
 0xa3a   :  { %v1052_v28 = vpack.c.bf16 %v1050_v26, %v1050_v26  ;;  %5862 = vmatprep.subr.bf16.mxu1 %v6485_v2 }
 0xa3c   :  { %5847 = vmatmul.mubr.msk.bf16.vlgmr.msra.gmra.mrb[36].mxu0 %vm311_vm6, %v1052_v28  ;;  %v6307_v28 = vld [vmem:[%s7518_s1 + $0x90] sm:$0xff]  }
 0xa3d   :  { %5857 = vmatpush3.bf16.xpose.msra.mxu0 %v1207_v29  ;;  %5858 = vmatprep.mubr.msk.bf16.mxu0 %vm6486_vm1, %v6485_v2  ;;  %v6308_v29 = vld [vmem:[%s7518_s1 + $0xa0] sm:$0xff]  }
 0xa3e   :  { %5868 = vmatprep.subr.bf16.mxu0 %v6485_v2 }
 0xa40   :  { %5853 = vmatmul.mubr.msk.bf16.vlgmr.msra.gmra.mrb[36].mxu1 %vm221_vm4, %v1147_v30  ;;  %v5299_v30 = vld [vmem:[%s7519_s2 + $0x7] ss:$0 sm:$0xff] }
 0xa41   :  { %5864 = vmatprep.mubr.msk.bf16.mxu1 %vm6486_vm1, %v6485_v2 }
 0xa44   :  { %5859 = vmatmul.mubr.msk.bf16.vlgmr.msra.gmra.mrb[40].mxu0 %vm221_vm4, %v1199_v31 }
 0xa45   :  { %5870 = vmatprep.mubr.msk.bf16.mxu0 %vm6486_vm1, %v6485_v2 }
 0xb0b   :  { %v6754_v33 = vpop.f32.mrb[32].mxu1 }
 0xb0c   :  { %v5842_v36 = vpop.f32.mrb[33].mxu1 }
 0xb0d   :  { %v1096_v37 = vpop.f32.mrb[34].mxu1 }
 0xb0e   :  { %v5843_v38 = vpop.f32.mrb[35].mxu1 }
 0xb0f   :  { %v6756_v39 = vpop.f32.mrb[36].mxu0 }
 0xb10   :  { %v5848_v40 = vpop.f32.mrb[37].mxu0 }
 0xb11   :  { %v1142_v41 = vpop.f32.mrb[38].mxu0 }
 0xb12   :  { %v5849_v42 = vpop.f32.mrb[39].mxu0 }
 0xb13   :  { %v1191_v6 = vpop.f32.mrb[36].mxu1 }
 0xb14   :  { %v5854_v43 = vpop.f32.mrb[37].mxu1  ;;  %v1249_v44 = vsel %vm311_vm6, %v1191_v6, -inf }
 0xb15   :  { %1250 = vmax.xlane.f32.xlu1 %v1249_v44  ;;  %v1194_v34 = vpop.f32.mrb[38].mxu1 }
 0xb16   :  { %v5855_v45 = vpop.f32.mrb[39].mxu1  ;;  %v6311_v34 = vld [vmem:[%s7518_s1 + $0x80] sm:$0xff]  }
 0xb17   :  { %v1243_v46 = vpop.f32.mrb[40].mxu0 }
 0xb18   :  { %v5860_v47 = vpop.f32.mrb[41].mxu0  ;;  %v1252_v48 = vsel %vm311_vm6, %v1243_v46, -inf }
 0xb19   :  { %1253 = vmax.xlane.f32.xlu0 %v1252_v48  ;;  %v1246_v50 = vpop.f32.mrb[42].mxu0  ;;  %v5233_v47 = vld [vmem:[%s7520_s3 + $0x8] sm:$0xff] }
 0xb1a   :  { %v5861_v51 = vpop.f32.mrb[43].mxu0  ;;  %v1604_v48 = vpack.c.bf16 %v5233_v47, %v5233_v47  ;;  %v5323_v50 = vld [vmem:[%s7519_s2 + $0x9] ss:$0 sm:$0xff] }
 0xb26   :  { %1274 = vrot.lane.b32.xlu1 %v6710_v52, %s6487_s8 }
 0xba2   :  { %v1251_v53 = vpop.xlane.xlu1 %1250 }
 0xba3   :  { %v1255_v54 = vsub.f32 %v1191_v6, %v1251_v53 }
 0xba5   :  { %v1257_v56 = vmul.f32 1.442695, %v1255_v54 }
 0xba6   :  { %v1275_v57 = vpop.permute.xlu1 %1274  ;;  %v1254_v58 = vpop.xlane.xlu0 %1253 }
 0xba7   :  { %6373 = vpow2.f32 %v1257_v56  ;;  %v1280_v59 = vsel %vm339_vm5, %v1275_v57, 0  ;;  %v1256_v60 = vsub.f32 %v1243_v46, %v1254_v58  ;;  %v6312_v46 = vld [vmem:[%s7518_s1 + $0x88] sm:$0xff]  }
 0xba8   :  { %5863 = vmatpush3.bf16.msra.mxu1 %v1280_v59 }
 0xba9   :  { %v1259_v61 = vmul.f32 1.442695, %v1256_v60  ;;  %5874 = vmatprep.subr.bf16.mxu1 %v6485_v2 }
 0xbab   :  { %6375 = vpow2.f32 %v1259_v61 }
 0xbb1   :  { %v6374_v62 = vpop.eup %6373 }
 0xbb2   :  { %v1261_v63 = vsel %vm311_vm6, %v6374_v62, 0.0 }
 0xbb3   :  { %1262 = vadd.xlane.f32.xlu0 %v1261_v63 }
 0xbb5   :  { %v6376_v0 = vpop.eup %6375 }
 0xbb6   :  { %v1264_v52 = vsel %vm311_vm6, %v6376_v0, 0.0 }
 0xbb7   :  { %1265 = vadd.xlane.f32.xlu0 %v1264_v52 }
 0xbcd   :  { %1323 = vrot.lane.b32.xlu0 %v6715_v55, %s6487_s8 }
 0xc40   :  { %v1263_v1 = vpop.xlane.xlu0 %1262 }
 0xc41   :  { %6377 = vrcp.f32 %v1263_v1 }
 0xc44   :  { %v1266_v3 = vpop.xlane.xlu0 %1265 }
 0xc45   :  { %6379 = vrcp.f32 %v1266_v3  ;;  %v5331_v3 = vld [vmem:[%s7519_s2 + $0x8] ss:$0 sm:$0xff] }
 0xc48   :  { %v1324_v4 = vpop.permute.xlu0 %1323 }
 0xc49   :  { %v1329_v5 = vsel %vm339_vm5, %v1324_v4, 0 }
 0xc4a   :  { %5869 = vmatpush3.bf16.msra.mxu0 %v1329_v5 }
 0xc4b   :  { %v6378_v7 = vpop.eup %6377  ;;  %5882 = vmatprep.subr.bf16.mxu0 %v6485_v2 }
 0xc4c   :  { %v1269_v8 = vmul.f32 %v6378_v7, %v6374_v62 }
 0xc4e   :  { %v1271_v9 = vpack.c.bf16 %v1269_v8, %v1269_v8 }
 0xc4f   :  { %v6380_v10 = vpop.eup %6379 }
 0xc50   :  { %v1270_v32 = vmul.f32 %v6380_v10, %v6376_v0  ;;  %5865 = vmatmul.mubr.msk.bf16.vlgmr.msra.gmra.mrb[40].mxu1 %vm311_vm6, %v1271_v9  ;;  %v5327_v0 = vld [vmem:[%s7519_s2 + $0xa] ss:$0 sm:$0xff] }
 0xc51   :  { %5878 = vmatprep.mubr.msk.bf16.mxu1 %vm6486_vm1, %v6485_v2  ;;  %5875 = vmatpush3.bf16.msra.mxu1 %v6305_v11 }
 0xc52   :  { %v1272_v55 = vpack.c.bf16 %v1270_v32, %v1270_v32  ;;  %5876 = vmatprep.subr.bf16.mxu1 %v6485_v2 }
 0xc54   :  { %5871 = vmatmul.mubr.msk.bf16.vlgmr.msra.gmra.mrb[44].mxu0 %vm311_vm6, %v1272_v55 }
 0xc55   :  { %5886 = vmatprep.mubr.msk.bf16.mxu0 %vm6486_vm1, %v6485_v2  ;;  %5877 = vmatpush3.bf16.msra.mxu1 %v6306_v12 }
 0xc56   :  { %5890 = vmatprep.subr.bf16.mxu1 %v6485_v2  ;;  %5883 = vmatpush3.bf16.msra.mxu0 %v6307_v28 }
 0xc57   :  { %5884 = vmatprep.subr.bf16.mxu0 %v6485_v2 }
 0xd23   :  { %v1316_v13 = vpop.f32.mrb[40].mxu1 }
 0xd24   :  { %1373 = vrot.lane.b32.xlu1 %v1316_v13, %s6488_s13  ;;  %v5866_v14 = vpop.f32.mrb[41].mxu1 }
 0xd25   :  { %v1319_v15 = vpop.f32.mrb[42].mxu1 }
 0xd26   :  { %v5867_v16 = vpop.f32.mrb[43].mxu1 }
 0xd27   :  { %v1365_v17 = vpop.f32.mrb[44].mxu0 }
 0xd28   :  { %1375 = vrot.lane.b32.xlu1 %v1365_v17, %s6488_s13  ;;  %v5872_v18 = vpop.f32.mrb[45].mxu0 }
 0xd29   :  { %v1368_v19 = vpop.f32.mrb[46].mxu0 }
 0xd2a   :  { %v5873_v20 = vpop.f32.mrb[47].mxu0 }
 0xd96   :  { %v1374_v21 = vpop.permute.xlu1 %1373 }
 0xd97   :  { %v1379_v22 = vsel %vm221_vm4, %v6754_v33, %v1374_v21 }
 0xd98   :  { %v1381_v25 = vadd.f32 %v1379_v22, %v6707_v49  ;;  %v6309_v49 = vld [vmem:[%s7518_s1 + $0x98] sm:$0xff]  }
 0xd99   :  { %5885 = vmatpush3.bf16.msra.mxu0 %v6309_v49 }
 0xd9a   :  { %v1376_v23 = vpop.permute.xlu1 %1375  ;;  %5898 = vmatprep.subr.bf16.mxu0 %v6485_v2 }
 0xd9b   :  { %v1380_v24 = vsel %vm221_vm4, %v6756_v39, %v1376_v23 }
 0xd9c   :  { %v1382_v26 = vadd.f32 %v1380_v24, %v6713_v35  ;;  %v6310_v35 = vld [vmem:[%s7518_s1 + $0xa8] sm:$0xff]  }
 0xd9e   :  { %v1383_v27 = vpack.c.bf16 %v1382_v26, %v1381_v25 }
 0xda0   :  { %5879 = vmatmul.mubr.msk.bf16.vlgmr.msra.gmra.mrb[44].mxu1 %vm171_vm3, %v1383_v27 }
 0xda1   :  { %5894 = vmatprep.mubr.msk.bf16.mxu1 %vm6486_vm1, %v6485_v2  ;;  %5891 = vmatpush3.bf16.msra.mxu1 %v6308_v29 }
 0xda2   :  { %5892 = vmatprep.subr.bf16.mxu1 %v6485_v2 }
 0xda5   :  { %5893 = vmatpush3.bf16.msra.mxu1 %v6310_v35 }
 0xda6   :  { %5906 = vmatprep.subr.bf16.mxu1 %v6485_v2 }
 0xe73   :  { %v1439_v31 = vpop.f32.mrb[44].mxu1 }
 0xe74   :  { %v1440_v33 = vadd.f32 %v5299_v30, %v1439_v31  ;;  %v5880_v36 = vpop.f32.mrb[45].mxu1 }
 0xe75   :  { %v1442_v37 = vpop.f32.mrb[46].mxu1 }
 0xe76   :  { %v1446_v38 = vmax.f32 %v1440_v33, 0.0  ;;  %v1443_v39 = vadd.f32 %v5299_v30, %v1442_v37  ;;  %v5881_v40 = vpop.f32.mrb[47].mxu1 }
 0xe78   :  { %v1448_v41 = vadd.f32 %v1446_v38, %v1381_v25  ;;  %v1447_v42 = vmax.f32 %v1443_v39, 0.0 }
 0xe7a   :  { %1450 = vst.msk [vmem:[#allocation2] sm:$0xff] %vm171_vm3, %v1448_v41  ;;  %v1449_v6 = vadd.f32 %v1447_v42, %v1382_v26 }
 0xe7c   :  { %1451 = vst.msk [vmem:[#allocation2 + $0x8] sm:$0xff] %vm171_vm3, %v1449_v6 }
 0xe81   :  { %v1452_v43 = vld [vmem:[#allocation2] sm:$0xff] }
 0xe83   :  { %v1453_v44 = vld [vmem:[#allocation2 + $0x8] sm:$0xff] }
 0xe84   :  { %v6819_v45 = vpack.c.bf16 %v1453_v44, %v1452_v43 }
 0xe86   :  { %5887 = vmatmul.mubr.msk.bf16.vlgmr.msra.gmra.mrb[48].mxu0 %vm171_vm3, %v6819_v45  ;;  %5895 = vmatmul.mubr.msk.bf16.vlgmr.msra.gmra.mrb[48].mxu1 %vm171_vm3, %v6819_v45 }
 0xe87   :  { %5899 = vmatpush3.bf16.msra.mxu0 %v6311_v34  ;;  %5902 = vmatprep.mubr.msk.bf16.mxu0 %vm6486_vm1, %v6485_v2 }
 0xe88   :  { %5900 = vmatprep.subr.bf16.mxu0 %v6485_v2  ;;  %5908 = vmatprep.mubr.msk.bf16.mxu1 %vm6486_vm1, %v6485_v2 }
 0xe8b   :  { %5901 = vmatpush3.bf16.msra.mxu0 %v6312_v46 }
 0xe8c   :  { %5912 = vmatprep.subr.bf16.mxu0 %v6485_v2 }
 0xe8e   :  { %5903 = vmatmul.mubr.msk.bf16.vlgmr.msra.gmra.mrb[52].mxu0 %vm171_vm3, %v1604_v48 }
 0xe8f   :  { %5914 = vmatprep.mubr.msk.bf16.mxu0 %vm6486_vm1, %v6485_v2 }
 0xf59   :  { %v1538_v51 = vpop.f32.mrb[48].mxu0  ;;  %v1597_v53 = vpop.f32.mrb[48].mxu1 }
 0xf5a   :  { %v1539_v54 = vadd.f32 %v5323_v50, %v1538_v51  ;;  %v5888_v56 = vpop.f32.mrb[49].mxu0  ;;  %v5896_v57 = vpop.f32.mrb[49].mxu1  ;;  %v1598_v4 = vadd.f32 %v5327_v0, %v1597_v53 }
 0xf5b   :  { %v1541_v58 = vpop.f32.mrb[50].mxu0  ;;  %v1600_v59 = vpop.f32.mrb[50].mxu1 }
 0xf5c   :  { %v1668_v60 = vpack.c.bf16 %v1539_v54, %v1539_v54  ;;  %v1542_v61 = vadd.f32 %v5323_v50, %v1541_v58  ;;  %v5889_v62 = vpop.f32.mrb[51].mxu0  ;;  %v5897_v63 = vpop.f32.mrb[51].mxu1  ;;  %v1601_v7 = vadd.f32 %v5327_v0, %v1600_v59  ;;  %v6855_v55 = vpack.c.bf16 %v1598_v4, %v1598_v4 }
 0xf5e   :  { %v1676_v52 = vsel %vm221_vm4, %v1668_v60, 0  ;;  %v1669_v1 = vpack.c.bf16 %v1542_v61, %v1542_v61  ;;  %v6857_v11 = vpack.c.bf16 %v1601_v7, %v1601_v7  ;;  %v1789_v15 = vsel %vm339_vm5, %v6855_v55, 0 }
 0xf5f   :  { %5907 = vmatpush3.bf16.xpose.msra.mxu1 %v1676_v52 }
 0xf60   :  { %v1719_v5 = vsel %vm221_vm4, %v1669_v1, 0  ;;  %5918 = vmatprep.subr.bf16.mxu1 %v6485_v2  ;;  %v1835_v16 = vsel %vm339_vm5, %v6857_v11, 0 }
 0xf61   :  { %v1660_v8 = vpop.f32.mrb[52].mxu0  ;;  %5913 = vmatpush3.bf16.xpose.msra.mxu0 %v1719_v5 }
 0xf62   :  { %v6852_v9 = vadd.f32 %v5331_v3, %v1660_v8  ;;  %v5904_v10 = vpop.f32.mrb[53].mxu0  ;;  %5924 = vmatprep.subr.bf16.mxu0 %v6485_v2 }
 0xf63   :  { %v1663_v32 = vpop.f32.mrb[54].mxu0 }
 0xf64   :  { %v1666_v12 = vmul.f32 0.17677669, %v6852_v9  ;;  %v5905_v13 = vpop.f32.mrb[55].mxu0 }
 0xf66   :  { %v1667_v14 = vpack.c.bf16 %v1666_v12, %v1666_v12 }
 0xf68   :  { %5909 = vmatmul.mubr.msk.bf16.vlgmr.msra.gmra.mrb[52].mxu1 %vm221_vm4, %v1667_v14  ;;  %5915 = vmatmul.mubr.msk.bf16.vlgmr.msra.gmra.mrb[56].mxu0 %vm221_vm4, %v1667_v14 }
 0xf69   :  { %5919 = vmatpush3.bf16.msra.mxu1 %v1789_v15  ;;  %5925 = vmatpush3.bf16.msra.mxu0 %v1835_v16 }
 0xf6a   :  { %5920 = vmatprep.mubr.msk.bf16.mxu1 %vm6486_vm1, %v6485_v2  ;;  %5930 = vmatprep.subr.bf16.mxu1 %v6485_v2 }
 0xf6b   :  { %5926 = vmatprep.mubr.msk.bf16.mxu0 %vm6486_vm1, %v6485_v2  ;;  %5936 = vmatprep.subr.bf16.mxu0 %v6485_v2 }
0x103b   :  { %v1712_v17 = vpop.f32.mrb[52].mxu1  ;;  %v1755_v18 = vpop.f32.mrb[56].mxu0 }
0x103c   :  { %v5910_v19 = vpop.f32.mrb[53].mxu1  ;;  %v5916_v20 = vpop.f32.mrb[57].mxu0  ;;  %v1761_v21 = vsel %vm311_vm6, %v1712_v17, -inf  ;;  %v1764_v22 = vsel %vm311_vm6, %v1755_v18, -inf }
0x103d   :  { %1762 = vmax.xlane.f32.xlu1 %v1761_v21  ;;  %v1715_v23 = vpop.f32.mrb[54].mxu1  ;;  %1765 = vmax.xlane.f32.xlu0 %v1764_v22  ;;  %v1758_v24 = vpop.f32.mrb[58].mxu0 }
0x103e   :  { %v5911_v25 = vpop.f32.mrb[55].mxu1  ;;  %v5917_v26 = vpop.f32.mrb[59].mxu0 }
0x104e   :  { %1881 = vrot.lane.b32.xlu1 %v1668_v60, %s6487_s8 }
0x1052   :  { %1878 = vrot.lane.b32.xlu1 %v1667_v14, %s6487_s8 }
0x10ca   :  { %v1763_v27 = vpop.xlane.xlu1 %1762  ;;  %v1766_v28 = vpop.xlane.xlu0 %1765 }
0x10cb   :  { %v1767_v29 = vsub.f32 %v1712_v17, %v1763_v27  ;;  %v1768_v49 = vsub.f32 %v1755_v18, %v1766_v28 }
0x10cd   :  { %v1769_v35 = vmul.f32 1.442695, %v1767_v29  ;;  %v1771_v30 = vmul.f32 1.442695, %v1768_v49  ;;  %v6313_v29 = vld [vmem:[%s7518_s1 + $0xb0] sm:$0xff]   ;;  %v6314_v49 = vld [vmem:[%s7518_s1 + $0xb8] sm:$0xff]  }
0x10ce   :  { %v1882_v42 = vpop.permute.xlu1 %1881 }
0x10cf   :  { %6381 = vpow2.f32 %v1769_v35  ;;  %v1887_v44 = vsel %vm221_vm4, %v1882_v42, 0 }
0x10d0   :  { %6383 = vpow2.f32 %v1771_v30 }
0x10d2   :  { %v1879_v50 = vpop.permute.xlu1 %1878 }
0x10d9   :  { %v6382_v31 = vpop.eup %6381 }
0x10da   :  { %v1773_v33 = vsel %vm311_vm6, %v6382_v31, 0.0  ;;  %v6384_v36 = vpop.eup %6383 }
0x10db   :  { %1774 = vadd.xlane.f32.xlu0 %v1773_v33  ;;  %v1776_v37 = vsel %vm311_vm6, %v6384_v36, 0.0 }
0x10df   :  { %1777 = vadd.xlane.f32.xlu0 %v1776_v37 }
0x10f5   :  { %1930 = vrot.lane.b32.xlu0 %v1669_v1, %s6487_s8 }
0x1168   :  { %v1775_v38 = vpop.xlane.xlu0 %1774 }
0x1169   :  { %6385 = vrcp.f32 %v1775_v38 }
0x116c   :  { %v1778_v39 = vpop.xlane.xlu0 %1777 }
0x116d   :  { %6387 = vrcp.f32 %v1778_v39 }
0x1170   :  { %v1931_v46 = vpop.permute.xlu0 %1930 }
0x1171   :  { %v1933_v48 = vsel %vm221_vm4, %v1931_v46, 0  ;;  %v6315_v46 = vld [vmem:[%s7518_s1 + $0xd0] sm:$0xff]  }
0x1173   :  { %v6386_v40 = vpop.eup %6385 }
0x1174   :  { %v1781_v41 = vmul.f32 %v6386_v40, %v6382_v31 }
0x1176   :  { %v1783_v6 = vpack.c.bf16 %v1781_v41, %v1781_v41 }
0x1177   :  { %v6388_v43 = vpop.eup %6387 }
0x1178   :  { %v1782_v34 = vmul.f32 %v6388_v43, %v6384_v36  ;;  %5921 = vmatmul.mubr.msk.bf16.vlgmr.msra.gmra.mrb[56].mxu1 %vm311_vm6, %v1783_v6 }
0x1179   :  { %5931 = vmatpush3.bf16.xpose.msra.mxu1 %v1887_v44  ;;  %5932 = vmatprep.mubr.msk.bf16.mxu1 %vm6486_vm1, %v6485_v2 }
0x117a   :  { %v1784_v47 = vpack.c.bf16 %v1782_v34, %v1782_v34  ;;  %5942 = vmatprep.subr.bf16.mxu1 %v6485_v2 }
0x117c   :  { %5927 = vmatmul.mubr.msk.bf16.vlgmr.msra.gmra.mrb[60].mxu0 %vm311_vm6, %v1784_v47  ;;  %v6316_v47 = vld [vmem:[%s7518_s1 + $0xe0] sm:$0xff]  }
0x117d   :  { %5937 = vmatpush3.bf16.xpose.msra.mxu0 %v1933_v48  ;;  %5938 = vmatprep.mubr.msk.bf16.mxu0 %vm6486_vm1, %v6485_v2  ;;  %v6318_v48 = vld [vmem:[%s7518_s1 + $0xe8] sm:$0xff]  }
0x117e   :  { %5948 = vmatprep.subr.bf16.mxu0 %v6485_v2 }
0x1180   :  { %5933 = vmatmul.mubr.msk.bf16.vlgmr.msra.gmra.mrb[60].mxu1 %vm221_vm4, %v1879_v50 }
0x1181   :  { %5944 = vmatprep.mubr.msk.bf16.mxu1 %vm6486_vm1, %v6485_v2 }
0x1184   :  { %5939 = vmatmul.mubr.msk.bf16.vlgmr.msra.gmra.mrb[64].mxu0 %vm221_vm4, %v1879_v50  ;;  %v5343_v50 = vld [vmem:[%s7519_s2 + $0xb] ss:$0 sm:$0xff] }
0x1185   :  { %5950 = vmatprep.mubr.msk.bf16.mxu0 %vm6486_vm1, %v6485_v2 }
0x124b   :  { %v6895_v51 = vpop.f32.mrb[56].mxu1 }
0x124c   :  { %v5922_v53 = vpop.f32.mrb[57].mxu1 }
0x124d   :  { %v1828_v54 = vpop.f32.mrb[58].mxu1 }
0x124e   :  { %v5923_v56 = vpop.f32.mrb[59].mxu1 }
0x124f   :  { %v6897_v57 = vpop.f32.mrb[60].mxu0 }
0x1250   :  { %v5928_v58 = vpop.f32.mrb[61].mxu0 }
0x1251   :  { %v1874_v59 = vpop.f32.mrb[62].mxu0 }
0x1252   :  { %v5929_v60 = vpop.f32.mrb[63].mxu0 }
0x1253   :  { %v1923_v61 = vpop.f32.mrb[60].mxu1 }
0x1254   :  { %v5934_v62 = vpop.f32.mrb[61].mxu1  ;;  %v1975_v63 = vsel %vm311_vm6, %v1923_v61, -inf }
0x1255   :  { %1976 = vmax.xlane.f32.xlu1 %v1975_v63  ;;  %v1926_v0 = vpop.f32.mrb[62].mxu1 }
0x1256   :  { %v5935_v52 = vpop.f32.mrb[63].mxu1 }
0x1257   :  { %v1969_v1 = vpop.f32.mrb[64].mxu0  ;;  %v6319_v52 = vld [vmem:[%s7518_s1 + $0xc0] sm:$0xff]  }
0x1258   :  { %v5940_v3 = vpop.f32.mrb[65].mxu0  ;;  %v1978_v4 = vsel %vm311_vm6, %v1969_v1, -inf }
0x1259   :  { %1979 = vmax.xlane.f32.xlu0 %v1978_v4  ;;  %v1972_v5 = vpop.f32.mrb[66].mxu0  ;;  %v6320_v3 = vld [vmem:[%s7518_s1 + $0xc8] sm:$0xff]  }
0x125a   :  { %v5941_v7 = vpop.f32.mrb[67].mxu0  ;;  %v5367_v4 = vld [vmem:[%s7519_s2 + $0xd] ss:$0 sm:$0xff] }
0x12e2   :  { %v1977_v8 = vpop.xlane.xlu1 %1976 }
0x12e3   :  { %v1981_v10 = vsub.f32 %v1923_v61, %v1977_v8 }
0x12e5   :  { %v1983_v32 = vmul.f32 1.442695, %v1981_v10 }
0x12e6   :  { %v1980_v12 = vpop.xlane.xlu0 %1979 }
0x12e7   :  { %6389 = vpow2.f32 %v1983_v32  ;;  %v1982_v13 = vsub.f32 %v1969_v1, %v1980_v12 }
0x12e9   :  { %v1985_v14 = vmul.f32 1.442695, %v1982_v13 }
0x12eb   :  { %6391 = vpow2.f32 %v1985_v14 }
0x12f1   :  { %v6390_v15 = vpop.eup %6389 }
0x12f2   :  { %v1987_v16 = vsel %vm311_vm6, %v6390_v15, 0.0 }
0x12f3   :  { %1988 = vadd.xlane.f32.xlu0 %v1987_v16 }
0x12f5   :  { %v6392_v17 = vpop.eup %6391 }
0x12f6   :  { %v1990_v18 = vsel %vm311_vm6, %v6392_v17, 0.0 }
0x12f7   :  { %1991 = vadd.xlane.f32.xlu1 %v1990_v18 }
0x1308   :  { %2049 = vrot.lane.b32.xlu1 %v6857_v11, %s6487_s8 }
0x1309   :  { %2000 = vrot.lane.b32.xlu0 %v6855_v55, %s6487_s8 }
0x1380   :  { %v1989_v19 = vpop.xlane.xlu0 %1988 }
0x1381   :  { %6393 = vrcp.f32 %v1989_v19 }
0x1384   :  { %v1992_v20 = vpop.xlane.xlu1 %1991  ;;  %v2001_v21 = vpop.permute.xlu0 %2000 }
0x1385   :  { %6395 = vrcp.f32 %v1992_v20  ;;  %v2006_v22 = vsel %vm339_vm5, %v2001_v21, 0  ;;  %v5375_v20 = vld [vmem:[%s7519_s2 + $0xc] ss:$0 sm:$0xff] }
0x1386   :  { %5943 = vmatpush3.bf16.msra.mxu1 %v2006_v22 }
0x1387   :  { %5954 = vmatprep.subr.bf16.mxu1 %v6485_v2 }
0x1388   :  { %v2050_v23 = vpop.permute.xlu1 %2049 }
0x1389   :  { %v2055_v24 = vsel %vm339_vm5, %v2050_v23, 0 }
0x138a   :  { %5949 = vmatpush3.bf16.msra.mxu0 %v2055_v24 }
0x138b   :  { %v6394_v25 = vpop.eup %6393  ;;  %5962 = vmatprep.subr.bf16.mxu0 %v6485_v2 }
0x138c   :  { %v1995_v11 = vmul.f32 %v6394_v25, %v6390_v15 }
0x138e   :  { %v1997_v26 = vpack.c.bf16 %v1995_v11, %v1995_v11 }
0x138f   :  { %v6396_v55 = vpop.eup %6395 }
0x1390   :  { %v1996_v27 = vmul.f32 %v6396_v55, %v6392_v17  ;;  %5945 = vmatmul.mubr.msk.bf16.vlgmr.msra.gmra.mrb[64].mxu1 %vm311_vm6, %v1997_v26 }
0x1391   :  { %5958 = vmatprep.mubr.msk.bf16.mxu1 %vm6486_vm1, %v6485_v2  ;;  %5955 = vmatpush3.bf16.msra.mxu1 %v6313_v29 }
0x1392   :  { %v1998_v28 = vpack.c.bf16 %v1996_v27, %v1996_v27  ;;  %5956 = vmatprep.subr.bf16.mxu1 %v6485_v2 }
0x1394   :  { %5951 = vmatmul.mubr.msk.bf16.vlgmr.msra.gmra.mrb[68].mxu0 %vm311_vm6, %v1998_v28 }
0x1395   :  { %5966 = vmatprep.mubr.msk.bf16.mxu0 %vm6486_vm1, %v6485_v2  ;;  %5957 = vmatpush3.bf16.msra.mxu1 %v6314_v49 }
0x1396   :  { %5970 = vmatprep.subr.bf16.mxu1 %v6485_v2  ;;  %5963 = vmatpush3.bf16.msra.mxu0 %v6315_v46 }
0x1397   :  { %5964 = vmatprep.subr.bf16.mxu0 %v6485_v2 }
0x1463   :  { %v2042_v35 = vpop.f32.mrb[64].mxu1 }
0x1464   :  { %2099 = vrot.lane.b32.xlu1 %v2042_v35, %s6488_s13  ;;  %v5946_v30 = vpop.f32.mrb[65].mxu1 }
0x1465   :  { %v2045_v31 = vpop.f32.mrb[66].mxu1 }
0x1466   :  { %v5947_v33 = vpop.f32.mrb[67].mxu1 }
0x1467   :  { %v2091_v36 = vpop.f32.mrb[68].mxu0 }
0x1468   :  { %2101 = vrot.lane.b32.xlu1 %v2091_v36, %s6488_s13  ;;  %v5952_v37 = vpop.f32.mrb[69].mxu0 }
0x1469   :  { %v2094_v38 = vpop.f32.mrb[70].mxu0 }
0x146a   :  { %v5953_v39 = vpop.f32.mrb[71].mxu0 }
0x14d6   :  { %v2100_v40 = vpop.permute.xlu1 %2099 }
0x14d7   :  { %v2105_v41 = vsel %vm221_vm4, %v6895_v51, %v2100_v40 }
0x14d8   :  { %v2107_v43 = vadd.f32 %v2105_v41, %v6852_v9 }
0x14da   :  { %v2102_v42 = vpop.permute.xlu1 %2101 }
0x14db   :  { %v2106_v6 = vsel %vm221_vm4, %v6897_v57, %v2102_v42 }
0x14dc   :  { %v2108_v44 = vadd.f32 %v2106_v6, %v6852_v9  ;;  %v6317_v9 = vld [vmem:[%s7518_s1 + $0xd8] sm:$0xff]  }
0x14dd   :  { %5965 = vmatpush3.bf16.msra.mxu0 %v6317_v9 }
0x14de   :  { %v2109_v34 = vpack.c.bf16 %v2108_v44, %v2107_v43  ;;  %5978 = vmatprep.subr.bf16.mxu0 %v6485_v2 }
0x14e0   :  { %5959 = vmatmul.mubr.msk.bf16.vlgmr.msra.gmra.mrb[68].mxu1 %vm171_vm3, %v2109_v34 }
0x14e1   :  { %5974 = vmatprep.mubr.msk.bf16.mxu1 %vm6486_vm1, %v6485_v2  ;;  %5971 = vmatpush3.bf16.msra.mxu1 %v6316_v47 }
0x14e2   :  { %5972 = vmatprep.subr.bf16.mxu1 %v6485_v2 }
0x14e5   :  { %5973 = vmatpush3.bf16.msra.mxu1 %v6318_v48 }
0x14e6   :  { %5986 = vmatprep.subr.bf16.mxu1 %v6485_v2 }
0x15b3   :  { %v2165_v51 = vpop.f32.mrb[68].mxu1 }
0x15b4   :  { %v2166_v53 = vadd.f32 %v5343_v50, %v2165_v51  ;;  %v5960_v54 = vpop.f32.mrb[69].mxu1 }
0x15b5   :  { %v2168_v56 = vpop.f32.mrb[70].mxu1 }
0x15b6   :  { %v2172_v57 = vmax.f32 %v2166_v53, 0.0  ;;  %v2169_v58 = vadd.f32 %v5343_v50, %v2168_v56  ;;  %v5961_v59 = vpop.f32.mrb[71].mxu1 }
0x15b8   :  { %v2174_v60 = vadd.f32 %v2172_v57, %v2107_v43  ;;  %v2173_v61 = vmax.f32 %v2169_v58, 0.0 }
0x15ba   :  { %2176 = vst.msk [vmem:[#allocation3] sm:$0xff] %vm171_vm3, %v2174_v60  ;;  %v2175_v62 = vadd.f32 %v2173_v61, %v2108_v44 }
0x15bc   :  { %2177 = vst.msk [vmem:[#allocation3 + $0x8] sm:$0xff] %vm171_vm3, %v2175_v62 }
0x15c1   :  { %v2180_v63 = vld [vmem:[#allocation3] sm:$0xff] }
0x15c3   :  { %v2181_v0 = vld [vmem:[#allocation3 + $0x8] sm:$0xff] }
0x15c4   :  { %v2210_v1 = vpack.c.bf16 %v2181_v0, %v2180_v63 }
0x15c6   :  { %5967 = vmatmul.mubr.msk.bf16.vlgmr.msra.gmra.mrb[72].mxu0 %vm171_vm3, %v2210_v1  ;;  %5975 = vmatmul.mubr.msk.bf16.vlgmr.msra.gmra.mrb[72].mxu1 %vm171_vm3, %v2210_v1 }
0x15c7   :  { %5979 = vmatpush3.bf16.msra.mxu0 %v6319_v52  ;;  %5982 = vmatprep.mubr.msk.bf16.mxu0 %vm6486_vm1, %v6485_v2 }
0x15c8   :  { %5980 = vmatprep.subr.bf16.mxu0 %v6485_v2  ;;  %5988 = vmatprep.mubr.msk.bf16.mxu1 %vm6486_vm1, %v6485_v2 }
0x15cb   :  { %5981 = vmatpush3.bf16.msra.mxu0 %v6320_v3 }
0x15cc   :  { %5992 = vmatprep.subr.bf16.mxu0 %v6485_v2 }
0x15ce   :  { %5983 = vmatmul.mubr.msk.bf16.vlgmr.msra.gmra.mrb[76].mxu0 %vm171_vm3, %v6819_v45  ;;  %v5371_v45 = vld [vmem:[%s7519_s2 + $0xe] ss:$0 sm:$0xff] }
0x15cf   :  { %5994 = vmatprep.mubr.msk.bf16.mxu0 %vm6486_vm1, %v6485_v2 }
0x1699   :  { %v2266_v5 = vpop.f32.mrb[72].mxu0  ;;  %v2325_v7 = vpop.f32.mrb[72].mxu1 }
0x169a   :  { %v2267_v8 = vadd.f32 %v5367_v4, %v2266_v5  ;;  %v5968_v10 = vpop.f32.mrb[73].mxu0  ;;  %v5976_v32 = vpop.f32.mrb[73].mxu1  ;;  %v2326_v21 = vadd.f32 %v5371_v45, %v2325_v7 }
0x169b   :  { %v2269_v12 = vpop.f32.mrb[74].mxu0  ;;  %v2328_v13 = vpop.f32.mrb[74].mxu1 }
0x169c   :  { %v6978_v14 = vpack.c.bf16 %v2267_v8, %v2267_v8  ;;  %v2270_v15 = vadd.f32 %v5367_v4, %v2269_v12  ;;  %v5969_v16 = vpop.f32.mrb[75].mxu0  ;;  %v5977_v17 = vpop.f32.mrb[75].mxu1  ;;  %v2329_v24 = vadd.f32 %v5371_v45, %v2328_v13  ;;  %v6993_v55 = vpack.c.bf16 %v2326_v21, %v2326_v21 }
0x169e   :  { %v2407_v18 = vsel %vm221_vm4, %v6978_v14, 0  ;;  %v2400_v19 = vpack.c.bf16 %v2270_v15, %v2270_v15  ;;  %v6998_v49 = vpack.c.bf16 %v2329_v24, %v2329_v24  ;;  %v2523_v31 = vsel %vm339_vm5, %v6993_v55, 0 }
0x169f   :  { %5987 = vmatpush3.bf16.xpose.msra.mxu1 %v2407_v18 }
0x16a0   :  { %v2453_v22 = vsel %vm221_vm4, %v2400_v19, 0  ;;  %5998 = vmatprep.subr.bf16.mxu1 %v6485_v2  ;;  %v2569_v36 = vsel %vm339_vm5, %v6998_v49, 0 }
0x16a1   :  { %v2388_v23 = vpop.f32.mrb[76].mxu0  ;;  %5993 = vmatpush3.bf16.xpose.msra.mxu0 %v2453_v22 }
0x16a2   :  { %v6990_v25 = vadd.f32 %v5375_v20, %v2388_v23  ;;  %v5984_v11 = vpop.f32.mrb[77].mxu0  ;;  %6004 = vmatprep.subr.bf16.mxu0 %v6485_v2 }
0x16a3   :  { %v2391_v26 = vpop.f32.mrb[78].mxu0 }
0x16a4   :  { %v2395_v27 = vmul.f32 0.17677669, %v6990_v25  ;;  %v6996_v28 = vadd.f32 %v5375_v20, %v2391_v26  ;;  %v5985_v29 = vpop.f32.mrb[79].mxu0 }
0x16a6   :  { %v2397_v35 = vpack.c.bf16 %v2395_v27, %v2395_v27  ;;  %v2396_v30 = vmul.f32 0.17677669, %v6996_v28 }
0x16a8   :  { %v2398_v33 = vpack.c.bf16 %v2396_v30, %v2396_v30  ;;  %5989 = vmatmul.mubr.msk.bf16.vlgmr.msra.gmra.mrb[76].mxu1 %vm221_vm4, %v2397_v35 }
0x16a9   :  { %5999 = vmatpush3.bf16.msra.mxu1 %v2523_v31  ;;  %6000 = vmatprep.mubr.msk.bf16.mxu1 %vm6486_vm1, %v6485_v2 }
0x16aa   :  { %5995 = vmatmul.mubr.msk.bf16.vlgmr.msra.gmra.mrb[80].mxu0 %vm221_vm4, %v2398_v33  ;;  %6010 = vmatprep.subr.bf16.mxu1 %v6485_v2 }
0x16ab   :  { %6005 = vmatpush3.bf16.msra.mxu0 %v2569_v36  ;;  %6006 = vmatprep.mubr.msk.bf16.mxu0 %vm6486_vm1, %v6485_v2 }
0x16ac   :  { %6016 = vmatprep.subr.bf16.mxu0 %v6485_v2 }
0x177b   :  { %v2443_v37 = vpop.f32.mrb[76].mxu1 }
0x177c   :  { %v5990_v38 = vpop.f32.mrb[77].mxu1  ;;  %v2495_v39 = vsel %vm311_vm6, %v2443_v37, -inf }
0x177d   :  { %2496 = vmax.xlane.f32.xlu0 %v2495_v39  ;;  %v2446_v40 = vpop.f32.mrb[78].mxu1  ;;  %v2489_v41 = vpop.f32.mrb[80].mxu0 }
0x177e   :  { %v5991_v42 = vpop.f32.mrb[79].mxu1  ;;  %v5996_v6 = vpop.f32.mrb[81].mxu0  ;;  %v2498_v43 = vsel %vm311_vm6, %v2489_v41, -inf }
0x177f   :  { %2499 = vmax.xlane.f32.xlu1 %v2498_v43  ;;  %v2492_v44 = vpop.f32.mrb[82].mxu0 }
0x1780   :  { %v5997_v34 = vpop.f32.mrb[83].mxu0 }
0x1790   :  { %2667 = vrot.lane.b32.xlu1 %v2400_v19, %s6487_s8 }
0x1794   :  { %2612 = vrot.lane.b32.xlu1 %v2397_v35, %s6487_s8 }
0x1798   :  { %2664 = vrot.lane.b32.xlu1 %v2398_v33, %s6487_s8 }
0x180a   :  { %v2497_v46 = vpop.xlane.xlu0 %2496 }
0x180b   :  { %v2501_v47 = vsub.f32 %v2443_v37, %v2497_v46 }
0x180c   :  { %v2500_v9 = vpop.xlane.xlu1 %2499 }
0x180d   :  { %v2503_v48 = vmul.f32 1.442695, %v2501_v47  ;;  %v2502_v50 = vsub.f32 %v2489_v41, %v2500_v9 }
0x180f   :  { %6397 = vpow2.f32 %v2503_v48  ;;  %v2505_v51 = vmul.f32 1.442695, %v2502_v50  ;;  %v6321_v48 = vld [vmem:[%s7518_s1 + $0xf0] sm:$0xff]   ;;  %v6322_v50 = vld [vmem:[%s7518_s1 + $0xf8] sm:$0xff]  }
0x1810   :  { %v2668_v52 = vpop.permute.xlu1 %2667 }
0x1811   :  { %6399 = vpow2.f32 %v2505_v51  ;;  %v2673_v5 = vsel %vm221_vm4, %v2668_v52, 0 }
0x1814   :  { %v2613_v7 = vpop.permute.xlu1 %2612 }
0x1818   :  { %v2665_v8 = vpop.permute.xlu1 %2664 }
0x1819   :  { %v6398_v53 = vpop.eup %6397 }
0x181a   :  { %v2507_v54 = vsel %vm311_vm6, %v6398_v53, 0.0 }
0x181b   :  { %v6400_v56 = vpop.eup %6399  ;;  %2508 = vadd.xlane.f32.xlu0 %v2507_v54 }
0x181c   :  { %v2510_v57 = vsel %vm311_vm6, %v6400_v56, 0.0 }
0x181f   :  { %2511 = vadd.xlane.f32.xlu0 %v2510_v57 }
0x1835   :  { %2615 = vrot.lane.b32.xlu0 %v6978_v14, %s6487_s8 }
0x18a8   :  { %v2509_v58 = vpop.xlane.xlu0 %2508 }
0x18a9   :  { %6401 = vrcp.f32 %v2509_v58 }
0x18ac   :  { %v2512_v59 = vpop.xlane.xlu0 %2511 }
0x18ad   :  { %6403 = vrcp.f32 %v2512_v59 }
0x18b0   :  { %v2616_v62 = vpop.permute.xlu0 %2615 }
0x18b1   :  { %v2621_v3 = vsel %vm221_vm4, %v2616_v62, 0 }
0x18b3   :  { %v6402_v60 = vpop.eup %6401 }
0x18b4   :  { %v2515_v61 = vmul.f32 %v6402_v60, %v6398_v53 }
0x18b6   :  { %v2517_v63 = vpack.c.bf16 %v2515_v61, %v2515_v61 }
0x18b7   :  { %v6404_v0 = vpop.eup %6403 }
0x18b8   :  { %v2516_v1 = vmul.f32 %v6404_v0, %v6400_v56  ;;  %6001 = vmatmul.mubr.msk.bf16.vlgmr.msra.gmra.mrb[80].mxu1 %vm311_vm6, %v2517_v63 }
0x18b9   :  { %6011 = vmatpush3.bf16.xpose.msra.mxu1 %v2621_v3  ;;  %6012 = vmatprep.mubr.msk.bf16.mxu1 %vm6486_vm1, %v6485_v2 }
0x18ba   :  { %v2518_v4 = vpack.c.bf16 %v2516_v1, %v2516_v1  ;;  %6022 = vmatprep.subr.bf16.mxu1 %v6485_v2 }
0x18bc   :  { %6007 = vmatmul.mubr.msk.bf16.vlgmr.msra.gmra.mrb[84].mxu0 %vm311_vm6, %v2518_v4  ;;  %v6323_v4 = vld [vmem:[%s7518_s1 + $0x110] sm:$0xff]  }
0x18bd   :  { %6017 = vmatpush3.bf16.xpose.msra.mxu0 %v2673_v5  ;;  %6018 = vmatprep.mubr.msk.bf16.mxu0 %vm6486_vm1, %v6485_v2  ;;  %v6324_v5 = vld [vmem:[%s7518_s1 + $0x120] sm:$0xff]  }
0x18be   :  { %6028 = vmatprep.subr.bf16.mxu0 %v6485_v2 }
0x18c0   :  { %6013 = vmatmul.mubr.msk.bf16.vlgmr.msra.gmra.mrb[84].mxu1 %vm221_vm4, %v2613_v7  ;;  %v5387_v7 = vld [vmem:[%s7519_s2 + $0xf] ss:$0 sm:$0xff] }
0x18c1   :  { %6024 = vmatprep.mubr.msk.bf16.mxu1 %vm6486_vm1, %v6485_v2 }
0x18c4   :  { %6019 = vmatmul.mubr.msk.bf16.vlgmr.msra.gmra.mrb[88].mxu0 %vm221_vm4, %v2665_v8 }
0x18c5   :  { %6030 = vmatprep.mubr.msk.bf16.mxu0 %vm6486_vm1, %v6485_v2 }
0x198b   :  { %v7038_v10 = vpop.f32.mrb[80].mxu1 }
0x198c   :  { %v6002_v32 = vpop.f32.mrb[81].mxu1 }
0x198d   :  { %v2562_v12 = vpop.f32.mrb[82].mxu1 }
0x198e   :  { %v6003_v13 = vpop.f32.mrb[83].mxu1 }
0x198f   :  { %v7040_v14 = vpop.f32.mrb[84].mxu0 }
0x1990   :  { %v6008_v15 = vpop.f32.mrb[85].mxu0 }
0x1991   :  { %v2608_v16 = vpop.f32.mrb[86].mxu0 }
0x1992   :  { %v6009_v17 = vpop.f32.mrb[87].mxu0 }
0x1993   :  { %v2657_v45 = vpop.f32.mrb[84].mxu1 }
0x1994   :  { %v6014_v18 = vpop.f32.mrb[85].mxu1  ;;  %v2715_v19 = vsel %vm311_vm6, %v2657_v45, -inf }
0x1995   :  { %2716 = vmax.xlane.f32.xlu0 %v2715_v19  ;;  %v2660_v20 = vpop.f32.mrb[86].mxu1 }
0x1996   :  { %v6015_v21 = vpop.f32.mrb[87].mxu1  ;;  %v6327_v20 = vld [vmem:[%s7518_s1 + $0x100] sm:$0xff]  }
0x1997   :  { %v2709_v22 = vpop.f32.mrb[88].mxu0 }
0x1998   :  { %v6020_v23 = vpop.f32.mrb[89].mxu0  ;;  %v2718_v24 = vsel %vm311_vm6, %v2709_v22, -inf }
0x1999   :  { %2719 = vmax.xlane.f32.xlu1 %v2718_v24  ;;  %v2712_v11 = vpop.f32.mrb[90].mxu0  ;;  %v5234_v23 = vld [vmem:[%s7520_s3 + $0x10] sm:$0xf] }
0x199a   :  { %v6021_v26 = vpop.f32.mrb[91].mxu0  ;;  %v3070_v24 = vpack.c.bf16 %v5234_v23, %v5234_v23  ;;  %v5411_v11 = vld [vmem:[%s7519_s2 + $0x11] ss:$0 sm:$0xff] }
0x19aa   :  { %2789 = vrot.lane.b32.xlu1 %v6998_v49, %s6487_s8 }
0x1a22   :  { %v2717_v27 = vpop.xlane.xlu0 %2716 }
0x1a23   :  { %v2721_v29 = vsub.f32 %v2657_v45, %v2717_v27 }
0x1a25   :  { %v2723_v35 = vmul.f32 1.442695, %v2721_v29 }
0x1a26   :  { %v2720_v30 = vpop.xlane.xlu1 %2719 }
0x1a27   :  { %6405 = vpow2.f32 %v2723_v35  ;;  %v2722_v31 = vsub.f32 %v2709_v22, %v2720_v30  ;;  %v6328_v22 = vld [vmem:[%s7518_s1 + $0x108] sm:$0xff]  }
0x1a29   :  { %v2725_v33 = vmul.f32 1.442695, %v2722_v31 }
0x1a2a   :  { %v2790_v36 = vpop.permute.xlu1 %2789 }
0x1a2b   :  { %6407 = vpow2.f32 %v2725_v33  ;;  %v2795_v37 = vsel %vm339_vm5, %v2790_v36, 0 }
0x1a2c   :  { %6029 = vmatpush3.bf16.msra.mxu0 %v2795_v37 }
0x1a2d   :  { %6042 = vmatprep.subr.bf16.mxu0 %v6485_v2 }
0x1a31   :  { %v6406_v38 = vpop.eup %6405 }
0x1a32   :  { %v2727_v39 = vsel %vm311_vm6, %v6406_v38, 0.0 }
0x1a33   :  { %2728 = vadd.xlane.f32.xlu0 %v2727_v39 }
0x1a35   :  { %v6408_v40 = vpop.eup %6407 }
0x1a36   :  { %v2730_v49 = vsel %vm311_vm6, %v6408_v40, 0.0 }
0x1a37   :  { %2731 = vadd.xlane.f32.xlu0 %v2730_v49 }
0x1a4d   :  { %2740 = vrot.lane.b32.xlu0 %v6993_v55, %s6487_s8 }
0x1ac0   :  { %v2729_v41 = vpop.xlane.xlu0 %2728 }
0x1ac1   :  { %6409 = vrcp.f32 %v2729_v41 }
0x1ac4   :  { %v2732_v42 = vpop.xlane.xlu0 %2731 }
0x1ac5   :  { %6411 = vrcp.f32 %v2732_v42  ;;  %v5419_v42 = vld [vmem:[%s7519_s2 + $0x10] ss:$0 sm:$0xff] }
0x1ac8   :  { %v2741_v6 = vpop.permute.xlu0 %2740 }
0x1ac9   :  { %v2746_v43 = vsel %vm339_vm5, %v2741_v6, 0 }
0x1aca   :  { %6023 = vmatpush3.bf16.msra.mxu1 %v2746_v43 }
0x1acb   :  { %v6410_v44 = vpop.eup %6409  ;;  %6034 = vmatprep.subr.bf16.mxu1 %v6485_v2 }
0x1acc   :  { %v2735_v34 = vmul.f32 %v6410_v44, %v6406_v38 }
0x1ace   :  { %v2737_v46 = vpack.c.bf16 %v2735_v34, %v2735_v34 }
0x1acf   :  { %v6412_v47 = vpop.eup %6411 }
0x1ad0   :  { %v2736_v9 = vmul.f32 %v6412_v47, %v6408_v40  ;;  %6025 = vmatmul.mubr.msk.bf16.vlgmr.msra.gmra.mrb[88].mxu1 %vm311_vm6, %v2737_v46  ;;  %v5415_v40 = vld [vmem:[%s7519_s2 + $0x12] ss:$0 sm:$0xff] }
0x1ad1   :  { %6038 = vmatprep.mubr.msk.bf16.mxu1 %vm6486_vm1, %v6485_v2  ;;  %6035 = vmatpush3.bf16.msra.mxu1 %v6321_v48 }
0x1ad2   :  { %v2738_v55 = vpack.c.bf16 %v2736_v9, %v2736_v9  ;;  %6036 = vmatprep.subr.bf16.mxu1 %v6485_v2 }
0x1ad4   :  { %6031 = vmatmul.mubr.msk.bf16.vlgmr.msra.gmra.mrb[92].mxu0 %vm311_vm6, %v2738_v55 }
0x1ad5   :  { %6046 = vmatprep.mubr.msk.bf16.mxu0 %vm6486_vm1, %v6485_v2  ;;  %6037 = vmatpush3.bf16.msra.mxu1 %v6322_v50 }
0x1ad6   :  { %6050 = vmatprep.subr.bf16.mxu1 %v6485_v2  ;;  %6043 = vmatpush3.bf16.msra.mxu0 %v6323_v4 }
0x1ad7   :  { %6044 = vmatprep.subr.bf16.mxu0 %v6485_v2 }
0x1ba3   :  { %v2782_v51 = vpop.f32.mrb[88].mxu1 }
0x1ba4   :  { %2839 = vrot.lane.b32.xlu1 %v2782_v51, %s6488_s13  ;;  %v6026_v53 = vpop.f32.mrb[89].mxu1 }
0x1ba5   :  { %v2785_v54 = vpop.f32.mrb[90].mxu1 }
0x1ba6   :  { %v6027_v56 = vpop.f32.mrb[91].mxu1 }
0x1ba7   :  { %v2831_v57 = vpop.f32.mrb[92].mxu0 }
0x1ba8   :  { %2841 = vrot.lane.b32.xlu1 %v2831_v57, %s6488_s13  ;;  %v6032_v58 = vpop.f32.mrb[93].mxu0 }
0x1ba9   :  { %v2834_v59 = vpop.f32.mrb[94].mxu0 }
0x1baa   :  { %v6033_v60 = vpop.f32.mrb[95].mxu0 }
0x1c16   :  { %v2840_v61 = vpop.permute.xlu1 %2839 }
0x1c17   :  { %v2845_v62 = vsel %vm221_vm4, %v7038_v10, %v2840_v61 }
0x1c18   :  { %v2847_v52 = vadd.f32 %v2845_v62, %v6990_v25  ;;  %v6325_v25 = vld [vmem:[%s7518_s1 + $0x118] sm:$0xff]  }
0x1c19   :  { %6045 = vmatpush3.bf16.msra.mxu0 %v6325_v25 }
0x1c1a   :  { %v2842_v63 = vpop.permute.xlu1 %2841  ;;  %6058 = vmatprep.subr.bf16.mxu0 %v6485_v2 }
0x1c1b   :  { %v2846_v0 = vsel %vm221_vm4, %v7040_v14, %v2842_v63 }
0x1c1c   :  { %v2848_v1 = vadd.f32 %v2846_v0, %v6996_v28  ;;  %v6326_v28 = vld [vmem:[%s7518_s1 + $0x128] sm:$0xff]  }
0x1c1e   :  { %v2849_v3 = vpack.c.bf16 %v2848_v1, %v2847_v52 }
0x1c20   :  { %6039 = vmatmul.mubr.msk.bf16.vlgmr.msra.gmra.mrb[92].mxu1 %vm171_vm3, %v2849_v3 }
0x1c21   :  { %6054 = vmatprep.mubr.msk.bf16.mxu1 %vm6486_vm1, %v6485_v2  ;;  %6051 = vmatpush3.bf16.msra.mxu1 %v6324_v5 }
0x1c22   :  { %6052 = vmatprep.subr.bf16.mxu1 %v6485_v2 }
0x1c25   :  { %6053 = vmatpush3.bf16.msra.mxu1 %v6326_v28 }
0x1c26   :  { %6066 = vmatprep.subr.bf16.mxu1 %v6485_v2 }
0x1cf3   :  { %v2905_v8 = vpop.f32.mrb[92].mxu1 }
0x1cf4   :  { %v2906_v10 = vadd.f32 %v5387_v7, %v2905_v8  ;;  %v6040_v32 = vpop.f32.mrb[93].mxu1 }
0x1cf5   :  { %v2908_v12 = vpop.f32.mrb[94].mxu1 }
0x1cf6   :  { %v2912_v13 = vmax.f32 %v2906_v10, 0.0  ;;  %v2909_v14 = vadd.f32 %v5387_v7, %v2908_v12  ;;  %v6041_v15 = vpop.f32.mrb[95].mxu1 }
0x1cf8   :  { %v2914_v16 = vadd.f32 %v2912_v13, %v2847_v52  ;;  %v2913_v17 = vmax.f32 %v2909_v14, 0.0 }
0x1cfa   :  { %2916 = vst.msk [vmem:[#allocation2] sm:$0xff] %vm171_vm3, %v2914_v16  ;;  %v2915_v45 = vadd.f32 %v2913_v17, %v2848_v1 }
0x1cfc   :  { %2917 = vst.msk [vmem:[#allocation2 + $0x8] sm:$0xff] %vm171_vm3, %v2915_v45 }
0x1d01   :  { %v2918_v18 = vld [vmem:[#allocation2] sm:$0xff] }
0x1d03   :  { %v2919_v19 = vld [vmem:[#allocation2 + $0x8] sm:$0xff] }
0x1d04   :  { %v2948_v21 = vpack.c.bf16 %v2919_v19, %v2918_v18 }
0x1d06   :  { %6047 = vmatmul.mubr.msk.bf16.vlgmr.msra.gmra.mrb[96].mxu0 %vm171_vm3, %v2948_v21  ;;  %6055 = vmatmul.mubr.msk.bf16.vlgmr.msra.gmra.mrb[96].mxu1 %vm171_vm3, %v2948_v21 }
0x1d07   :  { %6059 = vmatpush3.bf16.msra.mxu0 %v6327_v20  ;;  %6062 = vmatprep.mubr.msk.bf16.mxu0 %vm6486_vm1, %v6485_v2 }
0x1d08   :  { %6060 = vmatprep.subr.bf16.mxu0 %v6485_v2  ;;  %6068 = vmatprep.mubr.msk.bf16.mxu1 %vm6486_vm1, %v6485_v2 }
0x1d0b   :  { %6061 = vmatpush3.bf16.msra.mxu0 %v6328_v22 }
0x1d0c   :  { %6072 = vmatprep.subr.bf16.mxu0 %v6485_v2 }
0x1d0e   :  { %6063 = vmatmul.mubr.msk.bf16.vlgmr.msra.gmra.mrb[100].mxu0 %vm171_vm3, %v3070_v24 }
0x1d0f   :  { %6074 = vmatprep.mubr.msk.bf16.mxu0 %vm6486_vm1, %v6485_v2 }
0x1dd9   :  { %v3004_v26 = vpop.f32.mrb[96].mxu0  ;;  %v3063_v27 = vpop.f32.mrb[96].mxu1 }
0x1dda   :  { %v3005_v29 = vadd.f32 %v5411_v11, %v3004_v26  ;;  %v6048_v35 = vpop.f32.mrb[97].mxu0  ;;  %v6056_v30 = vpop.f32.mrb[97].mxu1  ;;  %v3064_v6 = vadd.f32 %v5415_v40, %v3063_v27 }
0x1ddb   :  { %v3007_v31 = vpop.f32.mrb[98].mxu0  ;;  %v3066_v33 = vpop.f32.mrb[98].mxu1 }
0x1ddc   :  { %v3134_v36 = vpack.c.bf16 %v3005_v29, %v3005_v29  ;;  %v3008_v37 = vadd.f32 %v5411_v11, %v3007_v31  ;;  %v6049_v38 = vpop.f32.mrb[99].mxu0  ;;  %v6057_v39 = vpop.f32.mrb[99].mxu1  ;;  %v3067_v44 = vadd.f32 %v5415_v40, %v3066_v33  ;;  %v7135_v55 = vpack.c.bf16 %v3064_v6, %v3064_v6 }
0x1dde   :  { %v3142_v49 = vsel %vm221_vm4, %v3134_v36, 0  ;;  %v3135_v41 = vpack.c.bf16 %v3008_v37, %v3008_v37  ;;  %v7137_v48 = vpack.c.bf16 %v3067_v44, %v3067_v44  ;;  %v3256_v54 = vsel %vm339_vm5, %v7135_v55, 0 }
0x1ddf   :  { %6067 = vmatpush3.bf16.xpose.msra.mxu1 %v3142_v49 }
0x1de0   :  { %v3185_v43 = vsel %vm221_vm4, %v3135_v41, 0  ;;  %6078 = vmatprep.subr.bf16.mxu1 %v6485_v2  ;;  %v3302_v56 = vsel %vm339_vm5, %v7137_v48, 0 }
0x1de1   :  { %v3126_v34 = vpop.f32.mrb[100].mxu0  ;;  %6073 = vmatpush3.bf16.xpose.msra.mxu0 %v3185_v43 }
0x1de2   :  { %v7132_v46 = vadd.f32 %v5419_v42, %v3126_v34  ;;  %v6064_v47 = vpop.f32.mrb[101].mxu0  ;;  %6084 = vmatprep.subr.bf16.mxu0 %v6485_v2 }
0x1de3   :  { %v3129_v9 = vpop.f32.mrb[102].mxu0 }
0x1de4   :  { %v3132_v50 = vmul.f32 0.17677669, %v7132_v46  ;;  %v6065_v51 = vpop.f32.mrb[103].mxu0 }
0x1de6   :  { %v3133_v53 = vpack.c.bf16 %v3132_v50, %v3132_v50 }
0x1de8   :  { %6069 = vmatmul.mubr.msk.bf16.vlgmr.msra.gmra.mrb[100].mxu1 %vm221_vm4, %v3133_v53  ;;  %6075 = vmatmul.mubr.msk.bf16.vlgmr.msra.gmra.mrb[104].mxu0 %vm221_vm4, %v3133_v53 }
0x1de9   :  { %6079 = vmatpush3.bf16.msra.mxu1 %v3256_v54  ;;  %6085 = vmatpush3.bf16.msra.mxu0 %v3302_v56 }
0x1dea   :  { %6080 = vmatprep.mubr.msk.bf16.mxu1 %vm6486_vm1, %v6485_v2  ;;  %6090 = vmatprep.subr.bf16.mxu1 %v6485_v2 }
0x1deb   :  { %6086 = vmatprep.mubr.msk.bf16.mxu0 %vm6486_vm1, %v6485_v2  ;;  %6096 = vmatprep.subr.bf16.mxu0 %v6485_v2 }
0x1ebb   :  { %v3178_v57 = vpop.f32.mrb[100].mxu1  ;;  %v3221_v58 = vpop.f32.mrb[104].mxu0 }
0x1ebc   :  { %v6070_v59 = vpop.f32.mrb[101].mxu1  ;;  %v6076_v60 = vpop.f32.mrb[105].mxu0  ;;  %v3228_v61 = vsel %vm3227_vm7, %v3178_v57, -inf  ;;  %v3231_v62 = vsel %vm3227_vm7, %v3221_v58, -inf }
0x1ebd   :  { %3229 = vmax.xlane.f32.xlu0 %v3228_v61  ;;  %v3181_v63 = vpop.f32.mrb[102].mxu1  ;;  %3232 = vmax.xlane.f32.xlu1 %v3231_v62  ;;  %v3224_v0 = vpop.f32.mrb[106].mxu0 }
0x1ebe   :  { %v6071_v52 = vpop.f32.mrb[103].mxu1  ;;  %v6077_v1 = vpop.f32.mrb[107].mxu0 }
0x1ece   :  { %3397 = vrot.lane.b32.xlu1 %v3135_v41, %s6487_s8 }
0x1ed2   :  { %3345 = vrot.lane.b32.xlu1 %v3133_v53, %s6487_s8 }
0x1f4a   :  { %v3230_v3 = vpop.xlane.xlu0 %3229  ;;  %v3233_v4 = vpop.xlane.xlu1 %3232 }
0x1f4b   :  { %v3234_v5 = vsub.f32 %v3178_v57, %v3230_v3  ;;  %v3235_v25 = vsub.f32 %v3221_v58, %v3233_v4  ;;  %v6329_v4 = vld [vmem:[%s7518_s1 + $0x130] sm:$0xff]  }
0x1f4d   :  { %v3236_v28 = vmul.f32 1.442695, %v3234_v5  ;;  %v3238_v7 = vmul.f32 1.442695, %v3235_v25  ;;  %v6330_v5 = vld [vmem:[%s7518_s1 + $0x138] sm:$0xff]  }
0x1f4e   :  { %v3398_v21 = vpop.permute.xlu1 %3397 }
0x1f4f   :  { %6413 = vpow2.f32 %v3236_v28  ;;  %v3400_v23 = vsel %vm221_vm4, %v3398_v21, 0  ;;  %v6331_v21 = vld [vmem:[%s7518_s1 + $0x150] sm:$0xff]  }
0x1f50   :  { %6415 = vpow2.f32 %v3238_v7 }
0x1f52   :  { %v3346_v24 = vpop.permute.xlu1 %3345 }
0x1f59   :  { %v6414_v8 = vpop.eup %6413 }
0x1f5a   :  { %v3240_v10 = vsel %vm3227_vm7, %v6414_v8, 0.0  ;;  %v6416_v32 = vpop.eup %6415 }
0x1f5b   :  { %3241 = vadd.xlane.f32.xlu0 %v3240_v10  ;;  %v3243_v12 = vsel %vm3227_vm7, %v6416_v32, 0.0 }
0x1f5f   :  { %3244 = vadd.xlane.f32.xlu0 %v3243_v12 }
0x1f75   :  { %3348 = vrot.lane.b32.xlu0 %v3134_v36, %s6487_s8 }
0x1fe8   :  { %v3242_v13 = vpop.xlane.xlu0 %3241 }
0x1fe9   :  { %6417 = vrcp.f32 %v3242_v13 }
0x1fec   :  { %v3245_v14 = vpop.xlane.xlu0 %3244 }
0x1fed   :  { %6419 = vrcp.f32 %v3245_v14 }
0x1ff0   :  { %v3349_v17 = vpop.permute.xlu0 %3348 }
0x1ff1   :  { %v3354_v20 = vsel %vm221_vm4, %v3349_v17, 0 }
0x1ff3   :  { %v6418_v15 = vpop.eup %6417 }
0x1ff4   :  { %v3248_v16 = vmul.f32 %v6418_v15, %v6414_v8 }
0x1ff6   :  { %v3250_v45 = vpack.c.bf16 %v3248_v16, %v3248_v16 }
0x1ff7   :  { %v6420_v18 = vpop.eup %6419 }
0x1ff8   :  { %v3249_v19 = vmul.f32 %v6420_v18, %v6416_v32  ;;  %6081 = vmatmul.mubr.msk.bf16.vlgmr.msra.gmra.mrb[104].mxu1 %vm311_vm6, %v3250_v45 }
0x1ff9   :  { %6091 = vmatpush3.bf16.xpose.msra.mxu1 %v3354_v20  ;;  %6092 = vmatprep.mubr.msk.bf16.mxu1 %vm6486_vm1, %v6485_v2 }
0x1ffa   :  { %v3251_v22 = vpack.c.bf16 %v3249_v19, %v3249_v19  ;;  %6102 = vmatprep.subr.bf16.mxu1 %v6485_v2 }
0x1ffc   :  { %6087 = vmatmul.mubr.msk.bf16.vlgmr.msra.gmra.mrb[108].mxu0 %vm311_vm6, %v3251_v22  ;;  %v6332_v22 = vld [vmem:[%s7518_s1 + $0x160] sm:$0xff]  }
0x1ffd   :  { %6097 = vmatpush3.bf16.xpose.msra.mxu0 %v3400_v23  ;;  %6098 = vmatprep.mubr.msk.bf16.mxu0 %vm6486_vm1, %v6485_v2  ;;  %v6334_v23 = vld [vmem:[%s7518_s1 + $0x168] sm:$0xff]  }
0x1ffe   :  { %6108 = vmatprep.subr.bf16.mxu0 %v6485_v2 }
0x2000   :  { %6093 = vmatmul.mubr.msk.bf16.vlgmr.msra.gmra.mrb[108].mxu1 %vm221_vm4, %v3346_v24 }
0x2001   :  { %6104 = vmatprep.mubr.msk.bf16.mxu1 %vm6486_vm1, %v6485_v2 }
0x2004   :  { %6099 = vmatmul.mubr.msk.bf16.vlgmr.msra.gmra.mrb[112].mxu0 %vm221_vm4, %v3346_v24  ;;  %v5431_v24 = vld [vmem:[%s7519_s2 + $0x13] ss:$0 sm:$0xff] }
0x2005   :  { %6110 = vmatprep.mubr.msk.bf16.mxu0 %vm6486_vm1, %v6485_v2 }
0x20cb   :  { %v7175_v11 = vpop.f32.mrb[104].mxu1 }
0x20cc   :  { %v6082_v26 = vpop.f32.mrb[105].mxu1 }
0x20cd   :  { %v3295_v27 = vpop.f32.mrb[106].mxu1 }
0x20ce   :  { %v6083_v29 = vpop.f32.mrb[107].mxu1 }
0x20cf   :  { %v7177_v35 = vpop.f32.mrb[108].mxu0 }
0x20d0   :  { %v6088_v30 = vpop.f32.mrb[109].mxu0 }
0x20d1   :  { %v3341_v31 = vpop.f32.mrb[110].mxu0 }
0x20d2   :  { %v6089_v33 = vpop.f32.mrb[111].mxu0 }
0x20d3   :  { %v3390_v36 = vpop.f32.mrb[108].mxu1 }
0x20d4   :  { %v6094_v37 = vpop.f32.mrb[109].mxu1  ;;  %v3442_v38 = vsel %vm3227_vm7, %v3390_v36, -inf }
0x20d5   :  { %3443 = vmax.xlane.f32.xlu1 %v3442_v38  ;;  %v3393_v39 = vpop.f32.mrb[110].mxu1  ;;  %v6335_v38 = vld [vmem:[%s7518_s1 + $0x140] sm:$0xff]  }
0x20d6   :  { %v6095_v40 = vpop.f32.mrb[111].mxu1 }
0x20d7   :  { %v3436_v49 = vpop.f32.mrb[112].mxu0  ;;  %v6336_v40 = vld [vmem:[%s7518_s1 + $0x148] sm:$0xff]  }
0x20d8   :  { %v6100_v41 = vpop.f32.mrb[113].mxu0  ;;  %v3445_v42 = vsel %vm3227_vm7, %v3436_v49, -inf }
0x20d9   :  { %3446 = vmax.xlane.f32.xlu0 %v3445_v42  ;;  %v3439_v6 = vpop.f32.mrb[114].mxu0 }
0x20da   :  { %v6101_v43 = vpop.f32.mrb[115].mxu0 }
0x20e6   :  { %3467 = vrot.lane.b32.xlu1 %v7135_v55, %s6487_s8 }
0x2162   :  { %v3444_v44 = vpop.xlane.xlu1 %3443 }
0x2163   :  { %v3448_v34 = vsub.f32 %v3390_v36, %v3444_v44 }
0x2165   :  { %v3450_v47 = vmul.f32 1.442695, %v3448_v34  ;;  %v5459_v34 = vld [vmem:[%s7519_s2 + $0x16] ss:$0 sm:$0xff] }
0x2166   :  { %v3468_v9 = vpop.permute.xlu1 %3467  ;;  %v3447_v50 = vpop.xlane.xlu0 %3446 }
0x2167   :  { %6421 = vpow2.f32 %v3450_v47  ;;  %v3473_v51 = vsel %vm339_vm5, %v3468_v9, 0  ;;  %v3449_v53 = vsub.f32 %v3436_v49, %v3447_v50  ;;  %v5455_v49 = vld [vmem:[%s7519_s2 + $0x15] ss:$0 sm:$0xff] }
0x2168   :  { %6103 = vmatpush3.bf16.msra.mxu1 %v3473_v51 }
0x2169   :  { %v3452_v54 = vmul.f32 1.442695, %v3449_v53  ;;  %6114 = vmatprep.subr.bf16.mxu1 %v6485_v2 }
0x216b   :  { %6423 = vpow2.f32 %v3452_v54 }
0x2171   :  { %v6422_v56 = vpop.eup %6421 }
0x2172   :  { %v3454_v57 = vsel %vm3227_vm7, %v6422_v56, 0.0 }
0x2173   :  { %3455 = vadd.xlane.f32.xlu0 %v3454_v57 }
0x2175   :  { %v6424_v58 = vpop.eup %6423 }
0x2176   :  { %v3457_v55 = vsel %vm3227_vm7, %v6424_v58, 0.0 }
0x2177   :  { %3458 = vadd.xlane.f32.xlu0 %v3457_v55  ;;  %v5463_v55 = vld [vmem:[%s7519_s2 + $0x14] ss:$0 sm:$0xff] }
0x218d   :  { %3516 = vrot.lane.b32.xlu0 %v7137_v48, %s6487_s8 }
0x2200   :  { %v3456_v59 = vpop.xlane.xlu0 %3455 }
0x2201   :  { %6425 = vrcp.f32 %v3456_v59 }
0x2204   :  { %v3459_v60 = vpop.xlane.xlu0 %3458 }
0x2205   :  { %6427 = vrcp.f32 %v3459_v60 }
0x2208   :  { %v3517_v61 = vpop.permute.xlu0 %3516 }
0x2209   :  { %v3522_v62 = vsel %vm339_vm5, %v3517_v61, 0 }
0x220a   :  { %6109 = vmatpush3.bf16.msra.mxu0 %v3522_v62 }
0x220b   :  { %v6426_v63 = vpop.eup %6425  ;;  %6122 = vmatprep.subr.bf16.mxu0 %v6485_v2 }
0x220c   :  { %v3462_v0 = vmul.f32 %v6426_v63, %v6422_v56 }
0x220e   :  { %v3464_v52 = vpack.c.bf16 %v3462_v0, %v3462_v0 }
0x220f   :  { %v6428_v1 = vpop.eup %6427 }
0x2210   :  { %v3463_v3 = vmul.f32 %v6428_v1, %v6424_v58  ;;  %6105 = vmatmul.mubr.msk.bf16.vlgmr.msra.gmra.mrb[112].mxu1 %vm311_vm6, %v3464_v52 }
0x2211   :  { %6118 = vmatprep.mubr.msk.bf16.mxu1 %vm6486_vm1, %v6485_v2  ;;  %6115 = vmatpush3.bf16.msra.mxu1 %v6329_v4 }
0x2212   :  { %v3465_v48 = vpack.c.bf16 %v3463_v3, %v3463_v3  ;;  %6116 = vmatprep.subr.bf16.mxu1 %v6485_v2 }
0x2214   :  { %6111 = vmatmul.mubr.msk.bf16.vlgmr.msra.gmra.mrb[116].mxu0 %vm311_vm6, %v3465_v48 }
0x2215   :  { %6126 = vmatprep.mubr.msk.bf16.mxu0 %vm6486_vm1, %v6485_v2  ;;  %6117 = vmatpush3.bf16.msra.mxu1 %v6330_v5 }
0x2216   :  { %6130 = vmatprep.subr.bf16.mxu1 %v6485_v2  ;;  %6123 = vmatpush3.bf16.msra.mxu0 %v6331_v21 }
0x2217   :  { %6124 = vmatprep.subr.bf16.mxu0 %v6485_v2 }
0x22e3   :  { %v3509_v25 = vpop.f32.mrb[112].mxu1 }
0x22e4   :  { %3566 = vrot.lane.b32.xlu1 %v3509_v25, %s6488_s13  ;;  %v6106_v28 = vpop.f32.mrb[113].mxu1 }
0x22e5   :  { %v3512_v7 = vpop.f32.mrb[114].mxu1 }
0x22e6   :  { %v6107_v8 = vpop.f32.mrb[115].mxu1 }
0x22e7   :  { %v3558_v10 = vpop.f32.mrb[116].mxu0 }
0x22e8   :  { %3568 = vrot.lane.b32.xlu1 %v3558_v10, %s6488_s13  ;;  %v6112_v32 = vpop.f32.mrb[117].mxu0 }
0x22e9   :  { %v3561_v12 = vpop.f32.mrb[118].mxu0 }
0x22ea   :  { %v6113_v13 = vpop.f32.mrb[119].mxu0 }
0x2356   :  { %v3567_v14 = vpop.permute.xlu1 %3566 }
0x2357   :  { %v3572_v15 = vsel %vm221_vm4, %v7175_v11, %v3567_v14 }
0x2358   :  { %v3574_v45 = vadd.f32 %v3572_v15, %v7132_v46 }
0x235a   :  { %v3569_v16 = vpop.permute.xlu1 %3568 }
0x235b   :  { %v3573_v17 = vsel %vm221_vm4, %v7177_v35, %v3569_v16 }
0x235c   :  { %v3575_v18 = vadd.f32 %v3573_v17, %v7132_v46  ;;  %v6333_v46 = vld [vmem:[%s7518_s1 + $0x158] sm:$0xff]  }
0x235d   :  { %6125 = vmatpush3.bf16.msra.mxu0 %v6333_v46 }
0x235e   :  { %v3578_v19 = vcombine.low %v3574_v45, %v3575_v18  ;;  %6138 = vmatprep.subr.bf16.mxu0 %v6485_v2 }
0x2360   :  { %v3580_v20 = vpack.c.bf16 %v3578_v19, %v3578_v19 }
0x2362   :  { %6119 = vmatmul.mubr.msk.bf16.vlgmr.msra.gmra.mrb[116].mxu1 %vm171_vm3, %v3580_v20 }
0x2363   :  { %6134 = vmatprep.mubr.msk.bf16.mxu1 %vm6486_vm1, %v6485_v2  ;;  %6131 = vmatpush3.bf16.msra.mxu1 %v6332_v22 }
0x2364   :  { %6132 = vmatprep.subr.bf16.mxu1 %v6485_v2 }
0x2367   :  { %6133 = vmatpush3.bf16.msra.mxu1 %v6334_v23 }
0x2368   :  { %6146 = vmatprep.subr.bf16.mxu1 %v6485_v2 }
0x2435   :  { %v3636_v11 = vpop.f32.mrb[116].mxu1 }
0x2436   :  { %v3637_v26 = vadd.f32 %v5431_v24, %v3636_v11  ;;  %v6120_v27 = vpop.f32.mrb[117].mxu1 }
0x2437   :  { %v3639_v29 = vpop.f32.mrb[118].mxu1 }
0x2438   :  { %v3642_v35 = vmax.f32 %v3637_v26, 0.0  ;;  %v6121_v30 = vpop.f32.mrb[119].mxu1 }
0x243a   :  { %v3644_v31 = vcombine.high %v3642_v35, %v3642_v35  ;;  %v3646_v33 = vadd.f32 %v3642_v35, %v3574_v45 }
0x243c   :  { %v3647_v36 = vadd.f32 %v3644_v31, %v3575_v18 }
0x243e   :  { %v3678_v37 = vcombine.low %v3646_v33, %v3647_v36 }
0x2440   :  { %v3680_v39 = vpack.c.bf16 %v3678_v37, %v3678_v37 }
0x2442   :  { %6127 = vmatmul.mubr.msk.bf16.vlgmr.msra.gmra.mrb[120].mxu0 %vm171_vm3, %v3680_v39  ;;  %6135 = vmatmul.mubr.msk.bf16.vlgmr.msra.gmra.mrb[120].mxu1 %vm171_vm3, %v3680_v39 }
0x2443   :  { %6139 = vmatpush3.bf16.msra.mxu0 %v6335_v38  ;;  %6142 = vmatprep.mubr.msk.bf16.mxu0 %vm6486_vm1, %v6485_v2 }
0x2444   :  { %6140 = vmatprep.subr.bf16.mxu0 %v6485_v2  ;;  %6148 = vmatprep.mubr.msk.bf16.mxu1 %vm6486_vm1, %v6485_v2 }
0x2447   :  { %6141 = vmatpush3.bf16.msra.mxu0 %v6336_v40 }
0x2448   :  { %6152 = vmatprep.subr.bf16.mxu0 %v6485_v2 }
0x244a   :  { %6143 = vmatmul.mubr.msk.bf16.vlgmr.msra.gmra.mrb[124].mxu0 %vm171_vm3, %v3680_v39 }
0x244b   :  { %6154 = vmatprep.mubr.msk.bf16.mxu0 %vm6486_vm1, %v6485_v2 }
0x2515   :  { %v3736_v41 = vpop.f32.mrb[120].mxu0  ;;  %v3794_v42 = vpop.f32.mrb[120].mxu1 }
0x2516   :  { %v3737_v6 = vadd.f32 %v5455_v49, %v3736_v41  ;;  %v6128_v43 = vpop.f32.mrb[121].mxu0  ;;  %v6136_v44 = vpop.f32.mrb[121].mxu1  ;;  %v3795_v57 = vadd.f32 %v5459_v34, %v3794_v42 }
0x2517   :  { %v3739_v47 = vpop.f32.mrb[122].mxu0  ;;  %v3797_v9 = vpop.f32.mrb[122].mxu1 }
0x2518   :  { %v3801_v50 = vcombine.high %v3737_v6, %v3737_v6  ;;  %v3871_v51 = vpack.c.bf16 %v3737_v6, %v3737_v6  ;;  %v6129_v53 = vpop.f32.mrb[123].mxu0  ;;  %v6137_v54 = vpop.f32.mrb[123].mxu1  ;;  %v3804_v61 = vcombine.high %v3795_v57, %v3795_v57  ;;  %v7267_v52 = vpack.c.bf16 %v3795_v57, %v3795_v57 }
0x251a   :  { %v3872_v56 = vpack.c.bf16 %v3801_v50, %v3801_v50  ;;  %v3879_v58 = vsel %vm221_vm4, %v3871_v51, 0  ;;  %v7274_v4 = vpack.c.bf16 %v3804_v61, %v3804_v61  ;;  %v3996_v7 = vsel %vm57_vm0, %v7267_v52, 0 }
0x251b   :  { %6147 = vmatpush3.bf16.xpose.msra.mxu1 %v3879_v58 }
0x251c   :  { %v3925_v59 = vsel %vm221_vm4, %v3872_v56, 0  ;;  %6158 = vmatprep.subr.bf16.mxu1 %v6485_v2  ;;  %v4042_v8 = vsel %vm57_vm0, %v7274_v4, 0 }
0x251d   :  { %v3858_v60 = vpop.f32.mrb[124].mxu0  ;;  %6153 = vmatpush3.bf16.xpose.msra.mxu0 %v3925_v59 }
0x251e   :  { %v7264_v62 = vadd.f32 %v5463_v55, %v3858_v60  ;;  %v6144_v63 = vpop.f32.mrb[125].mxu0  ;;  %6164 = vmatprep.subr.bf16.mxu0 %v6485_v2 }
0x251f   :  { %v3861_v0 = vpop.f32.mrb[126].mxu0 }
0x2520   :  { %v7271_v1 = vcombine.high %v7264_v62, %v7264_v62  ;;  %v3867_v3 = vmul.f32 0.17677669, %v7264_v62  ;;  %v6145_v48 = vpop.f32.mrb[127].mxu0 }
0x2522   :  { %v3868_v5 = vmul.f32 0.17677669, %v7271_v1  ;;  %v3869_v25 = vpack.c.bf16 %v3867_v3, %v3867_v3 }
0x2524   :  { %v3870_v28 = vpack.c.bf16 %v3868_v5, %v3868_v5  ;;  %6149 = vmatmul.mubr.msk.bf16.vlgmr.msra.gmra.mrb[124].mxu1 %vm221_vm4, %v3869_v25 }
0x2525   :  { %6159 = vmatpush3.bf16.msra.mxu1 %v3996_v7  ;;  %6160 = vmatprep.mubr.msk.bf16.mxu1 %vm6486_vm1, %v6485_v2 }
0x2526   :  { %6155 = vmatmul.mubr.msk.bf16.vlgmr.msra.gmra.mrb[128].mxu0 %vm221_vm4, %v3870_v28  ;;  %6170 = vmatprep.subr.bf16.mxu1 %v6485_v2 }
0x2527   :  { %6165 = vmatpush3.bf16.msra.mxu0 %v4042_v8  ;;  %6166 = vmatprep.mubr.msk.bf16.mxu0 %vm6486_vm1, %v6485_v2 }
0x2528   :  { %6176 = vmatprep.subr.bf16.mxu0 %v6485_v2 }
0x25f7   :  { %v3915_v10 = vpop.f32.mrb[124].mxu1 }
0x25f8   :  { %v6150_v32 = vpop.f32.mrb[125].mxu1  ;;  %v3968_v12 = vsel %vm3967_vm8, %v3915_v10, -inf }
0x25f9   :  { %3969 = vmax.xlane.f32.xlu1 %v3968_v12  ;;  %v3918_v13 = vpop.f32.mrb[126].mxu1  ;;  %v3961_v14 = vpop.f32.mrb[128].mxu0 }
0x25fa   :  { %v6151_v15 = vpop.f32.mrb[127].mxu1  ;;  %v6156_v16 = vpop.f32.mrb[129].mxu0  ;;  %v3971_v17 = vsel %vm3967_vm8, %v3961_v14, -inf }
0x25fb   :  { %3972 = vmax.xlane.f32.xlu0 %v3971_v17  ;;  %v3964_v45 = vpop.f32.mrb[130].mxu0 }
0x25fc   :  { %v6157_v18 = vpop.f32.mrb[131].mxu0 }
0x260a   :  { %4088 = vrot.lane.b32.xlu1 %v3871_v51, %s6487_s8 }
0x260e   :  { %4085 = vrot.lane.b32.xlu1 %v3869_v25, %s6487_s8 }
0x2612   :  { %4137 = vrot.lane.b32.xlu1 %v3870_v28, %s6487_s8 }
0x2686   :  { %v3970_v19 = vpop.xlane.xlu1 %3969 }
0x2687   :  { %v3974_v20 = vsub.f32 %v3915_v10, %v3970_v19 }
0x2688   :  { %v3973_v21 = vpop.xlane.xlu0 %3972 }
0x2689   :  { %v3976_v22 = vmul.f32 1.442695, %v3974_v20  ;;  %v3975_v46 = vsub.f32 %v3961_v14, %v3973_v21 }
0x268a   :  { %v4089_v33 = vpop.permute.xlu1 %4088 }
0x268b   :  { %6429 = vpow2.f32 %v3976_v22  ;;  %v3978_v23 = vmul.f32 1.442695, %v3975_v46  ;;  %v4094_v38 = vsel %vm221_vm4, %v4089_v33, 0  ;;  %v6337_v22 = vld [vmem:[%s7518_s1 + $0x170] sm:$0xff]   ;;  %v6338_v46 = vld [vmem:[%s7518_s1 + $0x178] sm:$0xff]  }
0x268d   :  { %6431 = vpow2.f32 %v3978_v23 }
0x268e   :  { %v4086_v42 = vpop.permute.xlu1 %4085 }
0x2692   :  { %v4138_v6 = vpop.permute.xlu1 %4137 }
0x2695   :  { %v6430_v24 = vpop.eup %6429 }
0x2696   :  { %v3980_v11 = vsel %vm3967_vm8, %v6430_v24, 0.0 }
0x2697   :  { %v6432_v26 = vpop.eup %6431  ;;  %3981 = vadd.xlane.f32.xlu0 %v3980_v11 }
0x2698   :  { %v3983_v27 = vsel %vm3967_vm8, %v6432_v26, 0.0 }
0x269b   :  { %3984 = vadd.xlane.f32.xlu0 %v3983_v27 }
0x26b1   :  { %4140 = vrot.lane.b32.xlu0 %v3872_v56, %s6487_s8 }
0x2724   :  { %v3982_v29 = vpop.xlane.xlu0 %3981 }
0x2725   :  { %6433 = vrcp.f32 %v3982_v29 }
0x2728   :  { %v3985_v35 = vpop.xlane.xlu0 %3984 }
0x2729   :  { %6435 = vrcp.f32 %v3985_v35 }
0x272c   :  { %v4141_v40 = vpop.permute.xlu0 %4140 }
0x272d   :  { %v4146_v41 = vsel %vm221_vm4, %v4141_v40, 0 }
0x272f   :  { %v6434_v30 = vpop.eup %6433 }
0x2730   :  { %v3988_v31 = vmul.f32 %v6434_v30, %v6430_v24 }
0x2732   :  { %v3990_v36 = vpack.c.bf16 %v3988_v31, %v3988_v31 }
0x2733   :  { %v6436_v37 = vpop.eup %6435 }
0x2734   :  { %v3989_v39 = vmul.f32 %v6436_v37, %v6432_v26  ;;  %6161 = vmatmul.mubr.msk.bf16.vlgmr.msra.gmra.mrb[128].mxu1 %vm53_vm2, %v3990_v36 }
0x2735   :  { %6171 = vmatpush3.bf16.xpose.msra.mxu1 %v4094_v38  ;;  %6172 = vmatprep.mubr.msk.bf16.mxu1 %vm6486_vm1, %v6485_v2 }
0x2736   :  { %v3991_v49 = vpack.c.bf16 %v3989_v39, %v3989_v39  ;;  %6182 = vmatprep.subr.bf16.mxu1 %v6485_v2 }
0x2738   :  { %6167 = vmatmul.mubr.msk.bf16.vlgmr.msra.gmra.mrb[132].mxu0 %vm53_vm2, %v3991_v49 }
0x2739   :  { %6177 = vmatpush3.bf16.xpose.msra.mxu0 %v4146_v41  ;;  %6178 = vmatprep.mubr.msk.bf16.mxu0 %vm6486_vm1, %v6485_v2  ;;  %v6339_v41 = vld [vmem:[%s7518_s1 + $0x190] sm:$0xff]  }
0x273a   :  { %6188 = vmatprep.subr.bf16.mxu0 %v6485_v2 }
0x273c   :  { %6173 = vmatmul.mubr.msk.bf16.vlgmr.msra.gmra.mrb[132].mxu1 %vm221_vm4, %v4086_v42  ;;  %v6340_v42 = vld [vmem:[%s7518_s1 + $0x1a0] sm:$0xff]  }
0x273d   :  { %6184 = vmatprep.mubr.msk.bf16.mxu1 %vm6486_vm1, %v6485_v2 }
0x2740   :  { %6179 = vmatmul.mubr.msk.bf16.vlgmr.msra.gmra.mrb[136].mxu0 %vm221_vm4, %v4138_v6  ;;  %v5475_v6 = vld [vmem:[%s7519_s2 + $0x17] ss:$0 sm:$0xff] }
0x2741   :  { %6190 = vmatprep.mubr.msk.bf16.mxu0 %vm6486_vm1, %v6485_v2 }
0x2807   :  { %v7313_v43 = vpop.f32.mrb[128].mxu1 }
0x2808   :  { %v6162_v44 = vpop.f32.mrb[129].mxu1 }
0x2809   :  { %v4035_v34 = vpop.f32.mrb[130].mxu1 }
0x280a   :  { %v6163_v47 = vpop.f32.mrb[131].mxu1 }
0x280b   :  { %v7315_v9 = vpop.f32.mrb[132].mxu0 }
0x280c   :  { %v6168_v50 = vpop.f32.mrb[133].mxu0 }
0x280d   :  { %v4081_v51 = vpop.f32.mrb[134].mxu0 }
0x280e   :  { %v6169_v53 = vpop.f32.mrb[135].mxu0 }
0x280f   :  { %v4130_v54 = vpop.f32.mrb[132].mxu1 }
0x2810   :  { %v6174_v56 = vpop.f32.mrb[133].mxu1  ;;  %v4188_v57 = vsel %vm3967_vm8, %v4130_v54, -inf }
0x2811   :  { %4189 = vmax.xlane.f32.xlu1 %v4188_v57  ;;  %v4133_v58 = vpop.f32.mrb[134].mxu1  ;;  %v6343_v57 = vld [vmem:[%s7518_s1 + $0x180] sm:$0xff]  }
0x2812   :  { %v6175_v55 = vpop.f32.mrb[135].mxu1 }
0x2813   :  { %v4182_v59 = vpop.f32.mrb[136].mxu0  ;;  %v6344_v55 = vld [vmem:[%s7518_s1 + $0x188] sm:$0xff]  }
0x2814   :  { %v6180_v60 = vpop.f32.mrb[137].mxu0  ;;  %v4191_v61 = vsel %vm3967_vm8, %v4182_v59, -inf }
0x2815   :  { %4192 = vmax.xlane.f32.xlu0 %v4191_v61  ;;  %v4185_v63 = vpop.f32.mrb[138].mxu0 }
0x2816   :  { %v6181_v0 = vpop.f32.mrb[139].mxu0 }
0x2822   :  { %4213 = vrot.lane.b32.xlu1 %v7267_v52, %s6487_s8 }
0x289e   :  { %v4190_v3 = vpop.xlane.xlu1 %4189 }
0x289f   :  { %v4194_v48 = vsub.f32 %v4130_v54, %v4190_v3 }
0x28a1   :  { %v4196_v5 = vmul.f32 1.442695, %v4194_v48  ;;  %v5503_v48 = vld [vmem:[%s7519_s2 + $0x1a] ss:$0 sm:$0xff] }
0x28a2   :  { %v4214_v25 = vpop.permute.xlu1 %4213  ;;  %v4193_v28 = vpop.xlane.xlu0 %4192 }
0x28a3   :  { %6437 = vpow2.f32 %v4196_v5  ;;  %v4219_v7 = vsel %vm57_vm0, %v4214_v25, 0  ;;  %v4195_v8 = vsub.f32 %v4182_v59, %v4193_v28  ;;  %v5499_v59 = vld [vmem:[%s7519_s2 + $0x19] ss:$0 sm:$0xff] }
0x28a4   :  { %6183 = vmatpush3.bf16.msra.mxu1 %v4219_v7 }
0x28a5   :  { %v4198_v10 = vmul.f32 1.442695, %v4195_v8  ;;  %6194 = vmatprep.subr.bf16.mxu1 %v6485_v2 }
0x28a7   :  { %6439 = vpow2.f32 %v4198_v10 }
0x28ad   :  { %v6438_v32 = vpop.eup %6437 }
0x28ae   :  { %v4200_v12 = vsel %vm3967_vm8, %v6438_v32, 0.0 }
0x28af   :  { %4201 = vadd.xlane.f32.xlu0 %v4200_v12 }
0x28b1   :  { %v6440_v13 = vpop.eup %6439 }
0x28b2   :  { %v4203_v52 = vsel %vm3967_vm8, %v6440_v13, 0.0 }
0x28b3   :  { %4204 = vadd.xlane.f32.xlu0 %v4203_v52  ;;  %v5507_v52 = vld [vmem:[%s7519_s2 + $0x18] ss:$0 sm:$0xff] }
0x28c9   :  { %4262 = vrot.lane.b32.xlu0 %v7274_v4, %s6487_s8 }
0x293c   :  { %v4202_v14 = vpop.xlane.xlu0 %4201 }
0x293d   :  { %6441 = vrcp.f32 %v4202_v14 }
0x2940   :  { %v4205_v15 = vpop.xlane.xlu0 %4204 }
0x2941   :  { %6443 = vrcp.f32 %v4205_v15 }
0x2944   :  { %v4263_v16 = vpop.permute.xlu0 %4262 }
0x2945   :  { %v4268_v17 = vsel %vm57_vm0, %v4263_v16, 0 }
0x2946   :  { %6189 = vmatpush3.bf16.msra.mxu0 %v4268_v17 }
0x2947   :  { %v6442_v45 = vpop.eup %6441  ;;  %6202 = vmatprep.subr.bf16.mxu0 %v6485_v2 }
0x2948   :  { %v4208_v18 = vmul.f32 %v6442_v45, %v6438_v32 }
0x294a   :  { %v4210_v19 = vpack.c.bf16 %v4208_v18, %v4208_v18 }
0x294b   :  { %v6444_v20 = vpop.eup %6443 }
0x294c   :  { %v4209_v21 = vmul.f32 %v6444_v20, %v6440_v13  ;;  %6185 = vmatmul.mubr.msk.bf16.vlgmr.msra.gmra.mrb[136].mxu1 %vm53_vm2, %v4210_v19 }
0x294d   :  { %6198 = vmatprep.mubr.msk.bf16.mxu1 %vm6486_vm1, %v6485_v2  ;;  %6195 = vmatpush3.bf16.msra.mxu1 %v6337_v22 }
0x294e   :  { %v4211_v4 = vpack.c.bf16 %v4209_v21, %v4209_v21  ;;  %6196 = vmatprep.subr.bf16.mxu1 %v6485_v2 }
0x2950   :  { %6191 = vmatmul.mubr.msk.bf16.vlgmr.msra.gmra.mrb[140].mxu0 %vm53_vm2, %v4211_v4 }
0x2951   :  { %6206 = vmatprep.mubr.msk.bf16.mxu0 %vm6486_vm1, %v6485_v2  ;;  %6197 = vmatpush3.bf16.msra.mxu1 %v6338_v46 }
0x2952   :  { %6210 = vmatprep.subr.bf16.mxu1 %v6485_v2  ;;  %6203 = vmatpush3.bf16.msra.mxu0 %v6339_v41 }
0x2953   :  { %6204 = vmatprep.subr.bf16.mxu0 %v6485_v2 }
0x2a1f   :  { %v4255_v23 = vpop.f32.mrb[136].mxu1 }
0x2a20   :  { %4312 = vrot.lane.b32.xlu1 %v4255_v23, %s6488_s13  ;;  %v6186_v24 = vpop.f32.mrb[137].mxu1 }
0x2a21   :  { %v4258_v11 = vpop.f32.mrb[138].mxu1 }
0x2a22   :  { %v6187_v26 = vpop.f32.mrb[139].mxu1 }
0x2a23   :  { %v4304_v27 = vpop.f32.mrb[140].mxu0 }
0x2a24   :  { %4314 = vrot.lane.b32.xlu1 %v4304_v27, %s6488_s13  ;;  %v6192_v29 = vpop.f32.mrb[141].mxu0 }
0x2a25   :  { %v4307_v35 = vpop.f32.mrb[142].mxu0 }
0x2a26   :  { %v6193_v30 = vpop.f32.mrb[143].mxu0 }
0x2a92   :  { %v4313_v31 = vpop.permute.xlu1 %4312 }
0x2a93   :  { %v4318_v33 = vsel %vm221_vm4, %v7313_v43, %v4313_v31 }
0x2a94   :  { %v4320_v38 = vadd.f32 %v4318_v33, %v7264_v62  ;;  %v6341_v62 = vld [vmem:[%s7518_s1 + $0x198] sm:$0xff]  }
0x2a95   :  { %6205 = vmatpush3.bf16.msra.mxu0 %v6341_v62 }
0x2a96   :  { %v4315_v36 = vpop.permute.xlu1 %4314  ;;  %6218 = vmatprep.subr.bf16.mxu0 %v6485_v2 }
0x2a97   :  { %v4319_v37 = vsel %vm221_vm4, %v7315_v9, %v4315_v36 }
0x2a98   :  { %v4321_v39 = vadd.f32 %v4319_v37, %v7271_v1  ;;  %v6342_v1 = vld [vmem:[%s7518_s1 + $0x1a8] sm:$0xff]  }
0x2a9a   :  { %v4324_v40 = vcombine.low %v4320_v38, %v4321_v39 }
0x2a9c   :  { %v4326_v49 = vpack.c.bf16 %v4324_v40, %v4324_v40 }
0x2a9e   :  { %6199 = vmatmul.mubr.msk.bf16.vlgmr.msra.gmra.mrb[140].mxu1 %vm171_vm3, %v4326_v49 }
0x2a9f   :  { %6214 = vmatprep.mubr.msk.bf16.mxu1 %vm6486_vm1, %v6485_v2  ;;  %6211 = vmatpush3.bf16.msra.mxu1 %v6340_v42 }
0x2aa0   :  { %6212 = vmatprep.subr.bf16.mxu1 %v6485_v2 }
0x2aa3   :  { %6213 = vmatpush3.bf16.msra.mxu1 %v6342_v1 }
0x2aa4   :  { %6226 = vmatprep.subr.bf16.mxu1 %v6485_v2 }
0x2b71   :  { %v4382_v43 = vpop.f32.mrb[140].mxu1 }
0x2b72   :  { %v4383_v44 = vadd.f32 %v5475_v6, %v4382_v43  ;;  %v6200_v34 = vpop.f32.mrb[141].mxu1 }
0x2b73   :  { %v4385_v47 = vpop.f32.mrb[142].mxu1 }
0x2b74   :  { %v4388_v9 = vmax.f32 %v4383_v44, 0.0  ;;  %v6201_v50 = vpop.f32.mrb[143].mxu1 }
0x2b76   :  { %v4390_v51 = vcombine.high %v4388_v9, %v4388_v9  ;;  %v4392_v53 = vadd.f32 %v4388_v9, %v4320_v38 }
0x2b78   :  { %v4393_v54 = vadd.f32 %v4390_v51, %v4321_v39 }
0x2b7a   :  { %v4424_v56 = vcombine.low %v4392_v53, %v4393_v54 }
0x2b7c   :  { %v4426_v58 = vpack.c.bf16 %v4424_v56, %v4424_v56 }
0x2b7e   :  { %6207 = vmatmul.mubr.msk.bf16.vlgmr.msra.gmra.mrb[144].mxu0 %vm171_vm3, %v4426_v58  ;;  %6215 = vmatmul.mubr.msk.bf16.vlgmr.msra.gmra.mrb[144].mxu1 %vm171_vm3, %v4426_v58 }
0x2b7f   :  { %6219 = vmatpush3.bf16.msra.mxu0 %v6343_v57  ;;  %6222 = vmatprep.mubr.msk.bf16.mxu0 %vm6486_vm1, %v6485_v2 }
0x2b80   :  { %6220 = vmatprep.subr.bf16.mxu0 %v6485_v2  ;;  %6228 = vmatprep.mubr.msk.bf16.mxu1 %vm6486_vm1, %v6485_v2 }
0x2b83   :  { %6221 = vmatpush3.bf16.msra.mxu0 %v6344_v55 }
0x2b84   :  { %6232 = vmatprep.subr.bf16.mxu0 %v6485_v2 }
0x2b86   :  { %6223 = vmatmul.mubr.msk.bf16.vlgmr.msra.gmra.mrb[148].mxu0 %vm171_vm3, %v4426_v58 }
0x2b87   :  { %6234 = vmatprep.mubr.msk.bf16.mxu0 %vm6486_vm1, %v6485_v2 }
0x2c51   :  { %v4482_v60 = vpop.f32.mrb[144].mxu0  ;;  %v4540_v61 = vpop.f32.mrb[144].mxu1 }
0x2c52   :  { %v4483_v63 = vadd.f32 %v5499_v59, %v4482_v60  ;;  %v6208_v0 = vpop.f32.mrb[145].mxu0  ;;  %v6216_v3 = vpop.f32.mrb[145].mxu1  ;;  %v4541_v12 = vadd.f32 %v5503_v48, %v4540_v61 }
0x2c53   :  { %v4485_v5 = vpop.f32.mrb[146].mxu0  ;;  %v4543_v25 = vpop.f32.mrb[146].mxu1 }
0x2c54   :  { %v4547_v28 = vcombine.high %v4483_v63, %v4483_v63  ;;  %v4617_v7 = vpack.c.bf16 %v4483_v63, %v4483_v63  ;;  %v6209_v8 = vpop.f32.mrb[147].mxu0  ;;  %v6217_v10 = vpop.f32.mrb[147].mxu1  ;;  %v4550_v16 = vcombine.high %v4541_v12, %v4541_v12  ;;  %v7405_v19 = vpack.c.bf16 %v4541_v12, %v4541_v12 }
0x2c56   :  { %v4618_v32 = vpack.c.bf16 %v4547_v28, %v4547_v28  ;;  %v4625_v13 = vsel %vm221_vm4, %v4617_v7, 0  ;;  %v7412_v22 = vpack.c.bf16 %v4550_v16, %v4550_v16  ;;  %v4741_v11 = vsel %vm57_vm0, %v7405_v19, 0 }
0x2c57   :  { %6227 = vmatpush3.bf16.xpose.msra.mxu1 %v4625_v13 }
0x2c58   :  { %v4671_v14 = vsel %vm221_vm4, %v4618_v32, 0  ;;  %6238 = vmatprep.subr.bf16.mxu1 %v6485_v2  ;;  %v4787_v26 = vsel %vm57_vm0, %v7412_v22, 0 }
0x2c59   :  { %v4604_v15 = vpop.f32.mrb[148].mxu0  ;;  %6233 = vmatpush3.bf16.xpose.msra.mxu0 %v4671_v14 }
0x2c5a   :  { %v7402_v17 = vadd.f32 %v5507_v52, %v4604_v15  ;;  %v6224_v45 = vpop.f32.mrb[149].mxu0  ;;  %6244 = vmatprep.subr.bf16.mxu0 %v6485_v2 }
0x2c5b   :  { %v4607_v18 = vpop.f32.mrb[150].mxu0 }
0x2c5c   :  { %v7409_v20 = vcombine.high %v7402_v17, %v7402_v17  ;;  %v4613_v21 = vmul.f32 0.17677669, %v7402_v17  ;;  %v6225_v4 = vpop.f32.mrb[151].mxu0 }
0x2c5e   :  { %v4614_v46 = vmul.f32 0.17677669, %v7409_v20  ;;  %v4615_v23 = vpack.c.bf16 %v4613_v21, %v4613_v21 }
0x2c60   :  { %v4616_v24 = vpack.c.bf16 %v4614_v46, %v4614_v46  ;;  %6229 = vmatmul.mubr.msk.bf16.vlgmr.msra.gmra.mrb[148].mxu1 %vm221_vm4, %v4615_v23 }
0x2c61   :  { %6239 = vmatpush3.bf16.msra.mxu1 %v4741_v11  ;;  %6240 = vmatprep.mubr.msk.bf16.mxu1 %vm6486_vm1, %v6485_v2 }
0x2c62   :  { %6235 = vmatmul.mubr.msk.bf16.vlgmr.msra.gmra.mrb[152].mxu0 %vm221_vm4, %v4616_v24  ;;  %6250 = vmatprep.subr.bf16.mxu1 %v6485_v2 }
0x2c63   :  { %6245 = vmatpush3.bf16.msra.mxu0 %v4787_v26  ;;  %6246 = vmatprep.mubr.msk.bf16.mxu0 %vm6486_vm1, %v6485_v2 }
0x2c64   :  { %6256 = vmatprep.subr.bf16.mxu0 %v6485_v2 }
0x2d33   :  { %v4661_v27 = vpop.f32.mrb[148].mxu1 }
0x2d34   :  { %v6230_v29 = vpop.f32.mrb[149].mxu1  ;;  %v4713_v35 = vsel %vm3967_vm8, %v4661_v27, -inf }
0x2d35   :  { %4714 = vmax.xlane.f32.xlu1 %v4713_v35  ;;  %v4664_v30 = vpop.f32.mrb[150].mxu1  ;;  %v4707_v31 = vpop.f32.mrb[152].mxu0 }
0x2d36   :  { %v6231_v33 = vpop.f32.mrb[151].mxu1  ;;  %v6236_v36 = vpop.f32.mrb[153].mxu0  ;;  %v4716_v37 = vsel %vm3967_vm8, %v4707_v31, -inf }
0x2d37   :  { %4717 = vmax.xlane.f32.xlu0 %v4716_v37  ;;  %v4710_v38 = vpop.f32.mrb[154].mxu0 }
0x2d38   :  { %v6237_v39 = vpop.f32.mrb[155].mxu0 }
0x2d46   :  { %4833 = vrot.lane.b32.xlu1 %v4617_v7, %s6487_s8 }
0x2d4a   :  { %4830 = vrot.lane.b32.xlu1 %v4615_v23, %s6487_s8 }
0x2d4e   :  { %4882 = vrot.lane.b32.xlu1 %v4616_v24, %s6487_s8 }
0x2dc2   :  { %v4715_v40 = vpop.xlane.xlu1 %4714 }
0x2dc3   :  { %v4719_v49 = vsub.f32 %v4661_v27, %v4715_v40 }
0x2dc4   :  { %v4718_v41 = vpop.xlane.xlu0 %4717 }
0x2dc5   :  { %v4721_v42 = vmul.f32 1.442695, %v4719_v49  ;;  %v4720_v62 = vsub.f32 %v4707_v31, %v4718_v41 }
0x2dc6   :  { %v4834_v53 = vpop.permute.xlu1 %4833 }
0x2dc7   :  { %6445 = vpow2.f32 %v4721_v42  ;;  %v4723_v1 = vmul.f32 1.442695, %v4720_v62  ;;  %v4839_v57 = vsel %vm221_vm4, %v4834_v53, 0  ;;  %v6345_v42 = vld [vmem:[%s7518_s1 + $0x1b0] sm:$0xff]   ;;  %v6346_v62 = vld [vmem:[%s7518_s1 + $0x1b8] sm:$0xff]  }
0x2dc9   :  { %6447 = vpow2.f32 %v4723_v1 }
0x2dca   :  { %v4831_v61 = vpop.permute.xlu1 %4830 }
0x2dce   :  { %v4883_v63 = vpop.permute.xlu1 %4882 }
0x2dd1   :  { %v6446_v6 = vpop.eup %6445 }
0x2dd2   :  { %v4725_v43 = vsel %vm3967_vm8, %v6446_v6, 0.0 }
0x2dd3   :  { %v6448_v44 = vpop.eup %6447  ;;  %4726 = vadd.xlane.f32.xlu0 %v4725_v43 }
0x2dd4   :  { %v4728_v34 = vsel %vm3967_vm8, %v6448_v44, 0.0 }
0x2dd7   :  { %4729 = vadd.xlane.f32.xlu0 %v4728_v34 }
0x2ded   :  { %4885 = vrot.lane.b32.xlu0 %v4618_v32, %s6487_s8 }
0x2e60   :  { %v4727_v47 = vpop.xlane.xlu0 %4726 }
0x2e61   :  { %6449 = vrcp.f32 %v4727_v47 }
0x2e64   :  { %v4730_v9 = vpop.xlane.xlu0 %4729 }
0x2e65   :  { %6451 = vrcp.f32 %v4730_v9 }
0x2e68   :  { %v4886_v55 = vpop.permute.xlu0 %4885 }
0x2e69   :  { %v4891_v60 = vsel %vm221_vm4, %v4886_v55, 0 }
0x2e6b   :  { %v6450_v50 = vpop.eup %6449 }
0x2e6c   :  { %v4733_v51 = vmul.f32 %v6450_v50, %v6446_v6 }
0x2e6e   :  { %v4735_v54 = vpack.c.bf16 %v4733_v51, %v4733_v51 }
0x2e6f   :  { %v6452_v56 = vpop.eup %6451 }
0x2e70   :  { %v4734_v58 = vmul.f32 %v6452_v56, %v6448_v44  ;;  %6241 = vmatmul.mubr.msk.bf16.vlgmr.msra.gmra.mrb[152].mxu1 %vm53_vm2, %v4735_v54 }
0x2e71   :  { %6251 = vmatpush3.bf16.xpose.msra.mxu1 %v4839_v57  ;;  %6252 = vmatprep.mubr.msk.bf16.mxu1 %vm6486_vm1, %v6485_v2 }
0x2e72   :  { %v4736_v59 = vpack.c.bf16 %v4734_v58, %v4734_v58  ;;  %6262 = vmatprep.subr.bf16.mxu1 %v6485_v2 }
0x2e74   :  { %6247 = vmatmul.mubr.msk.bf16.vlgmr.msra.gmra.mrb[156].mxu0 %vm53_vm2, %v4736_v59 }
0x2e75   :  { %6257 = vmatpush3.bf16.xpose.msra.mxu0 %v4891_v60  ;;  %6258 = vmatprep.mubr.msk.bf16.mxu0 %vm6486_vm1, %v6485_v2  ;;  %v6347_v60 = vld [vmem:[%s7518_s1 + $0x1c0] sm:$0xff]  }
0x2e76   :  { %6268 = vmatprep.subr.bf16.mxu0 %v6485_v2 }
0x2e78   :  { %6253 = vmatmul.mubr.msk.bf16.vlgmr.msra.gmra.mrb[156].mxu1 %vm221_vm4, %v4831_v61  ;;  %v6348_v61 = vld [vmem:[%s7518_s1 + $0x1c8] sm:$0xff]  }
0x2e79   :  { %6264 = vmatprep.mubr.msk.bf16.mxu1 %vm6486_vm1, %v6485_v2 }
0x2e7c   :  { %6259 = vmatmul.mubr.msk.bf16.vlgmr.msra.gmra.mrb[160].mxu0 %vm221_vm4, %v4883_v63 }
0x2e7d   :  { %6270 = vmatprep.mubr.msk.bf16.mxu0 %vm6486_vm1, %v6485_v2 }
0x2f43   :  { %v7451_v0 = vpop.f32.mrb[152].mxu1 }
0x2f44   :  { %v6242_v3 = vpop.f32.mrb[153].mxu1 }
0x2f45   :  { %v4780_v48 = vpop.f32.mrb[154].mxu1 }
0x2f46   :  { %v6243_v5 = vpop.f32.mrb[155].mxu1 }
0x2f47   :  { %v7453_v25 = vpop.f32.mrb[156].mxu0 }
0x2f48   :  { %v6248_v28 = vpop.f32.mrb[157].mxu0 }
0x2f49   :  { %v4826_v7 = vpop.f32.mrb[158].mxu0 }
0x2f4a   :  { %v6249_v8 = vpop.f32.mrb[159].mxu0 }
0x2f4b   :  { %v4875_v10 = vpop.f32.mrb[156].mxu1 }
0x2f4c   :  { %v6254_v32 = vpop.f32.mrb[157].mxu1  ;;  %v4933_v12 = vsel %vm3967_vm8, %v4875_v10, -inf }
0x2f4d   :  { %4934 = vmax.xlane.f32.xlu1 %v4933_v12  ;;  %v4878_v13 = vpop.f32.mrb[158].mxu1 }
0x2f4e   :  { %v6255_v52 = vpop.f32.mrb[159].mxu1 }
0x2f4f   :  { %v4927_v14 = vpop.f32.mrb[160].mxu0 }
0x2f50   :  { %v6260_v15 = vpop.f32.mrb[161].mxu0  ;;  %v4936_v16 = vsel %vm3967_vm8, %v4927_v14, -inf }
0x2f51   :  { %4937 = vmax.xlane.f32.xlu0 %v4936_v16  ;;  %v4930_v45 = vpop.f32.mrb[162].mxu0 }
0x2f52   :  { %v6261_v18 = vpop.f32.mrb[163].mxu0 }
0x2f5e   :  { %4958 = vrot.lane.b32.xlu1 %v7405_v19, %s6487_s8 }
0x2fda   :  { %v4935_v21 = vpop.xlane.xlu1 %4934 }
0x2fdb   :  { %v4939_v4 = vsub.f32 %v4875_v10, %v4935_v21  ;;  %v5528_v10 = vld [vmem:[%s7519_s2 + $0x1c] ss:$0 sm:$0xff] }
0x2fdd   :  { %v4941_v46 = vmul.f32 1.442695, %v4939_v4 }
0x2fde   :  { %v4959_v23 = vpop.permute.xlu1 %4958  ;;  %v4938_v24 = vpop.xlane.xlu0 %4937 }
0x2fdf   :  { %6453 = vpow2.f32 %v4941_v46  ;;  %v4964_v11 = vsel %vm57_vm0, %v4959_v23, 0  ;;  %v4940_v26 = vsub.f32 %v4927_v14, %v4938_v24 }
0x2fe0   :  { %6263 = vmatpush3.bf16.msra.mxu1 %v4964_v11 }
0x2fe1   :  { %v4943_v27 = vmul.f32 1.442695, %v4940_v26  ;;  %6274 = vmatprep.subr.bf16.mxu1 %v6485_v2 }
0x2fe3   :  { %6455 = vpow2.f32 %v4943_v27 }
0x2fe9   :  { %v6454_v29 = vpop.eup %6453 }
0x2fea   :  { %v4945_v35 = vsel %vm3967_vm8, %v6454_v29, 0.0 }
0x2feb   :  { %4946 = vadd.xlane.f32.xlu0 %v4945_v35 }
0x2fed   :  { %v6456_v30 = vpop.eup %6455 }
0x2fee   :  { %v4948_v19 = vsel %vm3967_vm8, %v6456_v30, 0.0 }
0x2fef   :  { %4949 = vadd.xlane.f32.xlu0 %v4948_v19 }
0x3005   :  { %5007 = vrot.lane.b32.xlu0 %v7412_v22, %s6487_s8 }
0x3078   :  { %v4947_v31 = vpop.xlane.xlu0 %4946 }
0x3079   :  { %6457 = vrcp.f32 %v4947_v31 }
0x307c   :  { %v4950_v33 = vpop.xlane.xlu0 %4949 }
0x307d   :  { %6459 = vrcp.f32 %v4950_v33 }
0x3080   :  { %v5008_v36 = vpop.permute.xlu0 %5007 }
0x3081   :  { %v5013_v37 = vsel %vm57_vm0, %v5008_v36, 0 }
0x3082   :  { %6269 = vmatpush3.bf16.msra.mxu0 %v5013_v37 }
0x3083   :  { %v6458_v38 = vpop.eup %6457  ;;  %6282 = vmatprep.subr.bf16.mxu0 %v6485_v2 }
0x3084   :  { %v4953_v39 = vmul.f32 %v6458_v38, %v6454_v29 }
0x3086   :  { %v4955_v40 = vpack.c.bf16 %v4953_v39, %v4953_v39 }
0x3087   :  { %v6460_v49 = vpop.eup %6459 }
0x3088   :  { %v4954_v41 = vmul.f32 %v6460_v49, %v6456_v30  ;;  %6265 = vmatmul.mubr.msk.bf16.vlgmr.msra.gmra.mrb[160].mxu1 %vm53_vm2, %v4955_v40 }
0x3089   :  { %6278 = vmatprep.mubr.msk.bf16.mxu1 %vm6486_vm1, %v6485_v2  ;;  %6275 = vmatpush3.bf16.msra.mxu1 %v6345_v42 }
0x308a   :  { %v4956_v22 = vpack.c.bf16 %v4954_v41, %v4954_v41  ;;  %6276 = vmatprep.subr.bf16.mxu1 %v6485_v2 }
0x308c   :  { %6271 = vmatmul.mubr.msk.bf16.vlgmr.msra.gmra.mrb[164].mxu0 %vm53_vm2, %v4956_v22 }
0x308d   :  { %6286 = vmatprep.mubr.msk.bf16.mxu0 %vm6486_vm1, %v6485_v2  ;;  %6277 = vmatpush3.bf16.msra.mxu1 %v6346_v62 }
0x308e   :  { %6283 = vmatpush3.bf16.msra.mxu0 %v6347_v60 }
0x308f   :  { %6284 = vmatprep.subr.bf16.mxu0 %v6485_v2 }
0x3092   :  { %6285 = vmatpush3.bf16.msra.mxu0 %v6348_v61 }
0x315b   :  { %v5000_v1 = vpop.f32.mrb[160].mxu1 }
0x315c   :  { %5057 = vrot.lane.b32.xlu1 %v5000_v1, %s6488_s13  ;;  %v6266_v6 = vpop.f32.mrb[161].mxu1 }
0x315d   :  { %v5003_v43 = vpop.f32.mrb[162].mxu1 }
0x315e   :  { %v6267_v44 = vpop.f32.mrb[163].mxu1 }
0x315f   :  { %v5049_v34 = vpop.f32.mrb[164].mxu0 }
0x3160   :  { %5059 = vrot.lane.b32.xlu1 %v5049_v34, %s6488_s13  ;;  %v6272_v47 = vpop.f32.mrb[165].mxu0 }
0x3161   :  { %v5052_v9 = vpop.f32.mrb[166].mxu0 }
0x3162   :  { %v6273_v50 = vpop.f32.mrb[167].mxu0 }
0x31ce   :  { %v5058_v51 = vpop.permute.xlu1 %5057 }
0x31cf   :  { %v5063_v53 = vsel %vm221_vm4, %v7451_v0, %v5058_v51 }
0x31d0   :  { %v5065_v57 = vadd.f32 %v5063_v53, %v7402_v17  ;;  %v5519_v17 = vld [vmem:[%s7519_s2 + $0x1b] ss:$0 sm:$0xff] }
0x31d2   :  { %v5060_v54 = vpop.permute.xlu1 %5059 }
0x31d3   :  { %v5064_v56 = vsel %vm221_vm4, %v7453_v25, %v5060_v54 }
0x31d4   :  { %v5066_v58 = vadd.f32 %v5064_v56, %v7409_v20 }
0x31d6   :  { %v5069_v55 = vcombine.low %v5065_v57, %v5066_v58 }
0x31d8   :  { %v5071_v59 = vpack.c.bf16 %v5069_v55, %v5069_v55 }
0x31da   :  { %6279 = vmatmul.mubr.msk.bf16.vlgmr.msra.gmra.mrb[164].mxu1 %vm171_vm3, %v5071_v59 }
0x32ad   :  { %v5127_v20 = vpop.f32.mrb[164].mxu1 }
0x32ae   :  { %v5128_v63 = vadd.f32 %v5519_v17, %v5127_v20  ;;  %v6280_v0 = vpop.f32.mrb[165].mxu1 }
0x32af   :  { %v5130_v3 = vpop.f32.mrb[166].mxu1 }
0x32b0   :  { %v5133_v48 = vmax.f32 %v5128_v63, 0.0  ;;  %v6281_v5 = vpop.f32.mrb[167].mxu1 }
0x32b2   :  { %v5135_v25 = vcombine.high %v5133_v48, %v5133_v48  ;;  %v5137_v28 = vadd.f32 %v5133_v48, %v5065_v57 }
0x32b4   :  { %v5138_v7 = vadd.f32 %v5135_v25, %v5066_v58 }
0x32b6   :  { %v5148_v8 = vcombine.low %v5137_v28, %v5138_v7 }
0x32b8   :  { %v5150_v2 = vpack.c.bf16 %v5148_v8, %v5148_v8 }
0x32ba   :  { %6287 = vmatmul.mubr.msk.bf16.vlgmr.msra.gmra.mrb[168].mxu0 %vm171_vm3, %v5150_v2 }
0x338d   :  { %v5206_v32 = vpop.f32.mrb[168].mxu0 }
0x338e   :  { %v5207_v12 = vadd.f32 %v5528_v10, %v5206_v32  ;;  %v6288_v13 = vpop.f32.mrb[169].mxu0 }
0x338f   :  { %v5209_v52 = vpop.f32.mrb[170].mxu0 }
0x3390   :  { %v5213_v14 = vcombine.high %v5207_v12, %v5207_v12  ;;  %5215 = vst.msk [vmem:[#allocation4] sm:$0xf] %vm3967_vm8, %v5207_v12  ;;  %v6289_v15 = vpop.f32.mrb[171].mxu0 }
0x3392   :  { %5216 = vst.msk [vmem:[#allocation4 + $0x4] sm:$0xf] %vm3967_vm8, %v5213_v14 }
0x3393   :  { %6472 = shalt.err (!%p6469_p4)
}
0x3394   :  { %s6473_s16 = scalar_lea.hbm %s7521_s4, 128 }
0x3395   :  { %p6474_p5 = scmp.ne.s32.totalorder %s7521_s4, %s6473_s16  ;;  %p6477_p6 = scmp.lt.u32.totalorder %s6473_s16, %s7521_s4 }
0x3397   :  { %p6479_p7 = pnand %p6477_p6, %p6474_p5 }
0x3399   :  { %6482 = shalt.err (!%p6479_p7)
}
0x339a   :  { %s6490_s21 = smov 64   ;;  %s6491_s22 = smov 4  }
0x339b   :  { %5228 = dma.vmem_to_hbm [thread:$0]  %s5223_s12, 128, %s7521_s4, [#allocation5], %s6490_s21, %s6490_s21, %s6491_s22  }
0x339c   :  { %6483 = dma.done.wait [#allocation5], 128  }
0x339d   :  { %6484 = vsyncadd [#allocation5], 4294967168 }
0x339e   :  { %5232 = vsyncpa [#allocation5], 1 }

// kernel: set_transformer_forward.1
= control target key start
LH: loop header
LB: loop body
LE: loop exit
PB: predicated region body
PF: predicated region fallthrough
CT: control target
= control target key end

     0   :  { %vm57_vm0 = vcmask 1041408   ;;  %v6485_v2 = vmov 0.0   ;;  %vm6486_vm1 = vmmov 0   ;;  %vm53_vm2 = vcmask 31744   ;;  %s7517_s0 = inlined_call_operand.vmem [shape: f32[2,8,4], index: 0, kind: input, shape index: {}]   ;;  %s7518_s1 = inlined_call_operand.vmem [shape: bf16[29,32,32], index: 1, kind: input, shape index: {}]   ;;  %s7519_s2 = inlined_call_operand.vmem [shape: f32[29,1,32], index: 2, kind: input, shape index: {}]   ;;  %s7520_s3 = inlined_call_operand.vmem [shape: f32[3,8,32], index: 3, kind: input, shape index: {}]   ;;  %s7521_s4 = inlined_call_operand.hbm [shape: f32[2,4,4], index: 4, kind: output, shape index: {}]  }
   0x1   :  { %v5235_v0 = vld [vmem:[%s7518_s1 + $0x10] sm:$0x3]  ;;  %v19_v1 = vld [vmem:[%s7517_s0] sm:$0xff]  ;;  %5728 = vmatprep.subr.bf16.mxu0 %v6485_v2  ;;  %5730 = vmatprep.mubr.msk.bf16.mxu0 %vm6486_vm1, %v6485_v2  ;;  %v20_v4 = vld [vmem:[%s7517_s0 + $0x8] sm:$0xff]  ;;  %vm171_vm3 = vcmask 261120  }
   0x2   :  { %v59_v3 = vsel %vm57_vm0, %v5235_v0, 0  ;;  %v6297_v5 = vld [vmem:[%s7518_s1] sm:$0xff]   ;;  %v6533_v6 = vpack.c.bf16 %v20_v4, %v19_v1  ;;  %5734 = vmatprep.subr.bf16.mxu1 %v6485_v2  ;;  %5736 = vmatprep.mubr.msk.bf16.mxu1 %vm6486_vm1, %v6485_v2  ;;  %v6298_v8 = vld [vmem:[%s7518_s1 + $0x8] sm:$0xff]  }
   0x3   :  { %5729 = vmatpush3.bf16.msra.mxu0 %v59_v3  ;;  %v5237_v7 = vld [vmem:[%s7518_s1 + $0x20] sm:$0x3] }
   0x4   :  { %5740 = vmatprep.subr.bf16.mxu0 %v6485_v2  ;;  %v21_v9 = vld [vmem:[%s7520_s3] sm:$0xff]  ;;  %v109_v10 = vsel %vm57_vm0, %v5237_v7, 0 }
   0x5   :  { %5735 = vmatpush3.bf16.msra.mxu1 %v109_v10  ;;  %v152_v11 = vpack.c.bf16 %v21_v9, %v21_v9 }
   0x6   :  { %5731 = vmatmul.mubr.msk.bf16.vlgmr.msra.gmra.mrb[0].mxu0 %vm53_vm2, %v6533_v6  ;;  %5748 = vmatprep.subr.bf16.mxu1 %v6485_v2 }
   0x7   :  { %5741 = vmatpush3.bf16.msra.mxu0 %v6297_v5  ;;  %5744 = vmatprep.mubr.msk.bf16.mxu0 %vm6486_vm1, %v6485_v2 }
   0x8   :  { %5742 = vmatprep.subr.bf16.mxu0 %v6485_v2  ;;  %5737 = vmatmul.mubr.msk.bf16.vlgmr.msra.gmra.mrb[0].mxu1 %vm53_vm2, %v6533_v6 }
   0x9   :  { %5750 = vmatprep.mubr.msk.bf16.mxu1 %vm6486_vm1, %v6485_v2 }
   0xb   :  { %5743 = vmatpush3.bf16.msra.mxu0 %v6298_v8 }
   0xc   :  { %5754 = vmatprep.subr.bf16.mxu0 %v6485_v2 }
   0xe   :  { %5745 = vmatmul.mubr.msk.bf16.vlgmr.msra.gmra.mrb[4].mxu0 %vm171_vm3, %v152_v11 }
   0xf   :  { %5756 = vmatprep.mubr.msk.bf16.mxu0 %vm6486_vm1, %v6485_v2 }
  0x10   :  { %9 = vsyncpa [#allocation5], 0  ;;  %v5244_v12 = vld [vmem:[%s7519_s2 + $0x1] ss:$0 sm:$0xff]  ;;  %vm221_vm4 = vcmask 130048   ;;  %vm339_vm5 = vcmask 1043456  }
  0x11   :  { %v5246_v17 = vld [vmem:[%s7519_s2 + $0x2] ss:$0 sm:$0xff]  ;;  %v5248_v27 = vld [vmem:[%s7519_s2] ss:$0 sm:$0xff]  ;;  %vm311_vm6 = vcmask 64512   ;;  %s6487_s8 = smov 112  }
  0x12   :  { %s6488_s13 = smov 16   ;;  %vm3227_vm7 = vcmask 60416   ;;  %vm3967_vm8 = vcmask 27648   ;;  %s6489_s11 = smov [#allocation4]  }
  0x13   :  { %s5222_s12 = sshll.u32 %s6489_s11, 4  ;;  %s5223_s12 = int_to_ptr.vmem [resolvable:$true] %s5222_s12 }
  0x14   :  { %s6461_s14 = scalar_lea.vmem %s5223_s12, 128  ;;  %p6466_p1 = scmp.lt.s32.totalorder %s5223_s12, %s5223_s12 }
  0x15   :  { %p6462_p0 = scmp.ne.s32.totalorder %s5223_s12, %s6461_s14  ;;  %p6467_p2 = scmp.lt.s32.totalorder %s6461_s14, %s6461_s14 }
  0x17   :  { %p6468_p3 = por %p6467_p2, %p6466_p1 }
  0x19   :  { %p6469_p4 = pnand %p6468_p3, %p6462_p0 }
  0xd9   :  { %v95_v13 = vpop.f32.mrb[0].mxu0 }
  0xda   :  { %v96_v14 = vadd.f32 %v5244_v12, %v95_v13  ;;  %v5732_v15 = vpop.f32.mrb[1].mxu0 }
  0xdb   :  { %v98_v16 = vpop.f32.mrb[2].mxu0  ;;  %v145_v21 = vpop.f32.mrb[0].mxu1 }
  0xdc   :  { %v217_v18 = vpack.c.bf16 %v96_v14, %v96_v14  ;;  %v99_v19 = vadd.f32 %v5244_v12, %v98_v16  ;;  %v5733_v20 = vpop.f32.mrb[3].mxu0  ;;  %v5738_v22 = vpop.f32.mrb[1].mxu1  ;;  %v146_v25 = vadd.f32 %v5246_v17, %v145_v21 }
  0xdd   :  { %v148_v26 = vpop.f32.mrb[2].mxu1 }
  0xde   :  { %v226_v23 = vsel %vm221_vm4, %v217_v18, 0  ;;  %v218_v24 = vpack.c.bf16 %v99_v19, %v99_v19  ;;  %v149_v28 = vadd.f32 %v5246_v17, %v148_v26  ;;  %v5739_v29 = vpop.f32.mrb[3].mxu1  ;;  %v6577_v34 = vpack.c.bf16 %v146_v25, %v146_v25 }
  0xdf   :  { %5749 = vmatpush3.bf16.xpose.msra.mxu1 %v226_v23 }
  0xe0   :  { %v269_v30 = vsel %vm221_vm4, %v218_v24, 0  ;;  %5760 = vmatprep.subr.bf16.mxu1 %v6485_v2  ;;  %v6579_v35 = vpack.c.bf16 %v149_v28, %v149_v28  ;;  %v341_v40 = vsel %vm339_vm5, %v6577_v34, 0 }
  0xe1   :  { %v209_v31 = vpop.f32.mrb[4].mxu0  ;;  %5755 = vmatpush3.bf16.xpose.msra.mxu0 %v269_v30 }
  0xe2   :  { %v6575_v32 = vadd.f32 %v5248_v27, %v209_v31  ;;  %v5746_v33 = vpop.f32.mrb[5].mxu0  ;;  %5766 = vmatprep.subr.bf16.mxu0 %v6485_v2  ;;  %v387_v41 = vsel %vm339_vm5, %v6579_v35, 0 }
  0xe3   :  { %v212_v36 = vpop.f32.mrb[6].mxu0 }
  0xe4   :  { %v215_v37 = vmul.f32 0.17677669, %v6575_v32  ;;  %v5747_v38 = vpop.f32.mrb[7].mxu0 }
  0xe6   :  { %v216_v39 = vpack.c.bf16 %v215_v37, %v215_v37 }
  0xe8   :  { %5751 = vmatmul.mubr.msk.bf16.vlgmr.msra.gmra.mrb[4].mxu1 %vm221_vm4, %v216_v39  ;;  %5757 = vmatmul.mubr.msk.bf16.vlgmr.msra.gmra.mrb[8].mxu0 %vm221_vm4, %v216_v39 }
  0xe9   :  { %5761 = vmatpush3.bf16.msra.mxu1 %v341_v40  ;;  %5767 = vmatpush3.bf16.msra.mxu0 %v387_v41 }
  0xea   :  { %5762 = vmatprep.mubr.msk.bf16.mxu1 %vm6486_vm1, %v6485_v2  ;;  %5772 = vmatprep.subr.bf16.mxu1 %v6485_v2 }
  0xeb   :  { %5768 = vmatprep.mubr.msk.bf16.mxu0 %vm6486_vm1, %v6485_v2  ;;  %5778 = vmatprep.subr.bf16.mxu0 %v6485_v2 }
 0x1bb   :  { %v262_v42 = vpop.f32.mrb[4].mxu1  ;;  %v305_v43 = vpop.f32.mrb[8].mxu0 }
 0x1bc   :  { %v5752_v44 = vpop.f32.mrb[5].mxu1  ;;  %v5758_v45 = vpop.f32.mrb[9].mxu0  ;;  %v312_v46 = vsel %vm311_vm6, %v262_v42, -inf  ;;  %v315_v51 = vsel %vm311_vm6, %v305_v43, -inf }
 0x1bd   :  { %313 = vmax.xlane.f32.xlu0 %v312_v46  ;;  %v265_v47 = vpop.f32.mrb[6].mxu1  ;;  %v308_v48 = vpop.f32.mrb[10].mxu0 }
 0x1be   :  { %v5753_v49 = vpop.f32.mrb[7].mxu1  ;;  %v5759_v50 = vpop.f32.mrb[11].mxu0 }
 0x1c1   :  { %316 = vmax.xlane.f32.xlu0 %v315_v51 }
 0x1d7   :  { %433 = vrot.lane.b32.xlu0 %v217_v18, %s6487_s8 }
 0x24a   :  { %v314_v52 = vpop.xlane.xlu0 %313 }
 0x24b   :  { %v318_v53 = vsub.f32 %v262_v42, %v314_v52 }
 0x24d   :  { %v320_v54 = vmul.f32 1.442695, %v318_v53 }
 0x24e   :  { %v317_v55 = vpop.xlane.xlu0 %316 }
 0x24f   :  { %6349 = vpow2.f32 %v320_v54  ;;  %v319_v56 = vsub.f32 %v305_v43, %v317_v55  ;;  %v6299_v54 = vld [vmem:[%s7518_s1 + $0x30] sm:$0xff]   ;;  %v6300_v55 = vld [vmem:[%s7518_s1 + $0x38] sm:$0xff]  }
 0x251   :  { %v322_v57 = vmul.f32 1.442695, %v319_v56 }
 0x252   :  { %v434_v3 = vpop.permute.xlu0 %433 }
 0x253   :  { %6351 = vpow2.f32 %v322_v57  ;;  %v439_v7 = vsel %vm221_vm4, %v434_v3, 0 }
 0x259   :  { %v6350_v58 = vpop.eup %6349 }
 0x25a   :  { %v324_v59 = vsel %vm311_vm6, %v6350_v58, 0.0 }
 0x25b   :  { %325 = vadd.xlane.f32.xlu1 %v324_v59 }
 0x25d   :  { %v6352_v60 = vpop.eup %6351 }
 0x25e   :  { %v327_v61 = vsel %vm311_vm6, %v6352_v60, 0.0 }
 0x25f   :  { %328 = vadd.xlane.f32.xlu1 %v327_v61 }
 0x270   :  { %482 = vrot.lane.b32.xlu1 %v218_v24, %s6487_s8 }
 0x274   :  { %430 = vrot.lane.b32.xlu1 %v216_v39, %s6487_s8 }
 0x2e8   :  { %v326_v62 = vpop.xlane.xlu1 %325 }
 0x2e9   :  { %6353 = vrcp.f32 %v326_v62 }
 0x2ec   :  { %v329_v63 = vpop.xlane.xlu1 %328 }
 0x2ed   :  { %6355 = vrcp.f32 %v329_v63 }
 0x2f0   :  { %v483_v9 = vpop.permute.xlu1 %482 }
 0x2f1   :  { %v485_v11 = vsel %vm221_vm4, %v483_v9, 0  ;;  %v6301_v9 = vld [vmem:[%s7518_s1 + $0x50] sm:$0xff]  }
 0x2f3   :  { %v6354_v0 = vpop.eup %6353 }
 0x2f4   :  { %v332_v1 = vmul.f32 %v6354_v0, %v6350_v58  ;;  %v431_v12 = vpop.permute.xlu1 %430 }
 0x2f6   :  { %v334_v4 = vpack.c.bf16 %v332_v1, %v332_v1 }
 0x2f7   :  { %v6356_v5 = vpop.eup %6355 }
 0x2f8   :  { %5763 = vmatmul.mubr.msk.bf16.vlgmr.msra.gmra.mrb[8].mxu1 %vm311_vm6, %v334_v4  ;;  %v333_v8 = vmul.f32 %v6356_v5, %v6352_v60 }
 0x2f9   :  { %5773 = vmatpush3.bf16.xpose.msra.mxu1 %v439_v7  ;;  %5774 = vmatprep.mubr.msk.bf16.mxu1 %vm6486_vm1, %v6485_v2 }
 0x2fa   :  { %v335_v10 = vpack.c.bf16 %v333_v8, %v333_v8  ;;  %5784 = vmatprep.subr.bf16.mxu1 %v6485_v2 }
 0x2fc   :  { %5769 = vmatmul.mubr.msk.bf16.vlgmr.msra.gmra.mrb[12].mxu0 %vm311_vm6, %v335_v10  ;;  %v6302_v10 = vld [vmem:[%s7518_s1 + $0x60] sm:$0xff]  }
 0x2fd   :  { %5779 = vmatpush3.bf16.xpose.msra.mxu0 %v485_v11  ;;  %5780 = vmatprep.mubr.msk.bf16.mxu0 %vm6486_vm1, %v6485_v2  ;;  %v6304_v11 = vld [vmem:[%s7518_s1 + $0x68] sm:$0xff]  }
 0x2fe   :  { %5790 = vmatprep.subr.bf16.mxu0 %v6485_v2 }
 0x300   :  { %5775 = vmatmul.mubr.msk.bf16.vlgmr.msra.gmra.mrb[12].mxu1 %vm221_vm4, %v431_v12 }
 0x301   :  { %5786 = vmatprep.mubr.msk.bf16.mxu1 %vm6486_vm1, %v6485_v2 }
 0x304   :  { %5781 = vmatmul.mubr.msk.bf16.vlgmr.msra.gmra.mrb[16].mxu0 %vm221_vm4, %v431_v12  ;;  %v5260_v12 = vld [vmem:[%s7519_s2 + $0x3] ss:$0 sm:$0xff] }
 0x305   :  { %5792 = vmatprep.mubr.msk.bf16.mxu0 %vm6486_vm1, %v6485_v2 }
 0x3cb   :  { %v6618_v13 = vpop.f32.mrb[8].mxu1 }
 0x3cc   :  { %v5764_v14 = vpop.f32.mrb[9].mxu1 }
 0x3cd   :  { %v380_v15 = vpop.f32.mrb[10].mxu1 }
 0x3ce   :  { %v5765_v16 = vpop.f32.mrb[11].mxu1 }
 0x3cf   :  { %v6620_v17 = vpop.f32.mrb[12].mxu0 }
 0x3d0   :  { %v5770_v18 = vpop.f32.mrb[13].mxu0 }
 0x3d1   :  { %v426_v19 = vpop.f32.mrb[14].mxu0 }
 0x3d2   :  { %v5771_v20 = vpop.f32.mrb[15].mxu0 }
 0x3d3   :  { %v475_v21 = vpop.f32.mrb[12].mxu1 }
 0x3d4   :  { %v5776_v22 = vpop.f32.mrb[13].mxu1  ;;  %v527_v23 = vsel %vm311_vm6, %v475_v21, -inf }
 0x3d5   :  { %528 = vmax.xlane.f32.xlu1 %v527_v23  ;;  %v478_v24 = vpop.f32.mrb[14].mxu1  ;;  %v5264_v23 = vld [vmem:[%s7518_s1 + $0x40] sm:$0x3] }
 0x3d6   :  { %v5777_v25 = vpop.f32.mrb[15].mxu1 }
 0x3d7   :  { %v521_v26 = vpop.f32.mrb[16].mxu0 }
 0x3d8   :  { %v5782_v27 = vpop.f32.mrb[17].mxu0  ;;  %v530_v28 = vsel %vm311_vm6, %v521_v26, -inf }
 0x3d9   :  { %531 = vmax.xlane.f32.xlu0 %v530_v28  ;;  %v524_v29 = vpop.f32.mrb[18].mxu0  ;;  %v886_v27 = vsel %vm57_vm0, %v5264_v23, 0  ;;  %v5281_v28 = vld [vmem:[%s7519_s2 + $0x5] ss:$0 sm:$0xff] }
 0x3da   :  { %v5783_v30 = vpop.f32.mrb[19].mxu0 }
 0x3e6   :  { %552 = vrot.lane.b32.xlu1 %v6577_v34, %s6487_s8 }
 0x462   :  { %v529_v31 = vpop.xlane.xlu1 %528 }
 0x463   :  { %v533_v33 = vsub.f32 %v475_v21, %v529_v31 }
 0x465   :  { %v535_v36 = vmul.f32 1.442695, %v533_v33 }
 0x466   :  { %v553_v37 = vpop.permute.xlu1 %552  ;;  %v532_v38 = vpop.xlane.xlu0 %531 }
 0x467   :  { %6357 = vpow2.f32 %v535_v36  ;;  %v558_v39 = vsel %vm339_vm5, %v553_v37, 0  ;;  %v534_v40 = vsub.f32 %v521_v26, %v532_v38 }
 0x468   :  { %5785 = vmatpush3.bf16.msra.mxu1 %v558_v39 }
 0x469   :  { %v537_v41 = vmul.f32 1.442695, %v534_v40  ;;  %5796 = vmatprep.subr.bf16.mxu1 %v6485_v2 }
 0x46b   :  { %6359 = vpow2.f32 %v537_v41 }
 0x471   :  { %v6358_v42 = vpop.eup %6357 }
 0x472   :  { %v539_v43 = vsel %vm311_vm6, %v6358_v42, 0.0 }
 0x473   :  { %540 = vadd.xlane.f32.xlu0 %v539_v43 }
 0x475   :  { %v6360_v44 = vpop.eup %6359 }
 0x476   :  { %v542_v34 = vsel %vm311_vm6, %v6360_v44, 0.0 }
 0x477   :  { %543 = vadd.xlane.f32.xlu0 %v542_v34  ;;  %v5289_v34 = vld [vmem:[%s7519_s2 + $0x4] ss:$0 sm:$0xff] }
 0x48d   :  { %601 = vrot.lane.b32.xlu0 %v6579_v35, %s6487_s8 }
 0x500   :  { %v541_v45 = vpop.xlane.xlu0 %540 }
 0x501   :  { %6361 = vrcp.f32 %v541_v45 }
 0x504   :  { %v544_v46 = vpop.xlane.xlu0 %543 }
 0x505   :  { %6363 = vrcp.f32 %v544_v46 }
 0x508   :  { %v602_v47 = vpop.permute.xlu0 %601 }
 0x509   :  { %v607_v48 = vsel %vm339_vm5, %v602_v47, 0 }
 0x50a   :  { %5791 = vmatpush3.bf16.msra.mxu0 %v607_v48 }
 0x50b   :  { %v6362_v49 = vpop.eup %6361  ;;  %5804 = vmatprep.subr.bf16.mxu0 %v6485_v2 }
 0x50c   :  { %v547_v50 = vmul.f32 %v6362_v49, %v6358_v42 }
 0x50e   :  { %v549_v51 = vpack.c.bf16 %v547_v50, %v547_v50 }
 0x50f   :  { %v6364_v52 = vpop.eup %6363 }
 0x510   :  { %v548_v53 = vmul.f32 %v6364_v52, %v6360_v44  ;;  %5787 = vmatmul.mubr.msk.bf16.vlgmr.msra.gmra.mrb[16].mxu1 %vm311_vm6, %v549_v51 }
 0x511   :  { %5800 = vmatprep.mubr.msk.bf16.mxu1 %vm6486_vm1, %v6485_v2  ;;  %5797 = vmatpush3.bf16.msra.mxu1 %v6299_v54 }
 0x512   :  { %v550_v35 = vpack.c.bf16 %v548_v53, %v548_v53  ;;  %5798 = vmatprep.subr.bf16.mxu1 %v6485_v2 }
 0x514   :  { %5793 = vmatmul.mubr.msk.bf16.vlgmr.msra.gmra.mrb[20].mxu0 %vm311_vm6, %v550_v35 }
 0x515   :  { %5808 = vmatprep.mubr.msk.bf16.mxu0 %vm6486_vm1, %v6485_v2  ;;  %5799 = vmatpush3.bf16.msra.mxu1 %v6300_v55 }
 0x516   :  { %5812 = vmatprep.subr.bf16.mxu1 %v6485_v2  ;;  %5805 = vmatpush3.bf16.msra.mxu0 %v6301_v9 }
 0x517   :  { %5806 = vmatprep.subr.bf16.mxu0 %v6485_v2 }
 0x5e3   :  { %v594_v56 = vpop.f32.mrb[16].mxu1 }
 0x5e4   :  { %651 = vrot.lane.b32.xlu1 %v594_v56, %s6488_s13  ;;  %v5788_v57 = vpop.f32.mrb[17].mxu1 }
 0x5e5   :  { %v597_v58 = vpop.f32.mrb[18].mxu1 }
 0x5e6   :  { %v5789_v59 = vpop.f32.mrb[19].mxu1 }
 0x5e7   :  { %v643_v60 = vpop.f32.mrb[20].mxu0 }
 0x5e8   :  { %653 = vrot.lane.b32.xlu1 %v643_v60, %s6488_s13  ;;  %v5794_v61 = vpop.f32.mrb[21].mxu0 }
 0x5e9   :  { %v646_v62 = vpop.f32.mrb[22].mxu0 }
 0x5ea   :  { %v5795_v63 = vpop.f32.mrb[23].mxu0 }
 0x656   :  { %v652_v0 = vpop.permute.xlu1 %651 }
 0x657   :  { %v657_v1 = vsel %vm221_vm4, %v6618_v13, %v652_v0 }
 0x658   :  { %v659_v5 = vadd.f32 %v657_v1, %v6575_v32 }
 0x65a   :  { %v654_v3 = vpop.permute.xlu1 %653 }
 0x65b   :  { %v658_v4 = vsel %vm221_vm4, %v6620_v17, %v654_v3 }
 0x65c   :  { %v660_v7 = vadd.f32 %v658_v4, %v6575_v32  ;;  %v6303_v32 = vld [vmem:[%s7518_s1 + $0x58] sm:$0xff]  }
 0x65d   :  { %5807 = vmatpush3.bf16.msra.mxu0 %v6303_v32 }
 0x65e   :  { %v661_v8 = vpack.c.bf16 %v660_v7, %v659_v5  ;;  %5820 = vmatprep.subr.bf16.mxu0 %v6485_v2 }
 0x660   :  { %5801 = vmatmul.mubr.msk.bf16.vlgmr.msra.gmra.mrb[20].mxu1 %vm171_vm3, %v661_v8 }
 0x661   :  { %5816 = vmatprep.mubr.msk.bf16.mxu1 %vm6486_vm1, %v6485_v2  ;;  %5813 = vmatpush3.bf16.msra.mxu1 %v6302_v10 }
 0x662   :  { %5814 = vmatprep.subr.bf16.mxu1 %v6485_v2 }
 0x665   :  { %5815 = vmatpush3.bf16.msra.mxu1 %v6304_v11 }
 0x666   :  { %5826 = vmatprep.subr.bf16.mxu1 %v6485_v2 }
 0x733   :  { %v717_v13 = vpop.f32.mrb[20].mxu1 }
 0x734   :  { %v718_v14 = vadd.f32 %v5260_v12, %v717_v13  ;;  %v5802_v15 = vpop.f32.mrb[21].mxu1 }
 0x735   :  { %v720_v16 = vpop.f32.mrb[22].mxu1 }
 0x736   :  { %v724_v17 = vmax.f32 %v718_v14, 0.0  ;;  %v721_v18 = vadd.f32 %v5260_v12, %v720_v16  ;;  %v5803_v19 = vpop.f32.mrb[23].mxu1 }
 0x738   :  { %v726_v20 = vadd.f32 %v724_v17, %v659_v5  ;;  %v725_v21 = vmax.f32 %v721_v18, 0.0 }
 0x73a   :  { %728 = vst.msk [vmem:[#allocation3] sm:$0xff] %vm171_vm3, %v726_v20  ;;  %v727_v22 = vadd.f32 %v725_v21, %v660_v7 }
 0x73c   :  { %729 = vst.msk [vmem:[#allocation3 + $0x8] sm:$0xff] %vm171_vm3, %v727_v22 }
 0x741   :  { %v730_v24 = vld [vmem:[#allocation3] sm:$0xff] }
 0x743   :  { %v731_v25 = vld [vmem:[#allocation3 + $0x8] sm:$0xff] }
 0x744   :  { %v757_v26 = vpack.c.bf16 %v731_v25, %v730_v24 }
 0x746   :  { %5809 = vmatmul.mubr.msk.bf16.vlgmr.msra.gmra.mrb[24].mxu0 %vm171_vm3, %v757_v26  ;;  %5817 = vmatmul.mubr.msk.bf16.vlgmr.msra.gmra.mrb[24].mxu1 %vm171_vm3, %v757_v26 }
 0x747   :  { %5821 = vmatpush3.bf16.msra.mxu0 %v886_v27  ;;  %5822 = vmatprep.mubr.msk.bf16.mxu0 %vm6486_vm1, %v6485_v2 }
 0x748   :  { %5832 = vmatprep.subr.bf16.mxu0 %v6485_v2  ;;  %5828 = vmatprep.mubr.msk.bf16.mxu1 %vm6486_vm1, %v6485_v2 }
 0x74e   :  { %5823 = vmatmul.mubr.msk.bf16.vlgmr.msra.gmra.mrb[28].mxu0 %vm53_vm2, %v6533_v6  ;;  %v5285_v6 = vld [vmem:[%s7519_s2 + $0x6] ss:$0 sm:$0xff] }
 0x74f   :  { %5834 = vmatprep.mubr.msk.bf16.mxu0 %vm6486_vm1, %v6485_v2 }
 0x819   :  { %v813_v29 = vpop.f32.mrb[24].mxu0  ;;  %v872_v30 = vpop.f32.mrb[24].mxu1 }
 0x81a   :  { %v814_v31 = vadd.f32 %v5281_v28, %v813_v29  ;;  %v5810_v33 = vpop.f32.mrb[25].mxu0  ;;  %v5818_v36 = vpop.f32.mrb[25].mxu1  ;;  %v873_v45 = vadd.f32 %v5285_v6, %v872_v30 }
 0x81b   :  { %v816_v37 = vpop.f32.mrb[26].mxu0  ;;  %v875_v38 = vpop.f32.mrb[26].mxu1 }
 0x81c   :  { %v933_v39 = vpack.c.bf16 %v814_v31, %v814_v31  ;;  %v817_v40 = vadd.f32 %v5281_v28, %v816_v37  ;;  %v5811_v41 = vpop.f32.mrb[27].mxu0  ;;  %v5819_v42 = vpop.f32.mrb[27].mxu1  ;;  %v876_v48 = vadd.f32 %v5285_v6, %v875_v38  ;;  %v6710_v52 = vpack.c.bf16 %v873_v45, %v873_v45 }
 0x81e   :  { %v941_v43 = vsel %vm221_vm4, %v933_v39, 0  ;;  %v934_v44 = vpack.c.bf16 %v817_v40, %v817_v40  ;;  %v6715_v55 = vpack.c.bf16 %v876_v48, %v876_v48  ;;  %v1057_v58 = vsel %vm339_vm5, %v6710_v52, 0 }
 0x81f   :  { %5827 = vmatpush3.bf16.xpose.msra.mxu1 %v941_v43 }
 0x820   :  { %v987_v46 = vsel %vm221_vm4, %v934_v44, 0  ;;  %5838 = vmatprep.subr.bf16.mxu1 %v6485_v2  ;;  %v1103_v60 = vsel %vm339_vm5, %v6715_v55, 0 }
 0x821   :  { %v922_v47 = vpop.f32.mrb[28].mxu0  ;;  %5833 = vmatpush3.bf16.xpose.msra.mxu0 %v987_v46 }
 0x822   :  { %v6707_v49 = vadd.f32 %v5289_v34, %v922_v47  ;;  %v5824_v50 = vpop.f32.mrb[29].mxu0  ;;  %5844 = vmatprep.subr.bf16.mxu0 %v6485_v2 }
 0x823   :  { %v925_v51 = vpop.f32.mrb[30].mxu0 }
 0x824   :  { %v929_v53 = vmul.f32 0.17677669, %v6707_v49  ;;  %v6713_v35 = vadd.f32 %v5289_v34, %v925_v51  ;;  %v5825_v54 = vpop.f32.mrb[31].mxu0 }
 0x826   :  { %v931_v56 = vpack.c.bf16 %v929_v53, %v929_v53  ;;  %v930_v57 = vmul.f32 0.17677669, %v6713_v35 }
 0x828   :  { %v932_v59 = vpack.c.bf16 %v930_v57, %v930_v57  ;;  %5829 = vmatmul.mubr.msk.bf16.vlgmr.msra.gmra.mrb[28].mxu1 %vm221_vm4, %v931_v56 }
 0x829   :  { %5839 = vmatpush3.bf16.msra.mxu1 %v1057_v58  ;;  %5840 = vmatprep.mubr.msk.bf16.mxu1 %vm6486_vm1, %v6485_v2 }
 0x82a   :  { %5835 = vmatmul.mubr.msk.bf16.vlgmr.msra.gmra.mrb[32].mxu0 %vm221_vm4, %v932_v59  ;;  %5850 = vmatprep.subr.bf16.mxu1 %v6485_v2 }
 0x82b   :  { %5845 = vmatpush3.bf16.msra.mxu0 %v1103_v60  ;;  %5846 = vmatprep.mubr.msk.bf16.mxu0 %vm6486_vm1, %v6485_v2 }
 0x82c   :  { %5856 = vmatprep.subr.bf16.mxu0 %v6485_v2 }
 0x8fb   :  { %v977_v61 = vpop.f32.mrb[28].mxu1 }
 0x8fc   :  { %v5830_v62 = vpop.f32.mrb[29].mxu1  ;;  %v1029_v63 = vsel %vm311_vm6, %v977_v61, -inf }
 0x8fd   :  { %1030 = vmax.xlane.f32.xlu1 %v1029_v63  ;;  %v980_v0 = vpop.f32.mrb[30].mxu1  ;;  %v1023_v1 = vpop.f32.mrb[32].mxu0 }
 0x8fe   :  { %v5831_v3 = vpop.f32.mrb[31].mxu1  ;;  %v5836_v4 = vpop.f32.mrb[33].mxu0  ;;  %v1032_v5 = vsel %vm311_vm6, %v1023_v1, -inf }
 0x8ff   :  { %1033 = vmax.xlane.f32.xlu0 %v1032_v5  ;;  %v1026_v7 = vpop.f32.mrb[34].mxu0 }
 0x900   :  { %v5837_v8 = vpop.f32.mrb[35].mxu0 }
 0x90e   :  { %1149 = vrot.lane.b32.xlu1 %v933_v39, %s6487_s8 }
 0x912   :  { %1146 = vrot.lane.b32.xlu1 %v931_v56, %s6487_s8 }
 0x916   :  { %1198 = vrot.lane.b32.xlu1 %v932_v59, %s6487_s8 }
 0x98a   :  { %v1031_v9 = vpop.xlane.xlu1 %1030 }
 0x98b   :  { %v1035_v10 = vsub.f32 %v977_v61, %v1031_v9 }
 0x98c   :  { %v1034_v32 = vpop.xlane.xlu0 %1033 }
 0x98d   :  { %v1037_v11 = vmul.f32 1.442695, %v1035_v10  ;;  %v1036_v12 = vsub.f32 %v1023_v1, %v1034_v32 }
 0x98e   :  { %v1150_v22 = vpop.permute.xlu1 %1149 }
 0x98f   :  { %6365 = vpow2.f32 %v1037_v11  ;;  %v1039_v13 = vmul.f32 1.442695, %v1036_v12  ;;  %v1155_v25 = vsel %vm221_vm4, %v1150_v22, 0  ;;  %v6305_v11 = vld [vmem:[%s7518_s1 + $0x70] sm:$0xff]   ;;  %v6306_v12 = vld [vmem:[%s7518_s1 + $0x78] sm:$0xff]  }
 0x991   :  { %6367 = vpow2.f32 %v1039_v13 }
 0x992   :  { %v1147_v30 = vpop.permute.xlu1 %1146 }
 0x996   :  { %v1199_v31 = vpop.permute.xlu1 %1198 }
 0x999   :  { %v6366_v14 = vpop.eup %6365 }
 0x99a   :  { %v1041_v15 = vsel %vm311_vm6, %v6366_v14, 0.0 }
 0x99b   :  { %v6368_v16 = vpop.eup %6367  ;;  %1042 = vadd.xlane.f32.xlu0 %v1041_v15 }
 0x99c   :  { %v1044_v17 = vsel %vm311_vm6, %v6368_v16, 0.0 }
 0x99f   :  { %1045 = vadd.xlane.f32.xlu0 %v1044_v17 }
 0x9b5   :  { %1201 = vrot.lane.b32.xlu0 %v934_v44, %s6487_s8 }
 0xa28   :  { %v1043_v18 = vpop.xlane.xlu0 %1042 }
 0xa29   :  { %6369 = vrcp.f32 %v1043_v18 }
 0xa2c   :  { %v1046_v19 = vpop.xlane.xlu0 %1045 }
 0xa2d   :  { %6371 = vrcp.f32 %v1046_v19 }
 0xa30   :  { %v1202_v27 = vpop.permute.xlu0 %1201 }
 0xa31   :  { %v1207_v29 = vsel %vm221_vm4, %v1202_v27, 0 }
 0xa33   :  { %v6370_v20 = vpop.eup %6369 }
 0xa34   :  { %v1049_v21 = vmul.f32 %v6370_v20, %v6366_v14 }
 0xa36   :  { %v1051_v23 = vpack.c.bf16 %v1049_v21, %v1049_v21 }
 0xa37   :  { %v6372_v24 = vpop.eup %6371 }
 0xa38   :  { %v1050_v26 = vmul.f32 %v6372_v24, %v6368_v16  ;;  %5841 = vmatmul.mubr.msk.bf16.vlgmr.msra.gmra.mrb[32].mxu1 %vm311_vm6, %v1051_v23 }
 0xa39   :  { %5851 = vmatpush3.bf16.xpose.msra.mxu1 %v1155_v25  ;;  %5852 = vmatprep.mubr.msk.bf16.mxu1 %vm6486_vm1, %v6485_v2 }
 0xa3a   :  { %v1052_v28 = vpack.c.bf16 %v1050_v26, %v1050_v26  ;;  %5862 = vmatprep.subr.bf16.mxu1 %v6485_v2 }
 0xa3c   :  { %5847 = vmatmul.mubr.msk.bf16.vlgmr.msra.gmra.mrb[36].mxu0 %vm311_vm6, %v1052_v28  ;;  %v6307_v28 = vld [vmem:[%s7518_s1 + $0x90] sm:$0xff]  }
 0xa3d   :  { %5857 = vmatpush3.bf16.xpose.msra.mxu0 %v1207_v29  ;;  %5858 = vmatprep.mubr.msk.bf16.mxu0 %vm6486_vm1, %v6485_v2  ;;  %v6308_v29 = vld [vmem:[%s7518_s1 + $0xa0] sm:$0xff]  }
 0xa3e   :  { %5868 = vmatprep.subr.bf16.mxu0 %v6485_v2 }
 0xa40   :  { %5853 = vmatmul.mubr.msk.bf16.vlgmr.msra.gmra.mrb[36].mxu1 %vm221_vm4, %v1147_v30  ;;  %v5299_v30 = vld [vmem:[%s7519_s2 + $0x7] ss:$0 sm:$0xff] }
 0xa41   :  { %5864 = vmatprep.mubr.msk.bf16.mxu1 %vm6486_vm1, %v6485_v2 }
 0xa44   :  { %5859 = vmatmul.mubr.msk.bf16.vlgmr.msra.gmra.mrb[40].mxu0 %vm221_vm4, %v1199_v31 }
 0xa45   :  { %5870 = vmatprep.mubr.msk.bf16.mxu0 %vm6486_vm1, %v6485_v2 }
 0xb0b   :  { %v6754_v33 = vpop.f32.mrb[32].mxu1 }
 0xb0c   :  { %v5842_v36 = vpop.f32.mrb[33].mxu1 }
 0xb0d   :  { %v1096_v37 = vpop.f32.mrb[34].mxu1 }
 0xb0e   :  { %v5843_v38 = vpop.f32.mrb[35].mxu1 }
 0xb0f   :  { %v6756_v39 = vpop.f32.mrb[36].mxu0 }
 0xb10   :  { %v5848_v40 = vpop.f32.mrb[37].mxu0 }
 0xb11   :  { %v1142_v41 = vpop.f32.mrb[38].mxu0 }
 0xb12   :  { %v5849_v42 = vpop.f32.mrb[39].mxu0 }
 0xb13   :  { %v1191_v6 = vpop.f32.mrb[36].mxu1 }
 0xb14   :  { %v5854_v43 = vpop.f32.mrb[37].mxu1  ;;  %v1249_v44 = vsel %vm311_vm6, %v1191_v6, -inf }
 0xb15   :  { %1250 = vmax.xlane.f32.xlu1 %v1249_v44  ;;  %v1194_v34 = vpop.f32.mrb[38].mxu1 }
 0xb16   :  { %v5855_v45 = vpop.f32.mrb[39].mxu1  ;;  %v6311_v34 = vld [vmem:[%s7518_s1 + $0x80] sm:$0xff]  }
 0xb17   :  { %v1243_v46 = vpop.f32.mrb[40].mxu0 }
 0xb18   :  { %v5860_v47 = vpop.f32.mrb[41].mxu0  ;;  %v1252_v48 = vsel %vm311_vm6, %v1243_v46, -inf }
 0xb19   :  { %1253 = vmax.xlane.f32.xlu0 %v1252_v48  ;;  %v1246_v50 = vpop.f32.mrb[42].mxu0  ;;  %v5233_v47 = vld [vmem:[%s7520_s3 + $0x8] sm:$0xff] }
 0xb1a   :  { %v5861_v51 = vpop.f32.mrb[43].mxu0  ;;  %v1604_v48 = vpack.c.bf16 %v5233_v47, %v5233_v47  ;;  %v5323_v50 = vld [vmem:[%s7519_s2 + $0x9] ss:$0 sm:$0xff] }
 0xb26   :  { %1274 = vrot.lane.b32.xlu1 %v6710_v52, %s6487_s8 }
 0xba2   :  { %v1251_v53 = vpop.xlane.xlu1 %1250 }
 0xba3   :  { %v1255_v54 = vsub.f32 %v1191_v6, %v1251_v53 }
 0xba5   :  { %v1257_v56 = vmul.f32 1.442695, %v1255_v54 }
 0xba6   :  { %v1275_v57 = vpop.permute.xlu1 %1274  ;;  %v1254_v58 = vpop.xlane.xlu0 %1253 }
 0xba7   :  { %6373 = vpow2.f32 %v1257_v56  ;;  %v1280_v59 = vsel %vm339_vm5, %v1275_v57, 0  ;;  %v1256_v60 = vsub.f32 %v1243_v46, %v1254_v58  ;;  %v6312_v46 = vld [vmem:[%s7518_s1 + $0x88] sm:$0xff]  }
 0xba8   :  { %5863 = vmatpush3.bf16.msra.mxu1 %v1280_v59 }
 0xba9   :  { %v1259_v61 = vmul.f32 1.442695, %v1256_v60  ;;  %5874 = vmatprep.subr.bf16.mxu1 %v6485_v2 }
 0xbab   :  { %6375 = vpow2.f32 %v1259_v61 }
 0xbb1   :  { %v6374_v62 = vpop.eup %6373 }
 0xbb2   :  { %v1261_v63 = vsel %vm311_vm6, %v6374_v62, 0.0 }
 0xbb3   :  { %1262 = vadd.xlane.f32.xlu0 %v1261_v63 }
 0xbb5   :  { %v6376_v0 = vpop.eup %6375 }
 0xbb6   :  { %v1264_v52 = vsel %vm311_vm6, %v6376_v0, 0.0 }
 0xbb7   :  { %1265 = vadd.xlane.f32.xlu0 %v1264_v52 }
 0xbcd   :  { %1323 = vrot.lane.b32.xlu0 %v6715_v55, %s6487_s8 }
 0xc40   :  { %v1263_v1 = vpop.xlane.xlu0 %1262 }
 0xc41   :  { %6377 = vrcp.f32 %v1263_v1 }
 0xc44   :  { %v1266_v3 = vpop.xlane.xlu0 %1265 }
 0xc45   :  { %6379 = vrcp.f32 %v1266_v3  ;;  %v5331_v3 = vld [vmem:[%s7519_s2 + $0x8] ss:$0 sm:$0xff] }
 0xc48   :  { %v1324_v4 = vpop.permute.xlu0 %1323 }
 0xc49   :  { %v1329_v5 = vsel %vm339_vm5, %v1324_v4, 0 }
 0xc4a   :  { %5869 = vmatpush3.bf16.msra.mxu0 %v1329_v5 }
 0xc4b   :  { %v6378_v7 = vpop.eup %6377  ;;  %5882 = vmatprep.subr.bf16.mxu0 %v6485_v2 }
 0xc4c   :  { %v1269_v8 = vmul.f32 %v6378_v7, %v6374_v62 }
 0xc4e   :  { %v1271_v9 = vpack.c.bf16 %v1269_v8, %v1269_v8 }
 0xc4f   :  { %v6380_v10 = vpop.eup %6379 }
 0xc50   :  { %v1270_v32 = vmul.f32 %v6380_v10, %v6376_v0  ;;  %5865 = vmatmul.mubr.msk.bf16.vlgmr.msra.gmra.mrb[40].mxu1 %vm311_vm6, %v1271_v9  ;;  %v5327_v0 = vld [vmem:[%s7519_s2 + $0xa] ss:$0 sm:$0xff] }
 0xc51   :  { %5878 = vmatprep.mubr.msk.bf16.mxu1 %vm6486_vm1, %v6485_v2  ;;  %5875 = vmatpush3.bf16.msra.mxu1 %v6305_v11 }
 0xc52   :  { %v1272_v55 = vpack.c.bf16 %v1270_v32, %v1270_v32  ;;  %5876 = vmatprep.subr.bf16.mxu1 %v6485_v2 }
 0xc54   :  { %5871 = vmatmul.mubr.msk.bf16.vlgmr.msra.gmra.mrb[44].mxu0 %vm311_vm6, %v1272_v55 }
 0xc55   :  { %5886 = vmatprep.mubr.msk.bf16.mxu0 %vm6486_vm1, %v6485_v2  ;;  %5877 = vmatpush3.bf16.msra.mxu1 %v6306_v12 }
 0xc56   :  { %5890 = vmatprep.subr.bf16.mxu1 %v6485_v2  ;;  %5883 = vmatpush3.bf16.msra.mxu0 %v6307_v28 }
 0xc57   :  { %5884 = vmatprep.subr.bf16.mxu0 %v6485_v2 }
 0xd23   :  { %v1316_v13 = vpop.f32.mrb[40].mxu1 }
 0xd24   :  { %1373 = vrot.lane.b32.xlu1 %v1316_v13, %s6488_s13  ;;  %v5866_v14 = vpop.f32.mrb[41].mxu1 }
 0xd25   :  { %v1319_v15 = vpop.f32.mrb[42].mxu1 }
 0xd26   :  { %v5867_v16 = vpop.f32.mrb[43].mxu1 }
 0xd27   :  { %v1365_v17 = vpop.f32.mrb[44].mxu0 }
 0xd28   :  { %1375 = vrot.lane.b32.xlu1 %v1365_v17, %s6488_s13  ;;  %v5872_v18 = vpop.f32.mrb[45].mxu0 }
 0xd29   :  { %v1368_v19 = vpop.f32.mrb[46].mxu0 }
 0xd2a   :  { %v5873_v20 = vpop.f32.mrb[47].mxu0 }
 0xd96   :  { %v1374_v21 = vpop.permute.xlu1 %1373 }
 0xd97   :  { %v1379_v22 = vsel %vm221_vm4, %v6754_v33, %v1374_v21 }
 0xd98   :  { %v1381_v25 = vadd.f32 %v1379_v22, %v6707_v49  ;;  %v6309_v49 = vld [vmem:[%s7518_s1 + $0x98] sm:$0xff]  }
 0xd99   :  { %5885 = vmatpush3.bf16.msra.mxu0 %v6309_v49 }
 0xd9a   :  { %v1376_v23 = vpop.permute.xlu1 %1375  ;;  %5898 = vmatprep.subr.bf16.mxu0 %v6485_v2 }
 0xd9b   :  { %v1380_v24 = vsel %vm221_vm4, %v6756_v39, %v1376_v23 }
 0xd9c   :  { %v1382_v26 = vadd.f32 %v1380_v24, %v6713_v35  ;;  %v6310_v35 = vld [vmem:[%s7518_s1 + $0xa8] sm:$0xff]  }
 0xd9e   :  { %v1383_v27 = vpack.c.bf16 %v1382_v26, %v1381_v25 }
 0xda0   :  { %5879 = vmatmul.mubr.msk.bf16.vlgmr.msra.gmra.mrb[44].mxu1 %vm171_vm3, %v1383_v27 }
 0xda1   :  { %5894 = vmatprep.mubr.msk.bf16.mxu1 %vm6486_vm1, %v6485_v2  ;;  %5891 = vmatpush3.bf16.msra.mxu1 %v6308_v29 }
 0xda2   :  { %5892 = vmatprep.subr.bf16.mxu1 %v6485_v2 }
 0xda5   :  { %5893 = vmatpush3.bf16.msra.mxu1 %v6310_v35 }
 0xda6   :  { %5906 = vmatprep.subr.bf16.mxu1 %v6485_v2 }
 0xe73   :  { %v1439_v31 = vpop.f32.mrb[44].mxu1 }
 0xe74   :  { %v1440_v33 = vadd.f32 %v5299_v30, %v1439_v31  ;;  %v5880_v36 = vpop.f32.mrb[45].mxu1 }
 0xe75   :  { %v1442_v37 = vpop.f32.mrb[46].mxu1 }
 0xe76   :  { %v1446_v38 = vmax.f32 %v1440_v33, 0.0  ;;  %v1443_v39 = vadd.f32 %v5299_v30, %v1442_v37  ;;  %v5881_v40 = vpop.f32.mrb[47].mxu1 }
 0xe78   :  { %v1448_v41 = vadd.f32 %v1446_v38, %v1381_v25  ;;  %v1447_v42 = vmax.f32 %v1443_v39, 0.0 }
 0xe7a   :  { %1450 = vst.msk [vmem:[#allocation2] sm:$0xff] %vm171_vm3, %v1448_v41  ;;  %v1449_v6 = vadd.f32 %v1447_v42, %v1382_v26 }
 0xe7c   :  { %1451 = vst.msk [vmem:[#allocation2 + $0x8] sm:$0xff] %vm171_vm3, %v1449_v6 }
 0xe81   :  { %v1452_v43 = vld [vmem:[#allocation2] sm:$0xff] }
 0xe83   :  { %v1453_v44 = vld [vmem:[#allocation2 + $0x8] sm:$0xff] }
 0xe84   :  { %v6819_v45 = vpack.c.bf16 %v1453_v44, %v1452_v43 }
 0xe86   :  { %5887 = vmatmul.mubr.msk.bf16.vlgmr.msra.gmra.mrb[48].mxu0 %vm171_vm3, %v6819_v45  ;;  %5895 = vmatmul.mubr.msk.bf16.vlgmr.msra.gmra.mrb[48].mxu1 %vm171_vm3, %v6819_v45 }
 0xe87   :  { %5899 = vmatpush3.bf16.msra.mxu0 %v6311_v34  ;;  %5902 = vmatprep.mubr.msk.bf16.mxu0 %vm6486_vm1, %v6485_v2 }
 0xe88   :  { %5900 = vmatprep.subr.bf16.mxu0 %v6485_v2  ;;  %5908 = vmatprep.mubr.msk.bf16.mxu1 %vm6486_vm1, %v6485_v2 }
 0xe8b   :  { %5901 = vmatpush3.bf16.msra.mxu0 %v6312_v46 }
 0xe8c   :  { %5912 = vmatprep.subr.bf16.mxu0 %v6485_v2 }
 0xe8e   :  { %5903 = vmatmul.mubr.msk.bf16.vlgmr.msra.gmra.mrb[52].mxu0 %vm171_vm3, %v1604_v48 }
 0xe8f   :  { %5914 = vmatprep.mubr.msk.bf16.mxu0 %vm6486_vm1, %v6485_v2 }
 0xf59   :  { %v1538_v51 = vpop.f32.mrb[48].mxu0  ;;  %v1597_v53 = vpop.f32.mrb[48].mxu1 }
 0xf5a   :  { %v1539_v54 = vadd.f32 %v5323_v50, %v1538_v51  ;;  %v5888_v56 = vpop.f32.mrb[49].mxu0  ;;  %v5896_v57 = vpop.f32.mrb[49].mxu1  ;;  %v1598_v4 = vadd.f32 %v5327_v0, %v1597_v53 }
 0xf5b   :  { %v1541_v58 = vpop.f32.mrb[50].mxu0  ;;  %v1600_v59 = vpop.f32.mrb[50].mxu1 }
 0xf5c   :  { %v1668_v60 = vpack.c.bf16 %v1539_v54, %v1539_v54  ;;  %v1542_v61 = vadd.f32 %v5323_v50, %v1541_v58  ;;  %v5889_v62 = vpop.f32.mrb[51].mxu0  ;;  %v5897_v63 = vpop.f32.mrb[51].mxu1  ;;  %v1601_v7 = vadd.f32 %v5327_v0, %v1600_v59  ;;  %v6855_v55 = vpack.c.bf16 %v1598_v4, %v1598_v4 }
 0xf5e   :  { %v1676_v52 = vsel %vm221_vm4, %v1668_v60, 0  ;;  %v1669_v1 = vpack.c.bf16 %v1542_v61, %v1542_v61  ;;  %v6857_v11 = vpack.c.bf16 %v1601_v7, %v1601_v7  ;;  %v1789_v15 = vsel %vm339_vm5, %v6855_v55, 0 }
 0xf5f   :  { %5907 = vmatpush3.bf16.xpose.msra.mxu1 %v1676_v52 }
 0xf60   :  { %v1719_v5 = vsel %vm221_vm4, %v1669_v1, 0  ;;  %5918 = vmatprep.subr.bf16.mxu1 %v6485_v2  ;;  %v1835_v16 = vsel %vm339_vm5, %v6857_v11, 0 }
 0xf61   :  { %v1660_v8 = vpop.f32.mrb[52].mxu0  ;;  %5913 = vmatpush3.bf16.xpose.msra.mxu0 %v1719_v5 }
 0xf62   :  { %v6852_v9 = vadd.f32 %v5331_v3, %v1660_v8  ;;  %v5904_v10 = vpop.f32.mrb[53].mxu0  ;;  %5924 = vmatprep.subr.bf16.mxu0 %v6485_v2 }
 0xf63   :  { %v1663_v32 = vpop.f32.mrb[54].mxu0 }
 0xf64   :  { %v1666_v12 = vmul.f32 0.17677669, %v6852_v9  ;;  %v5905_v13 = vpop.f32.mrb[55].mxu0 }
 0xf66   :  { %v1667_v14 = vpack.c.bf16 %v1666_v12, %v1666_v12 }
 0xf68   :  { %5909 = vmatmul.mubr.msk.bf16.vlgmr.msra.gmra.mrb[52].mxu1 %vm221_vm4, %v1667_v14  ;;  %5915 = vmatmul.mubr.msk.bf16.vlgmr.msra.gmra.mrb[56].mxu0 %vm221_vm4, %v1667_v14 }
 0xf69   :  { %5919 = vmatpush3.bf16.msra.mxu1 %v1789_v15  ;;  %5925 = vmatpush3.bf16.msra.mxu0 %v1835_v16 }
 0xf6a   :  { %5920 = vmatprep.mubr.msk.bf16.mxu1 %vm6486_vm1, %v6485_v2  ;;  %5930 = vmatprep.subr.bf16.mxu1 %v6485_v2 }
 0xf6b   :  { %5926 = vmatprep.mubr.msk.bf16.mxu0 %vm6486_vm1, %v6485_v2  ;;  %5936 = vmatprep.subr.bf16.mxu0 %v6485_v2 }
0x103b   :  { %v1712_v17 = vpop.f32.mrb[52].mxu1  ;;  %v1755_v18 = vpop.f32.mrb[56].mxu0 }
0x103c   :  { %v5910_v19 = vpop.f32.mrb[53].mxu1  ;;  %v5916_v20 = vpop.f32.mrb[57].mxu0  ;;  %v1761_v21 = vsel %vm311_vm6, %v1712_v17, -inf  ;;  %v1764_v22 = vsel %vm311_vm6, %v1755_v18, -inf }
0x103d   :  { %1762 = vmax.xlane.f32.xlu1 %v1761_v21  ;;  %v1715_v23 = vpop.f32.mrb[54].mxu1  ;;  %1765 = vmax.xlane.f32.xlu0 %v1764_v22  ;;  %v1758_v24 = vpop.f32.mrb[58].mxu0 }
0x103e   :  { %v5911_v25 = vpop.f32.mrb[55].mxu1  ;;  %v5917_v26 = vpop.f32.mrb[59].mxu0 }
0x104e   :  { %1881 = vrot.lane.b32.xlu1 %v1668_v60, %s6487_s8 }
0x1052   :  { %1878 = vrot.lane.b32.xlu1 %v1667_v14, %s6487_s8 }
0x10ca   :  { %v1763_v27 = vpop.xlane.xlu1 %1762  ;;  %v1766_v28 = vpop.xlane.xlu0 %1765 }
0x10cb   :  { %v1767_v29 = vsub.f32 %v1712_v17, %v1763_v27  ;;  %v1768_v49 = vsub.f32 %v1755_v18, %v1766_v28 }
0x10cd   :  { %v1769_v35 = vmul.f32 1.442695, %v1767_v29  ;;  %v1771_v30 = vmul.f32 1.442695, %v1768_v49  ;;  %v6313_v29 = vld [vmem:[%s7518_s1 + $0xb0] sm:$0xff]   ;;  %v6314_v49 = vld [vmem:[%s7518_s1 + $0xb8] sm:$0xff]  }
0x10ce   :  { %v1882_v42 = vpop.permute.xlu1 %1881 }
0x10cf   :  { %6381 = vpow2.f32 %v1769_v35  ;;  %v1887_v44 = vsel %vm221_vm4, %v1882_v42, 0 }
0x10d0   :  { %6383 = vpow2.f32 %v1771_v30 }
0x10d2   :  { %v1879_v50 = vpop.permute.xlu1 %1878 }
0x10d9   :  { %v6382_v31 = vpop.eup %6381 }
0x10da   :  { %v1773_v33 = vsel %vm311_vm6, %v6382_v31, 0.0  ;;  %v6384_v36 = vpop.eup %6383 }
0x10db   :  { %1774 = vadd.xlane.f32.xlu0 %v1773_v33  ;;  %v1776_v37 = vsel %vm311_vm6, %v6384_v36, 0.0 }
0x10df   :  { %1777 = vadd.xlane.f32.xlu0 %v1776_v37 }
0x10f5   :  { %1930 = vrot.lane.b32.xlu0 %v1669_v1, %s6487_s8 }
0x1168   :  { %v1775_v38 = vpop.xlane.xlu0 %1774 }
0x1169   :  { %6385 = vrcp.f32 %v1775_v38 }
0x116c   :  { %v1778_v39 = vpop.xlane.xlu0 %1777 }
0x116d   :  { %6387 = vrcp.f32 %v1778_v39 }
0x1170   :  { %v1931_v46 = vpop.permute.xlu0 %1930 }
0x1171   :  { %v1933_v48 = vsel %vm221_vm4, %v1931_v46, 0  ;;  %v6315_v46 = vld [vmem:[%s7518_s1 + $0xd0] sm:$0xff]  }
0x1173   :  { %v6386_v40 = vpop.eup %6385 }
0x1174   :  { %v1781_v41 = vmul.f32 %v6386_v40, %v6382_v31 }
0x1176   :  { %v1783_v6 = vpack.c.bf16 %v1781_v41, %v1781_v41 }
0x1177   :  { %v6388_v43 = vpop.eup %6387 }
0x1178   :  { %v1782_v34 = vmul.f32 %v6388_v43, %v6384_v36  ;;  %5921 = vmatmul.mubr.msk.bf16.vlgmr.msra.gmra.mrb[56].mxu1 %vm311_vm6, %v1783_v6 }
0x1179   :  { %5931 = vmatpush3.bf16.xpose.msra.mxu1 %v1887_v44  ;;  %5932 = vmatprep.mubr.msk.bf16.mxu1 %vm6486_vm1, %v6485_v2 }
0x117a   :  { %v1784_v47 = vpack.c.bf16 %v1782_v34, %v1782_v34  ;;  %5942 = vmatprep.subr.bf16.mxu1 %v6485_v2 }
0x117c   :  { %5927 = vmatmul.mubr.msk.bf16.vlgmr.msra.gmra.mrb[60].mxu0 %vm311_vm6, %v1784_v47  ;;  %v6316_v47 = vld [vmem:[%s7518_s1 + $0xe0] sm:$0xff]  }
0x117d   :  { %5937 = vmatpush3.bf16.xpose.msra.mxu0 %v1933_v48  ;;  %5938 = vmatprep.mubr.msk.bf16.mxu0 %vm6486_vm1, %v6485_v2  ;;  %v6318_v48 = vld [vmem:[%s7518_s1 + $0xe8] sm:$0xff]  }
0x117e   :  { %5948 = vmatprep.subr.bf16.mxu0 %v6485_v2 }
0x1180   :  { %5933 = vmatmul.mubr.msk.bf16.vlgmr.msra.gmra.mrb[60].mxu1 %vm221_vm4, %v1879_v50 }
0x1181   :  { %5944 = vmatprep.mubr.msk.bf16.mxu1 %vm6486_vm1, %v6485_v2 }
0x1184   :  { %5939 = vmatmul.mubr.msk.bf16.vlgmr.msra.gmra.mrb[64].mxu0 %vm221_vm4, %v1879_v50  ;;  %v5343_v50 = vld [vmem:[%s7519_s2 + $0xb] ss:$0 sm:$0xff] }
0x1185   :  { %5950 = vmatprep.mubr.msk.bf16.mxu0 %vm6486_vm1, %v6485_v2 }
0x124b   :  { %v6895_v51 = vpop.f32.mrb[56].mxu1 }
0x124c   :  { %v5922_v53 = vpop.f32.mrb[57].mxu1 }
0x124d   :  { %v1828_v54 = vpop.f32.mrb[58].mxu1 }
0x124e   :  { %v5923_v56 = vpop.f32.mrb[59].mxu1 }
0x124f   :  { %v6897_v57 = vpop.f32.mrb[60].mxu0 }
0x1250   :  { %v5928_v58 = vpop.f32.mrb[61].mxu0 }
0x1251   :  { %v1874_v59 = vpop.f32.mrb[62].mxu0 }
0x1252   :  { %v5929_v60 = vpop.f32.mrb[63].mxu0 }
0x1253   :  { %v1923_v61 = vpop.f32.mrb[60].mxu1 }
0x1254   :  { %v5934_v62 = vpop.f32.mrb[61].mxu1  ;;  %v1975_v63 = vsel %vm311_vm6, %v1923_v61, -inf }
0x1255   :  { %1976 = vmax.xlane.f32.xlu1 %v1975_v63  ;;  %v1926_v0 = vpop.f32.mrb[62].mxu1 }
0x1256   :  { %v5935_v52 = vpop.f32.mrb[63].mxu1 }
0x1257   :  { %v1969_v1 = vpop.f32.mrb[64].mxu0  ;;  %v6319_v52 = vld [vmem:[%s7518_s1 + $0xc0] sm:$0xff]  }
0x1258   :  { %v5940_v3 = vpop.f32.mrb[65].mxu0  ;;  %v1978_v4 = vsel %vm311_vm6, %v1969_v1, -inf }
0x1259   :  { %1979 = vmax.xlane.f32.xlu0 %v1978_v4  ;;  %v1972_v5 = vpop.f32.mrb[66].mxu0  ;;  %v6320_v3 = vld [vmem:[%s7518_s1 + $0xc8] sm:$0xff]  }
0x125a   :  { %v5941_v7 = vpop.f32.mrb[67].mxu0  ;;  %v5367_v4 = vld [vmem:[%s7519_s2 + $0xd] ss:$0 sm:$0xff] }
0x12e2   :  { %v1977_v8 = vpop.xlane.xlu1 %1976 }
0x12e3   :  { %v1981_v10 = vsub.f32 %v1923_v61, %v1977_v8 }
0x12e5   :  { %v1983_v32 = vmul.f32 1.442695, %v1981_v10 }
0x12e6   :  { %v1980_v12 = vpop.xlane.xlu0 %1979 }
0x12e7   :  { %6389 = vpow2.f32 %v1983_v32  ;;  %v1982_v13 = vsub.f32 %v1969_v1, %v1980_v12 }
0x12e9   :  { %v1985_v14 = vmul.f32 1.442695, %v1982_v13 }
0x12eb   :  { %6391 = vpow2.f32 %v1985_v14 }
0x12f1   :  { %v6390_v15 = vpop.eup %6389 }
0x12f2   :  { %v1987_v16 = vsel %vm311_vm6, %v6390_v15, 0.0 }
0x12f3   :  { %1988 = vadd.xlane.f32.xlu0 %v1987_v16 }
0x12f5   :  { %v6392_v17 = vpop.eup %6391 }
0x12f6   :  { %v1990_v18 = vsel %vm311_vm6, %v6392_v17, 0.0 }
0x12f7   :  { %1991 = vadd.xlane.f32.xlu1 %v1990_v18 }
0x1308   :  { %2049 = vrot.lane.b32.xlu1 %v6857_v11, %s6487_s8 }
0x1309   :  { %2000 = vrot.lane.b32.xlu0 %v6855_v55, %s6487_s8 }
0x1380   :  { %v1989_v19 = vpop.xlane.xlu0 %1988 }
0x1381   :  { %6393 = vrcp.f32 %v1989_v19 }
0x1384   :  { %v1992_v20 = vpop.xlane.xlu1 %1991  ;;  %v2001_v21 = vpop.permute.xlu0 %2000 }
0x1385   :  { %6395 = vrcp.f32 %v1992_v20  ;;  %v2006_v22 = vsel %vm339_vm5, %v2001_v21, 0  ;;  %v5375_v20 = vld [vmem:[%s7519_s2 + $0xc] ss:$0 sm:$0xff] }
0x1386   :  { %5943 = vmatpush3.bf16.msra.mxu1 %v2006_v22 }
0x1387   :  { %5954 = vmatprep.subr.bf16.mxu1 %v6485_v2 }
0x1388   :  { %v2050_v23 = vpop.permute.xlu1 %2049 }
0x1389   :  { %v2055_v24 = vsel %vm339_vm5, %v2050_v23, 0 }
0x138a   :  { %5949 = vmatpush3.bf16.msra.mxu0 %v2055_v24 }
0x138b   :  { %v6394_v25 = vpop.eup %6393  ;;  %5962 = vmatprep.subr.bf16.mxu0 %v6485_v2 }
0x138c   :  { %v1995_v11 = vmul.f32 %v6394_v25, %v6390_v15 }
0x138e   :  { %v1997_v26 = vpack.c.bf16 %v1995_v11, %v1995_v11 }
0x138f   :  { %v6396_v55 = vpop.eup %6395 }
0x1390   :  { %v1996_v27 = vmul.f32 %v6396_v55, %v6392_v17  ;;  %5945 = vmatmul.mubr.msk.bf16.vlgmr.msra.gmra.mrb[64].mxu1 %vm311_vm6, %v1997_v26 }
0x1391   :  { %5958 = vmatprep.mubr.msk.bf16.mxu1 %vm6486_vm1, %v6485_v2  ;;  %5955 = vmatpush3.bf16.msra.mxu1 %v6313_v29 }
0x1392   :  { %v1998_v28 = vpack.c.bf16 %v1996_v27, %v1996_v27  ;;  %5956 = vmatprep.subr.bf16.mxu1 %v6485_v2 }
0x1394   :  { %5951 = vmatmul.mubr.msk.bf16.vlgmr.msra.gmra.mrb[68].mxu0 %vm311_vm6, %v1998_v28 }
0x1395   :  { %5966 = vmatprep.mubr.msk.bf16.mxu0 %vm6486_vm1, %v6485_v2  ;;  %5957 = vmatpush3.bf16.msra.mxu1 %v6314_v49 }
0x1396   :  { %5970 = vmatprep.subr.bf16.mxu1 %v6485_v2  ;;  %5963 = vmatpush3.bf16.msra.mxu0 %v6315_v46 }
0x1397   :  { %5964 = vmatprep.subr.bf16.mxu0 %v6485_v2 }
0x1463   :  { %v2042_v35 = vpop.f32.mrb[64].mxu1 }
0x1464   :  { %2099 = vrot.lane.b32.xlu1 %v2042_v35, %s6488_s13  ;;  %v5946_v30 = vpop.f32.mrb[65].mxu1 }
0x1465   :  { %v2045_v31 = vpop.f32.mrb[66].mxu1 }
0x1466   :  { %v5947_v33 = vpop.f32.mrb[67].mxu1 }
0x1467   :  { %v2091_v36 = vpop.f32.mrb[68].mxu0 }
0x1468   :  { %2101 = vrot.lane.b32.xlu1 %v2091_v36, %s6488_s13  ;;  %v5952_v37 = vpop.f32.mrb[69].mxu0 }
0x1469   :  { %v2094_v38 = vpop.f32.mrb[70].mxu0 }
0x146a   :  { %v5953_v39 = vpop.f32.mrb[71].mxu0 }
0x14d6   :  { %v2100_v40 = vpop.permute.xlu1 %2099 }
0x14d7   :  { %v2105_v41 = vsel %vm221_vm4, %v6895_v51, %v2100_v40 }
0x14d8   :  { %v2107_v43 = vadd.f32 %v2105_v41, %v6852_v9 }
0x14da   :  { %v2102_v42 = vpop.permute.xlu1 %2101 }
0x14db   :  { %v2106_v6 = vsel %vm221_vm4, %v6897_v57, %v2102_v42 }
0x14dc   :  { %v2108_v44 = vadd.f32 %v2106_v6, %v6852_v9  ;;  %v6317_v9 = vld [vmem:[%s7518_s1 + $0xd8] sm:$0xff]  }
0x14dd   :  { %5965 = vmatpush3.bf16.msra.mxu0 %v6317_v9 }
0x14de   :  { %v2109_v34 = vpack.c.bf16 %v2108_v44, %v2107_v43  ;;  %5978 = vmatprep.subr.bf16.mxu0 %v6485_v2 }
0x14e0   :  { %5959 = vmatmul.mubr.msk.bf16.vlgmr.msra.gmra.mrb[68].mxu1 %vm171_vm3, %v2109_v34 }
0x14e1   :  { %5974 = vmatprep.mubr.msk.bf16.mxu1 %vm6486_vm1, %v6485_v2  ;;  %5971 = vmatpush3.bf16.msra.mxu1 %v6316_v47 }
0x14e2   :  { %5972 = vmatprep.subr.bf16.mxu1 %v6485_v2 }
0x14e5   :  { %5973 = vmatpush3.bf16.msra.mxu1 %v6318_v48 }
0x14e6   :  { %5986 = vmatprep.subr.bf16.mxu1 %v6485_v2 }
0x15b3   :  { %v2165_v51 = vpop.f32.mrb[68].mxu1 }
0x15b4   :  { %v2166_v53 = vadd.f32 %v5343_v50, %v2165_v51  ;;  %v5960_v54 = vpop.f32.mrb[69].mxu1 }
0x15b5   :  { %v2168_v56 = vpop.f32.mrb[70].mxu1 }
0x15b6   :  { %v2172_v57 = vmax.f32 %v2166_v53, 0.0  ;;  %v2169_v58 = vadd.f32 %v5343_v50, %v2168_v56  ;;  %v5961_v59 = vpop.f32.mrb[71].mxu1 }
0x15b8   :  { %v2174_v60 = vadd.f32 %v2172_v57, %v2107_v43  ;;  %v2173_v61 = vmax.f32 %v2169_v58, 0.0 }
0x15ba   :  { %2176 = vst.msk [vmem:[#allocation3] sm:$0xff] %vm171_vm3, %v2174_v60  ;;  %v2175_v62 = vadd.f32 %v2173_v61, %v2108_v44 }
0x15bc   :  { %2177 = vst.msk [vmem:[#allocation3 + $0x8] sm:$0xff] %vm171_vm3, %v2175_v62 }
0x15c1   :  { %v2180_v63 = vld [vmem:[#allocation3] sm:$0xff] }
0x15c3   :  { %v2181_v0 = vld [vmem:[#allocation3 + $0x8] sm:$0xff] }
0x15c4   :  { %v2210_v1 = vpack.c.bf16 %v2181_v0, %v2180_v63 }
0x15c6   :  { %5967 = vmatmul.mubr.msk.bf16.vlgmr.msra.gmra.mrb[72].mxu0 %vm171_vm3, %v2210_v1  ;;  %5975 = vmatmul.mubr.msk.bf16.vlgmr.msra.gmra.mrb[72].mxu1 %vm171_vm3, %v2210_v1 }
0x15c7   :  { %5979 = vmatpush3.bf16.msra.mxu0 %v6319_v52  ;;  %5982 = vmatprep.mubr.msk.bf16.mxu0 %vm6486_vm1, %v6485_v2 }
0x15c8   :  { %5980 = vmatprep.subr.bf16.mxu0 %v6485_v2  ;;  %5988 = vmatprep.mubr.msk.bf16.mxu1 %vm6486_vm1, %v6485_v2 }
0x15cb   :  { %5981 = vmatpush3.bf16.msra.mxu0 %v6320_v3 }
0x15cc   :  { %5992 = vmatprep.subr.bf16.mxu0 %v6485_v2 }
0x15ce   :  { %5983 = vmatmul.mubr.msk.bf16.vlgmr.msra.gmra.mrb[76].mxu0 %vm171_vm3, %v6819_v45  ;;  %v5371_v45 = vld [vmem:[%s7519_s2 + $0xe] ss:$0 sm:$0xff] }
0x15cf   :  { %5994 = vmatprep.mubr.msk.bf16.mxu0 %vm6486_vm1, %v6485_v2 }
0x1699   :  { %v2266_v5 = vpop.f32.mrb[72].mxu0  ;;  %v2325_v7 = vpop.f32.mrb[72].mxu1 }
0x169a   :  { %v2267_v8 = vadd.f32 %v5367_v4, %v2266_v5  ;;  %v5968_v10 = vpop.f32.mrb[73].mxu0  ;;  %v5976_v32 = vpop.f32.mrb[73].mxu1  ;;  %v2326_v21 = vadd.f32 %v5371_v45, %v2325_v7 }
0x169b   :  { %v2269_v12 = vpop.f32.mrb[74].mxu0  ;;  %v2328_v13 = vpop.f32.mrb[74].mxu1 }
0x169c   :  { %v6978_v14 = vpack.c.bf16 %v2267_v8, %v2267_v8  ;;  %v2270_v15 = vadd.f32 %v5367_v4, %v2269_v12  ;;  %v5969_v16 = vpop.f32.mrb[75].mxu0  ;;  %v5977_v17 = vpop.f32.mrb[75].mxu1  ;;  %v2329_v24 = vadd.f32 %v5371_v45, %v2328_v13  ;;  %v6993_v55 = vpack.c.bf16 %v2326_v21, %v2326_v21 }
0x169e   :  { %v2407_v18 = vsel %vm221_vm4, %v6978_v14, 0  ;;  %v2400_v19 = vpack.c.bf16 %v2270_v15, %v2270_v15  ;;  %v6998_v49 = vpack.c.bf16 %v2329_v24, %v2329_v24  ;;  %v2523_v31 = vsel %vm339_vm5, %v6993_v55, 0 }
0x169f   :  { %5987 = vmatpush3.bf16.xpose.msra.mxu1 %v2407_v18 }
0x16a0   :  { %v2453_v22 = vsel %vm221_vm4, %v2400_v19, 0  ;;  %5998 = vmatprep.subr.bf16.mxu1 %v6485_v2  ;;  %v2569_v36 = vsel %vm339_vm5, %v6998_v49, 0 }
0x16a1   :  { %v2388_v23 = vpop.f32.mrb[76].mxu0  ;;  %5993 = vmatpush3.bf16.xpose.msra.mxu0 %v2453_v22 }
0x16a2   :  { %v6990_v25 = vadd.f32 %v5375_v20, %v2388_v23  ;;  %v5984_v11 = vpop.f32.mrb[77].mxu0  ;;  %6004 = vmatprep.subr.bf16.mxu0 %v6485_v2 }
0x16a3   :  { %v2391_v26 = vpop.f32.mrb[78].mxu0 }
0x16a4   :  { %v2395_v27 = vmul.f32 0.17677669, %v6990_v25  ;;  %v6996_v28 = vadd.f32 %v5375_v20, %v2391_v26  ;;  %v5985_v29 = vpop.f32.mrb[79].mxu0 }
0x16a6   :  { %v2397_v35 = vpack.c.bf16 %v2395_v27, %v2395_v27  ;;  %v2396_v30 = vmul.f32 0.17677669, %v6996_v28 }
0x16a8   :  { %v2398_v33 = vpack.c.bf16 %v2396_v30, %v2396_v30  ;;  %5989 = vmatmul.mubr.msk.bf16.vlgmr.msra.gmra.mrb[76].mxu1 %vm221_vm4, %v2397_v35 }
0x16a9   :  { %5999 = vmatpush3.bf16.msra.mxu1 %v2523_v31  ;;  %6000 = vmatprep.mubr.msk.bf16.mxu1 %vm6486_vm1, %v6485_v2 }
0x16aa   :  { %5995 = vmatmul.mubr.msk.bf16.vlgmr.msra.gmra.mrb[80].mxu0 %vm221_vm4, %v2398_v33  ;;  %6010 = vmatprep.subr.bf16.mxu1 %v6485_v2 }
0x16ab   :  { %6005 = vmatpush3.bf16.msra.mxu0 %v2569_v36  ;;  %6006 = vmatprep.mubr.msk.bf16.mxu0 %vm6486_vm1, %v6485_v2 }
0x16ac   :  { %6016 = vmatprep.subr.bf16.mxu0 %v6485_v2 }
0x177b   :  { %v2443_v37 = vpop.f32.mrb[76].mxu1 }
0x177c   :  { %v5990_v38 = vpop.f32.mrb[77].mxu1  ;;  %v2495_v39 = vsel %vm311_vm6, %v2443_v37, -inf }
0x177d   :  { %2496 = vmax.xlane.f32.xlu0 %v2495_v39  ;;  %v2446_v40 = vpop.f32.mrb[78].mxu1  ;;  %v2489_v41 = vpop.f32.mrb[80].mxu0 }
0x177e   :  { %v5991_v42 = vpop.f32.mrb[79].mxu1  ;;  %v5996_v6 = vpop.f32.mrb[81].mxu0  ;;  %v2498_v43 = vsel %vm311_vm6, %v2489_v41, -inf }
0x177f   :  { %2499 = vmax.xlane.f32.xlu1 %v2498_v43  ;;  %v2492_v44 = vpop.f32.mrb[82].mxu0 }
0x1780   :  { %v5997_v34 = vpop.f32.mrb[83].mxu0 }
0x1790   :  { %2667 = vrot.lane.b32.xlu1 %v2400_v19, %s6487_s8 }
0x1794   :  { %2612 = vrot.lane.b32.xlu1 %v2397_v35, %s6487_s8 }
0x1798   :  { %2664 = vrot.lane.b32.xlu1 %v2398_v33, %s6487_s8 }
0x180a   :  { %v2497_v46 = vpop.xlane.xlu0 %2496 }
0x180b   :  { %v2501_v47 = vsub.f32 %v2443_v37, %v2497_v46 }
0x180c   :  { %v2500_v9 = vpop.xlane.xlu1 %2499 }
0x180d   :  { %v2503_v48 = vmul.f32 1.442695, %v2501_v47  ;;  %v2502_v50 = vsub.f32 %v2489_v41, %v2500_v9 }
0x180f   :  { %6397 = vpow2.f32 %v2503_v48  ;;  %v2505_v51 = vmul.f32 1.442695, %v2502_v50  ;;  %v6321_v48 = vld [vmem:[%s7518_s1 + $0xf0] sm:$0xff]   ;;  %v6322_v50 = vld [vmem:[%s7518_s1 + $0xf8] sm:$0xff]  }
0x1810   :  { %v2668_v52 = vpop.permute.xlu1 %2667 }
0x1811   :  { %6399 = vpow2.f32 %v2505_v51  ;;  %v2673_v5 = vsel %vm221_vm4, %v2668_v52, 0 }
0x1814   :  { %v2613_v7 = vpop.permute.xlu1 %2612 }
0x1818   :  { %v2665_v8 = vpop.permute.xlu1 %2664 }
0x1819   :  { %v6398_v53 = vpop.eup %6397 }
0x181a   :  { %v2507_v54 = vsel %vm311_vm6, %v6398_v53, 0.0 }
0x181b   :  { %v6400_v56 = vpop.eup %6399  ;;  %2508 = vadd.xlane.f32.xlu0 %v2507_v54 }
0x181c   :  { %v2510_v57 = vsel %vm311_vm6, %v6400_v56, 0.0 }
0x181f   :  { %2511 = vadd.xlane.f32.xlu0 %v2510_v57 }
0x1835   :  { %2615 = vrot.lane.b32.xlu0 %v6978_v14, %s6487_s8 }
0x18a8   :  { %v2509_v58 = vpop.xlane.xlu0 %2508 }
0x18a9   :  { %6401 = vrcp.f32 %v2509_v58 }
0x18ac   :  { %v2512_v59 = vpop.xlane.xlu0 %2511 }
0x18ad   :  { %6403 = vrcp.f32 %v2512_v59 }
0x18b0   :  { %v2616_v62 = vpop.permute.xlu0 %2615 }
0x18b1   :  { %v2621_v3 = vsel %vm221_vm4, %v2616_v62, 0 }
0x18b3   :  { %v6402_v60 = vpop.eup %6401 }
0x18b4   :  { %v2515_v61 = vmul.f32 %v6402_v60, %v6398_v53 }
0x18b6   :  { %v2517_v63 = vpack.c.bf16 %v2515_v61, %v2515_v61 }
0x18b7   :  { %v6404_v0 = vpop.eup %6403 }
0x18b8   :  { %v2516_v1 = vmul.f32 %v6404_v0, %v6400_v56  ;;  %6001 = vmatmul.mubr.msk.bf16.vlgmr.msra.gmra.mrb[80].mxu1 %vm311_vm6, %v2517_v63 }
0x18b9   :  { %6011 = vmatpush3.bf16.xpose.msra.mxu1 %v2621_v3  ;;  %6012 = vmatprep.mubr.msk.bf16.mxu1 %vm6486_vm1, %v6485_v2 }
0x18ba   :  { %v2518_v4 = vpack.c.bf16 %v2516_v1, %v2516_v1  ;;  %6022 = vmatprep.subr.bf16.mxu1 %v6485_v2 }
0x18bc   :  { %6007 = vmatmul.mubr.msk.bf16.vlgmr.msra.gmra.mrb[84].mxu0 %vm311_vm6, %v2518_v4  ;;  %v6323_v4 = vld [vmem:[%s7518_s1 + $0x110] sm:$0xff]  }
0x18bd   :  { %6017 = vmatpush3.bf16.xpose.msra.mxu0 %v2673_v5  ;;  %6018 = vmatprep.mubr.msk.bf16.mxu0 %vm6486_vm1, %v6485_v2  ;;  %v6324_v5 = vld [vmem:[%s7518_s1 + $0x120] sm:$0xff]  }
0x18be   :  { %6028 = vmatprep.subr.bf16.mxu0 %v6485_v2 }
0x18c0   :  { %6013 = vmatmul.mubr.msk.bf16.vlgmr.msra.gmra.mrb[84].mxu1 %vm221_vm4, %v2613_v7  ;;  %v5387_v7 = vld [vmem:[%s7519_s2 + $0xf] ss:$0 sm:$0xff] }
0x18c1   :  { %6024 = vmatprep.mubr.msk.bf16.mxu1 %vm6486_vm1, %v6485_v2 }
0x18c4   :  { %6019 = vmatmul.mubr.msk.bf16.vlgmr.msra.gmra.mrb[88].mxu0 %vm221_vm4, %v2665_v8 }
0x18c5   :  { %6030 = vmatprep.mubr.msk.bf16.mxu0 %vm6486_vm1, %v6485_v2 }
0x198b   :  { %v7038_v10 = vpop.f32.mrb[80].mxu1 }
0x198c   :  { %v6002_v32 = vpop.f32.mrb[81].mxu1 }
0x198d   :  { %v2562_v12 = vpop.f32.mrb[82].mxu1 }
0x198e   :  { %v6003_v13 = vpop.f32.mrb[83].mxu1 }
0x198f   :  { %v7040_v14 = vpop.f32.mrb[84].mxu0 }
0x1990   :  { %v6008_v15 = vpop.f32.mrb[85].mxu0 }
0x1991   :  { %v2608_v16 = vpop.f32.mrb[86].mxu0 }
0x1992   :  { %v6009_v17 = vpop.f32.mrb[87].mxu0 }
0x1993   :  { %v2657_v45 = vpop.f32.mrb[84].mxu1 }
0x1994   :  { %v6014_v18 = vpop.f32.mrb[85].mxu1  ;;  %v2715_v19 = vsel %vm311_vm6, %v2657_v45, -inf }
0x1995   :  { %2716 = vmax.xlane.f32.xlu0 %v2715_v19  ;;  %v2660_v20 = vpop.f32.mrb[86].mxu1 }
0x1996   :  { %v6015_v21 = vpop.f32.mrb[87].mxu1  ;;  %v6327_v20 = vld [vmem:[%s7518_s1 + $0x100] sm:$0xff]  }
0x1997   :  { %v2709_v22 = vpop.f32.mrb[88].mxu0 }
0x1998   :  { %v6020_v23 = vpop.f32.mrb[89].mxu0  ;;  %v2718_v24 = vsel %vm311_vm6, %v2709_v22, -inf }
0x1999   :  { %2719 = vmax.xlane.f32.xlu1 %v2718_v24  ;;  %v2712_v11 = vpop.f32.mrb[90].mxu0  ;;  %v5234_v23 = vld [vmem:[%s7520_s3 + $0x10] sm:$0xf] }
0x199a   :  { %v6021_v26 = vpop.f32.mrb[91].mxu0  ;;  %v3070_v24 = vpack.c.bf16 %v5234_v23, %v5234_v23  ;;  %v5411_v11 = vld [vmem:[%s7519_s2 + $0x11] ss:$0 sm:$0xff] }
0x19aa   :  { %2789 = vrot.lane.b32.xlu1 %v6998_v49, %s6487_s8 }
0x1a22   :  { %v2717_v27 = vpop.xlane.xlu0 %2716 }
0x1a23   :  { %v2721_v29 = vsub.f32 %v2657_v45, %v2717_v27 }
0x1a25   :  { %v2723_v35 = vmul.f32 1.442695, %v2721_v29 }
0x1a26   :  { %v2720_v30 = vpop.xlane.xlu1 %2719 }
0x1a27   :  { %6405 = vpow2.f32 %v2723_v35  ;;  %v2722_v31 = vsub.f32 %v2709_v22, %v2720_v30  ;;  %v6328_v22 = vld [vmem:[%s7518_s1 + $0x108] sm:$0xff]  }
0x1a29   :  { %v2725_v33 = vmul.f32 1.442695, %v2722_v31 }
0x1a2a   :  { %v2790_v36 = vpop.permute.xlu1 %2789 }
0x1a2b   :  { %6407 = vpow2.f32 %v2725_v33  ;;  %v2795_v37 = vsel %vm339_vm5, %v2790_v36, 0 }
0x1a2c   :  { %6029 = vmatpush3.bf16.msra.mxu0 %v2795_v37 }
0x1a2d   :  { %6042 = vmatprep.subr.bf16.mxu0 %v6485_v2 }
0x1a31   :  { %v6406_v38 = vpop.eup %6405 }
0x1a32   :  { %v2727_v39 = vsel %vm311_vm6, %v6406_v38, 0.0 }
0x1a33   :  { %2728 = vadd.xlane.f32.xlu0 %v2727_v39 }
0x1a35   :  { %v6408_v40 = vpop.eup %6407 }
0x1a36   :  { %v2730_v49 = vsel %vm311_vm6, %v6408_v40, 0.0 }
0x1a37   :  { %2731 = vadd.xlane.f32.xlu0 %v2730_v49 }
0x1a4d   :  { %2740 = vrot.lane.b32.xlu0 %v6993_v55, %s6487_s8 }
0x1ac0   :  { %v2729_v41 = vpop.xlane.xlu0 %2728 }
0x1ac1   :  { %6409 = vrcp.f32 %v2729_v41 }
0x1ac4   :  { %v2732_v42 = vpop.xlane.xlu0 %2731 }
0x1ac5   :  { %6411 = vrcp.f32 %v2732_v42  ;;  %v5419_v42 = vld [vmem:[%s7519_s2 + $0x10] ss:$0 sm:$0xff] }
0x1ac8   :  { %v2741_v6 = vpop.permute.xlu0 %2740 }
0x1ac9   :  { %v2746_v43 = vsel %vm339_vm5, %v2741_v6, 0 }
0x1aca   :  { %6023 = vmatpush3.bf16.msra.mxu1 %v2746_v43 }
0x1acb   :  { %v6410_v44 = vpop.eup %6409  ;;  %6034 = vmatprep.subr.bf16.mxu1 %v6485_v2 }
0x1acc   :  { %v2735_v34 = vmul.f32 %v6410_v44, %v6406_v38 }
0x1ace   :  { %v2737_v46 = vpack.c.bf16 %v2735_v34, %v2735_v34 }
0x1acf   :  { %v6412_v47 = vpop.eup %6411 }
0x1ad0   :  { %v2736_v9 = vmul.f32 %v6412_v47, %v6408_v40  ;;  %6025 = vmatmul.mubr.msk.bf16.vlgmr.msra.gmra.mrb[88].mxu1 %vm311_vm6, %v2737_v46  ;;  %v5415_v40 = vld [vmem:[%s7519_s2 + $0x12] ss:$0 sm:$0xff] }
0x1ad1   :  { %6038 = vmatprep.mubr.msk.bf16.mxu1 %vm6486_vm1, %v6485_v2  ;;  %6035 = vmatpush3.bf16.msra.mxu1 %v6321_v48 }
0x1ad2   :  { %v2738_v55 = vpack.c.bf16 %v2736_v9, %v2736_v9  ;;  %6036 = vmatprep.subr.bf16.mxu1 %v6485_v2 }
0x1ad4   :  { %6031 = vmatmul.mubr.msk.bf16.vlgmr.msra.gmra.mrb[92].mxu0 %vm311_vm6, %v2738_v55 }
0x1ad5   :  { %6046 = vmatprep.mubr.msk.bf16.mxu0 %vm6486_vm1, %v6485_v2  ;;  %6037 = vmatpush3.bf16.msra.mxu1 %v6322_v50 }
0x1ad6   :  { %6050 = vmatprep.subr.bf16.mxu1 %v6485_v2  ;;  %6043 = vmatpush3.bf16.msra.mxu0 %v6323_v4 }
0x1ad7   :  { %6044 = vmatprep.subr.bf16.mxu0 %v6485_v2 }
0x1ba3   :  { %v2782_v51 = vpop.f32.mrb[88].mxu1 }
0x1ba4   :  { %2839 = vrot.lane.b32.xlu1 %v2782_v51, %s6488_s13  ;;  %v6026_v53 = vpop.f32.mrb[89].mxu1 }
0x1ba5   :  { %v2785_v54 = vpop.f32.mrb[90].mxu1 }
0x1ba6   :  { %v6027_v56 = vpop.f32.mrb[91].mxu1 }
0x1ba7   :  { %v2831_v57 = vpop.f32.mrb[92].mxu0 }
0x1ba8   :  { %2841 = vrot.lane.b32.xlu1 %v2831_v57, %s6488_s13  ;;  %v6032_v58 = vpop.f32.mrb[93].mxu0 }
0x1ba9   :  { %v2834_v59 = vpop.f32.mrb[94].mxu0 }
0x1baa   :  { %v6033_v60 = vpop.f32.mrb[95].mxu0 }
0x1c16   :  { %v2840_v61 = vpop.permute.xlu1 %2839 }
0x1c17   :  { %v2845_v62 = vsel %vm221_vm4, %v7038_v10, %v2840_v61 }
0x1c18   :  { %v2847_v52 = vadd.f32 %v2845_v62, %v6990_v25  ;;  %v6325_v25 = vld [vmem:[%s7518_s1 + $0x118] sm:$0xff]  }
0x1c19   :  { %6045 = vmatpush3.bf16.msra.mxu0 %v6325_v25 }
0x1c1a   :  { %v2842_v63 = vpop.permute.xlu1 %2841  ;;  %6058 = vmatprep.subr.bf16.mxu0 %v6485_v2 }
0x1c1b   :  { %v2846_v0 = vsel %vm221_vm4, %v7040_v14, %v2842_v63 }
0x1c1c   :  { %v2848_v1 = vadd.f32 %v2846_v0, %v6996_v28  ;;  %v6326_v28 = vld [vmem:[%s7518_s1 + $0x128] sm:$0xff]  }
0x1c1e   :  { %v2849_v3 = vpack.c.bf16 %v2848_v1, %v2847_v52 }
0x1c20   :  { %6039 = vmatmul.mubr.msk.bf16.vlgmr.msra.gmra.mrb[92].mxu1 %vm171_vm3, %v2849_v3 }
0x1c21   :  { %6054 = vmatprep.mubr.msk.bf16.mxu1 %vm6486_vm1, %v6485_v2  ;;  %6051 = vmatpush3.bf16.msra.mxu1 %v6324_v5 }
0x1c22   :  { %6052 = vmatprep.subr.bf16.mxu1 %v6485_v2 }
0x1c25   :  { %6053 = vmatpush3.bf16.msra.mxu1 %v6326_v28 }
0x1c26   :  { %6066 = vmatprep.subr.bf16.mxu1 %v6485_v2 }
0x1cf3   :  { %v2905_v8 = vpop.f32.mrb[92].mxu1 }
0x1cf4   :  { %v2906_v10 = vadd.f32 %v5387_v7, %v2905_v8  ;;  %v6040_v32 = vpop.f32.mrb[93].mxu1 }
0x1cf5   :  { %v2908_v12 = vpop.f32.mrb[94].mxu1 }
0x1cf6   :  { %v2912_v13 = vmax.f32 %v2906_v10, 0.0  ;;  %v2909_v14 = vadd.f32 %v5387_v7, %v2908_v12  ;;  %v6041_v15 = vpop.f32.mrb[95].mxu1 }
0x1cf8   :  { %v2914_v16 = vadd.f32 %v2912_v13, %v2847_v52  ;;  %v2913_v17 = vmax.f32 %v2909_v14, 0.0 }
0x1cfa   :  { %2916 = vst.msk [vmem:[#allocation2] sm:$0xff] %vm171_vm3, %v2914_v16  ;;  %v2915_v45 = vadd.f32 %v2913_v17, %v2848_v1 }
0x1cfc   :  { %2917 = vst.msk [vmem:[#allocation2 + $0x8] sm:$0xff] %vm171_vm3, %v2915_v45 }
0x1d01   :  { %v2918_v18 = vld [vmem:[#allocation2] sm:$0xff] }
0x1d03   :  { %v2919_v19 = vld [vmem:[#allocation2 + $0x8] sm:$0xff] }
0x1d04   :  { %v2948_v21 = vpack.c.bf16 %v2919_v19, %v2918_v18 }
0x1d06   :  { %6047 = vmatmul.mubr.msk.bf16.vlgmr.msra.gmra.mrb[96].mxu0 %vm171_vm3, %v2948_v21  ;;  %6055 = vmatmul.mubr.msk.bf16.vlgmr.msra.gmra.mrb[96].mxu1 %vm171_vm3, %v2948_v21 }
0x1d07   :  { %6059 = vmatpush3.bf16.msra.mxu0 %v6327_v20  ;;  %6062 = vmatprep.mubr.msk.bf16.mxu0 %vm6486_vm1, %v6485_v2 }
0x1d08   :  { %6060 = vmatprep.subr.bf16.mxu0 %v6485_v2  ;;  %6068 = vmatprep.mubr.msk.bf16.mxu1 %vm6486_vm1, %v6485_v2 }
0x1d0b   :  { %6061 = vmatpush3.bf16.msra.mxu0 %v6328_v22 }
0x1d0c   :  { %6072 = vmatprep.subr.bf16.mxu0 %v6485_v2 }
0x1d0e   :  { %6063 = vmatmul.mubr.msk.bf16.vlgmr.msra.gmra.mrb[100].mxu0 %vm171_vm3, %v3070_v24 }
0x1d0f   :  { %6074 = vmatprep.mubr.msk.bf16.mxu0 %vm6486_vm1, %v6485_v2 }
0x1dd9   :  { %v3004_v26 = vpop.f32.mrb[96].mxu0  ;;  %v3063_v27 = vpop.f32.mrb[96].mxu1 }
0x1dda   :  { %v3005_v29 = vadd.f32 %v5411_v11, %v3004_v26  ;;  %v6048_v35 = vpop.f32.mrb[97].mxu0  ;;  %v6056_v30 = vpop.f32.mrb[97].mxu1  ;;  %v3064_v6 = vadd.f32 %v5415_v40, %v3063_v27 }
0x1ddb   :  { %v3007_v31 = vpop.f32.mrb[98].mxu0  ;;  %v3066_v33 = vpop.f32.mrb[98].mxu1 }
0x1ddc   :  { %v3134_v36 = vpack.c.bf16 %v3005_v29, %v3005_v29  ;;  %v3008_v37 = vadd.f32 %v5411_v11, %v3007_v31  ;;  %v6049_v38 = vpop.f32.mrb[99].mxu0  ;;  %v6057_v39 = vpop.f32.mrb[99].mxu1  ;;  %v3067_v44 = vadd.f32 %v5415_v40, %v3066_v33  ;;  %v7135_v55 = vpack.c.bf16 %v3064_v6, %v3064_v6 }
0x1dde   :  { %v3142_v49 = vsel %vm221_vm4, %v3134_v36, 0  ;;  %v3135_v41 = vpack.c.bf16 %v3008_v37, %v3008_v37  ;;  %v7137_v48 = vpack.c.bf16 %v3067_v44, %v3067_v44  ;;  %v3256_v54 = vsel %vm339_vm5, %v7135_v55, 0 }
0x1ddf   :  { %6067 = vmatpush3.bf16.xpose.msra.mxu1 %v3142_v49 }
0x1de0   :  { %v3185_v43 = vsel %vm221_vm4, %v3135_v41, 0  ;;  %6078 = vmatprep.subr.bf16.mxu1 %v6485_v2  ;;  %v3302_v56 = vsel %vm339_vm5, %v7137_v48, 0 }
0x1de1   :  { %v3126_v34 = vpop.f32.mrb[100].mxu0  ;;  %6073 = vmatpush3.bf16.xpose.msra.mxu0 %v3185_v43 }
0x1de2   :  { %v7132_v46 = vadd.f32 %v5419_v42, %v3126_v34  ;;  %v6064_v47 = vpop.f32.mrb[101].mxu0  ;;  %6084 = vmatprep.subr.bf16.mxu0 %v6485_v2 }
0x1de3   :  { %v3129_v9 = vpop.f32.mrb[102].mxu0 }
0x1de4   :  { %v3132_v50 = vmul.f32 0.17677669, %v7132_v46  ;;  %v6065_v51 = vpop.f32.mrb[103].mxu0 }
0x1de6   :  { %v3133_v53 = vpack.c.bf16 %v3132_v50, %v3132_v50 }
0x1de8   :  { %6069 = vmatmul.mubr.msk.bf16.vlgmr.msra.gmra.mrb[100].mxu1 %vm221_vm4, %v3133_v53  ;;  %6075 = vmatmul.mubr.msk.bf16.vlgmr.msra.gmra.mrb[104].mxu0 %vm221_vm4, %v3133_v53 }
0x1de9   :  { %6079 = vmatpush3.bf16.msra.mxu1 %v3256_v54  ;;  %6085 = vmatpush3.bf16.msra.mxu0 %v3302_v56 }
0x1dea   :  { %6080 = vmatprep.mubr.msk.bf16.mxu1 %vm6486_vm1, %v6485_v2  ;;  %6090 = vmatprep.subr.bf16.mxu1 %v6485_v2 }
0x1deb   :  { %6086 = vmatprep.mubr.msk.bf16.mxu0 %vm6486_vm1, %v6485_v2  ;;  %6096 = vmatprep.subr.bf16.mxu0 %v6485_v2 }
0x1ebb   :  { %v3178_v57 = vpop.f32.mrb[100].mxu1  ;;  %v3221_v58 = vpop.f32.mrb[104].mxu0 }
0x1ebc   :  { %v6070_v59 = vpop.f32.mrb[101].mxu1  ;;  %v6076_v60 = vpop.f32.mrb[105].mxu0  ;;  %v3228_v61 = vsel %vm3227_vm7, %v3178_v57, -inf  ;;  %v3231_v62 = vsel %vm3227_vm7, %v3221_v58, -inf }
0x1ebd   :  { %3229 = vmax.xlane.f32.xlu0 %v3228_v61  ;;  %v3181_v63 = vpop.f32.mrb[102].mxu1  ;;  %3232 = vmax.xlane.f32.xlu1 %v3231_v62  ;;  %v3224_v0 = vpop.f32.mrb[106].mxu0 }
0x1ebe   :  { %v6071_v52 = vpop.f32.mrb[103].mxu1  ;;  %v6077_v1 = vpop.f32.mrb[107].mxu0 }
0x1ece   :  { %3397 = vrot.lane.b32.xlu1 %v3135_v41, %s6487_s8 }
0x1ed2   :  { %3345 = vrot.lane.b32.xlu1 %v3133_v53, %s6487_s8 }
0x1f4a   :  { %v3230_v3 = vpop.xlane.xlu0 %3229  ;;  %v3233_v4 = vpop.xlane.xlu1 %3232 }
0x1f4b   :  { %v3234_v5 = vsub.f32 %v3178_v57, %v3230_v3  ;;  %v3235_v25 = vsub.f32 %v3221_v58, %v3233_v4  ;;  %v6329_v4 = vld [vmem:[%s7518_s1 + $0x130] sm:$0xff]  }
0x1f4d   :  { %v3236_v28 = vmul.f32 1.442695, %v3234_v5  ;;  %v3238_v7 = vmul.f32 1.442695, %v3235_v25  ;;  %v6330_v5 = vld [vmem:[%s7518_s1 + $0x138] sm:$0xff]  }
0x1f4e   :  { %v3398_v21 = vpop.permute.xlu1 %3397 }
0x1f4f   :  { %6413 = vpow2.f32 %v3236_v28  ;;  %v3400_v23 = vsel %vm221_vm4, %v3398_v21, 0  ;;  %v6331_v21 = vld [vmem:[%s7518_s1 + $0x150] sm:$0xff]  }
0x1f50   :  { %6415 = vpow2.f32 %v3238_v7 }
0x1f52   :  { %v3346_v24 = vpop.permute.xlu1 %3345 }
0x1f59   :  { %v6414_v8 = vpop.eup %6413 }
0x1f5a   :  { %v3240_v10 = vsel %vm3227_vm7, %v6414_v8, 0.0  ;;  %v6416_v32 = vpop.eup %6415 }
0x1f5b   :  { %3241 = vadd.xlane.f32.xlu0 %v3240_v10  ;;  %v3243_v12 = vsel %vm3227_vm7, %v6416_v32, 0.0 }
0x1f5f   :  { %3244 = vadd.xlane.f32.xlu0 %v3243_v12 }
0x1f75   :  { %3348 = vrot.lane.b32.xlu0 %v3134_v36, %s6487_s8 }
0x1fe8   :  { %v3242_v13 = vpop.xlane.xlu0 %3241 }
0x1fe9   :  { %6417 = vrcp.f32 %v3242_v13 }
0x1fec   :  { %v3245_v14 = vpop.xlane.xlu0 %3244 }
0x1fed   :  { %6419 = vrcp.f32 %v3245_v14 }
0x1ff0   :  { %v3349_v17 = vpop.permute.xlu0 %3348 }
0x1ff1   :  { %v3354_v20 = vsel %vm221_vm4, %v3349_v17, 0 }
0x1ff3   :  { %v6418_v15 = vpop.eup %6417 }
0x1ff4   :  { %v3248_v16 = vmul.f32 %v6418_v15, %v6414_v8 }
0x1ff6   :  { %v3250_v45 = vpack.c.bf16 %v3248_v16, %v3248_v16 }
0x1ff7   :  { %v6420_v18 = vpop.eup %6419 }
0x1ff8   :  { %v3249_v19 = vmul.f32 %v6420_v18, %v6416_v32  ;;  %6081 = vmatmul.mubr.msk.bf16.vlgmr.msra.gmra.mrb[104].mxu1 %vm311_vm6, %v3250_v45 }
0x1ff9   :  { %6091 = vmatpush3.bf16.xpose.msra.mxu1 %v3354_v20  ;;  %6092 = vmatprep.mubr.msk.bf16.mxu1 %vm6486_vm1, %v6485_v2 }
0x1ffa   :  { %v3251_v22 = vpack.c.bf16 %v3249_v19, %v3249_v19  ;;  %6102 = vmatprep.subr.bf16.mxu1 %v6485_v2 }
0x1ffc   :  { %6087 = vmatmul.mubr.msk.bf16.vlgmr.msra.gmra.mrb[108].mxu0 %vm311_vm6, %v3251_v22  ;;  %v6332_v22 = vld [vmem:[%s7518_s1 + $0x160] sm:$0xff]  }
0x1ffd   :  { %6097 = vmatpush3.bf16.xpose.msra.mxu0 %v3400_v23  ;;  %6098 = vmatprep.mubr.msk.bf16.mxu0 %vm6486_vm1, %v6485_v2  ;;  %v6334_v23 = vld [vmem:[%s7518_s1 + $0x168] sm:$0xff]  }
0x1ffe   :  { %6108 = vmatprep.subr.bf16.mxu0 %v6485_v2 }
0x2000   :  { %6093 = vmatmul.mubr.msk.bf16.vlgmr.msra.gmra.mrb[108].mxu1 %vm221_vm4, %v3346_v24 }
0x2001   :  { %6104 = vmatprep.mubr.msk.bf16.mxu1 %vm6486_vm1, %v6485_v2 }
0x2004   :  { %6099 = vmatmul.mubr.msk.bf16.vlgmr.msra.gmra.mrb[112].mxu0 %vm221_vm4, %v3346_v24  ;;  %v5431_v24 = vld [vmem:[%s7519_s2 + $0x13] ss:$0 sm:$0xff] }
0x2005   :  { %6110 = vmatprep.mubr.msk.bf16.mxu0 %vm6486_vm1, %v6485_v2 }
0x20cb   :  { %v7175_v11 = vpop.f32.mrb[104].mxu1 }
0x20cc   :  { %v6082_v26 = vpop.f32.mrb[105].mxu1 }
0x20cd   :  { %v3295_v27 = vpop.f32.mrb[106].mxu1 }
0x20ce   :  { %v6083_v29 = vpop.f32.mrb[107].mxu1 }
0x20cf   :  { %v7177_v35 = vpop.f32.mrb[108].mxu0 }
0x20d0   :  { %v6088_v30 = vpop.f32.mrb[109].mxu0 }
0x20d1   :  { %v3341_v31 = vpop.f32.mrb[110].mxu0 }
0x20d2   :  { %v6089_v33 = vpop.f32.mrb[111].mxu0 }
0x20d3   :  { %v3390_v36 = vpop.f32.mrb[108].mxu1 }
0x20d4   :  { %v6094_v37 = vpop.f32.mrb[109].mxu1  ;;  %v3442_v38 = vsel %vm3227_vm7, %v3390_v36, -inf }
0x20d5   :  { %3443 = vmax.xlane.f32.xlu1 %v3442_v38  ;;  %v3393_v39 = vpop.f32.mrb[110].mxu1  ;;  %v6335_v38 = vld [vmem:[%s7518_s1 + $0x140] sm:$0xff]  }
0x20d6   :  { %v6095_v40 = vpop.f32.mrb[111].mxu1 }
0x20d7   :  { %v3436_v49 = vpop.f32.mrb[112].mxu0  ;;  %v6336_v40 = vld [vmem:[%s7518_s1 + $0x148] sm:$0xff]  }
0x20d8   :  { %v6100_v41 = vpop.f32.mrb[113].mxu0  ;;  %v3445_v42 = vsel %vm3227_vm7, %v3436_v49, -inf }
0x20d9   :  { %3446 = vmax.xlane.f32.xlu0 %v3445_v42  ;;  %v3439_v6 = vpop.f32.mrb[114].mxu0 }
0x20da   :  { %v6101_v43 = vpop.f32.mrb[115].mxu0 }
0x20e6   :  { %3467 = vrot.lane.b32.xlu1 %v7135_v55, %s6487_s8 }
0x2162   :  { %v3444_v44 = vpop.xlane.xlu1 %3443 }
0x2163   :  { %v3448_v34 = vsub.f32 %v3390_v36, %v3444_v44 }
0x2165   :  { %v3450_v47 = vmul.f32 1.442695, %v3448_v34  ;;  %v5459_v34 = vld [vmem:[%s7519_s2 + $0x16] ss:$0 sm:$0xff] }
0x2166   :  { %v3468_v9 = vpop.permute.xlu1 %3467  ;;  %v3447_v50 = vpop.xlane.xlu0 %3446 }
0x2167   :  { %6421 = vpow2.f32 %v3450_v47  ;;  %v3473_v51 = vsel %vm339_vm5, %v3468_v9, 0  ;;  %v3449_v53 = vsub.f32 %v3436_v49, %v3447_v50  ;;  %v5455_v49 = vld [vmem:[%s7519_s2 + $0x15] ss:$0 sm:$0xff] }
0x2168   :  { %6103 = vmatpush3.bf16.msra.mxu1 %v3473_v51 }
0x2169   :  { %v3452_v54 = vmul.f32 1.442695, %v3449_v53  ;;  %6114 = vmatprep.subr.bf16.mxu1 %v6485_v2 }
0x216b   :  { %6423 = vpow2.f32 %v3452_v54 }
0x2171   :  { %v6422_v56 = vpop.eup %6421 }
0x2172   :  { %v3454_v57 = vsel %vm3227_vm7, %v6422_v56, 0.0 }
0x2173   :  { %3455 = vadd.xlane.f32.xlu0 %v3454_v57 }
0x2175   :  { %v6424_v58 = vpop.eup %6423 }
0x2176   :  { %v3457_v55 = vsel %vm3227_vm7, %v6424_v58, 0.0 }
0x2177   :  { %3458 = vadd.xlane.f32.xlu0 %v3457_v55  ;;  %v5463_v55 = vld [vmem:[%s7519_s2 + $0x14] ss:$0 sm:$0xff] }
0x218d   :  { %3516 = vrot.lane.b32.xlu0 %v7137_v48, %s6487_s8 }
0x2200   :  { %v3456_v59 = vpop.xlane.xlu0 %3455 }
0x2201   :  { %6425 = vrcp.f32 %v3456_v59 }
0x2204   :  { %v3459_v60 = vpop.xlane.xlu0 %3458 }
0x2205   :  { %6427 = vrcp.f32 %v3459_v60 }
0x2208   :  { %v3517_v61 = vpop.permute.xlu0 %3516 }
0x2209   :  { %v3522_v62 = vsel %vm339_vm5, %v3517_v61, 0 }
0x220a   :  { %6109 = vmatpush3.bf16.msra.mxu0 %v3522_v62 }
0x220b   :  { %v6426_v63 = vpop.eup %6425  ;;  %6122 = vmatprep.subr.bf16.mxu0 %v6485_v2 }
0x220c   :  { %v3462_v0 = vmul.f32 %v6426_v63, %v6422_v56 }
0x220e   :  { %v3464_v52 = vpack.c.bf16 %v3462_v0, %v3462_v0 }
0x220f   :  { %v6428_v1 = vpop.eup %6427 }
0x2210   :  { %v3463_v3 = vmul.f32 %v6428_v1, %v6424_v58  ;;  %6105 = vmatmul.mubr.msk.bf16.vlgmr.msra.gmra.mrb[112].mxu1 %vm311_vm6, %v3464_v52 }
0x2211   :  { %6118 = vmatprep.mubr.msk.bf16.mxu1 %vm6486_vm1, %v6485_v2  ;;  %6115 = vmatpush3.bf16.msra.mxu1 %v6329_v4 }
0x2212   :  { %v3465_v48 = vpack.c.bf16 %v3463_v3, %v3463_v3  ;;  %6116 = vmatprep.subr.bf16.mxu1 %v6485_v2 }
0x2214   :  { %6111 = vmatmul.mubr.msk.bf16.vlgmr.msra.gmra.mrb[116].mxu0 %vm311_vm6, %v3465_v48 }
0x2215   :  { %6126 = vmatprep.mubr.msk.bf16.mxu0 %vm6486_vm1, %v6485_v2  ;;  %6117 = vmatpush3.bf16.msra.mxu1 %v6330_v5 }
0x2216   :  { %6130 = vmatprep.subr.bf16.mxu1 %v6485_v2  ;;  %6123 = vmatpush3.bf16.msra.mxu0 %v6331_v21 }
0x2217   :  { %6124 = vmatprep.subr.bf16.mxu0 %v6485_v2 }
0x22e3   :  { %v3509_v25 = vpop.f32.mrb[112].mxu1 }
0x22e4   :  { %3566 = vrot.lane.b32.xlu1 %v3509_v25, %s6488_s13  ;;  %v6106_v28 = vpop.f32.mrb[113].mxu1 }
0x22e5   :  { %v3512_v7 = vpop.f32.mrb[114].mxu1 }
0x22e6   :  { %v6107_v8 = vpop.f32.mrb[115].mxu1 }
0x22e7   :  { %v3558_v10 = vpop.f32.mrb[116].mxu0 }
0x22e8   :  { %3568 = vrot.lane.b32.xlu1 %v3558_v10, %s6488_s13  ;;  %v6112_v32 = vpop.f32.mrb[117].mxu0 }
0x22e9   :  { %v3561_v12 = vpop.f32.mrb[118].mxu0 }
0x22ea   :  { %v6113_v13 = vpop.f32.mrb[119].mxu0 }
0x2356   :  { %v3567_v14 = vpop.permute.xlu1 %3566 }
0x2357   :  { %v3572_v15 = vsel %vm221_vm4, %v7175_v11, %v3567_v14 }
0x2358   :  { %v3574_v45 = vadd.f32 %v3572_v15, %v7132_v46 }
0x235a   :  { %v3569_v16 = vpop.permute.xlu1 %3568 }
0x235b   :  { %v3573_v17 = vsel %vm221_vm4, %v7177_v35, %v3569_v16 }
0x235c   :  { %v3575_v18 = vadd.f32 %v3573_v17, %v7132_v46  ;;  %v6333_v46 = vld [vmem:[%s7518_s1 + $0x158] sm:$0xff]  }
0x235d   :  { %6125 = vmatpush3.bf16.msra.mxu0 %v6333_v46 }
0x235e   :  { %v3578_v19 = vcombine.low %v3574_v45, %v3575_v18  ;;  %6138 = vmatprep.subr.bf16.mxu0 %v6485_v2 }
0x2360   :  { %v3580_v20 = vpack.c.bf16 %v3578_v19, %v3578_v19 }
0x2362   :  { %6119 = vmatmul.mubr.msk.bf16.vlgmr.msra.gmra.mrb[116].mxu1 %vm171_vm3, %v3580_v20 }
0x2363   :  { %6134 = vmatprep.mubr.msk.bf16.mxu1 %vm6486_vm1, %v6485_v2  ;;  %6131 = vmatpush3.bf16.msra.mxu1 %v6332_v22 }
0x2364   :  { %6132 = vmatprep.subr.bf16.mxu1 %v6485_v2 }
0x2367   :  { %6133 = vmatpush3.bf16.msra.mxu1 %v6334_v23 }
0x2368   :  { %6146 = vmatprep.subr.bf16.mxu1 %v6485_v2 }
0x2435   :  { %v3636_v11 = vpop.f32.mrb[116].mxu1 }
0x2436   :  { %v3637_v26 = vadd.f32 %v5431_v24, %v3636_v11  ;;  %v6120_v27 = vpop.f32.mrb[117].mxu1 }
0x2437   :  { %v3639_v29 = vpop.f32.mrb[118].mxu1 }
0x2438   :  { %v3642_v35 = vmax.f32 %v3637_v26, 0.0  ;;  %v6121_v30 = vpop.f32.mrb[119].mxu1 }
0x243a   :  { %v3644_v31 = vcombine.high %v3642_v35, %v3642_v35  ;;  %v3646_v33 = vadd.f32 %v3642_v35, %v3574_v45 }
0x243c   :  { %v3647_v36 = vadd.f32 %v3644_v31, %v3575_v18 }
0x243e   :  { %v3678_v37 = vcombine.low %v3646_v33, %v3647_v36 }
0x2440   :  { %v3680_v39 = vpack.c.bf16 %v3678_v37, %v3678_v37 }
0x2442   :  { %6127 = vmatmul.mubr.msk.bf16.vlgmr.msra.gmra.mrb[120].mxu0 %vm171_vm3, %v3680_v39  ;;  %6135 = vmatmul.mubr.msk.bf16.vlgmr.msra.gmra.mrb[120].mxu1 %vm171_vm3, %v3680_v39 }
0x2443   :  { %6139 = vmatpush3.bf16.msra.mxu0 %v6335_v38  ;;  %6142 = vmatprep.mubr.msk.bf16.mxu0 %vm6486_vm1, %v6485_v2 }
0x2444   :  { %6140 = vmatprep.subr.bf16.mxu0 %v6485_v2  ;;  %6148 = vmatprep.mubr.msk.bf16.mxu1 %vm6486_vm1, %v6485_v2 }
0x2447   :  { %6141 = vmatpush3.bf16.msra.mxu0 %v6336_v40 }
0x2448   :  { %6152 = vmatprep.subr.bf16.mxu0 %v6485_v2 }
0x244a   :  { %6143 = vmatmul.mubr.msk.bf16.vlgmr.msra.gmra.mrb[124].mxu0 %vm171_vm3, %v3680_v39 }
0x244b   :  { %6154 = vmatprep.mubr.msk.bf16.mxu0 %vm6486_vm1, %v6485_v2 }
0x2515   :  { %v3736_v41 = vpop.f32.mrb[120].mxu0  ;;  %v3794_v42 = vpop.f32.mrb[120].mxu1 }
0x2516   :  { %v3737_v6 = vadd.f32 %v5455_v49, %v3736_v41  ;;  %v6128_v43 = vpop.f32.mrb[121].mxu0  ;;  %v6136_v44 = vpop.f32.mrb[121].mxu1  ;;  %v3795_v57 = vadd.f32 %v5459_v34, %v3794_v42 }
0x2517   :  { %v3739_v47 = vpop.f32.mrb[122].mxu0  ;;  %v3797_v9 = vpop.f32.mrb[122].mxu1 }
0x2518   :  { %v3801_v50 = vcombine.high %v3737_v6, %v3737_v6  ;;  %v3871_v51 = vpack.c.bf16 %v3737_v6, %v3737_v6  ;;  %v6129_v53 = vpop.f32.mrb[123].mxu0  ;;  %v6137_v54 = vpop.f32.mrb[123].mxu1  ;;  %v3804_v61 = vcombine.high %v3795_v57, %v3795_v57  ;;  %v7267_v52 = vpack.c.bf16 %v3795_v57, %v3795_v57 }
0x251a   :  { %v3872_v56 = vpack.c.bf16 %v3801_v50, %v3801_v50  ;;  %v3879_v58 = vsel %vm221_vm4, %v3871_v51, 0  ;;  %v7274_v4 = vpack.c.bf16 %v3804_v61, %v3804_v61  ;;  %v3996_v7 = vsel %vm57_vm0, %v7267_v52, 0 }
0x251b   :  { %6147 = vmatpush3.bf16.xpose.msra.mxu1 %v3879_v58 }
0x251c   :  { %v3925_v59 = vsel %vm221_vm4, %v3872_v56, 0  ;;  %6158 = vmatprep.subr.bf16.mxu1 %v6485_v2  ;;  %v4042_v8 = vsel %vm57_vm0, %v7274_v4, 0 }
0x251d   :  { %v3858_v60 = vpop.f32.mrb[124].mxu0  ;;  %6153 = vmatpush3.bf16.xpose.msra.mxu0 %v3925_v59 }
0x251e   :  { %v7264_v62 = vadd.f32 %v5463_v55, %v3858_v60  ;;  %v6144_v63 = vpop.f32.mrb[125].mxu0  ;;  %6164 = vmatprep.subr.bf16.mxu0 %v6485_v2 }
0x251f   :  { %v3861_v0 = vpop.f32.mrb[126].mxu0 }
0x2520   :  { %v7271_v1 = vcombine.high %v7264_v62, %v7264_v62  ;;  %v3867_v3 = vmul.f32 0.17677669, %v7264_v62  ;;  %v6145_v48 = vpop.f32.mrb[127].mxu0 }
0x2522   :  { %v3868_v5 = vmul.f32 0.17677669, %v7271_v1  ;;  %v3869_v25 = vpack.c.bf16 %v3867_v3, %v3867_v3 }
0x2524   :  { %v3870_v28 = vpack.c.bf16 %v3868_v5, %v3868_v5  ;;  %6149 = vmatmul.mubr.msk.bf16.vlgmr.msra.gmra.mrb[124].mxu1 %vm221_vm4, %v3869_v25 }
0x2525   :  { %6159 = vmatpush3.bf16.msra.mxu1 %v3996_v7  ;;  %6160 = vmatprep.mubr.msk.bf16.mxu1 %vm6486_vm1, %v6485_v2 }
0x2526   :  { %6155 = vmatmul.mubr.msk.bf16.vlgmr.msra.gmra.mrb[128].mxu0 %vm221_vm4, %v3870_v28  ;;  %6170 = vmatprep.subr.bf16.mxu1 %v6485_v2 }
0x2527   :  { %6165 = vmatpush3.bf16.msra.mxu0 %v4042_v8  ;;  %6166 = vmatprep.mubr.msk.bf16.mxu0 %vm6486_vm1, %v6485_v2 }
0x2528   :  { %6176 = vmatprep.subr.bf16.mxu0 %v6485_v2 }
0x25f7   :  { %v3915_v10 = vpop.f32.mrb[124].mxu1 }
0x25f8   :  { %v6150_v32 = vpop.f32.mrb[125].mxu1  ;;  %v3968_v12 = vsel %vm3967_vm8, %v3915_v10, -inf }
0x25f9   :  { %3969 = vmax.xlane.f32.xlu1 %v3968_v12  ;;  %v3918_v13 = vpop.f32.mrb[126].mxu1  ;;  %v3961_v14 = vpop.f32.mrb[128].mxu0 }
0x25fa   :  { %v6151_v15 = vpop.f32.mrb[127].mxu1  ;;  %v6156_v16 = vpop.f32.mrb[129].mxu0  ;;  %v3971_v17 = vsel %vm3967_vm8, %v3961_v14, -inf }
0x25fb   :  { %3972 = vmax.xlane.f32.xlu0 %v3971_v17  ;;  %v3964_v45 = vpop.f32.mrb[130].mxu0 }
0x25fc   :  { %v6157_v18 = vpop.f32.mrb[131].mxu0 }
0x260a   :  { %4088 = vrot.lane.b32.xlu1 %v3871_v51, %s6487_s8 }
0x260e   :  { %4085 = vrot.lane.b32.xlu1 %v3869_v25, %s6487_s8 }
0x2612   :  { %4137 = vrot.lane.b32.xlu1 %v3870_v28, %s6487_s8 }
0x2686   :  { %v3970_v19 = vpop.xlane.xlu1 %3969 }
0x2687   :  { %v3974_v20 = vsub.f32 %v3915_v10, %v3970_v19 }
0x2688   :  { %v3973_v21 = vpop.xlane.xlu0 %3972 }
0x2689   :  { %v3976_v22 = vmul.f32 1.442695, %v3974_v20  ;;  %v3975_v46 = vsub.f32 %v3961_v14, %v3973_v21 }
0x268a   :  { %v4089_v33 = vpop.permute.xlu1 %4088 }
0x268b   :  { %6429 = vpow2.f32 %v3976_v22  ;;  %v3978_v23 = vmul.f32 1.442695, %v3975_v46  ;;  %v4094_v38 = vsel %vm221_vm4, %v4089_v33, 0  ;;  %v6337_v22 = vld [vmem:[%s7518_s1 + $0x170] sm:$0xff]   ;;  %v6338_v46 = vld [vmem:[%s7518_s1 + $0x178] sm:$0xff]  }
0x268d   :  { %6431 = vpow2.f32 %v3978_v23 }
0x268e   :  { %v4086_v42 = vpop.permute.xlu1 %4085 }
0x2692   :  { %v4138_v6 = vpop.permute.xlu1 %4137 }
0x2695   :  { %v6430_v24 = vpop.eup %6429 }
0x2696   :  { %v3980_v11 = vsel %vm3967_vm8, %v6430_v24, 0.0 }
0x2697   :  { %v6432_v26 = vpop.eup %6431  ;;  %3981 = vadd.xlane.f32.xlu0 %v3980_v11 }
0x2698   :  { %v3983_v27 = vsel %vm3967_vm8, %v6432_v26, 0.0 }
0x269b   :  { %3984 = vadd.xlane.f32.xlu0 %v3983_v27 }
0x26b1   :  { %4140 = vrot.lane.b32.xlu0 %v3872_v56, %s6487_s8 }
0x2724   :  { %v3982_v29 = vpop.xlane.xlu0 %3981 }
0x2725   :  { %6433 = vrcp.f32 %v3982_v29 }
0x2728   :  { %v3985_v35 = vpop.xlane.xlu0 %3984 }
0x2729   :  { %6435 = vrcp.f32 %v3985_v35 }
0x272c   :  { %v4141_v40 = vpop.permute.xlu0 %4140 }
0x272d   :  { %v4146_v41 = vsel %vm221_vm4, %v4141_v40, 0 }
0x272f   :  { %v6434_v30 = vpop.eup %6433 }
0x2730   :  { %v3988_v31 = vmul.f32 %v6434_v30, %v6430_v24 }
0x2732   :  { %v3990_v36 = vpack.c.bf16 %v3988_v31, %v3988_v31 }
0x2733   :  { %v6436_v37 = vpop.eup %6435 }
0x2734   :  { %v3989_v39 = vmul.f32 %v6436_v37, %v6432_v26  ;;  %6161 = vmatmul.mubr.msk.bf16.vlgmr.msra.gmra.mrb[128].mxu1 %vm53_vm2, %v3990_v36 }
0x2735   :  { %6171 = vmatpush3.bf16.xpose.msra.mxu1 %v4094_v38  ;;  %6172 = vmatprep.mubr.msk.bf16.mxu1 %vm6486_vm1, %v6485_v2 }
0x2736   :  { %v3991_v49 = vpack.c.bf16 %v3989_v39, %v3989_v39  ;;  %6182 = vmatprep.subr.bf16.mxu1 %v6485_v2 }
0x2738   :  { %6167 = vmatmul.mubr.msk.bf16.vlgmr.msra.gmra.mrb[132].mxu0 %vm53_vm2, %v3991_v49 }
0x2739   :  { %6177 = vmatpush3.bf16.xpose.msra.mxu0 %v4146_v41  ;;  %6178 = vmatprep.mubr.msk.bf16.mxu0 %vm6486_vm1, %v6485_v2  ;;  %v6339_v41 = vld [vmem:[%s7518_s1 + $0x190] sm:$0xff]  }
0x273a   :  { %6188 = vmatprep.subr.bf16.mxu0 %v6485_v2 }
0x273c   :  { %6173 = vmatmul.mubr.msk.bf16.vlgmr.msra.gmra.mrb[132].mxu1 %vm221_vm4, %v4086_v42  ;;  %v6340_v42 = vld [vmem:[%s7518_s1 + $0x1a0] sm:$0xff]  }
0x273d   :  { %6184 = vmatprep.mubr.msk.bf16.mxu1 %vm6486_vm1, %v6485_v2 }
0x2740   :  { %6179 = vmatmul.mubr.msk.bf16.vlgmr.msra.gmra.mrb[136].mxu0 %vm221_vm4, %v4138_v6  ;;  %v5475_v6 = vld [vmem:[%s7519_s2 + $0x17] ss:$0 sm:$0xff] }
0x2741   :  { %6190 = vmatprep.mubr.msk.bf16.mxu0 %vm6486_vm1, %v6485_v2 }
0x2807   :  { %v7313_v43 = vpop.f32.mrb[128].mxu1 }
0x2808   :  { %v6162_v44 = vpop.f32.mrb[129].mxu1 }
0x2809   :  { %v4035_v34 = vpop.f32.mrb[130].mxu1 }
0x280a   :  { %v6163_v47 = vpop.f32.mrb[131].mxu1 }
0x280b   :  { %v7315_v9 = vpop.f32.mrb[132].mxu0 }
0x280c   :  { %v6168_v50 = vpop.f32.mrb[133].mxu0 }
0x280d   :  { %v4081_v51 = vpop.f32.mrb[134].mxu0 }
0x280e   :  { %v6169_v53 = vpop.f32.mrb[135].mxu0 }
0x280f   :  { %v4130_v54 = vpop.f32.mrb[132].mxu1 }
0x2810   :  { %v6174_v56 = vpop.f32.mrb[133].mxu1  ;;  %v4188_v57 = vsel %vm3967_vm8, %v4130_v54, -inf }
0x2811   :  { %4189 = vmax.xlane.f32.xlu1 %v4188_v57  ;;  %v4133_v58 = vpop.f32.mrb[134].mxu1  ;;  %v6343_v57 = vld [vmem:[%s7518_s1 + $0x180] sm:$0xff]  }
0x2812   :  { %v6175_v55 = vpop.f32.mrb[135].mxu1 }
0x2813   :  { %v4182_v59 = vpop.f32.mrb[136].mxu0  ;;  %v6344_v55 = vld [vmem:[%s7518_s1 + $0x188] sm:$0xff]  }
0x2814   :  { %v6180_v60 = vpop.f32.mrb[137].mxu0  ;;  %v4191_v61 = vsel %vm3967_vm8, %v4182_v59, -inf }
0x2815   :  { %4192 = vmax.xlane.f32.xlu0 %v4191_v61  ;;  %v4185_v63 = vpop.f32.mrb[138].mxu0 }
0x2816   :  { %v6181_v0 = vpop.f32.mrb[139].mxu0 }
0x2822   :  { %4213 = vrot.lane.b32.xlu1 %v7267_v52, %s6487_s8 }
0x289e   :  { %v4190_v3 = vpop.xlane.xlu1 %4189 }
0x289f   :  { %v4194_v48 = vsub.f32 %v4130_v54, %v4190_v3 }
0x28a1   :  { %v4196_v5 = vmul.f32 1.442695, %v4194_v48  ;;  %v5503_v48 = vld [vmem:[%s7519_s2 + $0x1a] ss:$0 sm:$0xff] }
0x28a2   :  { %v4214_v25 = vpop.permute.xlu1 %4213  ;;  %v4193_v28 = vpop.xlane.xlu0 %4192 }
0x28a3   :  { %6437 = vpow2.f32 %v4196_v5  ;;  %v4219_v7 = vsel %vm57_vm0, %v4214_v25, 0  ;;  %v4195_v8 = vsub.f32 %v4182_v59, %v4193_v28  ;;  %v5499_v59 = vld [vmem:[%s7519_s2 + $0x19] ss:$0 sm:$0xff] }
0x28a4   :  { %6183 = vmatpush3.bf16.msra.mxu1 %v4219_v7 }
0x28a5   :  { %v4198_v10 = vmul.f32 1.442695, %v4195_v8  ;;  %6194 = vmatprep.subr.bf16.mxu1 %v6485_v2 }
0x28a7   :  { %6439 = vpow2.f32 %v4198_v10 }
0x28ad   :  { %v6438_v32 = vpop.eup %6437 }
0x28ae   :  { %v4200_v12 = vsel %vm3967_vm8, %v6438_v32, 0.0 }
0x28af   :  { %4201 = vadd.xlane.f32.xlu0 %v4200_v12 }
0x28b1   :  { %v6440_v13 = vpop.eup %6439 }
0x28b2   :  { %v4203_v52 = vsel %vm3967_vm8, %v6440_v13, 0.0 }
0x28b3   :  { %4204 = vadd.xlane.f32.xlu0 %v4203_v52  ;;  %v5507_v52 = vld [vmem:[%s7519_s2 + $0x18] ss:$0 sm:$0xff] }
0x28c9   :  { %4262 = vrot.lane.b32.xlu0 %v7274_v4, %s6487_s8 }
0x293c   :  { %v4202_v14 = vpop.xlane.xlu0 %4201 }
0x293d   :  { %6441 = vrcp.f32 %v4202_v14 }
0x2940   :  { %v4205_v15 = vpop.xlane.xlu0 %4204 }
0x2941   :  { %6443 = vrcp.f32 %v4205_v15 }
0x2944   :  { %v4263_v16 = vpop.permute.xlu0 %4262 }
0x2945   :  { %v4268_v17 = vsel %vm57_vm0, %v4263_v16, 0 }
0x2946   :  { %6189 = vmatpush3.bf16.msra.mxu0 %v4268_v17 }
0x2947   :  { %v6442_v45 = vpop.eup %6441  ;;  %6202 = vmatprep.subr.bf16.mxu0 %v6485_v2 }
0x2948   :  { %v4208_v18 = vmul.f32 %v6442_v45, %v6438_v32 }
0x294a   :  { %v4210_v19 = vpack.c.bf16 %v4208_v18, %v4208_v18 }
0x294b   :  { %v6444_v20 = vpop.eup %6443 }
0x294c   :  { %v4209_v21 = vmul.f32 %v6444_v20, %v6440_v13  ;;  %6185 = vmatmul.mubr.msk.bf16.vlgmr.msra.gmra.mrb[136].mxu1 %vm53_vm2, %v4210_v19 }
0x294d   :  { %6198 = vmatprep.mubr.msk.bf16.mxu1 %vm6486_vm1, %v6485_v2  ;;  %6195 = vmatpush3.bf16.msra.mxu1 %v6337_v22 }
0x294e   :  { %v4211_v4 = vpack.c.bf16 %v4209_v21, %v4209_v21  ;;  %6196 = vmatprep.subr.bf16.mxu1 %v6485_v2 }
0x2950   :  { %6191 = vmatmul.mubr.msk.bf16.vlgmr.msra.gmra.mrb[140].mxu0 %vm53_vm2, %v4211_v4 }
0x2951   :  { %6206 = vmatprep.mubr.msk.bf16.mxu0 %vm6486_vm1, %v6485_v2  ;;  %6197 = vmatpush3.bf16.msra.mxu1 %v6338_v46 }
0x2952   :  { %6210 = vmatprep.subr.bf16.mxu1 %v6485_v2  ;;  %6203 = vmatpush3.bf16.msra.mxu0 %v6339_v41 }
0x2953   :  { %6204 = vmatprep.subr.bf16.mxu0 %v6485_v2 }
0x2a1f   :  { %v4255_v23 = vpop.f32.mrb[136].mxu1 }
0x2a20   :  { %4312 = vrot.lane.b32.xlu1 %v4255_v23, %s6488_s13  ;;  %v6186_v24 = vpop.f32.mrb[137].mxu1 }
0x2a21   :  { %v4258_v11 = vpop.f32.mrb[138].mxu1 }
0x2a22   :  { %v6187_v26 = vpop.f32.mrb[139].mxu1 }
0x2a23   :  { %v4304_v27 = vpop.f32.mrb[140].mxu0 }
0x2a24   :  { %4314 = vrot.lane.b32.xlu1 %v4304_v27, %s6488_s13  ;;  %v6192_v29 = vpop.f32.mrb[141].mxu0 }
0x2a25   :  { %v4307_v35 = vpop.f32.mrb[142].mxu0 }
0x2a26   :  { %v6193_v30 = vpop.f32.mrb[143].mxu0 }
0x2a92   :  { %v4313_v31 = vpop.permute.xlu1 %4312 }
0x2a93   :  { %v4318_v33 = vsel %vm221_vm4, %v7313_v43, %v4313_v31 }
0x2a94   :  { %v4320_v38 = vadd.f32 %v4318_v33, %v7264_v62  ;;  %v6341_v62 = vld [vmem:[%s7518_s1 + $0x198] sm:$0xff]  }
0x2a95   :  { %6205 = vmatpush3.bf16.msra.mxu0 %v6341_v62 }
0x2a96   :  { %v4315_v36 = vpop.permute.xlu1 %4314  ;;  %6218 = vmatprep.subr.bf16.mxu0 %v6485_v2 }
0x2a97   :  { %v4319_v37 = vsel %vm221_vm4, %v7315_v9, %v4315_v36 }
0x2a98   :  { %v4321_v39 = vadd.f32 %v4319_v37, %v7271_v1  ;;  %v6342_v1 = vld [vmem:[%s7518_s1 + $0x1a8] sm:$0xff]  }
0x2a9a   :  { %v4324_v40 = vcombine.low %v4320_v38, %v4321_v39 }
0x2a9c   :  { %v4326_v49 = vpack.c.bf16 %v4324_v40, %v4324_v40 }
0x2a9e   :  { %6199 = vmatmul.mubr.msk.bf16.vlgmr.msra.gmra.mrb[140].mxu1 %vm171_vm3, %v4326_v49 }
0x2a9f   :  { %6214 = vmatprep.mubr.msk.bf16.mxu1 %vm6486_vm1, %v6485_v2  ;;  %6211 = vmatpush3.bf16.msra.mxu1 %v6340_v42 }
0x2aa0   :  { %6212 = vmatprep.subr.bf16.mxu1 %v6485_v2 }
0x2aa3   :  { %6213 = vmatpush3.bf16.msra.mxu1 %v6342_v1 }
0x2aa4   :  { %6226 = vmatprep.subr.bf16.mxu1 %v6485_v2 }
0x2b71   :  { %v4382_v43 = vpop.f32.mrb[140].mxu1 }
0x2b72   :  { %v4383_v44 = vadd.f32 %v5475_v6, %v4382_v43  ;;  %v6200_v34 = vpop.f32.mrb[141].mxu1 }
0x2b73   :  { %v4385_v47 = vpop.f32.mrb[142].mxu1 }
0x2b74   :  { %v4388_v9 = vmax.f32 %v4383_v44, 0.0  ;;  %v6201_v50 = vpop.f32.mrb[143].mxu1 }
0x2b76   :  { %v4390_v51 = vcombine.high %v4388_v9, %v4388_v9  ;;  %v4392_v53 = vadd.f32 %v4388_v9, %v4320_v38 }
0x2b78   :  { %v4393_v54 = vadd.f32 %v4390_v51, %v4321_v39 }
0x2b7a   :  { %v4424_v56 = vcombine.low %v4392_v53, %v4393_v54 }
0x2b7c   :  { %v4426_v58 = vpack.c.bf16 %v4424_v56, %v4424_v56 }
0x2b7e   :  { %6207 = vmatmul.mubr.msk.bf16.vlgmr.msra.gmra.mrb[144].mxu0 %vm171_vm3, %v4426_v58  ;;  %6215 = vmatmul.mubr.msk.bf16.vlgmr.msra.gmra.mrb[144].mxu1 %vm171_vm3, %v4426_v58 }
0x2b7f   :  { %6219 = vmatpush3.bf16.msra.mxu0 %v6343_v57  ;;  %6222 = vmatprep.mubr.msk.bf16.mxu0 %vm6486_vm1, %v6485_v2 }
0x2b80   :  { %6220 = vmatprep.subr.bf16.mxu0 %v6485_v2  ;;  %6228 = vmatprep.mubr.msk.bf16.mxu1 %vm6486_vm1, %v6485_v2 }
0x2b83   :  { %6221 = vmatpush3.bf16.msra.mxu0 %v6344_v55 }
0x2b84   :  { %6232 = vmatprep.subr.bf16.mxu0 %v6485_v2 }
0x2b86   :  { %6223 = vmatmul.mubr.msk.bf16.vlgmr.msra.gmra.mrb[148].mxu0 %vm171_vm3, %v4426_v58 }
0x2b87   :  { %6234 = vmatprep.mubr.msk.bf16.mxu0 %vm6486_vm1, %v6485_v2 }
0x2c51   :  { %v4482_v60 = vpop.f32.mrb[144].mxu0  ;;  %v4540_v61 = vpop.f32.mrb[144].mxu1 }
0x2c52   :  { %v4483_v63 = vadd.f32 %v5499_v59, %v4482_v60  ;;  %v6208_v0 = vpop.f32.mrb[145].mxu0  ;;  %v6216_v3 = vpop.f32.mrb[145].mxu1  ;;  %v4541_v12 = vadd.f32 %v5503_v48, %v4540_v61 }
0x2c53   :  { %v4485_v5 = vpop.f32.mrb[146].mxu0  ;;  %v4543_v25 = vpop.f32.mrb[146].mxu1 }
0x2c54   :  { %v4547_v28 = vcombine.high %v4483_v63, %v4483_v63  ;;  %v4617_v7 = vpack.c.bf16 %v4483_v63, %v4483_v63  ;;  %v6209_v8 = vpop.f32.mrb[147].mxu0  ;;  %v6217_v10 = vpop.f32.mrb[147].mxu1  ;;  %v4550_v16 = vcombine.high %v4541_v12, %v4541_v12  ;;  %v7405_v19 = vpack.c.bf16 %v4541_v12, %v4541_v12 }
0x2c56   :  { %v4618_v32 = vpack.c.bf16 %v4547_v28, %v4547_v28  ;;  %v4625_v13 = vsel %vm221_vm4, %v4617_v7, 0  ;;  %v7412_v22 = vpack.c.bf16 %v4550_v16, %v4550_v16  ;;  %v4741_v11 = vsel %vm57_vm0, %v7405_v19, 0 }
0x2c57   :  { %6227 = vmatpush3.bf16.xpose.msra.mxu1 %v4625_v13 }
0x2c58   :  { %v4671_v14 = vsel %vm221_vm4, %v4618_v32, 0  ;;  %6238 = vmatprep.subr.bf16.mxu1 %v6485_v2  ;;  %v4787_v26 = vsel %vm57_vm0, %v7412_v22, 0 }
0x2c59   :  { %v4604_v15 = vpop.f32.mrb[148].mxu0  ;;  %6233 = vmatpush3.bf16.xpose.msra.mxu0 %v4671_v14 }
0x2c5a   :  { %v7402_v17 = vadd.f32 %v5507_v52, %v4604_v15  ;;  %v6224_v45 = vpop.f32.mrb[149].mxu0  ;;  %6244 = vmatprep.subr.bf16.mxu0 %v6485_v2 }
0x2c5b   :  { %v4607_v18 = vpop.f32.mrb[150].mxu0 }
0x2c5c   :  { %v7409_v20 = vcombine.high %v7402_v17, %v7402_v17  ;;  %v4613_v21 = vmul.f32 0.17677669, %v7402_v17  ;;  %v6225_v4 = vpop.f32.mrb[151].mxu0 }
0x2c5e   :  { %v4614_v46 = vmul.f32 0.17677669, %v7409_v20  ;;  %v4615_v23 = vpack.c.bf16 %v4613_v21, %v4613_v21 }
0x2c60   :  { %v4616_v24 = vpack.c.bf16 %v4614_v46, %v4614_v46  ;;  %6229 = vmatmul.mubr.msk.bf16.vlgmr.msra.gmra.mrb[148].mxu1 %vm221_vm4, %v4615_v23 }
0x2c61   :  { %6239 = vmatpush3.bf16.msra.mxu1 %v4741_v11  ;;  %6240 = vmatprep.mubr.msk.bf16.mxu1 %vm6486_vm1, %v6485_v2 }
0x2c62   :  { %6235 = vmatmul.mubr.msk.bf16.vlgmr.msra.gmra.mrb[152].mxu0 %vm221_vm4, %v4616_v24  ;;  %6250 = vmatprep.subr.bf16.mxu1 %v6485_v2 }
0x2c63   :  { %6245 = vmatpush3.bf16.msra.mxu0 %v4787_v26  ;;  %6246 = vmatprep.mubr.msk.bf16.mxu0 %vm6486_vm1, %v6485_v2 }
0x2c64   :  { %6256 = vmatprep.subr.bf16.mxu0 %v6485_v2 }
0x2d33   :  { %v4661_v27 = vpop.f32.mrb[148].mxu1 }
0x2d34   :  { %v6230_v29 = vpop.f32.mrb[149].mxu1  ;;  %v4713_v35 = vsel %vm3967_vm8, %v4661_v27, -inf }
0x2d35   :  { %4714 = vmax.xlane.f32.xlu1 %v4713_v35  ;;  %v4664_v30 = vpop.f32.mrb[150].mxu1  ;;  %v4707_v31 = vpop.f32.mrb[152].mxu0 }
0x2d36   :  { %v6231_v33 = vpop.f32.mrb[151].mxu1  ;;  %v6236_v36 = vpop.f32.mrb[153].mxu0  ;;  %v4716_v37 = vsel %vm3967_vm8, %v4707_v31, -inf }
0x2d37   :  { %4717 = vmax.xlane.f32.xlu0 %v4716_v37  ;;  %v4710_v38 = vpop.f32.mrb[154].mxu0 }
0x2d38   :  { %v6237_v39 = vpop.f32.mrb[155].mxu0 }
0x2d46   :  { %4833 = vrot.lane.b32.xlu1 %v4617_v7, %s6487_s8 }
0x2d4a   :  { %4830 = vrot.lane.b32.xlu1 %v4615_v23, %s6487_s8 }
0x2d4e   :  { %4882 = vrot.lane.b32.xlu1 %v4616_v24, %s6487_s8 }
0x2dc2   :  { %v4715_v40 = vpop.xlane.xlu1 %4714 }
0x2dc3   :  { %v4719_v49 = vsub.f32 %v4661_v27, %v4715_v40 }
0x2dc4   :  { %v4718_v41 = vpop.xlane.xlu0 %4717 }
0x2dc5   :  { %v4721_v42 = vmul.f32 1.442695, %v4719_v49  ;;  %v4720_v62 = vsub.f32 %v4707_v31, %v4718_v41 }
0x2dc6   :  { %v4834_v53 = vpop.permute.xlu1 %4833 }
0x2dc7   :  { %6445 = vpow2.f32 %v4721_v42  ;;  %v4723_v1 = vmul.f32 1.442695, %v4720_v62  ;;  %v4839_v57 = vsel %vm221_vm4, %v4834_v53, 0  ;;  %v6345_v42 = vld [vmem:[%s7518_s1 + $0x1b0] sm:$0xff]   ;;  %v6346_v62 = vld [vmem:[%s7518_s1 + $0x1b8] sm:$0xff]  }
0x2dc9   :  { %6447 = vpow2.f32 %v4723_v1 }
0x2dca   :  { %v4831_v61 = vpop.permute.xlu1 %4830 }
0x2dce   :  { %v4883_v63 = vpop.permute.xlu1 %4882 }
0x2dd1   :  { %v6446_v6 = vpop.eup %6445 }
0x2dd2   :  { %v4725_v43 = vsel %vm3967_vm8, %v6446_v6, 0.0 }
0x2dd3   :  { %v6448_v44 = vpop.eup %6447  ;;  %4726 = vadd.xlane.f32.xlu0 %v4725_v43 }
0x2dd4   :  { %v4728_v34 = vsel %vm3967_vm8, %v6448_v44, 0.0 }
0x2dd7   :  { %4729 = vadd.xlane.f32.xlu0 %v4728_v34 }
0x2ded   :  { %4885 = vrot.lane.b32.xlu0 %v4618_v32, %s6487_s8 }
0x2e60   :  { %v4727_v47 = vpop.xlane.xlu0 %4726 }
0x2e61   :  { %6449 = vrcp.f32 %v4727_v47 }
0x2e64   :  { %v4730_v9 = vpop.xlane.xlu0 %4729 }
0x2e65   :  { %6451 = vrcp.f32 %v4730_v9 }
0x2e68   :  { %v4886_v55 = vpop.permute.xlu0 %4885 }
0x2e69   :  { %v4891_v60 = vsel %vm221_vm4, %v4886_v55, 0 }
0x2e6b   :  { %v6450_v50 = vpop.eup %6449 }
0x2e6c   :  { %v4733_v51 = vmul.f32 %v6450_v50, %v6446_v6 }
0x2e6e   :  { %v4735_v54 = vpack.c.bf16 %v4733_v51, %v4733_v51 }
0x2e6f   :  { %v6452_v56 = vpop.eup %6451 }
0x2e70   :  { %v4734_v58 = vmul.f32 %v6452_v56, %v6448_v44  ;;  %6241 = vmatmul.mubr.msk.bf16.vlgmr.msra.gmra.mrb[152].mxu1 %vm53_vm2, %v4735_v54 }
0x2e71   :  { %6251 = vmatpush3.bf16.xpose.msra.mxu1 %v4839_v57  ;;  %6252 = vmatprep.mubr.msk.bf16.mxu1 %vm6486_vm1, %v6485_v2 }
0x2e72   :  { %v4736_v59 = vpack.c.bf16 %v4734_v58, %v4734_v58  ;;  %6262 = vmatprep.subr.bf16.mxu1 %v6485_v2 }
0x2e74   :  { %6247 = vmatmul.mubr.msk.bf16.vlgmr.msra.gmra.mrb[156].mxu0 %vm53_vm2, %v4736_v59 }
0x2e75   :  { %6257 = vmatpush3.bf16.xpose.msra.mxu0 %v4891_v60  ;;  %6258 = vmatprep.mubr.msk.bf16.mxu0 %vm6486_vm1, %v6485_v2  ;;  %v6347_v60 = vld [vmem:[%s7518_s1 + $0x1c0] sm:$0xff]  }
0x2e76   :  { %6268 = vmatprep.subr.bf16.mxu0 %v6485_v2 }
0x2e78   :  { %6253 = vmatmul.mubr.msk.bf16.vlgmr.msra.gmra.mrb[156].mxu1 %vm221_vm4, %v4831_v61  ;;  %v6348_v61 = vld [vmem:[%s7518_s1 + $0x1c8] sm:$0xff]  }
0x2e79   :  { %6264 = vmatprep.mubr.msk.bf16.mxu1 %vm6486_vm1, %v6485_v2 }
0x2e7c   :  { %6259 = vmatmul.mubr.msk.bf16.vlgmr.msra.gmra.mrb[160].mxu0 %vm221_vm4, %v4883_v63 }
0x2e7d   :  { %6270 = vmatprep.mubr.msk.bf16.mxu0 %vm6486_vm1, %v6485_v2 }
0x2f43   :  { %v7451_v0 = vpop.f32.mrb[152].mxu1 }
0x2f44   :  { %v6242_v3 = vpop.f32.mrb[153].mxu1 }
0x2f45   :  { %v4780_v48 = vpop.f32.mrb[154].mxu1 }
0x2f46   :  { %v6243_v5 = vpop.f32.mrb[155].mxu1 }
0x2f47   :  { %v7453_v25 = vpop.f32.mrb[156].mxu0 }
0x2f48   :  { %v6248_v28 = vpop.f32.mrb[157].mxu0 }
0x2f49   :  { %v4826_v7 = vpop.f32.mrb[158].mxu0 }
0x2f4a   :  { %v6249_v8 = vpop.f32.mrb[159].mxu0 }
0x2f4b   :  { %v4875_v10 = vpop.f32.mrb[156].mxu1 }
0x2f4c   :  { %v6254_v32 = vpop.f32.mrb[157].mxu1  ;;  %v4933_v12 = vsel %vm3967_vm8, %v4875_v10, -inf }
0x2f4d   :  { %4934 = vmax.xlane.f32.xlu1 %v4933_v12  ;;  %v4878_v13 = vpop.f32.mrb[158].mxu1 }
0x2f4e   :  { %v6255_v52 = vpop.f32.mrb[159].mxu1 }
0x2f4f   :  { %v4927_v14 = vpop.f32.mrb[160].mxu0 }
0x2f50   :  { %v6260_v15 = vpop.f32.mrb[161].mxu0  ;;  %v4936_v16 = vsel %vm3967_vm8, %v4927_v14, -inf }
0x2f51   :  { %4937 = vmax.xlane.f32.xlu0 %v4936_v16  ;;  %v4930_v45 = vpop.f32.mrb[162].mxu0 }
0x2f52   :  { %v6261_v18 = vpop.f32.mrb[163].mxu0 }
0x2f5e   :  { %4958 = vrot.lane.b32.xlu1 %v7405_v19, %s6487_s8 }
0x2fda   :  { %v4935_v21 = vpop.xlane.xlu1 %4934 }
0x2fdb   :  { %v4939_v4 = vsub.f32 %v4875_v10, %v4935_v21  ;;  %v5528_v10 = vld [vmem:[%s7519_s2 + $0x1c] ss:$0 sm:$0xff] }
0x2fdd   :  { %v4941_v46 = vmul.f32 1.442695, %v4939_v4 }
0x2fde   :  { %v4959_v23 = vpop.permute.xlu1 %4958  ;;  %v4938_v24 = vpop.xlane.xlu0 %4937 }
0x2fdf   :  { %6453 = vpow2.f32 %v4941_v46  ;;  %v4964_v11 = vsel %vm57_vm0, %v4959_v23, 0  ;;  %v4940_v26 = vsub.f32 %v4927_v14, %v4938_v24 }
0x2fe0   :  { %6263 = vmatpush3.bf16.msra.mxu1 %v4964_v11 }
0x2fe1   :  { %v4943_v27 = vmul.f32 1.442695, %v4940_v26  ;;  %6274 = vmatprep.subr.bf16.mxu1 %v6485_v2 }
0x2fe3   :  { %6455 = vpow2.f32 %v4943_v27 }
0x2fe9   :  { %v6454_v29 = vpop.eup %6453 }
0x2fea   :  { %v4945_v35 = vsel %vm3967_vm8, %v6454_v29, 0.0 }
0x2feb   :  { %4946 = vadd.xlane.f32.xlu0 %v4945_v35 }
0x2fed   :  { %v6456_v30 = vpop.eup %6455 }
0x2fee   :  { %v4948_v19 = vsel %vm3967_vm8, %v6456_v30, 0.0 }
0x2fef   :  { %4949 = vadd.xlane.f32.xlu0 %v4948_v19 }
0x3005   :  { %5007 = vrot.lane.b32.xlu0 %v7412_v22, %s6487_s8 }
0x3078   :  { %v4947_v31 = vpop.xlane.xlu0 %4946 }
0x3079   :  { %6457 = vrcp.f32 %v4947_v31 }
0x307c   :  { %v4950_v33 = vpop.xlane.xlu0 %4949 }
0x307d   :  { %6459 = vrcp.f32 %v4950_v33 }
0x3080   :  { %v5008_v36 = vpop.permute.xlu0 %5007 }
0x3081   :  { %v5013_v37 = vsel %vm57_vm0, %v5008_v36, 0 }
0x3082   :  { %6269 = vmatpush3.bf16.msra.mxu0 %v5013_v37 }
0x3083   :  { %v6458_v38 = vpop.eup %6457  ;;  %6282 = vmatprep.subr.bf16.mxu0 %v6485_v2 }
0x3084   :  { %v4953_v39 = vmul.f32 %v6458_v38, %v6454_v29 }
0x3086   :  { %v4955_v40 = vpack.c.bf16 %v4953_v39, %v4953_v39 }
0x3087   :  { %v6460_v49 = vpop.eup %6459 }
0x3088   :  { %v4954_v41 = vmul.f32 %v6460_v49, %v6456_v30  ;;  %6265 = vmatmul.mubr.msk.bf16.vlgmr.msra.gmra.mrb[160].mxu1 %vm53_vm2, %v4955_v40 }
0x3089   :  { %6278 = vmatprep.mubr.msk.bf16.mxu1 %vm6486_vm1, %v6485_v2  ;;  %6275 = vmatpush3.bf16.msra.mxu1 %v6345_v42 }
0x308a   :  { %v4956_v22 = vpack.c.bf16 %v4954_v41, %v4954_v41  ;;  %6276 = vmatprep.subr.bf16.mxu1 %v6485_v2 }
0x308c   :  { %6271 = vmatmul.mubr.msk.bf16.vlgmr.msra.gmra.mrb[164].mxu0 %vm53_vm2, %v4956_v22 }
0x308d   :  { %6286 = vmatprep.mubr.msk.bf16.mxu0 %vm6486_vm1, %v6485_v2  ;;  %6277 = vmatpush3.bf16.msra.mxu1 %v6346_v62 }
0x308e   :  { %6283 = vmatpush3.bf16.msra.mxu0 %v6347_v60 }
0x308f   :  { %6284 = vmatprep.subr.bf16.mxu0 %v6485_v2 }
0x3092   :  { %6285 = vmatpush3.bf16.msra.mxu0 %v6348_v61 }
0x315b   :  { %v5000_v1 = vpop.f32.mrb[160].mxu1 }
0x315c   :  { %5057 = vrot.lane.b32.xlu1 %v5000_v1, %s6488_s13  ;;  %v6266_v6 = vpop.f32.mrb[161].mxu1 }
0x315d   :  { %v5003_v43 = vpop.f32.mrb[162].mxu1 }
0x315e   :  { %v6267_v44 = vpop.f32.mrb[163].mxu1 }
0x315f   :  { %v5049_v34 = vpop.f32.mrb[164].mxu0 }
0x3160   :  { %5059 = vrot.lane.b32.xlu1 %v5049_v34, %s6488_s13  ;;  %v6272_v47 = vpop.f32.mrb[165].mxu0 }
0x3161   :  { %v5052_v9 = vpop.f32.mrb[166].mxu0 }
0x3162   :  { %v6273_v50 = vpop.f32.mrb[167].mxu0 }
0x31ce   :  { %v5058_v51 = vpop.permute.xlu1 %5057 }
0x31cf   :  { %v5063_v53 = vsel %vm221_vm4, %v7451_v0, %v5058_v51 }
0x31d0   :  { %v5065_v57 = vadd.f32 %v5063_v53, %v7402_v17  ;;  %v5519_v17 = vld [vmem:[%s7519_s2 + $0x1b] ss:$0 sm:$0xff] }
0x31d2   :  { %v5060_v54 = vpop.permute.xlu1 %5059 }
0x31d3   :  { %v5064_v56 = vsel %vm221_vm4, %v7453_v25, %v5060_v54 }
0x31d4   :  { %v5066_v58 = vadd.f32 %v5064_v56, %v7409_v20 }
0x31d6   :  { %v5069_v55 = vcombine.low %v5065_v57, %v5066_v58 }
0x31d8   :  { %v5071_v59 = vpack.c.bf16 %v5069_v55, %v5069_v55 }
0x31da   :  { %6279 = vmatmul.mubr.msk.bf16.vlgmr.msra.gmra.mrb[164].mxu1 %vm171_vm3, %v5071_v59 }
0x32ad   :  { %v5127_v20 = vpop.f32.mrb[164].mxu1 }
0x32ae   :  { %v5128_v63 = vadd.f32 %v5519_v17, %v5127_v20  ;;  %v6280_v0 = vpop.f32.mrb[165].mxu1 }
0x32af   :  { %v5130_v3 = vpop.f32.mrb[166].mxu1 }
0x32b0   :  { %v5133_v48 = vmax.f32 %v5128_v63, 0.0  ;;  %v6281_v5 = vpop.f32.mrb[167].mxu1 }
0x32b2   :  { %v5135_v25 = vcombine.high %v5133_v48, %v5133_v48  ;;  %v5137_v28 = vadd.f32 %v5133_v48, %v5065_v57 }
0x32b4   :  { %v5138_v7 = vadd.f32 %v5135_v25, %v5066_v58 }
0x32b6   :  { %v5148_v8 = vcombine.low %v5137_v28, %v5138_v7 }
0x32b8   :  { %v5150_v2 = vpack.c.bf16 %v5148_v8, %v5148_v8 }
0x32ba   :  { %6287 = vmatmul.mubr.msk.bf16.vlgmr.msra.gmra.mrb[168].mxu0 %vm171_vm3, %v5150_v2 }
0x338d   :  { %v5206_v32 = vpop.f32.mrb[168].mxu0 }
0x338e   :  { %v5207_v12 = vadd.f32 %v5528_v10, %v5206_v32  ;;  %v6288_v13 = vpop.f32.mrb[169].mxu0 }
0x338f   :  { %v5209_v52 = vpop.f32.mrb[170].mxu0 }
0x3390   :  { %v5213_v14 = vcombine.high %v5207_v12, %v5207_v12  ;;  %5215 = vst.msk [vmem:[#allocation4] sm:$0xf] %vm3967_vm8, %v5207_v12  ;;  %v6289_v15 = vpop.f32.mrb[171].mxu0 }
0x3392   :  { %5216 = vst.msk [vmem:[#allocation4 + $0x4] sm:$0xf] %vm3967_vm8, %v5213_v14 }
0x3393   :  { %6472 = shalt.err (!%p6469_p4)
}
0x3394   :  { %s6473_s16 = scalar_lea.hbm %s7521_s4, 128 }
0x3395   :  { %p6474_p5 = scmp.ne.s32.totalorder %s7521_s4, %s6473_s16  ;;  %p6477_p6 = scmp.lt.u32.totalorder %s6473_s16, %s7521_s4 }
0x3397   :  { %p6479_p7 = pnand %p6477_p6, %p6474_p5 }
0x3399   :  { %6482 = shalt.err (!%p6479_p7)
}
0x339a   :  { %s6490_s21 = smov 64   ;;  %s6491_s22 = smov 4  }
0x339b   :  { %5228 = dma.vmem_to_hbm [thread:$0]  %s5223_s12, 128, %s7521_s4, [#allocation5], %s6490_s21, %s6490_s21, %s6491_s22  }
0x339c   :  { %6483 = dma.done.wait [#allocation5], 128  }
0x339d   :  { %6484 = vsyncadd [#allocation5], 4294967168 }
0x339e   :  { %5232 = vsyncpa [#allocation5], 1 }

</bundles_post_ra>
